<compile_context>
chip_gen: v5e
topology: v5e:2x2
jax: 0.10.0
libtpu: 0.0.40
codegen_flags: <defaults>
</compile_context>

<pallas_src>
import functools

import jax
import jax.numpy as jnp
from jax import lax
from jax.experimental import pallas as pl
from jax.experimental.pallas import tpu as pltpu

KSIZE = 5
STRIDE = 2
EPS = 1e-5


def conv_size_out(size, ksize=KSIZE, stride=STRIDE):
    return (size - (ksize - 1) - 1) // stride + 1


def _round_up(x, m):
    return -(-x // m) * m


def _const_spec(shape):
    nd = len(shape)
    return pl.BlockSpec(shape, lambda i: (0,) * nd)


# ----------------------------------------------------------------------------
# Fused per-batch kernel: conv1 -> conv2 -> conv3 -> fc1 -> head, all in VMEM.
# Grid = (B,), one batch element per step ("parallel").
# ----------------------------------------------------------------------------
def _image_net_kernel(
    p1_ref, w1_ref, sh1_ref,      # conv1 im2col patches / BN-folded weight / shift
    w2_ref, sh2_ref,              # conv2 per-tap weights [25, C1, C2] / shift
    w3_ref, sh3_ref,              # conv3 per-tap weights [25, C2, C3] / shift
    fc1w_ref, fc1b_ref,           # fc1 per-pixel blocks [H3*W3, C3, half] / bias
    hw_ref, hb_ref,               # head
    out_ref,                      # [1, outputs]
    act1_ref, act2_ref,           # bf16 VMEM scratch for intermediate activations
    *, W1, rows1, H2, W2, H3, W3, G2, M1C,
):
    f32 = jnp.float32
    bf16 = jnp.bfloat16

    # ---- conv1 + BN1 + ReLU (BN scale folded into w1), M-chunked ------------
    for m0 in range(0, rows1, M1C):
        m = min(M1C, rows1 - m0)
        a = jnp.dot(p1_ref[pl.ds(m0, m), :], w1_ref[...],
                    preferred_element_type=f32)
        act1_ref[pl.ds(m0, m), :] = jnp.maximum(a + sh1_ref[...], 0.0).astype(bf16)

    # ---- conv2 + BN2 + ReLU: wide accumulator, chunked over output rows -----
    # Real output pixel (i2, j2) lives at wide row 2*W1*i2 + 2*j2; every tap is a
    # CONTIGUOUS slab load + matmul; junk rows are never read downstream.
    span_tail2 = 2 * (W2 - 1) + 1
    c2 = w2_ref.shape[2]
    for i2_0 in range(0, H2, G2):
        rows_out = min(G2, H2 - i2_0)
        span = 2 * W1 * (rows_out - 1) + span_tail2
        acc = jnp.zeros((span, c2), f32)
        for kh in range(KSIZE):
            for kw in range(KSIZE):
                slab = act1_ref[pl.ds(2 * W1 * i2_0 + kh * W1 + kw, span), :]
                acc = acc + jnp.dot(slab, w2_ref[kh * KSIZE + kw],
                                    preferred_element_type=f32)
        act2_ref[pl.ds(2 * W1 * i2_0, span), :] = jnp.maximum(
            acc + sh2_ref[...], 0.0).astype(bf16)

    # ---- conv3 + BN3 + ReLU fused with fc1 ----------------------------------
    # Per conv3 output row: a 5-row accumulator (real rows at local 4*j3), each
    # tap is one contiguous [5, C2] slab + matmul (single 8-row MXU push); the
    # BN+ReLU'd pixels go straight into fc1 as [1, C3] @ [C3, half] dots.
    span3 = 4 * (W3 - 1) + 1
    c3 = w3_ref.shape[2]
    h1 = fc1b_ref[...]                                        # [1, half] f32
    for i3 in range(H3):
        acc3 = jnp.zeros((span3, c3), f32)
        for kh in range(KSIZE):
            for kw in range(KSIZE):
                off = 4 * W1 * i3 + 2 * W1 * kh + 2 * kw
                slab = act2_ref[pl.ds(off, span3), :]
                acc3 = acc3 + jnp.dot(slab, w3_ref[kh * KSIZE + kw],
                                      preferred_element_type=f32)
        res3 = jnp.maximum(acc3 + sh3_ref[...], 0.0).astype(bf16)   # [span3, C3]
        for j3 in range(W3):
            xp = res3[4 * j3:4 * j3 + 1, :]                          # [1, C3]
            h1 = h1 + jnp.dot(xp, fc1w_ref[i3 * W3 + j3],
                              preferred_element_type=f32)

    # ---- fc1 ReLU + head -----------------------------------------------------
    h1 = jnp.maximum(h1, 0.0).astype(bf16)                     # [1, half]
    out = jnp.dot(h1, hw_ref[...], preferred_element_type=f32) + hb_ref[...]
    out_ref[...] = out.astype(out_ref.dtype)


# ----------------------------------------------------------------------------
# Wrapper-side input / weight preparation (cheap, one-time layout plumbing)
# ----------------------------------------------------------------------------
def _prepare_inputs(x, params):
    B, C, H, W = x.shape
    H1, W1 = conv_size_out(H), conv_size_out(W)
    H2, W2 = conv_size_out(H1), conv_size_out(W1)
    H3, W3 = conv_size_out(H2), conv_size_out(W2)
    assert H3 >= 1 and W3 >= 1, "input too small for three stride-2 5x5 convs"

    # conv1 im2col, rows ordered (b, h, w), columns ordered (kh, kw, c).
    xn = jnp.transpose(x, (0, 2, 3, 1)).astype(jnp.float32)
    taps = []
    for kh in range(KSIZE):
        for kw in range(KSIZE):
            taps.append(xn[:, kh:kh + STRIDE * H1 - 1:STRIDE,
                           kw:kw + STRIDE * W1 - 1:STRIDE, :])
    kc = KSIZE * KSIZE * C
    p1 = jnp.stack(taps, axis=3).reshape(B, H1 * W1, kc)
    kpad = _round_up(kc, 128)                                   # 75 -> 128
    p1 = jnp.pad(p1, ((0, 0), (0, 0), (0, kpad - kc))).astype(jnp.bfloat16)

    def bn_fold(layer, bias):
        scale = params[f"bn{layer}_gamma"] / jnp.sqrt(params[f"bn{layer}_var"] + EPS)
        shift = params[f"bn{layer}_beta"] + scale * (bias - params[f"bn{layer}_mean"])
        return scale, shift.reshape(1, -1).astype(jnp.float32)

    # conv1: fold BN scale into the flattened weight, zero-pad K to match p1.
    s1, sh1 = bn_fold(1, params["conv1_b"])
    w1 = params["conv1_w"].transpose(2, 3, 1, 0).reshape(kc, -1) * s1[None, :]
    w1 = jnp.pad(w1, ((0, kpad - kc), (0, 0))).astype(jnp.bfloat16)

    # conv2 / conv3: per-tap [Cin, Cout] weights with BN scale folded in.
    s2, sh2 = bn_fold(2, params["conv2_b"])
    c1 = w1.shape[1]
    w2 = (params["conv2_w"].transpose(2, 3, 1, 0)
          .reshape(KSIZE * KSIZE, c1, -1) * s2[None, None, :]).astype(jnp.bfloat16)
    s3, sh3 = bn_fold(3, params["conv3_b"])
    c2 = w2.shape[2]
    w3 = (params["conv3_w"].transpose(2, 3, 1, 0)
          .reshape(KSIZE * KSIZE, c2, -1) * s3[None, None, :]).astype(jnp.bfloat16)

    # fc1: per-pixel [C3, half] blocks; PyTorch's x.view(B,-1) on NCHW flattens
    # in (c, h, w) order, i.e. input index = c*H3*W3 + i3*W3 + j3.
    c3 = w3.shape[2]
    half = params["fc1_w"].shape[0]
    fc1w = (params["fc1_w"].reshape(half, c3, H3, W3)
            .transpose(2, 3, 1, 0)
            .reshape(H3 * W3, c3, half)).astype(jnp.bfloat16)
    fc1b = params["fc1_b"].reshape(1, -1).astype(jnp.float32)
    hw = params["head_w"].T.astype(jnp.bfloat16)
    hb = params["head_b"].reshape(1, -1).astype(jnp.float32)

    inputs = (p1, w1, sh1, w2, sh2, w3, sh3, fc1w, fc1b, hw, hb)
    return inputs, (H1, W1, H2, W2, H3, W3)


def image_network_forward(x, params):
    """Forward pass matching Image_Network.forward (eval-mode BatchNorm)."""
    B = x.shape[0]
    inputs, (H1, W1, H2, W2, H3, W3) = _prepare_inputs(x, params)
    p1, w1, sh1, w2, sh2, w3, sh3, fc1w, fc1b, hw, hb = inputs

    rows1 = H1 * W1
    c1, c2, c3 = w1.shape[1], w2.shape[2], w3.shape[2]
    half, n_out = fc1b.shape[1], hw.shape[1]
    assert W2 <= W1 and H2 <= H1

    G2 = 4            # conv2 output rows per accumulator chunk (bounds vreg use)
    M1C = 192         # conv1 M-chunk

    span_tail2 = 2 * (W2 - 1) + 1
    span3 = 4 * (W3 - 1) + 1

    # Scratch sizes: cover the real rows plus every (junk-including) slab read so
    # no in-kernel access ever leaves its allocation.
    a1_rows = _round_up(
        max(rows1,
            2 * W1 * (H2 - 1) + (KSIZE - 1) * (W1 + 1) + span_tail2), 8)
    r2_rows = _round_up(
        max(2 * W1 * (H2 - 1) + span_tail2,
            4 * W1 * (H3 - 1) + 2 * W1 * (KSIZE - 1) + 2 * (KSIZE - 1) + span3), 8)

    kernel = functools.partial(
        _image_net_kernel,
        W1=W1, rows1=rows1, H2=H2, W2=W2, H3=H3, W3=W3, G2=G2, M1C=M1C)

    # Advisory cost estimate for XLA's scheduler.
    spans2 = [2 * W1 * (min(G2, H2 - i0) - 1) + span_tail2
              for i0 in range(0, H2, G2)]
    flops_b = 2 * rows1 * p1.shape[2] * c1
    flops_b += 2 * sum(spans2) * KSIZE * KSIZE * c1 * c2
    flops_b += 2 * H3 * span3 * KSIZE * KSIZE * c2 * c3
    flops_b += 2 * H3 * W3 * c3 * half + 2 * half * n_out
    bytes_acc = int(p1.size * 2 + w1.size * 2 + w2.size * 2 + w3.size * 2 +
                    fc1w.size * 2 + hw.size * 2 +
                    (sh1.size + sh2.size + sh3.size + fc1b.size + hb.size) * 4 +
                    B * n_out * 4)
    cost = pl.CostEstimate(flops=int(B * flops_b), transcendentals=0,
                           bytes_accessed=bytes_acc)

    in_specs = [
        pl.BlockSpec((None, rows1, p1.shape[2]), lambda i: (i, 0, 0)),
        _const_spec(w1.shape), _const_spec(sh1.shape),
        _const_spec(w2.shape), _const_spec(sh2.shape),
        _const_spec(w3.shape), _const_spec(sh3.shape),
        _const_spec(fc1w.shape), _const_spec(fc1b.shape),
        _const_spec(hw.shape), _const_spec(hb.shape),
    ]

    out = pl.pallas_call(
        kernel,
        out_shape=jax.ShapeDtypeStruct((B, 1, n_out), jnp.float32),
        grid_spec=pltpu.PrefetchScalarGridSpec(
            num_scalar_prefetch=0,
            grid=(B,),
            in_specs=in_specs,
            out_specs=pl.BlockSpec((None, 1, n_out), lambda i: (i, 0, 0)),
            scratch_shapes=[
                pltpu.VMEM((a1_rows, c1), jnp.bfloat16),   # act1 (conv1 output)
                pltpu.VMEM((r2_rows, c2), jnp.bfloat16),   # act2 (conv2 output)
            ],
        ),
        compiler_params=pltpu.CompilerParams(
            dimension_semantics=("parallel",)),
        cost_estimate=cost,
    )(*inputs)
    return out.reshape(B, n_out)


# ----------------------------------------------------------------------------
# Pure-JAX f32 reference (eval-mode BatchNorm) for a tolerance check.
# ----------------------------------------------------------------------------
def reference_forward(x, params):
    hp = lax.Precision.HIGHEST

    def conv_bn_relu(y, li):
        y = lax.conv_general_dilated(
            y, params[f"conv{li}_w"], (STRIDE, STRIDE), "VALID",
            dimension_numbers=("NCHW", "OIHW", "NCHW"), precision=hp)
        y = y + params[f"conv{li}_b"].reshape(1, -1, 1, 1)
        g = params[f"bn{li}_gamma"].reshape(1, -1, 1, 1)
        b = params[f"bn{li}_beta"].reshape(1, -1, 1, 1)
        mu = params[f"bn{li}_mean"].reshape(1, -1, 1, 1)
        var = params[f"bn{li}_var"].reshape(1, -1, 1, 1)
        y = (y - mu) / jnp.sqrt(var + EPS) * g + b
        return jnp.maximum(y, 0.0)

    y = conv_bn_relu(x.astype(jnp.float32), 1)
    y = conv_bn_relu(y, 2)
    y = conv_bn_relu(y, 3)
    f = y.reshape(y.shape[0], -1)
    h = jnp.maximum(jnp.dot(f, params["fc1_w"].T, precision=hp) + params["fc1_b"], 0.0)
    return jnp.dot(h, params["head_w"].T, precision=hp) + params["head_b"]


# ----------------------------------------------------------------------------
# Parameter construction (deterministic, synthetic, PyTorch-default-like)
# ----------------------------------------------------------------------------
def init_params(h, w, outputs, key):
    convw = conv_size_out(conv_size_out(conv_size_out(w)))
    convh = conv_size_out(conv_size_out(conv_size_out(h)))
    linear_input_size = convw * convh * 128
    half_linear_input_size = int(linear_input_size / 2)

    keys = jax.random.split(key, 16)
    ki = iter(range(16))

    def uinit(k, shape, fan_in):
        bound = 1.0 / jnp.sqrt(float(fan_in))
        return jax.random.uniform(k, shape, jnp.float32, -bound, bound)

    params = {}
    conv_shapes = [(32, 3, 5, 5), (64, 32, 5, 5), (128, 64, 5, 5)]
    for li, wshape in enumerate(conv_shapes, start=1):
        cout, cin, kh, kw = wshape
        fan_in = cin * kh * kw
        params[f"conv{li}_w"] = uinit(keys[next(ki)], wshape, fan_in)
        params[f"conv{li}_b"] = uinit(keys[next(ki)], (cout,), fan_in)
        params[f"bn{li}_gamma"] = 1.0 + 0.1 * jax.random.normal(keys[next(ki)], (cout,), jnp.float32)
        params[f"bn{li}_beta"] = 0.1 * jax.random.normal(keys[next(ki)], (cout,), jnp.float32)
        params[f"bn{li}_mean"] = jnp.zeros((cout,), jnp.float32)
        params[f"bn{li}_var"] = jnp.ones((cout,), jnp.float32)

    params["fc1_w"] = uinit(keys[next(ki)], (half_linear_input_size, linear_input_size), linear_input_size)
    params["fc1_b"] = uinit(keys[next(ki)], (half_linear_input_size,), linear_input_size)
    params["head_w"] = uinit(keys[next(ki)], (outputs, half_linear_input_size), half_linear_input_size)
    params["head_b"] = uinit(keys[next(ki)], (outputs,), half_linear_input_size)
    return params


if __name__ == "__main__":
    key = jax.random.PRNGKey(0)
    k_x, k_p = jax.random.split(key)

    B, C, H, W = 2, 3, 40, 40       # conv stack -> 2x2x128 = 512 features
    outputs = 4

    x = jax.random.normal(k_x, (B, C, H, W), jnp.float32)
    params = init_params(H, W, outputs, k_p)

    fwd = jax.jit(image_network_forward)
    out = jax.block_until_ready(fwd(x, params))
    assert out.shape == (B, outputs), out.shape
    assert bool(jnp.all(jnp.isfinite(out)))

    # Loose tolerance: kernel runs bf16 matmuls with f32 accumulation.
    ref = reference_forward(x, params)
    err = float(jnp.max(jnp.abs(out - ref)))
    assert err < 5e-2, f"max abs error vs f32 reference: {err}"

    print("KERNEL_OK")
</pallas_src>

<mosaic_0001>
module attributes {stable_mosaic.version = 11 : i64} {
  func.func @_image_net_kernel(%arg0: i32, %arg1: memref<1x324x128xbf16, #tpu.memory_space<vmem>>, %arg2: memref<128x32xbf16, #tpu.memory_space<vmem>>, %arg3: memref<1x32xf32, #tpu.memory_space<vmem>>, %arg4: memref<25x32x64xbf16, #tpu.memory_space<vmem>>, %arg5: memref<1x64xf32, #tpu.memory_space<vmem>>, %arg6: memref<25x64x128xbf16, #tpu.memory_space<vmem>>, %arg7: memref<1x128xf32, #tpu.memory_space<vmem>>, %arg8: memref<4x128x256xbf16, #tpu.memory_space<vmem>>, %arg9: memref<1x256xf32, #tpu.memory_space<vmem>>, %arg10: memref<256x4xbf16, #tpu.memory_space<vmem>>, %arg11: memref<1x4xf32, #tpu.memory_space<vmem>>, %arg12: memref<1x1x4xf32, #tpu.memory_space<vmem>>, %arg13: memref<328x32xbf16, #tpu.memory_space<vmem>>, %arg14: memref<232x64xbf16, #tpu.memory_space<vmem>>) attributes {dimension_semantics = [#tpu.dimension_semantics<parallel>], iteration_bounds = array<i64: 2>, scalar_prefetch = 0 : i64, scratch_operands = 2 : i64, tpu.core_type = #tpu.core_type<tc>, window_params = [{transform_indices = @transform_0, window_bounds = array<i64: 1, 324, 128>}, {pipeline_mode = #tpu.pipeline_mode<synchronous>, transform_indices = @transform_1, window_bounds = array<i64: 128, 32>}, {pipeline_mode = #tpu.pipeline_mode<synchronous>, transform_indices = @transform_2, window_bounds = array<i64: 1, 32>}, {pipeline_mode = #tpu.pipeline_mode<synchronous>, transform_indices = @transform_3, window_bounds = array<i64: 25, 32, 64>}, {pipeline_mode = #tpu.pipeline_mode<synchronous>, transform_indices = @transform_4, window_bounds = array<i64: 1, 64>}, {pipeline_mode = #tpu.pipeline_mode<synchronous>, transform_indices = @transform_5, window_bounds = array<i64: 25, 64, 128>}, {pipeline_mode = #tpu.pipeline_mode<synchronous>, transform_indices = @transform_6, window_bounds = array<i64: 1, 128>}, {pipeline_mode = #tpu.pipeline_mode<synchronous>, transform_indices = @transform_7, window_bounds = array<i64: 4, 128, 256>}, {pipeline_mode = #tpu.pipeline_mode<synchronous>, transform_indices = @transform_8, window_bounds = array<i64: 1, 256>}, {pipeline_mode = #tpu.pipeline_mode<synchronous>, transform_indices = @transform_9, window_bounds = array<i64: 256, 4>}, {pipeline_mode = #tpu.pipeline_mode<synchronous>, transform_indices = @transform_10, window_bounds = array<i64: 1, 4>}, {transform_indices = @transform_11, window_bounds = array<i64: 1, 1, 4>}]} {
    %c0 = arith.constant 0 : index
    %c0_0 = arith.constant 0 : index
    %c0_1 = arith.constant 0 : index
    %0 = vector.load %arg1[%c0, %c0_0, %c0_1] : memref<1x324x128xbf16, #tpu.memory_space<vmem>>, vector<1x192x128xbf16>
    %1 = vector.shape_cast %0 : vector<1x192x128xbf16> to vector<192x128xbf16>
    %c0_2 = arith.constant 0 : index
    %c0_3 = arith.constant 0 : index
    %2 = vector.load %arg2[%c0_2, %c0_3] : memref<128x32xbf16, #tpu.memory_space<vmem>>, vector<128x32xbf16>
    %cst = arith.constant dense<0.000000e+00> : vector<192x32xf32>
    %3 = tpu.matmul %1, %2, %cst {dimension_numbers = #tpu.dot_dimension_numbers<[1], [0], [0], [1], [0, 0, 1, 1], [], []>} : vector<192x128xbf16>, vector<128x32xbf16>, vector<192x32xf32> -> vector<192x32xf32>
    %c0_4 = arith.constant 0 : index
    %c0_5 = arith.constant 0 : index
    %4 = vector.load %arg3[%c0_4, %c0_5] : memref<1x32xf32, #tpu.memory_space<vmem>>, vector<1x32xf32>
    %5 = vector.broadcast %4 : vector<1x32xf32> to vector<192x32xf32>
    %6 = arith.addf %3, %5 : vector<192x32xf32>
    %cst_6 = arith.constant 0.000000e+00 : f32
    %7 = vector.broadcast %cst_6 : f32 to vector<192x32xf32>
    %8 = arith.maximumf %6, %7 : vector<192x32xf32>
    %9 = arith.truncf %8 : vector<192x32xf32> to vector<192x32xbf16>
    %c0_7 = arith.constant 0 : index
    %c0_8 = arith.constant 0 : index
    %10 = vector.load %arg13[%c0_7, %c0_8] : memref<328x32xbf16, #tpu.memory_space<vmem>>, vector<192x32xbf16>
    tpu.vector_store %arg13[%c0_7, %c0_8], %9 {strides = array<i32>} : memref<328x32xbf16, #tpu.memory_space<vmem>>, vector<192x32xbf16>,
    %c0_9 = arith.constant 0 : index
    %c192 = arith.constant 192 : index
    %c0_10 = arith.constant 0 : index
    %11 = vector.load %arg1[%c0_9, %c192, %c0_10] : memref<1x324x128xbf16, #tpu.memory_space<vmem>>, vector<1x132x128xbf16>
    %12 = vector.shape_cast %11 : vector<1x132x128xbf16> to vector<132x128xbf16>
    %c0_11 = arith.constant 0 : index
    %c0_12 = arith.constant 0 : index
    %13 = vector.load %arg2[%c0_11, %c0_12] : memref<128x32xbf16, #tpu.memory_space<vmem>>, vector<128x32xbf16>
    %cst_13 = arith.constant dense<0.000000e+00> : vector<132x32xf32>
    %14 = tpu.matmul %12, %13, %cst_13 {dimension_numbers = #tpu.dot_dimension_numbers<[1], [0], [0], [1], [0, 0, 1, 1], [], []>} : vector<132x128xbf16>, vector<128x32xbf16>, vector<132x32xf32> -> vector<132x32xf32>
    %c0_14 = arith.constant 0 : index
    %c0_15 = arith.constant 0 : index
    %15 = vector.load %arg3[%c0_14, %c0_15] : memref<1x32xf32, #tpu.memory_space<vmem>>, vector<1x32xf32>
    %16 = vector.broadcast %15 : vector<1x32xf32> to vector<132x32xf32>
    %17 = arith.addf %14, %16 : vector<132x32xf32>
    %cst_16 = arith.constant 0.000000e+00 : f32
    %18 = vector.broadcast %cst_16 : f32 to vector<132x32xf32>
    %19 = arith.maximumf %17, %18 : vector<132x32xf32>
    %20 = arith.truncf %19 : vector<132x32xf32> to vector<132x32xbf16>
    %c192_17 = arith.constant 192 : index
    %c0_18 = arith.constant 0 : index
    %21 = vector.load %arg13[%c192_17, %c0_18] : memref<328x32xbf16, #tpu.memory_space<vmem>>, vector<132x32xbf16>
    tpu.vector_store %arg13[%c192_17, %c0_18], %20 {strides = array<i32>} : memref<328x32xbf16, #tpu.memory_space<vmem>>, vector<132x32xbf16>,
    %cst_19 = arith.constant 0.000000e+00 : f32
    %22 = vector.broadcast %cst_19 : f32 to vector<121x64xf32>
    %c0_20 = arith.constant 0 : index
    %c0_21 = arith.constant 0 : index
    %23 = vector.load %arg13[%c0_20, %c0_21] : memref<328x32xbf16, #tpu.memory_space<vmem>>, vector<121x32xbf16>
    %c0_22 = arith.constant 0 : index
    %c0_23 = arith.constant 0 : index
    %c0_24 = arith.constant 0 : index
    %24 = vector.load %arg4[%c0_22, %c0_23, %c0_24] : memref<25x32x64xbf16, #tpu.memory_space<vmem>>, vector<1x32x64xbf16>
    %25 = vector.shape_cast %24 : vector<1x32x64xbf16> to vector<32x64xbf16>
    %cst_25 = arith.constant dense<0.000000e+00> : vector<121x64xf32>
    %26 = tpu.matmul %23, %25, %cst_25 {dimension_numbers = #tpu.dot_dimension_numbers<[1], [0], [0], [1], [0, 0, 1, 1], [], []>} : vector<121x32xbf16>, vector<32x64xbf16>, vector<121x64xf32> -> vector<121x64xf32>
    %27 = arith.addf %22, %26 : vector<121x64xf32>
    %c1 = arith.constant 1 : index
    %c0_26 = arith.constant 0 : index
    %28 = vector.load %arg13[%c1, %c0_26] : memref<328x32xbf16, #tpu.memory_space<vmem>>, vector<121x32xbf16>
    %c1_27 = arith.constant 1 : index
    %c0_28 = arith.constant 0 : index
    %c0_29 = arith.constant 0 : index
    %29 = vector.load %arg4[%c1_27, %c0_28, %c0_29] : memref<25x32x64xbf16, #tpu.memory_space<vmem>>, vector<1x32x64xbf16>
    %30 = vector.shape_cast %29 : vector<1x32x64xbf16> to vector<32x64xbf16>
    %cst_30 = arith.constant dense<0.000000e+00> : vector<121x64xf32>
    %31 = tpu.matmul %28, %30, %cst_30 {dimension_numbers = #tpu.dot_dimension_numbers<[1], [0], [0], [1], [0, 0, 1, 1], [], []>} : vector<121x32xbf16>, vector<32x64xbf16>, vector<121x64xf32> -> vector<121x64xf32>
    %32 = arith.addf %27, %31 : vector<121x64xf32>
    %c2 = arith.constant 2 : index
    %c0_31 = arith.constant 0 : index
    %33 = vector.load %arg13[%c2, %c0_31] : memref<328x32xbf16, #tpu.memory_space<vmem>>, vector<121x32xbf16>
    %c2_32 = arith.constant 2 : index
    %c0_33 = arith.constant 0 : index
    %c0_34 = arith.constant 0 : index
    %34 = vector.load %arg4[%c2_32, %c0_33, %c0_34] : memref<25x32x64xbf16, #tpu.memory_space<vmem>>, vector<1x32x64xbf16>
    %35 = vector.shape_cast %34 : vector<1x32x64xbf16> to vector<32x64xbf16>
    %cst_35 = arith.constant dense<0.000000e+00> : vector<121x64xf32>
    %36 = tpu.matmul %33, %35, %cst_35 {dimension_numbers = #tpu.dot_dimension_numbers<[1], [0], [0], [1], [0, 0, 1, 1], [], []>} : vector<121x32xbf16>, vector<32x64xbf16>, vector<121x64xf32> -> vector<121x64xf32>
    %37 = arith.addf %32, %36 : vector<121x64xf32>
    %c3 = arith.constant 3 : index
    %c0_36 = arith.constant 0 : index
    %38 = vector.load %arg13[%c3, %c0_36] : memref<328x32xbf16, #tpu.memory_space<vmem>>, vector<121x32xbf16>
    %c3_37 = arith.constant 3 : index
    %c0_38 = arith.constant 0 : index
    %c0_39 = arith.constant 0 : index
    %39 = vector.load %arg4[%c3_37, %c0_38, %c0_39] : memref<25x32x64xbf16, #tpu.memory_space<vmem>>, vector<1x32x64xbf16>
    %40 = vector.shape_cast %39 : vector<1x32x64xbf16> to vector<32x64xbf16>
    %cst_40 = arith.constant dense<0.000000e+00> : vector<121x64xf32>
    %41 = tpu.matmul %38, %40, %cst_40 {dimension_numbers = #tpu.dot_dimension_numbers<[1], [0], [0], [1], [0, 0, 1, 1], [], []>} : vector<121x32xbf16>, vector<32x64xbf16>, vector<121x64xf32> -> vector<121x64xf32>
    %42 = arith.addf %37, %41 : vector<121x64xf32>
    %c4 = arith.constant 4 : index
    %c0_41 = arith.constant 0 : index
    %43 = vector.load %arg13[%c4, %c0_41] : memref<328x32xbf16, #tpu.memory_space<vmem>>, vector<121x32xbf16>
    %c4_42 = arith.constant 4 : index
    %c0_43 = arith.constant 0 : index
    %c0_44 = arith.constant 0 : index
    %44 = vector.load %arg4[%c4_42, %c0_43, %c0_44] : memref<25x32x64xbf16, #tpu.memory_space<vmem>>, vector<1x32x64xbf16>
    %45 = vector.shape_cast %44 : vector<1x32x64xbf16> to vector<32x64xbf16>
    %cst_45 = arith.constant dense<0.000000e+00> : vector<121x64xf32>
    %46 = tpu.matmul %43, %45, %cst_45 {dimension_numbers = #tpu.dot_dimension_numbers<[1], [0], [0], [1], [0, 0, 1, 1], [], []>} : vector<121x32xbf16>, vector<32x64xbf16>, vector<121x64xf32> -> vector<121x64xf32>
    %47 = arith.addf %42, %46 : vector<121x64xf32>
    %c18 = arith.constant 18 : index
    %c0_46 = arith.constant 0 : index
    %48 = vector.load %arg13[%c18, %c0_46] : memref<328x32xbf16, #tpu.memory_space<vmem>>, vector<121x32xbf16>
    %c5 = arith.constant 5 : index
    %c0_47 = arith.constant 0 : index
    %c0_48 = arith.constant 0 : index
    %49 = vector.load %arg4[%c5, %c0_47, %c0_48] : memref<25x32x64xbf16, #tpu.memory_space<vmem>>, vector<1x32x64xbf16>
    %50 = vector.shape_cast %49 : vector<1x32x64xbf16> to vector<32x64xbf16>
    %cst_49 = arith.constant dense<0.000000e+00> : vector<121x64xf32>
    %51 = tpu.matmul %48, %50, %cst_49 {dimension_numbers = #tpu.dot_dimension_numbers<[1], [0], [0], [1], [0, 0, 1, 1], [], []>} : vector<121x32xbf16>, vector<32x64xbf16>, vector<121x64xf32> -> vector<121x64xf32>
    %52 = arith.addf %47, %51 : vector<121x64xf32>
    %c19 = arith.constant 19 : index
    %c0_50 = arith.constant 0 : index
    %53 = vector.load %arg13[%c19, %c0_50] : memref<328x32xbf16, #tpu.memory_space<vmem>>, vector<121x32xbf16>
    %c6 = arith.constant 6 : index
    %c0_51 = arith.constant 0 : index
    %c0_52 = arith.constant 0 : index
    %54 = vector.load %arg4[%c6, %c0_51, %c0_52] : memref<25x32x64xbf16, #tpu.memory_space<vmem>>, vector<1x32x64xbf16>
    %55 = vector.shape_cast %54 : vector<1x32x64xbf16> to vector<32x64xbf16>
    %cst_53 = arith.constant dense<0.000000e+00> : vector<121x64xf32>
    %56 = tpu.matmul %53, %55, %cst_53 {dimension_numbers = #tpu.dot_dimension_numbers<[1], [0], [0], [1], [0, 0, 1, 1], [], []>} : vector<121x32xbf16>, vector<32x64xbf16>, vector<121x64xf32> -> vector<121x64xf32>
    %57 = arith.addf %52, %56 : vector<121x64xf32>
    %c20 = arith.constant 20 : index
    %c0_54 = arith.constant 0 : index
    %58 = vector.load %arg13[%c20, %c0_54] : memref<328x32xbf16, #tpu.memory_space<vmem>>, vector<121x32xbf16>
    %c7 = arith.constant 7 : index
    %c0_55 = arith.constant 0 : index
    %c0_56 = arith.constant 0 : index
    %59 = vector.load %arg4[%c7, %c0_55, %c0_56] : memref<25x32x64xbf16, #tpu.memory_space<vmem>>, vector<1x32x64xbf16>
    %60 = vector.shape_cast %59 : vector<1x32x64xbf16> to vector<32x64xbf16>
    %cst_57 = arith.constant dense<0.000000e+00> : vector<121x64xf32>
    %61 = tpu.matmul %58, %60, %cst_57 {dimension_numbers = #tpu.dot_dimension_numbers<[1], [0], [0], [1], [0, 0, 1, 1], [], []>} : vector<121x32xbf16>, vector<32x64xbf16>, vector<121x64xf32> -> vector<121x64xf32>
    %62 = arith.addf %57, %61 : vector<121x64xf32>
    %c21 = arith.constant 21 : index
    %c0_58 = arith.constant 0 : index
    %63 = vector.load %arg13[%c21, %c0_58] : memref<328x32xbf16, #tpu.memory_space<vmem>>, vector<121x32xbf16>
    %c8 = arith.constant 8 : index
    %c0_59 = arith.constant 0 : index
    %c0_60 = arith.constant 0 : index
    %64 = vector.load %arg4[%c8, %c0_59, %c0_60] : memref<25x32x64xbf16, #tpu.memory_space<vmem>>, vector<1x32x64xbf16>
    %65 = vector.shape_cast %64 : vector<1x32x64xbf16> to vector<32x64xbf16>
    %cst_61 = arith.constant dense<0.000000e+00> : vector<121x64xf32>
    %66 = tpu.matmul %63, %65, %cst_61 {dimension_numbers = #tpu.dot_dimension_numbers<[1], [0], [0], [1], [0, 0, 1, 1], [], []>} : vector<121x32xbf16>, vector<32x64xbf16>, vector<121x64xf32> -> vector<121x64xf32>
    %67 = arith.addf %62, %66 : vector<121x64xf32>
    %c22 = arith.constant 22 : index
    %c0_62 = arith.constant 0 : index
    %68 = vector.load %arg13[%c22, %c0_62] : memref<328x32xbf16, #tpu.memory_space<vmem>>, vector<121x32xbf16>
    %c9 = arith.constant 9 : index
    %c0_63 = arith.constant 0 : index
    %c0_64 = arith.constant 0 : index
    %69 = vector.load %arg4[%c9, %c0_63, %c0_64] : memref<25x32x64xbf16, #tpu.memory_space<vmem>>, vector<1x32x64xbf16>
    %70 = vector.shape_cast %69 : vector<1x32x64xbf16> to vector<32x64xbf16>
    %cst_65 = arith.constant dense<0.000000e+00> : vector<121x64xf32>
    %71 = tpu.matmul %68, %70, %cst_65 {dimension_numbers = #tpu.dot_dimension_numbers<[1], [0], [0], [1], [0, 0, 1, 1], [], []>} : vector<121x32xbf16>, vector<32x64xbf16>, vector<121x64xf32> -> vector<121x64xf32>
    %72 = arith.addf %67, %71 : vector<121x64xf32>
    %c36 = arith.constant 36 : index
    %c0_66 = arith.constant 0 : index
    %73 = vector.load %arg13[%c36, %c0_66] : memref<328x32xbf16, #tpu.memory_space<vmem>>, vector<121x32xbf16>
    %c10 = arith.constant 10 : index
    %c0_67 = arith.constant 0 : index
    %c0_68 = arith.constant 0 : index
    %74 = vector.load %arg4[%c10, %c0_67, %c0_68] : memref<25x32x64xbf16, #tpu.memory_space<vmem>>, vector<1x32x64xbf16>
    %75 = vector.shape_cast %74 : vector<1x32x64xbf16> to vector<32x64xbf16>
    %cst_69 = arith.constant dense<0.000000e+00> : vector<121x64xf32>
    %76 = tpu.matmul %73, %75, %cst_69 {dimension_numbers = #tpu.dot_dimension_numbers<[1], [0], [0], [1], [0, 0, 1, 1], [], []>} : vector<121x32xbf16>, vector<32x64xbf16>, vector<121x64xf32> -> vector<121x64xf32>
    %77 = arith.addf %72, %76 : vector<121x64xf32>
    %c37 = arith.constant 37 : index
    %c0_70 = arith.constant 0 : index
    %78 = vector.load %arg13[%c37, %c0_70] : memref<328x32xbf16, #tpu.memory_space<vmem>>, vector<121x32xbf16>
    %c11 = arith.constant 11 : index
    %c0_71 = arith.constant 0 : index
    %c0_72 = arith.constant 0 : index
    %79 = vector.load %arg4[%c11, %c0_71, %c0_72] : memref<25x32x64xbf16, #tpu.memory_space<vmem>>, vector<1x32x64xbf16>
    %80 = vector.shape_cast %79 : vector<1x32x64xbf16> to vector<32x64xbf16>
    %cst_73 = arith.constant dense<0.000000e+00> : vector<121x64xf32>
    %81 = tpu.matmul %78, %80, %cst_73 {dimension_numbers = #tpu.dot_dimension_numbers<[1], [0], [0], [1], [0, 0, 1, 1], [], []>} : vector<121x32xbf16>, vector<32x64xbf16>, vector<121x64xf32> -> vector<121x64xf32>
    %82 = arith.addf %77, %81 : vector<121x64xf32>
    %c38 = arith.constant 38 : index
    %c0_74 = arith.constant 0 : index
    %83 = vector.load %arg13[%c38, %c0_74] : memref<328x32xbf16, #tpu.memory_space<vmem>>, vector<121x32xbf16>
    %c12 = arith.constant 12 : index
    %c0_75 = arith.constant 0 : index
    %c0_76 = arith.constant 0 : index
    %84 = vector.load %arg4[%c12, %c0_75, %c0_76] : memref<25x32x64xbf16, #tpu.memory_space<vmem>>, vector<1x32x64xbf16>
    %85 = vector.shape_cast %84 : vector<1x32x64xbf16> to vector<32x64xbf16>
    %cst_77 = arith.constant dense<0.000000e+00> : vector<121x64xf32>
    %86 = tpu.matmul %83, %85, %cst_77 {dimension_numbers = #tpu.dot_dimension_numbers<[1], [0], [0], [1], [0, 0, 1, 1], [], []>} : vector<121x32xbf16>, vector<32x64xbf16>, vector<121x64xf32> -> vector<121x64xf32>
    %87 = arith.addf %82, %86 : vector<121x64xf32>
    %c39 = arith.constant 39 : index
    %c0_78 = arith.constant 0 : index
    %88 = vector.load %arg13[%c39, %c0_78] : memref<328x32xbf16, #tpu.memory_space<vmem>>, vector<121x32xbf16>
    %c13 = arith.constant 13 : index
    %c0_79 = arith.constant 0 : index
    %c0_80 = arith.constant 0 : index
    %89 = vector.load %arg4[%c13, %c0_79, %c0_80] : memref<25x32x64xbf16, #tpu.memory_space<vmem>>, vector<1x32x64xbf16>
    %90 = vector.shape_cast %89 : vector<1x32x64xbf16> to vector<32x64xbf16>
    %cst_81 = arith.constant dense<0.000000e+00> : vector<121x64xf32>
    %91 = tpu.matmul %88, %90, %cst_81 {dimension_numbers = #tpu.dot_dimension_numbers<[1], [0], [0], [1], [0, 0, 1, 1], [], []>} : vector<121x32xbf16>, vector<32x64xbf16>, vector<121x64xf32> -> vector<121x64xf32>
    %92 = arith.addf %87, %91 : vector<121x64xf32>
    %c40 = arith.constant 40 : index
    %c0_82 = arith.constant 0 : index
    %93 = vector.load %arg13[%c40, %c0_82] : memref<328x32xbf16, #tpu.memory_space<vmem>>, vector<121x32xbf16>
    %c14 = arith.constant 14 : index
    %c0_83 = arith.constant 0 : index
    %c0_84 = arith.constant 0 : index
    %94 = vector.load %arg4[%c14, %c0_83, %c0_84] : memref<25x32x64xbf16, #tpu.memory_space<vmem>>, vector<1x32x64xbf16>
    %95 = vector.shape_cast %94 : vector<1x32x64xbf16> to vector<32x64xbf16>
    %cst_85 = arith.constant dense<0.000000e+00> : vector<121x64xf32>
    %96 = tpu.matmul %93, %95, %cst_85 {dimension_numbers = #tpu.dot_dimension_numbers<[1], [0], [0], [1], [0, 0, 1, 1], [], []>} : vector<121x32xbf16>, vector<32x64xbf16>, vector<121x64xf32> -> vector<121x64xf32>
    %97 = arith.addf %92, %96 : vector<121x64xf32>
    %c54 = arith.constant 54 : index
    %c0_86 = arith.constant 0 : index
    %98 = vector.load %arg13[%c54, %c0_86] : memref<328x32xbf16, #tpu.memory_space<vmem>>, vector<121x32xbf16>
    %c15 = arith.constant 15 : index
    %c0_87 = arith.constant 0 : index
    %c0_88 = arith.constant 0 : index
    %99 = vector.load %arg4[%c15, %c0_87, %c0_88] : memref<25x32x64xbf16, #tpu.memory_space<vmem>>, vector<1x32x64xbf16>
    %100 = vector.shape_cast %99 : vector<1x32x64xbf16> to vector<32x64xbf16>
    %cst_89 = arith.constant dense<0.000000e+00> : vector<121x64xf32>
    %101 = tpu.matmul %98, %100, %cst_89 {dimension_numbers = #tpu.dot_dimension_numbers<[1], [0], [0], [1], [0, 0, 1, 1], [], []>} : vector<121x32xbf16>, vector<32x64xbf16>, vector<121x64xf32> -> vector<121x64xf32>
    %102 = arith.addf %97, %101 : vector<121x64xf32>
    %c55 = arith.constant 55 : index
    %c0_90 = arith.constant 0 : index
    %103 = vector.load %arg13[%c55, %c0_90] : memref<328x32xbf16, #tpu.memory_space<vmem>>, vector<121x32xbf16>
    %c16 = arith.constant 16 : index
    %c0_91 = arith.constant 0 : index
    %c0_92 = arith.constant 0 : index
    %104 = vector.load %arg4[%c16, %c0_91, %c0_92] : memref<25x32x64xbf16, #tpu.memory_space<vmem>>, vector<1x32x64xbf16>
    %105 = vector.shape_cast %104 : vector<1x32x64xbf16> to vector<32x64xbf16>
    %cst_93 = arith.constant dense<0.000000e+00> : vector<121x64xf32>
    %106 = tpu.matmul %103, %105, %cst_93 {dimension_numbers = #tpu.dot_dimension_numbers<[1], [0], [0], [1], [0, 0, 1, 1], [], []>} : vector<121x32xbf16>, vector<32x64xbf16>, vector<121x64xf32> -> vector<121x64xf32>
    %107 = arith.addf %102, %106 : vector<121x64xf32>
    %c56 = arith.constant 56 : index
    %c0_94 = arith.constant 0 : index
    %108 = vector.load %arg13[%c56, %c0_94] : memref<328x32xbf16, #tpu.memory_space<vmem>>, vector<121x32xbf16>
    %c17 = arith.constant 17 : index
    %c0_95 = arith.constant 0 : index
    %c0_96 = arith.constant 0 : index
    %109 = vector.load %arg4[%c17, %c0_95, %c0_96] : memref<25x32x64xbf16, #tpu.memory_space<vmem>>, vector<1x32x64xbf16>
    %110 = vector.shape_cast %109 : vector<1x32x64xbf16> to vector<32x64xbf16>
    %cst_97 = arith.constant dense<0.000000e+00> : vector<121x64xf32>
    %111 = tpu.matmul %108, %110, %cst_97 {dimension_numbers = #tpu.dot_dimension_numbers<[1], [0], [0], [1], [0, 0, 1, 1], [], []>} : vector<121x32xbf16>, vector<32x64xbf16>, vector<121x64xf32> -> vector<121x64xf32>
    %112 = arith.addf %107, %111 : vector<121x64xf32>
    %c57 = arith.constant 57 : index
    %c0_98 = arith.constant 0 : index
    %113 = vector.load %arg13[%c57, %c0_98] : memref<328x32xbf16, #tpu.memory_space<vmem>>, vector<121x32xbf16>
    %c18_99 = arith.constant 18 : index
    %c0_100 = arith.constant 0 : index
    %c0_101 = arith.constant 0 : index
    %114 = vector.load %arg4[%c18_99, %c0_100, %c0_101] : memref<25x32x64xbf16, #tpu.memory_space<vmem>>, vector<1x32x64xbf16>
    %115 = vector.shape_cast %114 : vector<1x32x64xbf16> to vector<32x64xbf16>
    %cst_102 = arith.constant dense<0.000000e+00> : vector<121x64xf32>
    %116 = tpu.matmul %113, %115, %cst_102 {dimension_numbers = #tpu.dot_dimension_numbers<[1], [0], [0], [1], [0, 0, 1, 1], [], []>} : vector<121x32xbf16>, vector<32x64xbf16>, vector<121x64xf32> -> vector<121x64xf32>
    %117 = arith.addf %112, %116 : vector<121x64xf32>
    %c58 = arith.constant 58 : index
    %c0_103 = arith.constant 0 : index
    %118 = vector.load %arg13[%c58, %c0_103] : memref<328x32xbf16, #tpu.memory_space<vmem>>, vector<121x32xbf16>
    %c19_104 = arith.constant 19 : index
    %c0_105 = arith.constant 0 : index
    %c0_106 = arith.constant 0 : index
    %119 = vector.load %arg4[%c19_104, %c0_105, %c0_106] : memref<25x32x64xbf16, #tpu.memory_space<vmem>>, vector<1x32x64xbf16>
    %120 = vector.shape_cast %119 : vector<1x32x64xbf16> to vector<32x64xbf16>
    %cst_107 = arith.constant dense<0.000000e+00> : vector<121x64xf32>
    %121 = tpu.matmul %118, %120, %cst_107 {dimension_numbers = #tpu.dot_dimension_numbers<[1], [0], [0], [1], [0, 0, 1, 1], [], []>} : vector<121x32xbf16>, vector<32x64xbf16>, vector<121x64xf32> -> vector<121x64xf32>
    %122 = arith.addf %117, %121 : vector<121x64xf32>
    %c72 = arith.constant 72 : index
    %c0_108 = arith.constant 0 : index
    %123 = vector.load %arg13[%c72, %c0_108] : memref<328x32xbf16, #tpu.memory_space<vmem>>, vector<121x32xbf16>
    %c20_109 = arith.constant 20 : index
    %c0_110 = arith.constant 0 : index
    %c0_111 = arith.constant 0 : index
    %124 = vector.load %arg4[%c20_109, %c0_110, %c0_111] : memref<25x32x64xbf16, #tpu.memory_space<vmem>>, vector<1x32x64xbf16>
    %125 = vector.shape_cast %124 : vector<1x32x64xbf16> to vector<32x64xbf16>
    %cst_112 = arith.constant dense<0.000000e+00> : vector<121x64xf32>
    %126 = tpu.matmul %123, %125, %cst_112 {dimension_numbers = #tpu.dot_dimension_numbers<[1], [0], [0], [1], [0, 0, 1, 1], [], []>} : vector<121x32xbf16>, vector<32x64xbf16>, vector<121x64xf32> -> vector<121x64xf32>
    %127 = arith.addf %122, %126 : vector<121x64xf32>
    %c73 = arith.constant 73 : index
    %c0_113 = arith.constant 0 : index
    %128 = vector.load %arg13[%c73, %c0_113] : memref<328x32xbf16, #tpu.memory_space<vmem>>, vector<121x32xbf16>
    %c21_114 = arith.constant 21 : index
    %c0_115 = arith.constant 0 : index
    %c0_116 = arith.constant 0 : index
    %129 = vector.load %arg4[%c21_114, %c0_115, %c0_116] : memref<25x32x64xbf16, #tpu.memory_space<vmem>>, vector<1x32x64xbf16>
    %130 = vector.shape_cast %129 : vector<1x32x64xbf16> to vector<32x64xbf16>
    %cst_117 = arith.constant dense<0.000000e+00> : vector<121x64xf32>
    %131 = tpu.matmul %128, %130, %cst_117 {dimension_numbers = #tpu.dot_dimension_numbers<[1], [0], [0], [1], [0, 0, 1, 1], [], []>} : vector<121x32xbf16>, vector<32x64xbf16>, vector<121x64xf32> -> vector<121x64xf32>
    %132 = arith.addf %127, %131 : vector<121x64xf32>
    %c74 = arith.constant 74 : index
    %c0_118 = arith.constant 0 : index
    %133 = vector.load %arg13[%c74, %c0_118] : memref<328x32xbf16, #tpu.memory_space<vmem>>, vector<121x32xbf16>
    %c22_119 = arith.constant 22 : index
    %c0_120 = arith.constant 0 : index
    %c0_121 = arith.constant 0 : index
    %134 = vector.load %arg4[%c22_119, %c0_120, %c0_121] : memref<25x32x64xbf16, #tpu.memory_space<vmem>>, vector<1x32x64xbf16>
    %135 = vector.shape_cast %134 : vector<1x32x64xbf16> to vector<32x64xbf16>
    %cst_122 = arith.constant dense<0.000000e+00> : vector<121x64xf32>
    %136 = tpu.matmul %133, %135, %cst_122 {dimension_numbers = #tpu.dot_dimension_numbers<[1], [0], [0], [1], [0, 0, 1, 1], [], []>} : vector<121x32xbf16>, vector<32x64xbf16>, vector<121x64xf32> -> vector<121x64xf32>
    %137 = arith.addf %132, %136 : vector<121x64xf32>
    %c75 = arith.constant 75 : index
    %c0_123 = arith.constant 0 : index
    %138 = vector.load %arg13[%c75, %c0_123] : memref<328x32xbf16, #tpu.memory_space<vmem>>, vector<121x32xbf16>
    %c23 = arith.constant 23 : index
    %c0_124 = arith.constant 0 : index
    %c0_125 = arith.constant 0 : index
    %139 = vector.load %arg4[%c23, %c0_124, %c0_125] : memref<25x32x64xbf16, #tpu.memory_space<vmem>>, vector<1x32x64xbf16>
    %140 = vector.shape_cast %139 : vector<1x32x64xbf16> to vector<32x64xbf16>
    %cst_126 = arith.constant dense<0.000000e+00> : vector<121x64xf32>
    %141 = tpu.matmul %138, %140, %cst_126 {dimension_numbers = #tpu.dot_dimension_numbers<[1], [0], [0], [1], [0, 0, 1, 1], [], []>} : vector<121x32xbf16>, vector<32x64xbf16>, vector<121x64xf32> -> vector<121x64xf32>
    %142 = arith.addf %137, %141 : vector<121x64xf32>
    %c76 = arith.constant 76 : index
    %c0_127 = arith.constant 0 : index
    %143 = vector.load %arg13[%c76, %c0_127] : memref<328x32xbf16, #tpu.memory_space<vmem>>, vector<121x32xbf16>
    %c24 = arith.constant 24 : index
    %c0_128 = arith.constant 0 : index
    %c0_129 = arith.constant 0 : index
    %144 = vector.load %arg4[%c24, %c0_128, %c0_129] : memref<25x32x64xbf16, #tpu.memory_space<vmem>>, vector<1x32x64xbf16>
    %145 = vector.shape_cast %144 : vector<1x32x64xbf16> to vector<32x64xbf16>
    %cst_130 = arith.constant dense<0.000000e+00> : vector<121x64xf32>
    %146 = tpu.matmul %143, %145, %cst_130 {dimension_numbers = #tpu.dot_dimension_numbers<[1], [0], [0], [1], [0, 0, 1, 1], [], []>} : vector<121x32xbf16>, vector<32x64xbf16>, vector<121x64xf32> -> vector<121x64xf32>
    %147 = arith.addf %142, %146 : vector<121x64xf32>
    %c0_131 = arith.constant 0 : index
    %c0_132 = arith.constant 0 : index
    %148 = vector.load %arg5[%c0_131, %c0_132] : memref<1x64xf32, #tpu.memory_space<vmem>>, vector<1x64xf32>
    %149 = vector.broadcast %148 : vector<1x64xf32> to vector<121x64xf32>
    %150 = arith.addf %147, %149 : vector<121x64xf32>
    %cst_133 = arith.constant 0.000000e+00 : f32
    %151 = vector.broadcast %cst_133 : f32 to vector<121x64xf32>
    %152 = arith.maximumf %150, %151 : vector<121x64xf32>
    %153 = arith.truncf %152 : vector<121x64xf32> to vector<121x64xbf16>
    %c0_134 = arith.constant 0 : index
    %c0_135 = arith.constant 0 : index
    %154 = vector.load %arg14[%c0_134, %c0_135] : memref<232x64xbf16, #tpu.memory_space<vmem>>, vector<121x64xbf16>
    tpu.vector_store %arg14[%c0_134, %c0_135], %153 {strides = array<i32>} : memref<232x64xbf16, #tpu.memory_space<vmem>>, vector<121x64xbf16>,
    %cst_136 = arith.constant 0.000000e+00 : f32
    %155 = vector.broadcast %cst_136 : f32 to vector<85x64xf32>
    %c144 = arith.constant 144 : index
    %c0_137 = arith.constant 0 : index
    %156 = vector.load %arg13[%c144, %c0_137] : memref<328x32xbf16, #tpu.memory_space<vmem>>, vector<85x32xbf16>
    %c0_138 = arith.constant 0 : index
    %c0_139 = arith.constant 0 : index
    %c0_140 = arith.constant 0 : index
    %157 = vector.load %arg4[%c0_138, %c0_139, %c0_140] : memref<25x32x64xbf16, #tpu.memory_space<vmem>>, vector<1x32x64xbf16>
    %158 = vector.shape_cast %157 : vector<1x32x64xbf16> to vector<32x64xbf16>
    %cst_141 = arith.constant dense<0.000000e+00> : vector<85x64xf32>
    %159 = tpu.matmul %156, %158, %cst_141 {dimension_numbers = #tpu.dot_dimension_numbers<[1], [0], [0], [1], [0, 0, 1, 1], [], []>} : vector<85x32xbf16>, vector<32x64xbf16>, vector<85x64xf32> -> vector<85x64xf32>
    %160 = arith.addf %155, %159 : vector<85x64xf32>
    %c145 = arith.constant 145 : index
    %c0_142 = arith.constant 0 : index
    %161 = vector.load %arg13[%c145, %c0_142] : memref<328x32xbf16, #tpu.memory_space<vmem>>, vector<85x32xbf16>
    %c1_143 = arith.constant 1 : index
    %c0_144 = arith.constant 0 : index
    %c0_145 = arith.constant 0 : index
    %162 = vector.load %arg4[%c1_143, %c0_144, %c0_145] : memref<25x32x64xbf16, #tpu.memory_space<vmem>>, vector<1x32x64xbf16>
    %163 = vector.shape_cast %162 : vector<1x32x64xbf16> to vector<32x64xbf16>
    %cst_146 = arith.constant dense<0.000000e+00> : vector<85x64xf32>
    %164 = tpu.matmul %161, %163, %cst_146 {dimension_numbers = #tpu.dot_dimension_numbers<[1], [0], [0], [1], [0, 0, 1, 1], [], []>} : vector<85x32xbf16>, vector<32x64xbf16>, vector<85x64xf32> -> vector<85x64xf32>
    %165 = arith.addf %160, %164 : vector<85x64xf32>
    %c146 = arith.constant 146 : index
    %c0_147 = arith.constant 0 : index
    %166 = vector.load %arg13[%c146, %c0_147] : memref<328x32xbf16, #tpu.memory_space<vmem>>, vector<85x32xbf16>
    %c2_148 = arith.constant 2 : index
    %c0_149 = arith.constant 0 : index
    %c0_150 = arith.constant 0 : index
    %167 = vector.load %arg4[%c2_148, %c0_149, %c0_150] : memref<25x32x64xbf16, #tpu.memory_space<vmem>>, vector<1x32x64xbf16>
    %168 = vector.shape_cast %167 : vector<1x32x64xbf16> to vector<32x64xbf16>
    %cst_151 = arith.constant dense<0.000000e+00> : vector<85x64xf32>
    %169 = tpu.matmul %166, %168, %cst_151 {dimension_numbers = #tpu.dot_dimension_numbers<[1], [0], [0], [1], [0, 0, 1, 1], [], []>} : vector<85x32xbf16>, vector<32x64xbf16>, vector<85x64xf32> -> vector<85x64xf32>
    %170 = arith.addf %165, %169 : vector<85x64xf32>
    %c147 = arith.constant 147 : index
    %c0_152 = arith.constant 0 : index
    %171 = vector.load %arg13[%c147, %c0_152] : memref<328x32xbf16, #tpu.memory_space<vmem>>, vector<85x32xbf16>
    %c3_153 = arith.constant 3 : index
    %c0_154 = arith.constant 0 : index
    %c0_155 = arith.constant 0 : index
    %172 = vector.load %arg4[%c3_153, %c0_154, %c0_155] : memref<25x32x64xbf16, #tpu.memory_space<vmem>>, vector<1x32x64xbf16>
    %173 = vector.shape_cast %172 : vector<1x32x64xbf16> to vector<32x64xbf16>
    %cst_156 = arith.constant dense<0.000000e+00> : vector<85x64xf32>
    %174 = tpu.matmul %171, %173, %cst_156 {dimension_numbers = #tpu.dot_dimension_numbers<[1], [0], [0], [1], [0, 0, 1, 1], [], []>} : vector<85x32xbf16>, vector<32x64xbf16>, vector<85x64xf32> -> vector<85x64xf32>
    %175 = arith.addf %170, %174 : vector<85x64xf32>
    %c148 = arith.constant 148 : index
    %c0_157 = arith.constant 0 : index
    %176 = vector.load %arg13[%c148, %c0_157] : memref<328x32xbf16, #tpu.memory_space<vmem>>, vector<85x32xbf16>
    %c4_158 = arith.constant 4 : index
    %c0_159 = arith.constant 0 : index
    %c0_160 = arith.constant 0 : index
    %177 = vector.load %arg4[%c4_158, %c0_159, %c0_160] : memref<25x32x64xbf16, #tpu.memory_space<vmem>>, vector<1x32x64xbf16>
    %178 = vector.shape_cast %177 : vector<1x32x64xbf16> to vector<32x64xbf16>
    %cst_161 = arith.constant dense<0.000000e+00> : vector<85x64xf32>
    %179 = tpu.matmul %176, %178, %cst_161 {dimension_numbers = #tpu.dot_dimension_numbers<[1], [0], [0], [1], [0, 0, 1, 1], [], []>} : vector<85x32xbf16>, vector<32x64xbf16>, vector<85x64xf32> -> vector<85x64xf32>
    %180 = arith.addf %175, %179 : vector<85x64xf32>
    %c162 = arith.constant 162 : index
    %c0_162 = arith.constant 0 : index
    %181 = vector.load %arg13[%c162, %c0_162] : memref<328x32xbf16, #tpu.memory_space<vmem>>, vector<85x32xbf16>
    %c5_163 = arith.constant 5 : index
    %c0_164 = arith.constant 0 : index
    %c0_165 = arith.constant 0 : index
    %182 = vector.load %arg4[%c5_163, %c0_164, %c0_165] : memref<25x32x64xbf16, #tpu.memory_space<vmem>>, vector<1x32x64xbf16>
    %183 = vector.shape_cast %182 : vector<1x32x64xbf16> to vector<32x64xbf16>
    %cst_166 = arith.constant dense<0.000000e+00> : vector<85x64xf32>
    %184 = tpu.matmul %181, %183, %cst_166 {dimension_numbers = #tpu.dot_dimension_numbers<[1], [0], [0], [1], [0, 0, 1, 1], [], []>} : vector<85x32xbf16>, vector<32x64xbf16>, vector<85x64xf32> -> vector<85x64xf32>
    %185 = arith.addf %180, %184 : vector<85x64xf32>
    %c163 = arith.constant 163 : index
    %c0_167 = arith.constant 0 : index
    %186 = vector.load %arg13[%c163, %c0_167] : memref<328x32xbf16, #tpu.memory_space<vmem>>, vector<85x32xbf16>
    %c6_168 = arith.constant 6 : index
    %c0_169 = arith.constant 0 : index
    %c0_170 = arith.constant 0 : index
    %187 = vector.load %arg4[%c6_168, %c0_169, %c0_170] : memref<25x32x64xbf16, #tpu.memory_space<vmem>>, vector<1x32x64xbf16>
    %188 = vector.shape_cast %187 : vector<1x32x64xbf16> to vector<32x64xbf16>
    %cst_171 = arith.constant dense<0.000000e+00> : vector<85x64xf32>
    %189 = tpu.matmul %186, %188, %cst_171 {dimension_numbers = #tpu.dot_dimension_numbers<[1], [0], [0], [1], [0, 0, 1, 1], [], []>} : vector<85x32xbf16>, vector<32x64xbf16>, vector<85x64xf32> -> vector<85x64xf32>
    %190 = arith.addf %185, %189 : vector<85x64xf32>
    %c164 = arith.constant 164 : index
    %c0_172 = arith.constant 0 : index
    %191 = vector.load %arg13[%c164, %c0_172] : memref<328x32xbf16, #tpu.memory_space<vmem>>, vector<85x32xbf16>
    %c7_173 = arith.constant 7 : index
    %c0_174 = arith.constant 0 : index
    %c0_175 = arith.constant 0 : index
    %192 = vector.load %arg4[%c7_173, %c0_174, %c0_175] : memref<25x32x64xbf16, #tpu.memory_space<vmem>>, vector<1x32x64xbf16>
    %193 = vector.shape_cast %192 : vector<1x32x64xbf16> to vector<32x64xbf16>
    %cst_176 = arith.constant dense<0.000000e+00> : vector<85x64xf32>
    %194 = tpu.matmul %191, %193, %cst_176 {dimension_numbers = #tpu.dot_dimension_numbers<[1], [0], [0], [1], [0, 0, 1, 1], [], []>} : vector<85x32xbf16>, vector<32x64xbf16>, vector<85x64xf32> -> vector<85x64xf32>
    %195 = arith.addf %190, %194 : vector<85x64xf32>
    %c165 = arith.constant 165 : index
    %c0_177 = arith.constant 0 : index
    %196 = vector.load %arg13[%c165, %c0_177] : memref<328x32xbf16, #tpu.memory_space<vmem>>, vector<85x32xbf16>
    %c8_178 = arith.constant 8 : index
    %c0_179 = arith.constant 0 : index
    %c0_180 = arith.constant 0 : index
    %197 = vector.load %arg4[%c8_178, %c0_179, %c0_180] : memref<25x32x64xbf16, #tpu.memory_space<vmem>>, vector<1x32x64xbf16>
    %198 = vector.shape_cast %197 : vector<1x32x64xbf16> to vector<32x64xbf16>
    %cst_181 = arith.constant dense<0.000000e+00> : vector<85x64xf32>
    %199 = tpu.matmul %196, %198, %cst_181 {dimension_numbers = #tpu.dot_dimension_numbers<[1], [0], [0], [1], [0, 0, 1, 1], [], []>} : vector<85x32xbf16>, vector<32x64xbf16>, vector<85x64xf32> -> vector<85x64xf32>
    %200 = arith.addf %195, %199 : vector<85x64xf32>
    %c166 = arith.constant 166 : index
    %c0_182 = arith.constant 0 : index
    %201 = vector.load %arg13[%c166, %c0_182] : memref<328x32xbf16, #tpu.memory_space<vmem>>, vector<85x32xbf16>
    %c9_183 = arith.constant 9 : index
    %c0_184 = arith.constant 0 : index
    %c0_185 = arith.constant 0 : index
    %202 = vector.load %arg4[%c9_183, %c0_184, %c0_185] : memref<25x32x64xbf16, #tpu.memory_space<vmem>>, vector<1x32x64xbf16>
    %203 = vector.shape_cast %202 : vector<1x32x64xbf16> to vector<32x64xbf16>
    %cst_186 = arith.constant dense<0.000000e+00> : vector<85x64xf32>
    %204 = tpu.matmul %201, %203, %cst_186 {dimension_numbers = #tpu.dot_dimension_numbers<[1], [0], [0], [1], [0, 0, 1, 1], [], []>} : vector<85x32xbf16>, vector<32x64xbf16>, vector<85x64xf32> -> vector<85x64xf32>
    %205 = arith.addf %200, %204 : vector<85x64xf32>
    %c180 = arith.constant 180 : index
    %c0_187 = arith.constant 0 : index
    %206 = vector.load %arg13[%c180, %c0_187] : memref<328x32xbf16, #tpu.memory_space<vmem>>, vector<85x32xbf16>
    %c10_188 = arith.constant 10 : index
    %c0_189 = arith.constant 0 : index
    %c0_190 = arith.constant 0 : index
    %207 = vector.load %arg4[%c10_188, %c0_189, %c0_190] : memref<25x32x64xbf16, #tpu.memory_space<vmem>>, vector<1x32x64xbf16>
    %208 = vector.shape_cast %207 : vector<1x32x64xbf16> to vector<32x64xbf16>
    %cst_191 = arith.constant dense<0.000000e+00> : vector<85x64xf32>
    %209 = tpu.matmul %206, %208, %cst_191 {dimension_numbers = #tpu.dot_dimension_numbers<[1], [0], [0], [1], [0, 0, 1, 1], [], []>} : vector<85x32xbf16>, vector<32x64xbf16>, vector<85x64xf32> -> vector<85x64xf32>
    %210 = arith.addf %205, %209 : vector<85x64xf32>
    %c181 = arith.constant 181 : index
    %c0_192 = arith.constant 0 : index
    %211 = vector.load %arg13[%c181, %c0_192] : memref<328x32xbf16, #tpu.memory_space<vmem>>, vector<85x32xbf16>
    %c11_193 = arith.constant 11 : index
    %c0_194 = arith.constant 0 : index
    %c0_195 = arith.constant 0 : index
    %212 = vector.load %arg4[%c11_193, %c0_194, %c0_195] : memref<25x32x64xbf16, #tpu.memory_space<vmem>>, vector<1x32x64xbf16>
    %213 = vector.shape_cast %212 : vector<1x32x64xbf16> to vector<32x64xbf16>
    %cst_196 = arith.constant dense<0.000000e+00> : vector<85x64xf32>
    %214 = tpu.matmul %211, %213, %cst_196 {dimension_numbers = #tpu.dot_dimension_numbers<[1], [0], [0], [1], [0, 0, 1, 1], [], []>} : vector<85x32xbf16>, vector<32x64xbf16>, vector<85x64xf32> -> vector<85x64xf32>
    %215 = arith.addf %210, %214 : vector<85x64xf32>
    %c182 = arith.constant 182 : index
    %c0_197 = arith.constant 0 : index
    %216 = vector.load %arg13[%c182, %c0_197] : memref<328x32xbf16, #tpu.memory_space<vmem>>, vector<85x32xbf16>
    %c12_198 = arith.constant 12 : index
    %c0_199 = arith.constant 0 : index
    %c0_200 = arith.constant 0 : index
    %217 = vector.load %arg4[%c12_198, %c0_199, %c0_200] : memref<25x32x64xbf16, #tpu.memory_space<vmem>>, vector<1x32x64xbf16>
    %218 = vector.shape_cast %217 : vector<1x32x64xbf16> to vector<32x64xbf16>
    %cst_201 = arith.constant dense<0.000000e+00> : vector<85x64xf32>
    %219 = tpu.matmul %216, %218, %cst_201 {dimension_numbers = #tpu.dot_dimension_numbers<[1], [0], [0], [1], [0, 0, 1, 1], [], []>} : vector<85x32xbf16>, vector<32x64xbf16>, vector<85x64xf32> -> vector<85x64xf32>
    %220 = arith.addf %215, %219 : vector<85x64xf32>
    %c183 = arith.constant 183 : index
    %c0_202 = arith.constant 0 : index
    %221 = vector.load %arg13[%c183, %c0_202] : memref<328x32xbf16, #tpu.memory_space<vmem>>, vector<85x32xbf16>
    %c13_203 = arith.constant 13 : index
    %c0_204 = arith.constant 0 : index
    %c0_205 = arith.constant 0 : index
    %222 = vector.load %arg4[%c13_203, %c0_204, %c0_205] : memref<25x32x64xbf16, #tpu.memory_space<vmem>>, vector<1x32x64xbf16>
    %223 = vector.shape_cast %222 : vector<1x32x64xbf16> to vector<32x64xbf16>
    %cst_206 = arith.constant dense<0.000000e+00> : vector<85x64xf32>
    %224 = tpu.matmul %221, %223, %cst_206 {dimension_numbers = #tpu.dot_dimension_numbers<[1], [0], [0], [1], [0, 0, 1, 1], [], []>} : vector<85x32xbf16>, vector<32x64xbf16>, vector<85x64xf32> -> vector<85x64xf32>
    %225 = arith.addf %220, %224 : vector<85x64xf32>
    %c184 = arith.constant 184 : index
    %c0_207 = arith.constant 0 : index
    %226 = vector.load %arg13[%c184, %c0_207] : memref<328x32xbf16, #tpu.memory_space<vmem>>, vector<85x32xbf16>
    %c14_208 = arith.constant 14 : index
    %c0_209 = arith.constant 0 : index
    %c0_210 = arith.constant 0 : index
    %227 = vector.load %arg4[%c14_208, %c0_209, %c0_210] : memref<25x32x64xbf16, #tpu.memory_space<vmem>>, vector<1x32x64xbf16>
    %228 = vector.shape_cast %227 : vector<1x32x64xbf16> to vector<32x64xbf16>
    %cst_211 = arith.constant dense<0.000000e+00> : vector<85x64xf32>
    %229 = tpu.matmul %226, %228, %cst_211 {dimension_numbers = #tpu.dot_dimension_numbers<[1], [0], [0], [1], [0, 0, 1, 1], [], []>} : vector<85x32xbf16>, vector<32x64xbf16>, vector<85x64xf32> -> vector<85x64xf32>
    %230 = arith.addf %225, %229 : vector<85x64xf32>
    %c198 = arith.constant 198 : index
    %c0_212 = arith.constant 0 : index
    %231 = vector.load %arg13[%c198, %c0_212] : memref<328x32xbf16, #tpu.memory_space<vmem>>, vector<85x32xbf16>
    %c15_213 = arith.constant 15 : index
    %c0_214 = arith.constant 0 : index
    %c0_215 = arith.constant 0 : index
    %232 = vector.load %arg4[%c15_213, %c0_214, %c0_215] : memref<25x32x64xbf16, #tpu.memory_space<vmem>>, vector<1x32x64xbf16>
    %233 = vector.shape_cast %232 : vector<1x32x64xbf16> to vector<32x64xbf16>
    %cst_216 = arith.constant dense<0.000000e+00> : vector<85x64xf32>
    %234 = tpu.matmul %231, %233, %cst_216 {dimension_numbers = #tpu.dot_dimension_numbers<[1], [0], [0], [1], [0, 0, 1, 1], [], []>} : vector<85x32xbf16>, vector<32x64xbf16>, vector<85x64xf32> -> vector<85x64xf32>
    %235 = arith.addf %230, %234 : vector<85x64xf32>
    %c199 = arith.constant 199 : index
    %c0_217 = arith.constant 0 : index
    %236 = vector.load %arg13[%c199, %c0_217] : memref<328x32xbf16, #tpu.memory_space<vmem>>, vector<85x32xbf16>
    %c16_218 = arith.constant 16 : index
    %c0_219 = arith.constant 0 : index
    %c0_220 = arith.constant 0 : index
    %237 = vector.load %arg4[%c16_218, %c0_219, %c0_220] : memref<25x32x64xbf16, #tpu.memory_space<vmem>>, vector<1x32x64xbf16>
    %238 = vector.shape_cast %237 : vector<1x32x64xbf16> to vector<32x64xbf16>
    %cst_221 = arith.constant dense<0.000000e+00> : vector<85x64xf32>
    %239 = tpu.matmul %236, %238, %cst_221 {dimension_numbers = #tpu.dot_dimension_numbers<[1], [0], [0], [1], [0, 0, 1, 1], [], []>} : vector<85x32xbf16>, vector<32x64xbf16>, vector<85x64xf32> -> vector<85x64xf32>
    %240 = arith.addf %235, %239 : vector<85x64xf32>
    %c200 = arith.constant 200 : index
    %c0_222 = arith.constant 0 : index
    %241 = vector.load %arg13[%c200, %c0_222] : memref<328x32xbf16, #tpu.memory_space<vmem>>, vector<85x32xbf16>
    %c17_223 = arith.constant 17 : index
    %c0_224 = arith.constant 0 : index
    %c0_225 = arith.constant 0 : index
    %242 = vector.load %arg4[%c17_223, %c0_224, %c0_225] : memref<25x32x64xbf16, #tpu.memory_space<vmem>>, vector<1x32x64xbf16>
    %243 = vector.shape_cast %242 : vector<1x32x64xbf16> to vector<32x64xbf16>
    %cst_226 = arith.constant dense<0.000000e+00> : vector<85x64xf32>
    %244 = tpu.matmul %241, %243, %cst_226 {dimension_numbers = #tpu.dot_dimension_numbers<[1], [0], [0], [1], [0, 0, 1, 1], [], []>} : vector<85x32xbf16>, vector<32x64xbf16>, vector<85x64xf32> -> vector<85x64xf32>
    %245 = arith.addf %240, %244 : vector<85x64xf32>
    %c201 = arith.constant 201 : index
    %c0_227 = arith.constant 0 : index
    %246 = vector.load %arg13[%c201, %c0_227] : memref<328x32xbf16, #tpu.memory_space<vmem>>, vector<85x32xbf16>
    %c18_228 = arith.constant 18 : index
    %c0_229 = arith.constant 0 : index
    %c0_230 = arith.constant 0 : index
    %247 = vector.load %arg4[%c18_228, %c0_229, %c0_230] : memref<25x32x64xbf16, #tpu.memory_space<vmem>>, vector<1x32x64xbf16>
    %248 = vector.shape_cast %247 : vector<1x32x64xbf16> to vector<32x64xbf16>
    %cst_231 = arith.constant dense<0.000000e+00> : vector<85x64xf32>
    %249 = tpu.matmul %246, %248, %cst_231 {dimension_numbers = #tpu.dot_dimension_numbers<[1], [0], [0], [1], [0, 0, 1, 1], [], []>} : vector<85x32xbf16>, vector<32x64xbf16>, vector<85x64xf32> -> vector<85x64xf32>
    %250 = arith.addf %245, %249 : vector<85x64xf32>
    %c202 = arith.constant 202 : index
    %c0_232 = arith.constant 0 : index
    %251 = vector.load %arg13[%c202, %c0_232] : memref<328x32xbf16, #tpu.memory_space<vmem>>, vector<85x32xbf16>
    %c19_233 = arith.constant 19 : index
    %c0_234 = arith.constant 0 : index
    %c0_235 = arith.constant 0 : index
    %252 = vector.load %arg4[%c19_233, %c0_234, %c0_235] : memref<25x32x64xbf16, #tpu.memory_space<vmem>>, vector<1x32x64xbf16>
    %253 = vector.shape_cast %252 : vector<1x32x64xbf16> to vector<32x64xbf16>
    %cst_236 = arith.constant dense<0.000000e+00> : vector<85x64xf32>
    %254 = tpu.matmul %251, %253, %cst_236 {dimension_numbers = #tpu.dot_dimension_numbers<[1], [0], [0], [1], [0, 0, 1, 1], [], []>} : vector<85x32xbf16>, vector<32x64xbf16>, vector<85x64xf32> -> vector<85x64xf32>
    %255 = arith.addf %250, %254 : vector<85x64xf32>
    %c216 = arith.constant 216 : index
    %c0_237 = arith.constant 0 : index
    %256 = vector.load %arg13[%c216, %c0_237] : memref<328x32xbf16, #tpu.memory_space<vmem>>, vector<85x32xbf16>
    %c20_238 = arith.constant 20 : index
    %c0_239 = arith.constant 0 : index
    %c0_240 = arith.constant 0 : index
    %257 = vector.load %arg4[%c20_238, %c0_239, %c0_240] : memref<25x32x64xbf16, #tpu.memory_space<vmem>>, vector<1x32x64xbf16>
    %258 = vector.shape_cast %257 : vector<1x32x64xbf16> to vector<32x64xbf16>
    %cst_241 = arith.constant dense<0.000000e+00> : vector<85x64xf32>
    %259 = tpu.matmul %256, %258, %cst_241 {dimension_numbers = #tpu.dot_dimension_numbers<[1], [0], [0], [1], [0, 0, 1, 1], [], []>} : vector<85x32xbf16>, vector<32x64xbf16>, vector<85x64xf32> -> vector<85x64xf32>
    %260 = arith.addf %255, %259 : vector<85x64xf32>
    %c217 = arith.constant 217 : index
    %c0_242 = arith.constant 0 : index
    %261 = vector.load %arg13[%c217, %c0_242] : memref<328x32xbf16, #tpu.memory_space<vmem>>, vector<85x32xbf16>
    %c21_243 = arith.constant 21 : index
    %c0_244 = arith.constant 0 : index
    %c0_245 = arith.constant 0 : index
    %262 = vector.load %arg4[%c21_243, %c0_244, %c0_245] : memref<25x32x64xbf16, #tpu.memory_space<vmem>>, vector<1x32x64xbf16>
    %263 = vector.shape_cast %262 : vector<1x32x64xbf16> to vector<32x64xbf16>
    %cst_246 = arith.constant dense<0.000000e+00> : vector<85x64xf32>
    %264 = tpu.matmul %261, %263, %cst_246 {dimension_numbers = #tpu.dot_dimension_numbers<[1], [0], [0], [1], [0, 0, 1, 1], [], []>} : vector<85x32xbf16>, vector<32x64xbf16>, vector<85x64xf32> -> vector<85x64xf32>
    %265 = arith.addf %260, %264 : vector<85x64xf32>
    %c218 = arith.constant 218 : index
    %c0_247 = arith.constant 0 : index
    %266 = vector.load %arg13[%c218, %c0_247] : memref<328x32xbf16, #tpu.memory_space<vmem>>, vector<85x32xbf16>
    %c22_248 = arith.constant 22 : index
    %c0_249 = arith.constant 0 : index
    %c0_250 = arith.constant 0 : index
    %267 = vector.load %arg4[%c22_248, %c0_249, %c0_250] : memref<25x32x64xbf16, #tpu.memory_space<vmem>>, vector<1x32x64xbf16>
    %268 = vector.shape_cast %267 : vector<1x32x64xbf16> to vector<32x64xbf16>
    %cst_251 = arith.constant dense<0.000000e+00> : vector<85x64xf32>
    %269 = tpu.matmul %266, %268, %cst_251 {dimension_numbers = #tpu.dot_dimension_numbers<[1], [0], [0], [1], [0, 0, 1, 1], [], []>} : vector<85x32xbf16>, vector<32x64xbf16>, vector<85x64xf32> -> vector<85x64xf32>
    %270 = arith.addf %265, %269 : vector<85x64xf32>
    %c219 = arith.constant 219 : index
    %c0_252 = arith.constant 0 : index
    %271 = vector.load %arg13[%c219, %c0_252] : memref<328x32xbf16, #tpu.memory_space<vmem>>, vector<85x32xbf16>
    %c23_253 = arith.constant 23 : index
    %c0_254 = arith.constant 0 : index
    %c0_255 = arith.constant 0 : index
    %272 = vector.load %arg4[%c23_253, %c0_254, %c0_255] : memref<25x32x64xbf16, #tpu.memory_space<vmem>>, vector<1x32x64xbf16>
    %273 = vector.shape_cast %272 : vector<1x32x64xbf16> to vector<32x64xbf16>
    %cst_256 = arith.constant dense<0.000000e+00> : vector<85x64xf32>
    %274 = tpu.matmul %271, %273, %cst_256 {dimension_numbers = #tpu.dot_dimension_numbers<[1], [0], [0], [1], [0, 0, 1, 1], [], []>} : vector<85x32xbf16>, vector<32x64xbf16>, vector<85x64xf32> -> vector<85x64xf32>
    %275 = arith.addf %270, %274 : vector<85x64xf32>
    %c220 = arith.constant 220 : index
    %c0_257 = arith.constant 0 : index
    %276 = vector.load %arg13[%c220, %c0_257] : memref<328x32xbf16, #tpu.memory_space<vmem>>, vector<85x32xbf16>
    %c24_258 = arith.constant 24 : index
    %c0_259 = arith.constant 0 : index
    %c0_260 = arith.constant 0 : index
    %277 = vector.load %arg4[%c24_258, %c0_259, %c0_260] : memref<25x32x64xbf16, #tpu.memory_space<vmem>>, vector<1x32x64xbf16>
    %278 = vector.shape_cast %277 : vector<1x32x64xbf16> to vector<32x64xbf16>
    %cst_261 = arith.constant dense<0.000000e+00> : vector<85x64xf32>
    %279 = tpu.matmul %276, %278, %cst_261 {dimension_numbers = #tpu.dot_dimension_numbers<[1], [0], [0], [1], [0, 0, 1, 1], [], []>} : vector<85x32xbf16>, vector<32x64xbf16>, vector<85x64xf32> -> vector<85x64xf32>
    %280 = arith.addf %275, %279 : vector<85x64xf32>
    %c0_262 = arith.constant 0 : index
    %c0_263 = arith.constant 0 : index
    %281 = vector.load %arg5[%c0_262, %c0_263] : memref<1x64xf32, #tpu.memory_space<vmem>>, vector<1x64xf32>
    %282 = vector.broadcast %281 : vector<1x64xf32> to vector<85x64xf32>
    %283 = arith.addf %280, %282 : vector<85x64xf32>
    %cst_264 = arith.constant 0.000000e+00 : f32
    %284 = vector.broadcast %cst_264 : f32 to vector<85x64xf32>
    %285 = arith.maximumf %283, %284 : vector<85x64xf32>
    %286 = arith.truncf %285 : vector<85x64xf32> to vector<85x64xbf16>
    %c144_265 = arith.constant 144 : index
    %c0_266 = arith.constant 0 : index
    %287 = vector.load %arg14[%c144_265, %c0_266] : memref<232x64xbf16, #tpu.memory_space<vmem>>, vector<85x64xbf16>
    tpu.vector_store %arg14[%c144_265, %c0_266], %286 {strides = array<i32>} : memref<232x64xbf16, #tpu.memory_space<vmem>>, vector<85x64xbf16>,
    %c0_267 = arith.constant 0 : index
    %c0_268 = arith.constant 0 : index
    %288 = vector.load %arg9[%c0_267, %c0_268] : memref<1x256xf32, #tpu.memory_space<vmem>>, vector<1x256xf32>
    %cst_269 = arith.constant 0.000000e+00 : f32
    %289 = vector.broadcast %cst_269 : f32 to vector<5x128xf32>
    %c0_270 = arith.constant 0 : index
    %c0_271 = arith.constant 0 : index
    %290 = vector.load %arg14[%c0_270, %c0_271] : memref<232x64xbf16, #tpu.memory_space<vmem>>, vector<5x64xbf16>
    %c0_272 = arith.constant 0 : index
    %c0_273 = arith.constant 0 : index
    %c0_274 = arith.constant 0 : index
    %291 = vector.load %arg6[%c0_272, %c0_273, %c0_274] : memref<25x64x128xbf16, #tpu.memory_space<vmem>>, vector<1x64x128xbf16>
    %292 = vector.shape_cast %291 : vector<1x64x128xbf16> to vector<64x128xbf16>
    %cst_275 = arith.constant dense<0.000000e+00> : vector<5x128xf32>
    %293 = tpu.matmul %290, %292, %cst_275 {dimension_numbers = #tpu.dot_dimension_numbers<[1], [0], [0], [1], [0, 0, 1, 1], [], []>} : vector<5x64xbf16>, vector<64x128xbf16>, vector<5x128xf32> -> vector<5x128xf32>
    %294 = arith.addf %289, %293 : vector<5x128xf32>
    %c2_276 = arith.constant 2 : index
    %c0_277 = arith.constant 0 : index
    %295 = vector.load %arg14[%c2_276, %c0_277] : memref<232x64xbf16, #tpu.memory_space<vmem>>, vector<5x64xbf16>
    %c1_278 = arith.constant 1 : index
    %c0_279 = arith.constant 0 : index
    %c0_280 = arith.constant 0 : index
    %296 = vector.load %arg6[%c1_278, %c0_279, %c0_280] : memref<25x64x128xbf16, #tpu.memory_space<vmem>>, vector<1x64x128xbf16>
    %297 = vector.shape_cast %296 : vector<1x64x128xbf16> to vector<64x128xbf16>
    %cst_281 = arith.constant dense<0.000000e+00> : vector<5x128xf32>
    %298 = tpu.matmul %295, %297, %cst_281 {dimension_numbers = #tpu.dot_dimension_numbers<[1], [0], [0], [1], [0, 0, 1, 1], [], []>} : vector<5x64xbf16>, vector<64x128xbf16>, vector<5x128xf32> -> vector<5x128xf32>
    %299 = arith.addf %294, %298 : vector<5x128xf32>
    %c4_282 = arith.constant 4 : index
    %c0_283 = arith.constant 0 : index
    %300 = vector.load %arg14[%c4_282, %c0_283] : memref<232x64xbf16, #tpu.memory_space<vmem>>, vector<5x64xbf16>
    %c2_284 = arith.constant 2 : index
    %c0_285 = arith.constant 0 : index
    %c0_286 = arith.constant 0 : index
    %301 = vector.load %arg6[%c2_284, %c0_285, %c0_286] : memref<25x64x128xbf16, #tpu.memory_space<vmem>>, vector<1x64x128xbf16>
    %302 = vector.shape_cast %301 : vector<1x64x128xbf16> to vector<64x128xbf16>
    %cst_287 = arith.constant dense<0.000000e+00> : vector<5x128xf32>
    %303 = tpu.matmul %300, %302, %cst_287 {dimension_numbers = #tpu.dot_dimension_numbers<[1], [0], [0], [1], [0, 0, 1, 1], [], []>} : vector<5x64xbf16>, vector<64x128xbf16>, vector<5x128xf32> -> vector<5x128xf32>
    %304 = arith.addf %299, %303 : vector<5x128xf32>
    %c6_288 = arith.constant 6 : index
    %c0_289 = arith.constant 0 : index
    %305 = vector.load %arg14[%c6_288, %c0_289] : memref<232x64xbf16, #tpu.memory_space<vmem>>, vector<5x64xbf16>
    %c3_290 = arith.constant 3 : index
    %c0_291 = arith.constant 0 : index
    %c0_292 = arith.constant 0 : index
    %306 = vector.load %arg6[%c3_290, %c0_291, %c0_292] : memref<25x64x128xbf16, #tpu.memory_space<vmem>>, vector<1x64x128xbf16>
    %307 = vector.shape_cast %306 : vector<1x64x128xbf16> to vector<64x128xbf16>
    %cst_293 = arith.constant dense<0.000000e+00> : vector<5x128xf32>
    %308 = tpu.matmul %305, %307, %cst_293 {dimension_numbers = #tpu.dot_dimension_numbers<[1], [0], [0], [1], [0, 0, 1, 1], [], []>} : vector<5x64xbf16>, vector<64x128xbf16>, vector<5x128xf32> -> vector<5x128xf32>
    %309 = arith.addf %304, %308 : vector<5x128xf32>
    %c8_294 = arith.constant 8 : index
    %c0_295 = arith.constant 0 : index
    %310 = vector.load %arg14[%c8_294, %c0_295] : memref<232x64xbf16, #tpu.memory_space<vmem>>, vector<5x64xbf16>
    %c4_296 = arith.constant 4 : index
    %c0_297 = arith.constant 0 : index
    %c0_298 = arith.constant 0 : index
    %311 = vector.load %arg6[%c4_296, %c0_297, %c0_298] : memref<25x64x128xbf16, #tpu.memory_space<vmem>>, vector<1x64x128xbf16>
    %312 = vector.shape_cast %311 : vector<1x64x128xbf16> to vector<64x128xbf16>
    %cst_299 = arith.constant dense<0.000000e+00> : vector<5x128xf32>
    %313 = tpu.matmul %310, %312, %cst_299 {dimension_numbers = #tpu.dot_dimension_numbers<[1], [0], [0], [1], [0, 0, 1, 1], [], []>} : vector<5x64xbf16>, vector<64x128xbf16>, vector<5x128xf32> -> vector<5x128xf32>
    %314 = arith.addf %309, %313 : vector<5x128xf32>
    %c36_300 = arith.constant 36 : index
    %c0_301 = arith.constant 0 : index
    %315 = vector.load %arg14[%c36_300, %c0_301] : memref<232x64xbf16, #tpu.memory_space<vmem>>, vector<5x64xbf16>
    %c5_302 = arith.constant 5 : index
    %c0_303 = arith.constant 0 : index
    %c0_304 = arith.constant 0 : index
    %316 = vector.load %arg6[%c5_302, %c0_303, %c0_304] : memref<25x64x128xbf16, #tpu.memory_space<vmem>>, vector<1x64x128xbf16>
    %317 = vector.shape_cast %316 : vector<1x64x128xbf16> to vector<64x128xbf16>
    %cst_305 = arith.constant dense<0.000000e+00> : vector<5x128xf32>
    %318 = tpu.matmul %315, %317, %cst_305 {dimension_numbers = #tpu.dot_dimension_numbers<[1], [0], [0], [1], [0, 0, 1, 1], [], []>} : vector<5x64xbf16>, vector<64x128xbf16>, vector<5x128xf32> -> vector<5x128xf32>
    %319 = arith.addf %314, %318 : vector<5x128xf32>
    %c38_306 = arith.constant 38 : index
    %c0_307 = arith.constant 0 : index
    %320 = vector.load %arg14[%c38_306, %c0_307] : memref<232x64xbf16, #tpu.memory_space<vmem>>, vector<5x64xbf16>
    %c6_308 = arith.constant 6 : index
    %c0_309 = arith.constant 0 : index
    %c0_310 = arith.constant 0 : index
    %321 = vector.load %arg6[%c6_308, %c0_309, %c0_310] : memref<25x64x128xbf16, #tpu.memory_space<vmem>>, vector<1x64x128xbf16>
    %322 = vector.shape_cast %321 : vector<1x64x128xbf16> to vector<64x128xbf16>
    %cst_311 = arith.constant dense<0.000000e+00> : vector<5x128xf32>
    %323 = tpu.matmul %320, %322, %cst_311 {dimension_numbers = #tpu.dot_dimension_numbers<[1], [0], [0], [1], [0, 0, 1, 1], [], []>} : vector<5x64xbf16>, vector<64x128xbf16>, vector<5x128xf32> -> vector<5x128xf32>
    %324 = arith.addf %319, %323 : vector<5x128xf32>
    %c40_312 = arith.constant 40 : index
    %c0_313 = arith.constant 0 : index
    %325 = vector.load %arg14[%c40_312, %c0_313] : memref<232x64xbf16, #tpu.memory_space<vmem>>, vector<5x64xbf16>
    %c7_314 = arith.constant 7 : index
    %c0_315 = arith.constant 0 : index
    %c0_316 = arith.constant 0 : index
    %326 = vector.load %arg6[%c7_314, %c0_315, %c0_316] : memref<25x64x128xbf16, #tpu.memory_space<vmem>>, vector<1x64x128xbf16>
    %327 = vector.shape_cast %326 : vector<1x64x128xbf16> to vector<64x128xbf16>
    %cst_317 = arith.constant dense<0.000000e+00> : vector<5x128xf32>
    %328 = tpu.matmul %325, %327, %cst_317 {dimension_numbers = #tpu.dot_dimension_numbers<[1], [0], [0], [1], [0, 0, 1, 1], [], []>} : vector<5x64xbf16>, vector<64x128xbf16>, vector<5x128xf32> -> vector<5x128xf32>
    %329 = arith.addf %324, %328 : vector<5x128xf32>
    %c42 = arith.constant 42 : index
    %c0_318 = arith.constant 0 : index
    %330 = vector.load %arg14[%c42, %c0_318] : memref<232x64xbf16, #tpu.memory_space<vmem>>, vector<5x64xbf16>
    %c8_319 = arith.constant 8 : index
    %c0_320 = arith.constant 0 : index
    %c0_321 = arith.constant 0 : index
    %331 = vector.load %arg6[%c8_319, %c0_320, %c0_321] : memref<25x64x128xbf16, #tpu.memory_space<vmem>>, vector<1x64x128xbf16>
    %332 = vector.shape_cast %331 : vector<1x64x128xbf16> to vector<64x128xbf16>
    %cst_322 = arith.constant dense<0.000000e+00> : vector<5x128xf32>
    %333 = tpu.matmul %330, %332, %cst_322 {dimension_numbers = #tpu.dot_dimension_numbers<[1], [0], [0], [1], [0, 0, 1, 1], [], []>} : vector<5x64xbf16>, vector<64x128xbf16>, vector<5x128xf32> -> vector<5x128xf32>
    %334 = arith.addf %329, %333 : vector<5x128xf32>
    %c44 = arith.constant 44 : index
    %c0_323 = arith.constant 0 : index
    %335 = vector.load %arg14[%c44, %c0_323] : memref<232x64xbf16, #tpu.memory_space<vmem>>, vector<5x64xbf16>
    %c9_324 = arith.constant 9 : index
    %c0_325 = arith.constant 0 : index
    %c0_326 = arith.constant 0 : index
    %336 = vector.load %arg6[%c9_324, %c0_325, %c0_326] : memref<25x64x128xbf16, #tpu.memory_space<vmem>>, vector<1x64x128xbf16>
    %337 = vector.shape_cast %336 : vector<1x64x128xbf16> to vector<64x128xbf16>
    %cst_327 = arith.constant dense<0.000000e+00> : vector<5x128xf32>
    %338 = tpu.matmul %335, %337, %cst_327 {dimension_numbers = #tpu.dot_dimension_numbers<[1], [0], [0], [1], [0, 0, 1, 1], [], []>} : vector<5x64xbf16>, vector<64x128xbf16>, vector<5x128xf32> -> vector<5x128xf32>
    %339 = arith.addf %334, %338 : vector<5x128xf32>
    %c72_328 = arith.constant 72 : index
    %c0_329 = arith.constant 0 : index
    %340 = vector.load %arg14[%c72_328, %c0_329] : memref<232x64xbf16, #tpu.memory_space<vmem>>, vector<5x64xbf16>
    %c10_330 = arith.constant 10 : index
    %c0_331 = arith.constant 0 : index
    %c0_332 = arith.constant 0 : index
    %341 = vector.load %arg6[%c10_330, %c0_331, %c0_332] : memref<25x64x128xbf16, #tpu.memory_space<vmem>>, vector<1x64x128xbf16>
    %342 = vector.shape_cast %341 : vector<1x64x128xbf16> to vector<64x128xbf16>
    %cst_333 = arith.constant dense<0.000000e+00> : vector<5x128xf32>
    %343 = tpu.matmul %340, %342, %cst_333 {dimension_numbers = #tpu.dot_dimension_numbers<[1], [0], [0], [1], [0, 0, 1, 1], [], []>} : vector<5x64xbf16>, vector<64x128xbf16>, vector<5x128xf32> -> vector<5x128xf32>
    %344 = arith.addf %339, %343 : vector<5x128xf32>
    %c74_334 = arith.constant 74 : index
    %c0_335 = arith.constant 0 : index
    %345 = vector.load %arg14[%c74_334, %c0_335] : memref<232x64xbf16, #tpu.memory_space<vmem>>, vector<5x64xbf16>
    %c11_336 = arith.constant 11 : index
    %c0_337 = arith.constant 0 : index
    %c0_338 = arith.constant 0 : index
    %346 = vector.load %arg6[%c11_336, %c0_337, %c0_338] : memref<25x64x128xbf16, #tpu.memory_space<vmem>>, vector<1x64x128xbf16>
    %347 = vector.shape_cast %346 : vector<1x64x128xbf16> to vector<64x128xbf16>
    %cst_339 = arith.constant dense<0.000000e+00> : vector<5x128xf32>
    %348 = tpu.matmul %345, %347, %cst_339 {dimension_numbers = #tpu.dot_dimension_numbers<[1], [0], [0], [1], [0, 0, 1, 1], [], []>} : vector<5x64xbf16>, vector<64x128xbf16>, vector<5x128xf32> -> vector<5x128xf32>
    %349 = arith.addf %344, %348 : vector<5x128xf32>
    %c76_340 = arith.constant 76 : index
    %c0_341 = arith.constant 0 : index
    %350 = vector.load %arg14[%c76_340, %c0_341] : memref<232x64xbf16, #tpu.memory_space<vmem>>, vector<5x64xbf16>
    %c12_342 = arith.constant 12 : index
    %c0_343 = arith.constant 0 : index
    %c0_344 = arith.constant 0 : index
    %351 = vector.load %arg6[%c12_342, %c0_343, %c0_344] : memref<25x64x128xbf16, #tpu.memory_space<vmem>>, vector<1x64x128xbf16>
    %352 = vector.shape_cast %351 : vector<1x64x128xbf16> to vector<64x128xbf16>
    %cst_345 = arith.constant dense<0.000000e+00> : vector<5x128xf32>
    %353 = tpu.matmul %350, %352, %cst_345 {dimension_numbers = #tpu.dot_dimension_numbers<[1], [0], [0], [1], [0, 0, 1, 1], [], []>} : vector<5x64xbf16>, vector<64x128xbf16>, vector<5x128xf32> -> vector<5x128xf32>
    %354 = arith.addf %349, %353 : vector<5x128xf32>
    %c78 = arith.constant 78 : index
    %c0_346 = arith.constant 0 : index
    %355 = vector.load %arg14[%c78, %c0_346] : memref<232x64xbf16, #tpu.memory_space<vmem>>, vector<5x64xbf16>
    %c13_347 = arith.constant 13 : index
    %c0_348 = arith.constant 0 : index
    %c0_349 = arith.constant 0 : index
    %356 = vector.load %arg6[%c13_347, %c0_348, %c0_349] : memref<25x64x128xbf16, #tpu.memory_space<vmem>>, vector<1x64x128xbf16>
    %357 = vector.shape_cast %356 : vector<1x64x128xbf16> to vector<64x128xbf16>
    %cst_350 = arith.constant dense<0.000000e+00> : vector<5x128xf32>
    %358 = tpu.matmul %355, %357, %cst_350 {dimension_numbers = #tpu.dot_dimension_numbers<[1], [0], [0], [1], [0, 0, 1, 1], [], []>} : vector<5x64xbf16>, vector<64x128xbf16>, vector<5x128xf32> -> vector<5x128xf32>
    %359 = arith.addf %354, %358 : vector<5x128xf32>
    %c80 = arith.constant 80 : index
    %c0_351 = arith.constant 0 : index
    %360 = vector.load %arg14[%c80, %c0_351] : memref<232x64xbf16, #tpu.memory_space<vmem>>, vector<5x64xbf16>
    %c14_352 = arith.constant 14 : index
    %c0_353 = arith.constant 0 : index
    %c0_354 = arith.constant 0 : index
    %361 = vector.load %arg6[%c14_352, %c0_353, %c0_354] : memref<25x64x128xbf16, #tpu.memory_space<vmem>>, vector<1x64x128xbf16>
    %362 = vector.shape_cast %361 : vector<1x64x128xbf16> to vector<64x128xbf16>
    %cst_355 = arith.constant dense<0.000000e+00> : vector<5x128xf32>
    %363 = tpu.matmul %360, %362, %cst_355 {dimension_numbers = #tpu.dot_dimension_numbers<[1], [0], [0], [1], [0, 0, 1, 1], [], []>} : vector<5x64xbf16>, vector<64x128xbf16>, vector<5x128xf32> -> vector<5x128xf32>
    %364 = arith.addf %359, %363 : vector<5x128xf32>
    %c108 = arith.constant 108 : index
    %c0_356 = arith.constant 0 : index
    %365 = vector.load %arg14[%c108, %c0_356] : memref<232x64xbf16, #tpu.memory_space<vmem>>, vector<5x64xbf16>
    %c15_357 = arith.constant 15 : index
    %c0_358 = arith.constant 0 : index
    %c0_359 = arith.constant 0 : index
    %366 = vector.load %arg6[%c15_357, %c0_358, %c0_359] : memref<25x64x128xbf16, #tpu.memory_space<vmem>>, vector<1x64x128xbf16>
    %367 = vector.shape_cast %366 : vector<1x64x128xbf16> to vector<64x128xbf16>
    %cst_360 = arith.constant dense<0.000000e+00> : vector<5x128xf32>
    %368 = tpu.matmul %365, %367, %cst_360 {dimension_numbers = #tpu.dot_dimension_numbers<[1], [0], [0], [1], [0, 0, 1, 1], [], []>} : vector<5x64xbf16>, vector<64x128xbf16>, vector<5x128xf32> -> vector<5x128xf32>
    %369 = arith.addf %364, %368 : vector<5x128xf32>
    %c110 = arith.constant 110 : index
    %c0_361 = arith.constant 0 : index
    %370 = vector.load %arg14[%c110, %c0_361] : memref<232x64xbf16, #tpu.memory_space<vmem>>, vector<5x64xbf16>
    %c16_362 = arith.constant 16 : index
    %c0_363 = arith.constant 0 : index
    %c0_364 = arith.constant 0 : index
    %371 = vector.load %arg6[%c16_362, %c0_363, %c0_364] : memref<25x64x128xbf16, #tpu.memory_space<vmem>>, vector<1x64x128xbf16>
    %372 = vector.shape_cast %371 : vector<1x64x128xbf16> to vector<64x128xbf16>
    %cst_365 = arith.constant dense<0.000000e+00> : vector<5x128xf32>
    %373 = tpu.matmul %370, %372, %cst_365 {dimension_numbers = #tpu.dot_dimension_numbers<[1], [0], [0], [1], [0, 0, 1, 1], [], []>} : vector<5x64xbf16>, vector<64x128xbf16>, vector<5x128xf32> -> vector<5x128xf32>
    %374 = arith.addf %369, %373 : vector<5x128xf32>
    %c112 = arith.constant 112 : index
    %c0_366 = arith.constant 0 : index
    %375 = vector.load %arg14[%c112, %c0_366] : memref<232x64xbf16, #tpu.memory_space<vmem>>, vector<5x64xbf16>
    %c17_367 = arith.constant 17 : index
    %c0_368 = arith.constant 0 : index
    %c0_369 = arith.constant 0 : index
    %376 = vector.load %arg6[%c17_367, %c0_368, %c0_369] : memref<25x64x128xbf16, #tpu.memory_space<vmem>>, vector<1x64x128xbf16>
    %377 = vector.shape_cast %376 : vector<1x64x128xbf16> to vector<64x128xbf16>
    %cst_370 = arith.constant dense<0.000000e+00> : vector<5x128xf32>
    %378 = tpu.matmul %375, %377, %cst_370 {dimension_numbers = #tpu.dot_dimension_numbers<[1], [0], [0], [1], [0, 0, 1, 1], [], []>} : vector<5x64xbf16>, vector<64x128xbf16>, vector<5x128xf32> -> vector<5x128xf32>
    %379 = arith.addf %374, %378 : vector<5x128xf32>
    %c114 = arith.constant 114 : index
    %c0_371 = arith.constant 0 : index
    %380 = vector.load %arg14[%c114, %c0_371] : memref<232x64xbf16, #tpu.memory_space<vmem>>, vector<5x64xbf16>
    %c18_372 = arith.constant 18 : index
    %c0_373 = arith.constant 0 : index
    %c0_374 = arith.constant 0 : index
    %381 = vector.load %arg6[%c18_372, %c0_373, %c0_374] : memref<25x64x128xbf16, #tpu.memory_space<vmem>>, vector<1x64x128xbf16>
    %382 = vector.shape_cast %381 : vector<1x64x128xbf16> to vector<64x128xbf16>
    %cst_375 = arith.constant dense<0.000000e+00> : vector<5x128xf32>
    %383 = tpu.matmul %380, %382, %cst_375 {dimension_numbers = #tpu.dot_dimension_numbers<[1], [0], [0], [1], [0, 0, 1, 1], [], []>} : vector<5x64xbf16>, vector<64x128xbf16>, vector<5x128xf32> -> vector<5x128xf32>
    %384 = arith.addf %379, %383 : vector<5x128xf32>
    %c116 = arith.constant 116 : index
    %c0_376 = arith.constant 0 : index
    %385 = vector.load %arg14[%c116, %c0_376] : memref<232x64xbf16, #tpu.memory_space<vmem>>, vector<5x64xbf16>
    %c19_377 = arith.constant 19 : index
    %c0_378 = arith.constant 0 : index
    %c0_379 = arith.constant 0 : index
    %386 = vector.load %arg6[%c19_377, %c0_378, %c0_379] : memref<25x64x128xbf16, #tpu.memory_space<vmem>>, vector<1x64x128xbf16>
    %387 = vector.shape_cast %386 : vector<1x64x128xbf16> to vector<64x128xbf16>
    %cst_380 = arith.constant dense<0.000000e+00> : vector<5x128xf32>
    %388 = tpu.matmul %385, %387, %cst_380 {dimension_numbers = #tpu.dot_dimension_numbers<[1], [0], [0], [1], [0, 0, 1, 1], [], []>} : vector<5x64xbf16>, vector<64x128xbf16>, vector<5x128xf32> -> vector<5x128xf32>
    %389 = arith.addf %384, %388 : vector<5x128xf32>
    %c144_381 = arith.constant 144 : index
    %c0_382 = arith.constant 0 : index
    %390 = vector.load %arg14[%c144_381, %c0_382] : memref<232x64xbf16, #tpu.memory_space<vmem>>, vector<5x64xbf16>
    %c20_383 = arith.constant 20 : index
    %c0_384 = arith.constant 0 : index
    %c0_385 = arith.constant 0 : index
    %391 = vector.load %arg6[%c20_383, %c0_384, %c0_385] : memref<25x64x128xbf16, #tpu.memory_space<vmem>>, vector<1x64x128xbf16>
    %392 = vector.shape_cast %391 : vector<1x64x128xbf16> to vector<64x128xbf16>
    %cst_386 = arith.constant dense<0.000000e+00> : vector<5x128xf32>
    %393 = tpu.matmul %390, %392, %cst_386 {dimension_numbers = #tpu.dot_dimension_numbers<[1], [0], [0], [1], [0, 0, 1, 1], [], []>} : vector<5x64xbf16>, vector<64x128xbf16>, vector<5x128xf32> -> vector<5x128xf32>
    %394 = arith.addf %389, %393 : vector<5x128xf32>
    %c146_387 = arith.constant 146 : index
    %c0_388 = arith.constant 0 : index
    %395 = vector.load %arg14[%c146_387, %c0_388] : memref<232x64xbf16, #tpu.memory_space<vmem>>, vector<5x64xbf16>
    %c21_389 = arith.constant 21 : index
    %c0_390 = arith.constant 0 : index
    %c0_391 = arith.constant 0 : index
    %396 = vector.load %arg6[%c21_389, %c0_390, %c0_391] : memref<25x64x128xbf16, #tpu.memory_space<vmem>>, vector<1x64x128xbf16>
    %397 = vector.shape_cast %396 : vector<1x64x128xbf16> to vector<64x128xbf16>
    %cst_392 = arith.constant dense<0.000000e+00> : vector<5x128xf32>
    %398 = tpu.matmul %395, %397, %cst_392 {dimension_numbers = #tpu.dot_dimension_numbers<[1], [0], [0], [1], [0, 0, 1, 1], [], []>} : vector<5x64xbf16>, vector<64x128xbf16>, vector<5x128xf32> -> vector<5x128xf32>
    %399 = arith.addf %394, %398 : vector<5x128xf32>
    %c148_393 = arith.constant 148 : index
    %c0_394 = arith.constant 0 : index
    %400 = vector.load %arg14[%c148_393, %c0_394] : memref<232x64xbf16, #tpu.memory_space<vmem>>, vector<5x64xbf16>
    %c22_395 = arith.constant 22 : index
    %c0_396 = arith.constant 0 : index
    %c0_397 = arith.constant 0 : index
    %401 = vector.load %arg6[%c22_395, %c0_396, %c0_397] : memref<25x64x128xbf16, #tpu.memory_space<vmem>>, vector<1x64x128xbf16>
    %402 = vector.shape_cast %401 : vector<1x64x128xbf16> to vector<64x128xbf16>
    %cst_398 = arith.constant dense<0.000000e+00> : vector<5x128xf32>
    %403 = tpu.matmul %400, %402, %cst_398 {dimension_numbers = #tpu.dot_dimension_numbers<[1], [0], [0], [1], [0, 0, 1, 1], [], []>} : vector<5x64xbf16>, vector<64x128xbf16>, vector<5x128xf32> -> vector<5x128xf32>
    %404 = arith.addf %399, %403 : vector<5x128xf32>
    %c150 = arith.constant 150 : index
    %c0_399 = arith.constant 0 : index
    %405 = vector.load %arg14[%c150, %c0_399] : memref<232x64xbf16, #tpu.memory_space<vmem>>, vector<5x64xbf16>
    %c23_400 = arith.constant 23 : index
    %c0_401 = arith.constant 0 : index
    %c0_402 = arith.constant 0 : index
    %406 = vector.load %arg6[%c23_400, %c0_401, %c0_402] : memref<25x64x128xbf16, #tpu.memory_space<vmem>>, vector<1x64x128xbf16>
    %407 = vector.shape_cast %406 : vector<1x64x128xbf16> to vector<64x128xbf16>
    %cst_403 = arith.constant dense<0.000000e+00> : vector<5x128xf32>
    %408 = tpu.matmul %405, %407, %cst_403 {dimension_numbers = #tpu.dot_dimension_numbers<[1], [0], [0], [1], [0, 0, 1, 1], [], []>} : vector<5x64xbf16>, vector<64x128xbf16>, vector<5x128xf32> -> vector<5x128xf32>
    %409 = arith.addf %404, %408 : vector<5x128xf32>
    %c152 = arith.constant 152 : index
    %c0_404 = arith.constant 0 : index
    %410 = vector.load %arg14[%c152, %c0_404] : memref<232x64xbf16, #tpu.memory_space<vmem>>, vector<5x64xbf16>
    %c24_405 = arith.constant 24 : index
    %c0_406 = arith.constant 0 : index
    %c0_407 = arith.constant 0 : index
    %411 = vector.load %arg6[%c24_405, %c0_406, %c0_407] : memref<25x64x128xbf16, #tpu.memory_space<vmem>>, vector<1x64x128xbf16>
    %412 = vector.shape_cast %411 : vector<1x64x128xbf16> to vector<64x128xbf16>
    %cst_408 = arith.constant dense<0.000000e+00> : vector<5x128xf32>
    %413 = tpu.matmul %410, %412, %cst_408 {dimension_numbers = #tpu.dot_dimension_numbers<[1], [0], [0], [1], [0, 0, 1, 1], [], []>} : vector<5x64xbf16>, vector<64x128xbf16>, vector<5x128xf32> -> vector<5x128xf32>
    %414 = arith.addf %409, %413 : vector<5x128xf32>
    %c0_409 = arith.constant 0 : index
    %c0_410 = arith.constant 0 : index
    %415 = vector.load %arg7[%c0_409, %c0_410] : memref<1x128xf32, #tpu.memory_space<vmem>>, vector<1x128xf32>
    %416 = vector.broadcast %415 : vector<1x128xf32> to vector<5x128xf32>
    %417 = arith.addf %414, %416 : vector<5x128xf32>
    %cst_411 = arith.constant 0.000000e+00 : f32
    %418 = vector.broadcast %cst_411 : f32 to vector<5x128xf32>
    %419 = arith.maximumf %417, %418 : vector<5x128xf32>
    %420 = arith.truncf %419 : vector<5x128xf32> to vector<5x128xbf16>
    %421 = vector.extract_strided_slice %420 {offsets = [0, 0], sizes = [1, 128], strides = [1, 1]} : vector<5x128xbf16> to vector<1x128xbf16>
    %c0_412 = arith.constant 0 : index
    %c0_413 = arith.constant 0 : index
    %c0_414 = arith.constant 0 : index
    %422 = vector.load %arg8[%c0_412, %c0_413, %c0_414] : memref<4x128x256xbf16, #tpu.memory_space<vmem>>, vector<1x128x256xbf16>
    %423 = vector.shape_cast %422 : vector<1x128x256xbf16> to vector<128x256xbf16>
    %cst_415 = arith.constant dense<0.000000e+00> : vector<1x256xf32>
    %424 = tpu.matmul %421, %423, %cst_415 {dimension_numbers = #tpu.dot_dimension_numbers<[1], [0], [0], [1], [0, 0, 1, 1], [], []>} : vector<1x128xbf16>, vector<128x256xbf16>, vector<1x256xf32> -> vector<1x256xf32>
    %425 = arith.addf %288, %424 : vector<1x256xf32>
    %426 = vector.extract_strided_slice %420 {offsets = [4, 0], sizes = [1, 128], strides = [1, 1]} : vector<5x128xbf16> to vector<1x128xbf16>
    %c1_416 = arith.constant 1 : index
    %c0_417 = arith.constant 0 : index
    %c0_418 = arith.constant 0 : index
    %427 = vector.load %arg8[%c1_416, %c0_417, %c0_418] : memref<4x128x256xbf16, #tpu.memory_space<vmem>>, vector<1x128x256xbf16>
    %428 = vector.shape_cast %427 : vector<1x128x256xbf16> to vector<128x256xbf16>
    %cst_419 = arith.constant dense<0.000000e+00> : vector<1x256xf32>
    %429 = tpu.matmul %426, %428, %cst_419 {dimension_numbers = #tpu.dot_dimension_numbers<[1], [0], [0], [1], [0, 0, 1, 1], [], []>} : vector<1x128xbf16>, vector<128x256xbf16>, vector<1x256xf32> -> vector<1x256xf32>
    %430 = arith.addf %425, %429 : vector<1x256xf32>
    %cst_420 = arith.constant 0.000000e+00 : f32
    %431 = vector.broadcast %cst_420 : f32 to vector<5x128xf32>
    %c72_421 = arith.constant 72 : index
    %c0_422 = arith.constant 0 : index
    %432 = vector.load %arg14[%c72_421, %c0_422] : memref<232x64xbf16, #tpu.memory_space<vmem>>, vector<5x64xbf16>
    %c0_423 = arith.constant 0 : index
    %c0_424 = arith.constant 0 : index
    %c0_425 = arith.constant 0 : index
    %433 = vector.load %arg6[%c0_423, %c0_424, %c0_425] : memref<25x64x128xbf16, #tpu.memory_space<vmem>>, vector<1x64x128xbf16>
    %434 = vector.shape_cast %433 : vector<1x64x128xbf16> to vector<64x128xbf16>
    %cst_426 = arith.constant dense<0.000000e+00> : vector<5x128xf32>
    %435 = tpu.matmul %432, %434, %cst_426 {dimension_numbers = #tpu.dot_dimension_numbers<[1], [0], [0], [1], [0, 0, 1, 1], [], []>} : vector<5x64xbf16>, vector<64x128xbf16>, vector<5x128xf32> -> vector<5x128xf32>
    %436 = arith.addf %431, %435 : vector<5x128xf32>
    %c74_427 = arith.constant 74 : index
    %c0_428 = arith.constant 0 : index
    %437 = vector.load %arg14[%c74_427, %c0_428] : memref<232x64xbf16, #tpu.memory_space<vmem>>, vector<5x64xbf16>
    %c1_429 = arith.constant 1 : index
    %c0_430 = arith.constant 0 : index
    %c0_431 = arith.constant 0 : index
    %438 = vector.load %arg6[%c1_429, %c0_430, %c0_431] : memref<25x64x128xbf16, #tpu.memory_space<vmem>>, vector<1x64x128xbf16>
    %439 = vector.shape_cast %438 : vector<1x64x128xbf16> to vector<64x128xbf16>
    %cst_432 = arith.constant dense<0.000000e+00> : vector<5x128xf32>
    %440 = tpu.matmul %437, %439, %cst_432 {dimension_numbers = #tpu.dot_dimension_numbers<[1], [0], [0], [1], [0, 0, 1, 1], [], []>} : vector<5x64xbf16>, vector<64x128xbf16>, vector<5x128xf32> -> vector<5x128xf32>
    %441 = arith.addf %436, %440 : vector<5x128xf32>
    %c76_433 = arith.constant 76 : index
    %c0_434 = arith.constant 0 : index
    %442 = vector.load %arg14[%c76_433, %c0_434] : memref<232x64xbf16, #tpu.memory_space<vmem>>, vector<5x64xbf16>
    %c2_435 = arith.constant 2 : index
    %c0_436 = arith.constant 0 : index
    %c0_437 = arith.constant 0 : index
    %443 = vector.load %arg6[%c2_435, %c0_436, %c0_437] : memref<25x64x128xbf16, #tpu.memory_space<vmem>>, vector<1x64x128xbf16>
    %444 = vector.shape_cast %443 : vector<1x64x128xbf16> to vector<64x128xbf16>
    %cst_438 = arith.constant dense<0.000000e+00> : vector<5x128xf32>
    %445 = tpu.matmul %442, %444, %cst_438 {dimension_numbers = #tpu.dot_dimension_numbers<[1], [0], [0], [1], [0, 0, 1, 1], [], []>} : vector<5x64xbf16>, vector<64x128xbf16>, vector<5x128xf32> -> vector<5x128xf32>
    %446 = arith.addf %441, %445 : vector<5x128xf32>
    %c78_439 = arith.constant 78 : index
    %c0_440 = arith.constant 0 : index
    %447 = vector.load %arg14[%c78_439, %c0_440] : memref<232x64xbf16, #tpu.memory_space<vmem>>, vector<5x64xbf16>
    %c3_441 = arith.constant 3 : index
    %c0_442 = arith.constant 0 : index
    %c0_443 = arith.constant 0 : index
    %448 = vector.load %arg6[%c3_441, %c0_442, %c0_443] : memref<25x64x128xbf16, #tpu.memory_space<vmem>>, vector<1x64x128xbf16>
    %449 = vector.shape_cast %448 : vector<1x64x128xbf16> to vector<64x128xbf16>
    %cst_444 = arith.constant dense<0.000000e+00> : vector<5x128xf32>
    %450 = tpu.matmul %447, %449, %cst_444 {dimension_numbers = #tpu.dot_dimension_numbers<[1], [0], [0], [1], [0, 0, 1, 1], [], []>} : vector<5x64xbf16>, vector<64x128xbf16>, vector<5x128xf32> -> vector<5x128xf32>
    %451 = arith.addf %446, %450 : vector<5x128xf32>
    %c80_445 = arith.constant 80 : index
    %c0_446 = arith.constant 0 : index
    %452 = vector.load %arg14[%c80_445, %c0_446] : memref<232x64xbf16, #tpu.memory_space<vmem>>, vector<5x64xbf16>
    %c4_447 = arith.constant 4 : index
    %c0_448 = arith.constant 0 : index
    %c0_449 = arith.constant 0 : index
    %453 = vector.load %arg6[%c4_447, %c0_448, %c0_449] : memref<25x64x128xbf16, #tpu.memory_space<vmem>>, vector<1x64x128xbf16>
    %454 = vector.shape_cast %453 : vector<1x64x128xbf16> to vector<64x128xbf16>
    %cst_450 = arith.constant dense<0.000000e+00> : vector<5x128xf32>
    %455 = tpu.matmul %452, %454, %cst_450 {dimension_numbers = #tpu.dot_dimension_numbers<[1], [0], [0], [1], [0, 0, 1, 1], [], []>} : vector<5x64xbf16>, vector<64x128xbf16>, vector<5x128xf32> -> vector<5x128xf32>
    %456 = arith.addf %451, %455 : vector<5x128xf32>
    %c108_451 = arith.constant 108 : index
    %c0_452 = arith.constant 0 : index
    %457 = vector.load %arg14[%c108_451, %c0_452] : memref<232x64xbf16, #tpu.memory_space<vmem>>, vector<5x64xbf16>
    %c5_453 = arith.constant 5 : index
    %c0_454 = arith.constant 0 : index
    %c0_455 = arith.constant 0 : index
    %458 = vector.load %arg6[%c5_453, %c0_454, %c0_455] : memref<25x64x128xbf16, #tpu.memory_space<vmem>>, vector<1x64x128xbf16>
    %459 = vector.shape_cast %458 : vector<1x64x128xbf16> to vector<64x128xbf16>
    %cst_456 = arith.constant dense<0.000000e+00> : vector<5x128xf32>
    %460 = tpu.matmul %457, %459, %cst_456 {dimension_numbers = #tpu.dot_dimension_numbers<[1], [0], [0], [1], [0, 0, 1, 1], [], []>} : vector<5x64xbf16>, vector<64x128xbf16>, vector<5x128xf32> -> vector<5x128xf32>
    %461 = arith.addf %456, %460 : vector<5x128xf32>
    %c110_457 = arith.constant 110 : index
    %c0_458 = arith.constant 0 : index
    %462 = vector.load %arg14[%c110_457, %c0_458] : memref<232x64xbf16, #tpu.memory_space<vmem>>, vector<5x64xbf16>
    %c6_459 = arith.constant 6 : index
    %c0_460 = arith.constant 0 : index
    %c0_461 = arith.constant 0 : index
    %463 = vector.load %arg6[%c6_459, %c0_460, %c0_461] : memref<25x64x128xbf16, #tpu.memory_space<vmem>>, vector<1x64x128xbf16>
    %464 = vector.shape_cast %463 : vector<1x64x128xbf16> to vector<64x128xbf16>
    %cst_462 = arith.constant dense<0.000000e+00> : vector<5x128xf32>
    %465 = tpu.matmul %462, %464, %cst_462 {dimension_numbers = #tpu.dot_dimension_numbers<[1], [0], [0], [1], [0, 0, 1, 1], [], []>} : vector<5x64xbf16>, vector<64x128xbf16>, vector<5x128xf32> -> vector<5x128xf32>
    %466 = arith.addf %461, %465 : vector<5x128xf32>
    %c112_463 = arith.constant 112 : index
    %c0_464 = arith.constant 0 : index
    %467 = vector.load %arg14[%c112_463, %c0_464] : memref<232x64xbf16, #tpu.memory_space<vmem>>, vector<5x64xbf16>
    %c7_465 = arith.constant 7 : index
    %c0_466 = arith.constant 0 : index
    %c0_467 = arith.constant 0 : index
    %468 = vector.load %arg6[%c7_465, %c0_466, %c0_467] : memref<25x64x128xbf16, #tpu.memory_space<vmem>>, vector<1x64x128xbf16>
    %469 = vector.shape_cast %468 : vector<1x64x128xbf16> to vector<64x128xbf16>
    %cst_468 = arith.constant dense<0.000000e+00> : vector<5x128xf32>
    %470 = tpu.matmul %467, %469, %cst_468 {dimension_numbers = #tpu.dot_dimension_numbers<[1], [0], [0], [1], [0, 0, 1, 1], [], []>} : vector<5x64xbf16>, vector<64x128xbf16>, vector<5x128xf32> -> vector<5x128xf32>
    %471 = arith.addf %466, %470 : vector<5x128xf32>
    %c114_469 = arith.constant 114 : index
    %c0_470 = arith.constant 0 : index
    %472 = vector.load %arg14[%c114_469, %c0_470] : memref<232x64xbf16, #tpu.memory_space<vmem>>, vector<5x64xbf16>
    %c8_471 = arith.constant 8 : index
    %c0_472 = arith.constant 0 : index
    %c0_473 = arith.constant 0 : index
    %473 = vector.load %arg6[%c8_471, %c0_472, %c0_473] : memref<25x64x128xbf16, #tpu.memory_space<vmem>>, vector<1x64x128xbf16>
    %474 = vector.shape_cast %473 : vector<1x64x128xbf16> to vector<64x128xbf16>
    %cst_474 = arith.constant dense<0.000000e+00> : vector<5x128xf32>
    %475 = tpu.matmul %472, %474, %cst_474 {dimension_numbers = #tpu.dot_dimension_numbers<[1], [0], [0], [1], [0, 0, 1, 1], [], []>} : vector<5x64xbf16>, vector<64x128xbf16>, vector<5x128xf32> -> vector<5x128xf32>
    %476 = arith.addf %471, %475 : vector<5x128xf32>
    %c116_475 = arith.constant 116 : index
    %c0_476 = arith.constant 0 : index
    %477 = vector.load %arg14[%c116_475, %c0_476] : memref<232x64xbf16, #tpu.memory_space<vmem>>, vector<5x64xbf16>
    %c9_477 = arith.constant 9 : index
    %c0_478 = arith.constant 0 : index
    %c0_479 = arith.constant 0 : index
    %478 = vector.load %arg6[%c9_477, %c0_478, %c0_479] : memref<25x64x128xbf16, #tpu.memory_space<vmem>>, vector<1x64x128xbf16>
    %479 = vector.shape_cast %478 : vector<1x64x128xbf16> to vector<64x128xbf16>
    %cst_480 = arith.constant dense<0.000000e+00> : vector<5x128xf32>
    %480 = tpu.matmul %477, %479, %cst_480 {dimension_numbers = #tpu.dot_dimension_numbers<[1], [0], [0], [1], [0, 0, 1, 1], [], []>} : vector<5x64xbf16>, vector<64x128xbf16>, vector<5x128xf32> -> vector<5x128xf32>
    %481 = arith.addf %476, %480 : vector<5x128xf32>
    %c144_481 = arith.constant 144 : index
    %c0_482 = arith.constant 0 : index
    %482 = vector.load %arg14[%c144_481, %c0_482] : memref<232x64xbf16, #tpu.memory_space<vmem>>, vector<5x64xbf16>
    %c10_483 = arith.constant 10 : index
    %c0_484 = arith.constant 0 : index
    %c0_485 = arith.constant 0 : index
    %483 = vector.load %arg6[%c10_483, %c0_484, %c0_485] : memref<25x64x128xbf16, #tpu.memory_space<vmem>>, vector<1x64x128xbf16>
    %484 = vector.shape_cast %483 : vector<1x64x128xbf16> to vector<64x128xbf16>
    %cst_486 = arith.constant dense<0.000000e+00> : vector<5x128xf32>
    %485 = tpu.matmul %482, %484, %cst_486 {dimension_numbers = #tpu.dot_dimension_numbers<[1], [0], [0], [1], [0, 0, 1, 1], [], []>} : vector<5x64xbf16>, vector<64x128xbf16>, vector<5x128xf32> -> vector<5x128xf32>
    %486 = arith.addf %481, %485 : vector<5x128xf32>
    %c146_487 = arith.constant 146 : index
    %c0_488 = arith.constant 0 : index
    %487 = vector.load %arg14[%c146_487, %c0_488] : memref<232x64xbf16, #tpu.memory_space<vmem>>, vector<5x64xbf16>
    %c11_489 = arith.constant 11 : index
    %c0_490 = arith.constant 0 : index
    %c0_491 = arith.constant 0 : index
    %488 = vector.load %arg6[%c11_489, %c0_490, %c0_491] : memref<25x64x128xbf16, #tpu.memory_space<vmem>>, vector<1x64x128xbf16>
    %489 = vector.shape_cast %488 : vector<1x64x128xbf16> to vector<64x128xbf16>
    %cst_492 = arith.constant dense<0.000000e+00> : vector<5x128xf32>
    %490 = tpu.matmul %487, %489, %cst_492 {dimension_numbers = #tpu.dot_dimension_numbers<[1], [0], [0], [1], [0, 0, 1, 1], [], []>} : vector<5x64xbf16>, vector<64x128xbf16>, vector<5x128xf32> -> vector<5x128xf32>
    %491 = arith.addf %486, %490 : vector<5x128xf32>
    %c148_493 = arith.constant 148 : index
    %c0_494 = arith.constant 0 : index
    %492 = vector.load %arg14[%c148_493, %c0_494] : memref<232x64xbf16, #tpu.memory_space<vmem>>, vector<5x64xbf16>
    %c12_495 = arith.constant 12 : index
    %c0_496 = arith.constant 0 : index
    %c0_497 = arith.constant 0 : index
    %493 = vector.load %arg6[%c12_495, %c0_496, %c0_497] : memref<25x64x128xbf16, #tpu.memory_space<vmem>>, vector<1x64x128xbf16>
    %494 = vector.shape_cast %493 : vector<1x64x128xbf16> to vector<64x128xbf16>
    %cst_498 = arith.constant dense<0.000000e+00> : vector<5x128xf32>
    %495 = tpu.matmul %492, %494, %cst_498 {dimension_numbers = #tpu.dot_dimension_numbers<[1], [0], [0], [1], [0, 0, 1, 1], [], []>} : vector<5x64xbf16>, vector<64x128xbf16>, vector<5x128xf32> -> vector<5x128xf32>
    %496 = arith.addf %491, %495 : vector<5x128xf32>
    %c150_499 = arith.constant 150 : index
    %c0_500 = arith.constant 0 : index
    %497 = vector.load %arg14[%c150_499, %c0_500] : memref<232x64xbf16, #tpu.memory_space<vmem>>, vector<5x64xbf16>
    %c13_501 = arith.constant 13 : index
    %c0_502 = arith.constant 0 : index
    %c0_503 = arith.constant 0 : index
    %498 = vector.load %arg6[%c13_501, %c0_502, %c0_503] : memref<25x64x128xbf16, #tpu.memory_space<vmem>>, vector<1x64x128xbf16>
    %499 = vector.shape_cast %498 : vector<1x64x128xbf16> to vector<64x128xbf16>
    %cst_504 = arith.constant dense<0.000000e+00> : vector<5x128xf32>
    %500 = tpu.matmul %497, %499, %cst_504 {dimension_numbers = #tpu.dot_dimension_numbers<[1], [0], [0], [1], [0, 0, 1, 1], [], []>} : vector<5x64xbf16>, vector<64x128xbf16>, vector<5x128xf32> -> vector<5x128xf32>
    %501 = arith.addf %496, %500 : vector<5x128xf32>
    %c152_505 = arith.constant 152 : index
    %c0_506 = arith.constant 0 : index
    %502 = vector.load %arg14[%c152_505, %c0_506] : memref<232x64xbf16, #tpu.memory_space<vmem>>, vector<5x64xbf16>
    %c14_507 = arith.constant 14 : index
    %c0_508 = arith.constant 0 : index
    %c0_509 = arith.constant 0 : index
    %503 = vector.load %arg6[%c14_507, %c0_508, %c0_509] : memref<25x64x128xbf16, #tpu.memory_space<vmem>>, vector<1x64x128xbf16>
    %504 = vector.shape_cast %503 : vector<1x64x128xbf16> to vector<64x128xbf16>
    %cst_510 = arith.constant dense<0.000000e+00> : vector<5x128xf32>
    %505 = tpu.matmul %502, %504, %cst_510 {dimension_numbers = #tpu.dot_dimension_numbers<[1], [0], [0], [1], [0, 0, 1, 1], [], []>} : vector<5x64xbf16>, vector<64x128xbf16>, vector<5x128xf32> -> vector<5x128xf32>
    %506 = arith.addf %501, %505 : vector<5x128xf32>
    %c180_511 = arith.constant 180 : index
    %c0_512 = arith.constant 0 : index
    %507 = vector.load %arg14[%c180_511, %c0_512] : memref<232x64xbf16, #tpu.memory_space<vmem>>, vector<5x64xbf16>
    %c15_513 = arith.constant 15 : index
    %c0_514 = arith.constant 0 : index
    %c0_515 = arith.constant 0 : index
    %508 = vector.load %arg6[%c15_513, %c0_514, %c0_515] : memref<25x64x128xbf16, #tpu.memory_space<vmem>>, vector<1x64x128xbf16>
    %509 = vector.shape_cast %508 : vector<1x64x128xbf16> to vector<64x128xbf16>
    %cst_516 = arith.constant dense<0.000000e+00> : vector<5x128xf32>
    %510 = tpu.matmul %507, %509, %cst_516 {dimension_numbers = #tpu.dot_dimension_numbers<[1], [0], [0], [1], [0, 0, 1, 1], [], []>} : vector<5x64xbf16>, vector<64x128xbf16>, vector<5x128xf32> -> vector<5x128xf32>
    %511 = arith.addf %506, %510 : vector<5x128xf32>
    %c182_517 = arith.constant 182 : index
    %c0_518 = arith.constant 0 : index
    %512 = vector.load %arg14[%c182_517, %c0_518] : memref<232x64xbf16, #tpu.memory_space<vmem>>, vector<5x64xbf16>
    %c16_519 = arith.constant 16 : index
    %c0_520 = arith.constant 0 : index
    %c0_521 = arith.constant 0 : index
    %513 = vector.load %arg6[%c16_519, %c0_520, %c0_521] : memref<25x64x128xbf16, #tpu.memory_space<vmem>>, vector<1x64x128xbf16>
    %514 = vector.shape_cast %513 : vector<1x64x128xbf16> to vector<64x128xbf16>
    %cst_522 = arith.constant dense<0.000000e+00> : vector<5x128xf32>
    %515 = tpu.matmul %512, %514, %cst_522 {dimension_numbers = #tpu.dot_dimension_numbers<[1], [0], [0], [1], [0, 0, 1, 1], [], []>} : vector<5x64xbf16>, vector<64x128xbf16>, vector<5x128xf32> -> vector<5x128xf32>
    %516 = arith.addf %511, %515 : vector<5x128xf32>
    %c184_523 = arith.constant 184 : index
    %c0_524 = arith.constant 0 : index
    %517 = vector.load %arg14[%c184_523, %c0_524] : memref<232x64xbf16, #tpu.memory_space<vmem>>, vector<5x64xbf16>
    %c17_525 = arith.constant 17 : index
    %c0_526 = arith.constant 0 : index
    %c0_527 = arith.constant 0 : index
    %518 = vector.load %arg6[%c17_525, %c0_526, %c0_527] : memref<25x64x128xbf16, #tpu.memory_space<vmem>>, vector<1x64x128xbf16>
    %519 = vector.shape_cast %518 : vector<1x64x128xbf16> to vector<64x128xbf16>
    %cst_528 = arith.constant dense<0.000000e+00> : vector<5x128xf32>
    %520 = tpu.matmul %517, %519, %cst_528 {dimension_numbers = #tpu.dot_dimension_numbers<[1], [0], [0], [1], [0, 0, 1, 1], [], []>} : vector<5x64xbf16>, vector<64x128xbf16>, vector<5x128xf32> -> vector<5x128xf32>
    %521 = arith.addf %516, %520 : vector<5x128xf32>
    %c186 = arith.constant 186 : index
    %c0_529 = arith.constant 0 : index
    %522 = vector.load %arg14[%c186, %c0_529] : memref<232x64xbf16, #tpu.memory_space<vmem>>, vector<5x64xbf16>
    %c18_530 = arith.constant 18 : index
    %c0_531 = arith.constant 0 : index
    %c0_532 = arith.constant 0 : index
    %523 = vector.load %arg6[%c18_530, %c0_531, %c0_532] : memref<25x64x128xbf16, #tpu.memory_space<vmem>>, vector<1x64x128xbf16>
    %524 = vector.shape_cast %523 : vector<1x64x128xbf16> to vector<64x128xbf16>
    %cst_533 = arith.constant dense<0.000000e+00> : vector<5x128xf32>
    %525 = tpu.matmul %522, %524, %cst_533 {dimension_numbers = #tpu.dot_dimension_numbers<[1], [0], [0], [1], [0, 0, 1, 1], [], []>} : vector<5x64xbf16>, vector<64x128xbf16>, vector<5x128xf32> -> vector<5x128xf32>
    %526 = arith.addf %521, %525 : vector<5x128xf32>
    %c188 = arith.constant 188 : index
    %c0_534 = arith.constant 0 : index
    %527 = vector.load %arg14[%c188, %c0_534] : memref<232x64xbf16, #tpu.memory_space<vmem>>, vector<5x64xbf16>
    %c19_535 = arith.constant 19 : index
    %c0_536 = arith.constant 0 : index
    %c0_537 = arith.constant 0 : index
    %528 = vector.load %arg6[%c19_535, %c0_536, %c0_537] : memref<25x64x128xbf16, #tpu.memory_space<vmem>>, vector<1x64x128xbf16>
    %529 = vector.shape_cast %528 : vector<1x64x128xbf16> to vector<64x128xbf16>
    %cst_538 = arith.constant dense<0.000000e+00> : vector<5x128xf32>
    %530 = tpu.matmul %527, %529, %cst_538 {dimension_numbers = #tpu.dot_dimension_numbers<[1], [0], [0], [1], [0, 0, 1, 1], [], []>} : vector<5x64xbf16>, vector<64x128xbf16>, vector<5x128xf32> -> vector<5x128xf32>
    %531 = arith.addf %526, %530 : vector<5x128xf32>
    %c216_539 = arith.constant 216 : index
    %c0_540 = arith.constant 0 : index
    %532 = vector.load %arg14[%c216_539, %c0_540] : memref<232x64xbf16, #tpu.memory_space<vmem>>, vector<5x64xbf16>
    %c20_541 = arith.constant 20 : index
    %c0_542 = arith.constant 0 : index
    %c0_543 = arith.constant 0 : index
    %533 = vector.load %arg6[%c20_541, %c0_542, %c0_543] : memref<25x64x128xbf16, #tpu.memory_space<vmem>>, vector<1x64x128xbf16>
    %534 = vector.shape_cast %533 : vector<1x64x128xbf16> to vector<64x128xbf16>
    %cst_544 = arith.constant dense<0.000000e+00> : vector<5x128xf32>
    %535 = tpu.matmul %532, %534, %cst_544 {dimension_numbers = #tpu.dot_dimension_numbers<[1], [0], [0], [1], [0, 0, 1, 1], [], []>} : vector<5x64xbf16>, vector<64x128xbf16>, vector<5x128xf32> -> vector<5x128xf32>
    %536 = arith.addf %531, %535 : vector<5x128xf32>
    %c218_545 = arith.constant 218 : index
    %c0_546 = arith.constant 0 : index
    %537 = vector.load %arg14[%c218_545, %c0_546] : memref<232x64xbf16, #tpu.memory_space<vmem>>, vector<5x64xbf16>
    %c21_547 = arith.constant 21 : index
    %c0_548 = arith.constant 0 : index
    %c0_549 = arith.constant 0 : index
    %538 = vector.load %arg6[%c21_547, %c0_548, %c0_549] : memref<25x64x128xbf16, #tpu.memory_space<vmem>>, vector<1x64x128xbf16>
    %539 = vector.shape_cast %538 : vector<1x64x128xbf16> to vector<64x128xbf16>
    %cst_550 = arith.constant dense<0.000000e+00> : vector<5x128xf32>
    %540 = tpu.matmul %537, %539, %cst_550 {dimension_numbers = #tpu.dot_dimension_numbers<[1], [0], [0], [1], [0, 0, 1, 1], [], []>} : vector<5x64xbf16>, vector<64x128xbf16>, vector<5x128xf32> -> vector<5x128xf32>
    %541 = arith.addf %536, %540 : vector<5x128xf32>
    %c220_551 = arith.constant 220 : index
    %c0_552 = arith.constant 0 : index
    %542 = vector.load %arg14[%c220_551, %c0_552] : memref<232x64xbf16, #tpu.memory_space<vmem>>, vector<5x64xbf16>
    %c22_553 = arith.constant 22 : index
    %c0_554 = arith.constant 0 : index
    %c0_555 = arith.constant 0 : index
    %543 = vector.load %arg6[%c22_553, %c0_554, %c0_555] : memref<25x64x128xbf16, #tpu.memory_space<vmem>>, vector<1x64x128xbf16>
    %544 = vector.shape_cast %543 : vector<1x64x128xbf16> to vector<64x128xbf16>
    %cst_556 = arith.constant dense<0.000000e+00> : vector<5x128xf32>
    %545 = tpu.matmul %542, %544, %cst_556 {dimension_numbers = #tpu.dot_dimension_numbers<[1], [0], [0], [1], [0, 0, 1, 1], [], []>} : vector<5x64xbf16>, vector<64x128xbf16>, vector<5x128xf32> -> vector<5x128xf32>
    %546 = arith.addf %541, %545 : vector<5x128xf32>
    %c222 = arith.constant 222 : index
    %c0_557 = arith.constant 0 : index
    %547 = vector.load %arg14[%c222, %c0_557] : memref<232x64xbf16, #tpu.memory_space<vmem>>, vector<5x64xbf16>
    %c23_558 = arith.constant 23 : index
    %c0_559 = arith.constant 0 : index
    %c0_560 = arith.constant 0 : index
    %548 = vector.load %arg6[%c23_558, %c0_559, %c0_560] : memref<25x64x128xbf16, #tpu.memory_space<vmem>>, vector<1x64x128xbf16>
    %549 = vector.shape_cast %548 : vector<1x64x128xbf16> to vector<64x128xbf16>
    %cst_561 = arith.constant dense<0.000000e+00> : vector<5x128xf32>
    %550 = tpu.matmul %547, %549, %cst_561 {dimension_numbers = #tpu.dot_dimension_numbers<[1], [0], [0], [1], [0, 0, 1, 1], [], []>} : vector<5x64xbf16>, vector<64x128xbf16>, vector<5x128xf32> -> vector<5x128xf32>
    %551 = arith.addf %546, %550 : vector<5x128xf32>
    %c224 = arith.constant 224 : index
    %c0_562 = arith.constant 0 : index
    %552 = vector.load %arg14[%c224, %c0_562] : memref<232x64xbf16, #tpu.memory_space<vmem>>, vector<5x64xbf16>
    %c24_563 = arith.constant 24 : index
    %c0_564 = arith.constant 0 : index
    %c0_565 = arith.constant 0 : index
    %553 = vector.load %arg6[%c24_563, %c0_564, %c0_565] : memref<25x64x128xbf16, #tpu.memory_space<vmem>>, vector<1x64x128xbf16>
    %554 = vector.shape_cast %553 : vector<1x64x128xbf16> to vector<64x128xbf16>
    %cst_566 = arith.constant dense<0.000000e+00> : vector<5x128xf32>
    %555 = tpu.matmul %552, %554, %cst_566 {dimension_numbers = #tpu.dot_dimension_numbers<[1], [0], [0], [1], [0, 0, 1, 1], [], []>} : vector<5x64xbf16>, vector<64x128xbf16>, vector<5x128xf32> -> vector<5x128xf32>
    %556 = arith.addf %551, %555 : vector<5x128xf32>
    %c0_567 = arith.constant 0 : index
    %c0_568 = arith.constant 0 : index
    %557 = vector.load %arg7[%c0_567, %c0_568] : memref<1x128xf32, #tpu.memory_space<vmem>>, vector<1x128xf32>
    %558 = vector.broadcast %557 : vector<1x128xf32> to vector<5x128xf32>
    %559 = arith.addf %556, %558 : vector<5x128xf32>
    %cst_569 = arith.constant 0.000000e+00 : f32
    %560 = vector.broadcast %cst_569 : f32 to vector<5x128xf32>
    %561 = arith.maximumf %559, %560 : vector<5x128xf32>
    %562 = arith.truncf %561 : vector<5x128xf32> to vector<5x128xbf16>
    %563 = vector.extract_strided_slice %562 {offsets = [0, 0], sizes = [1, 128], strides = [1, 1]} : vector<5x128xbf16> to vector<1x128xbf16>
    %c2_570 = arith.constant 2 : index
    %c0_571 = arith.constant 0 : index
    %c0_572 = arith.constant 0 : index
    %564 = vector.load %arg8[%c2_570, %c0_571, %c0_572] : memref<4x128x256xbf16, #tpu.memory_space<vmem>>, vector<1x128x256xbf16>
    %565 = vector.shape_cast %564 : vector<1x128x256xbf16> to vector<128x256xbf16>
    %cst_573 = arith.constant dense<0.000000e+00> : vector<1x256xf32>
    %566 = tpu.matmul %563, %565, %cst_573 {dimension_numbers = #tpu.dot_dimension_numbers<[1], [0], [0], [1], [0, 0, 1, 1], [], []>} : vector<1x128xbf16>, vector<128x256xbf16>, vector<1x256xf32> -> vector<1x256xf32>
    %567 = arith.addf %430, %566 : vector<1x256xf32>
    %568 = vector.extract_strided_slice %562 {offsets = [4, 0], sizes = [1, 128], strides = [1, 1]} : vector<5x128xbf16> to vector<1x128xbf16>
    %c3_574 = arith.constant 3 : index
    %c0_575 = arith.constant 0 : index
    %c0_576 = arith.constant 0 : index
    %569 = vector.load %arg8[%c3_574, %c0_575, %c0_576] : memref<4x128x256xbf16, #tpu.memory_space<vmem>>, vector<1x128x256xbf16>
    %570 = vector.shape_cast %569 : vector<1x128x256xbf16> to vector<128x256xbf16>
    %cst_577 = arith.constant dense<0.000000e+00> : vector<1x256xf32>
    %571 = tpu.matmul %568, %570, %cst_577 {dimension_numbers = #tpu.dot_dimension_numbers<[1], [0], [0], [1], [0, 0, 1, 1], [], []>} : vector<1x128xbf16>, vector<128x256xbf16>, vector<1x256xf32> -> vector<1x256xf32>
    %572 = arith.addf %567, %571 : vector<1x256xf32>
    %cst_578 = arith.constant 0.000000e+00 : f32
    %573 = vector.broadcast %cst_578 : f32 to vector<1x256xf32>
    %574 = arith.maximumf %572, %573 : vector<1x256xf32>
    %575 = arith.truncf %574 : vector<1x256xf32> to vector<1x256xbf16>
    %c0_579 = arith.constant 0 : index
    %c0_580 = arith.constant 0 : index
    %576 = vector.load %arg10[%c0_579, %c0_580] : memref<256x4xbf16, #tpu.memory_space<vmem>>, vector<256x4xbf16>
    %cst_581 = arith.constant dense<0.000000e+00> : vector<1x4xf32>
    %577 = tpu.matmul %575, %576, %cst_581 {dimension_numbers = #tpu.dot_dimension_numbers<[1], [0], [0], [1], [0, 0, 1, 1], [], []>} : vector<1x256xbf16>, vector<256x4xbf16>, vector<1x4xf32> -> vector<1x4xf32>
    %c0_582 = arith.constant 0 : index
    %c0_583 = arith.constant 0 : index
    %578 = vector.load %arg11[%c0_582, %c0_583] : memref<1x4xf32, #tpu.memory_space<vmem>>, vector<1x4xf32>
    %579 = arith.addf %577, %578 : vector<1x4xf32>
    %c0_584 = arith.constant 0 : index
    %c0_585 = arith.constant 0 : index
    %c0_586 = arith.constant 0 : index
    %580 = vector.load %arg12[%c0_584, %c0_585, %c0_586] : memref<1x1x4xf32, #tpu.memory_space<vmem>>, vector<1x1x4xf32>
    %581 = vector.shape_cast %580 : vector<1x1x4xf32> to vector<1x4xf32>
    %582 = vector.shape_cast %579 : vector<1x4xf32> to vector<1x1x4xf32>
    tpu.vector_store %arg12[%c0_584, %c0_585, %c0_586], %582 {strides = array<i32>} : memref<1x1x4xf32, #tpu.memory_space<vmem>>, vector<1x1x4xf32>,
    return
  }
  func.func @transform_0(%arg0: i32) -> (i32, i32, i32) {
    %c0_i32 = arith.constant 0 : i32
    %c0_i32_0 = arith.constant 0 : i32
    %c0_i32_1 = arith.constant 0 : i32
    return %arg0, %c0_i32, %c0_i32_0 : i32, i32, i32
  }
  func.func @transform_1(%arg0: i32) -> (i32, i32) {
    %c0_i32 = arith.constant 0 : i32
    %c0_i32_0 = arith.constant 0 : i32
    %c0_i32_1 = arith.constant 0 : i32
    return %c0_i32, %c0_i32_0 : i32, i32
  }
  func.func @transform_2(%arg0: i32) -> (i32, i32) {
    %c0_i32 = arith.constant 0 : i32
    %c0_i32_0 = arith.constant 0 : i32
    %c0_i32_1 = arith.constant 0 : i32
    return %c0_i32, %c0_i32_0 : i32, i32
  }
  func.func @transform_3(%arg0: i32) -> (i32, i32, i32) {
    %c0_i32 = arith.constant 0 : i32
    %c0_i32_0 = arith.constant 0 : i32
    %c0_i32_1 = arith.constant 0 : i32
    %c0_i32_2 = arith.constant 0 : i32
    return %c0_i32, %c0_i32_0, %c0_i32_1 : i32, i32, i32
  }
  func.func @transform_4(%arg0: i32) -> (i32, i32) {
    %c0_i32 = arith.constant 0 : i32
    %c0_i32_0 = arith.constant 0 : i32
    %c0_i32_1 = arith.constant 0 : i32
    return %c0_i32, %c0_i32_0 : i32, i32
  }
  func.func @transform_5(%arg0: i32) -> (i32, i32, i32) {
    %c0_i32 = arith.constant 0 : i32
    %c0_i32_0 = arith.constant 0 : i32
    %c0_i32_1 = arith.constant 0 : i32
    %c0_i32_2 = arith.constant 0 : i32
    return %c0_i32, %c0_i32_0, %c0_i32_1 : i32, i32, i32
  }
  func.func @transform_6(%arg0: i32) -> (i32, i32) {
    %c0_i32 = arith.constant 0 : i32
    %c0_i32_0 = arith.constant 0 : i32
    %c0_i32_1 = arith.constant 0 : i32
    return %c0_i32, %c0_i32_0 : i32, i32
  }
  func.func @transform_7(%arg0: i32) -> (i32, i32, i32) {
    %c0_i32 = arith.constant 0 : i32
    %c0_i32_0 = arith.constant 0 : i32
    %c0_i32_1 = arith.constant 0 : i32
    %c0_i32_2 = arith.constant 0 : i32
    return %c0_i32, %c0_i32_0, %c0_i32_1 : i32, i32, i32
  }
  func.func @transform_8(%arg0: i32) -> (i32, i32) {
    %c0_i32 = arith.constant 0 : i32
    %c0_i32_0 = arith.constant 0 : i32
    %c0_i32_1 = arith.constant 0 : i32
    return %c0_i32, %c0_i32_0 : i32, i32
  }
  func.func @transform_9(%arg0: i32) -> (i32, i32) {
    %c0_i32 = arith.constant 0 : i32
    %c0_i32_0 = arith.constant 0 : i32
    %c0_i32_1 = arith.constant 0 : i32
    return %c0_i32, %c0_i32_0 : i32, i32
  }
  func.func @transform_10(%arg0: i32) -> (i32, i32) {
    %c0_i32 = arith.constant 0 : i32
    %c0_i32_0 = arith.constant 0 : i32
    %c0_i32_1 = arith.constant 0 : i32
    return %c0_i32, %c0_i32_0 : i32, i32
  }
  func.func @transform_11(%arg0: i32) -> (i32, i32, i32) {
    %c0_i32 = arith.constant 0 : i32
    %c0_i32_0 = arith.constant 0 : i32
    %c0_i32_1 = arith.constant 0 : i32
    return %arg0, %c0_i32, %c0_i32_0 : i32, i32, i32
  }
}

</mosaic_0001>

<bundles_post_ra>
// kernel: image_network_forward.1
= control target key start
LH: loop header
LB: loop body
LE: loop exit
PB: predicated region body
PF: predicated region fallthrough
CT: control target
= control target key end

     0   :  { %16 = vsyncpa [#allocation5], 0  ;;  %s18775_s0 = inlined_call_operand.vmem [shape: bf16[2,324,128], index: 0, kind: input, shape index: {}]   ;;  %s18776_s1 = inlined_call_operand.vmem [shape: bf16[128,32], index: 1, kind: input, shape index: {}]   ;;  %s18777_s2 = inlined_call_operand.vmem [shape: f32[1,32], index: 2, kind: input, shape index: {}]   ;;  %s18778_s3 = inlined_call_operand.vmem [shape: bf16[25,32,64], index: 3, kind: input, shape index: {}]   ;;  %s18779_s4 = inlined_call_operand.vmem [shape: f32[1,64], index: 4, kind: input, shape index: {}]   ;;  %s18780_s5 = inlined_call_operand.vmem [shape: bf16[25,64,128], index: 5, kind: input, shape index: {}]   ;;  %s18781_s6 = inlined_call_operand.vmem [shape: f32[1,128], index: 6, kind: input, shape index: {}]   ;;  %s18782_s7 = inlined_call_operand.vmem [shape: bf16[4,128,256], index: 7, kind: input, shape index: {}]   ;;  %s18783_s8 = inlined_call_operand.vmem [shape: f32[1,256], index: 8, kind: input, shape index: {}]   ;;  %s18784_s9 = inlined_call_operand.vmem [shape: bf16[256,4], index: 9, kind: input, shape index: {}]   ;;  %s18785_s10 = inlined_call_operand.vmem [shape: f32[1,4], index: 10, kind: input, shape index: {}]   ;;  %s18786_s11 = inlined_call_operand.hbm [shape: f32[2,1,4], index: 11, kind: output, shape index: {}]  }
   0x1   :  { %18 = vsyncpa [#allocation5 + $0x1], 0  ;;  %s13694_s17 = smov 0   ;;  %s13696_s18 = smov 0  }
   0x2   :  { %s13698_s19 = smov 0   ;;  %s13700_s20 = smov 0  }
   0x3 LB: > { %18963 = sst [smem:[#allocation7_spill]] %s13628_s19  ;;  %s13715_s21 = sadd.s32 4294967295, %s13632_s20   ;;  %s13632_s20 = sphi %s13700_s20, %s19570_s20   ;;  %s13628_s19 = sphi %s13698_s19, %s19567_s19   ;;  %s13624_s18 = sphi %s13696_s18, %s19569_s18   ;;  %s13620_s17 = sphi %s13694_s17, %s19568_s17  }
   0x4   : > { %s10419_s22 = sadd.s32 4294967294, %s13632_s20   ;;  %s13719_s23 = sadd.s32 1, %s13632_s20  }
   0x5   : > { %s267_s24 = sadd.s32 1, %s13628_s19  ;;  %s264_s25 = ssub.s32 %s13632_s20, %s13719_s23 }
   0x6   : > { %p277_p0 = scmp.ne.s32.totalorder %s13628_s19, %s13624_s18  ;;  %p265_p1 = scmp.eq.s32.totalorder %s264_s25, 0 }
   0x7   : > { %p278_p2 = scmp.eq.s32.totalorder %s13715_s21, 1  ;;  %p283_p3 = scmp.ne.s32.totalorder %s13624_s18, %s13620_s17 }
   0x8   : > { %p284_p4 = scmp.eq.s32.totalorder %s10419_s22, 1  ;;  %p10422_p7 = scmp.ge.s32.totalorder %s13632_s20, 1 }
   0x9   : > { %s13730_s26 = scalar_select %p265_p1, %s13628_s19, %s267_s24  }
   0xa   : > { %p13732_p5 = por %p278_p2, %p277_p0  ;;  %p13736_p6 = por %p284_p4, %p283_p3 }
   0xb   : > { %18964 = sst [smem:[#allocation8_spill]] %s13730_s26  ;;  %p340_p8 = scmp.lt.s32.totalorder %s13632_s20, 3 }
   0xd   : > { %p341_p9 = pnand %p10422_p7, %p340_p8 }
   0xf   : > { %344 = sbr.rel (%p341_p9) target bundleno = 2597 (0xa25), region = 64 }
  0x14   : > { %v12909_v0 = vld [vmem:[%s18776_s1 + $0x38] sm:$0xff]  ;;  %v12908_v1 = vld [vmem:[%s18776_s1 + $0x30] sm:$0xff]  ;;  %v12907_v4 = vld [vmem:[%s18776_s1 + $0x28] sm:$0xff]  ;;  %p379_p10 = scmp.lt.s32.totalorder %s13715_s21, 1  ;;  %vm666_vm0 = vcmask 257024   ;;  %vm1516_vm1 = vcmask 1045504   ;;  %s10360_s15 = scalar_lea.hbm %s18786_s11, %s13715_s21 }
  0x15   : > { %549 = vmatpush.bf16.msra.mxu0 %v12909_v0  ;;  %v12925_v2 = vld [vmem:[%s18776_s1 + $0x38] sm:$0xff]  ;;  %v12924_v3 = vld [vmem:[%s18776_s1 + $0x30] sm:$0xff]  ;;  %v12923_v5 = vld [vmem:[%s18776_s1 + $0x28] sm:$0xff]  ;;  %vm1074_vm2 = vcmask 261120   ;;  %vm998_vm3 = vsmask.f32 7424 }
  0x16   : > { %828 = vmatpush.bf16.msra.mxu1 %v12925_v2  ;;  %v12906_v6 = vld [vmem:[%s18776_s1 + $0x20] sm:$0xff]  ;;  %v12905_v8 = vld [vmem:[%s18776_s1 + $0x18] sm:$0xff]  ;;  %v12904_v10 = vld [vmem:[%s18776_s1 + $0x10] sm:$0xff]  ;;  %s380_s12 = scalar_select %p379_p10, %s13715_s21, 1  ;;  %vm1360_vm4 = vsmask.f32 6400 }
  0x17   : > { %v12922_v7 = vld [vmem:[%s18776_s1 + $0x20] sm:$0xff]  ;;  %v12921_v9 = vld [vmem:[%s18776_s1 + $0x18] sm:$0xff]  ;;  %v12920_v11 = vld [vmem:[%s18776_s1 + $0x10] sm:$0xff]  ;;  %vm2121_vm5 = vsmask.f32 5376  ;;  %vm2277_vm6 = vcmask 1044480  }
  0x18   : > { %v12903_v12 = vld [vmem:[%s18776_s1 + $0x8] sm:$0xff]  ;;  %s13394_s22 = smul.u32 164, %s380_s12  ;;  %v12902_v14 = vld [vmem:[%s18776_s1] sm:$0xff]  ;;  %v12935_v44 = vld [vmem:[%s18778_s3 + $0x18] sm:$0xff]  ;;  %vm1238_vm7 = vcmask 1046528   ;;  %vm4773_vm9 = vcmask 519168  }
  0x19   : > { %550 = vmatpush.bf16.msra.mxu0 %v12908_v1  ;;  %v12919_v13 = vld [vmem:[%s18776_s1 + $0x8] sm:$0xff]  ;;  %v12918_v15 = vld [vmem:[%s18776_s1] sm:$0xff]  ;;  %1105 = vmatpush.bf16.msra.mxu2 %v12935_v44  ;;  %v12934_v50 = vld [vmem:[%s18778_s3 + $0x10] sm:$0xff]  ;;  %vm2882_vm8 = vsmask.f32 4352  ;;  %vm4789_vm10 = vcmask 516096  }
  0x1a   : > { %829 = vmatpush.bf16.msra.mxu1 %v12924_v3  ;;  %s13792_s13 = scalar_lea.vmem %s18775_s0, %s13394_s22  ;;  %v13817_v33 = vld [vmem:[%s18777_s2] ss:$0 sm:$0xff]  ;;  %v12941_v41 = vld [vmem:[%s18778_s3 + $0x48] sm:$0xff]  ;;  %13392 = vmatpush.bf16.msra.mxu3 %v12935_v44  ;;  %vm4790_vm11 = vsmask.f32 256  ;;  %vm7889_vm13 = vcmask 523264  }
  0x1b   : > { %v12890_v16 = vld [vmem:[%s13792_s13] sm:$0xff]  ;;  %v12891_v18 = vld [vmem:[%s13792_s13 + $0x8] sm:$0xff]  ;;  %v12892_v20 = vld [vmem:[%s13792_s13 + $0x10] sm:$0xff]  ;;  %vm7835_vm14 = vcmask 518144   ;;  %vm7836_vm15 = vsmask.f32 2304 }
  0x1c   : > { %v12910_v17 = vld [vmem:[%s13792_s13 + $0x60] sm:$0xff]  ;;  %v12911_v19 = vld [vmem:[%s13792_s13 + $0x68] sm:$0xff]  ;;  %v12912_v21 = vld [vmem:[%s13792_s13 + $0x70] sm:$0xff]  ;;  %s377_s14 = sand.u32 1, %s13624_s18   ;;  %s10364_s25 = sshll.u32 %s10360_s15, 4  ;;  %s10365_s25 = int_to_ptr.hbm [resolvable:$true] %s10364_s25 }
  0x1d   : > { %551 = vmatpush.bf16.msra.mxu0 %v12907_v4  ;;  %v12893_v22 = vld [vmem:[%s13792_s13 + $0x18] sm:$0xff]  ;;  %v12894_v24 = vld [vmem:[%s13792_s13 + $0x20] sm:$0xff]  ;;  %v12895_v26 = vld [vmem:[%s13792_s13 + $0x28] sm:$0xff]  ;;  %1106 = vmatpush.bf16.msra.mxu2 %v12934_v50  ;;  %s10352_s29 = scalar_lea.sflag [#allocation5], %s377_s14  ;;  %s13583_s30 = sshra.s32 %s10365_s25, 4  ;;  %s13584_s30 = int_to_ptr.hbm [resolvable:$true] %s13583_s30 }
  0x1e   : > { %830 = vmatpush.bf16.msra.mxu1 %v12923_v5  ;;  %v12913_v23 = vld [vmem:[%s13792_s13 + $0x78] sm:$0xff]  ;;  %v12914_v25 = vld [vmem:[%s13792_s13 + $0x80] sm:$0xff]  ;;  %v12915_v27 = vld [vmem:[%s13792_s13 + $0x88] sm:$0xff]  ;;  %13393 = vmatpush.bf16.msra.mxu3 %v12934_v50  ;;  %s13585_s21 = scalar_lea.hbm %s13584_s30, 1  ;;  %s13589_s26 = scalar_lea.hbm %s18786_s11, 2 }
  0x1f   : > { %v12896_v28 = vld [vmem:[%s13792_s13 + $0x30] sm:$0xff]  ;;  %v12897_v30 = vld [vmem:[%s13792_s13 + $0x38] sm:$0xff]  ;;  %v707_v32 = vld [vmem:[%s13792_s13 + $0xa0] sm:$0x3]  ;;  %p13586_p11 = scmp.ne.s32.totalorder %s13584_s30, %s13585_s21  ;;  %p13590_p0 = scmp.lt.s32.totalorder %s13584_s30, %s18786_s11 }
  0x20   : > { %v12916_v29 = vld [vmem:[%s13792_s13 + $0x90] sm:$0xff]  ;;  %v12917_v31 = vld [vmem:[%s13792_s13 + $0x98] sm:$0xff]  ;;  %v761_v34 = vunpack.c.l.b16 %v707_v32  ;;  %v12898_v35 = vld [vmem:[%s13792_s13 + $0x40] sm:$0xff]  ;;  %p13591_p1 = scmp.lt.s32.totalorder %s13589_s26, %s13585_s21 }
  0x21   : > { %552 = vmatpush.bf16.msra.mxu0 %v12906_v6  ;;  %v13823_v36 = vld [vmem:[%s18777_s2] ss:$0 sm:$0xff]  ;;  %v12899_v57 = vld [vmem:[%s13792_s13 + $0x48] sm:$0xff]  ;;  %vm4791_vm12 = vmand %vm4789_vm10, %vm4790_vm11  ;;  %p13587_p12 = pnand %p13586_p11, %p13732_p5 }
  0x22   : > { %831 = vmatpush.bf16.msra.mxu1 %v12922_v7  ;;  %v770_v39 = vpack.c.b16 %v761_v34, %v761_v34  ;;  %v12940_v47 = vld [vmem:[%s18778_s3 + $0x40] sm:$0xff]  ;;  %v12949_v7 = vld [vmem:[%s18778_s3 + $0x58] sm:$0xff]  ;;  %p13592_p2 = por %p13591_p1, %p13590_p0 }
  0x23   : > { %p13588_p13 = pneg %p13587_p12 }
  0x25   : > { %553 = vmatpush.bf16.msra.mxu0 %v12905_v8  ;;  %p13593_p3 = pnand %p13592_p2, %p13588_p13 }
  0x26   : > { %832 = vmatpush.bf16.msra.mxu1 %v12921_v9 }
  0x29   : > { %554 = vmatpush.bf16.msra.mxu0 %v12904_v10 }
  0x2a   : > { %833 = vmatpush.bf16.msra.mxu1 %v12920_v11 }
  0x2d   : > { %555 = vmatpush.bf16.msra.mxu0 %v12903_v12 }
  0x2e   : > { %834 = vmatpush.bf16.msra.mxu1 %v12919_v13 }
  0x31   : > { %556 = vmatpush.bf16.msra.mxu0 %v12902_v14  ;;  %v12948_v14 = vld [vmem:[%s18778_s3 + $0x50] sm:$0xff] }
  0x32   : > { %835 = vmatpush.bf16.msra.mxu1 %v12918_v15  ;;  %v12900_v15 = vld [vmem:[%s13792_s13 + $0x50] sm:$0xff] }
  0x34   : > { %557 = vmatmul.bf16.vlgmr.msra.gmra.mxu0 %v12890_v16 }
  0x35   : > { %836 = vmatmul.bf16.vlgmr.msra.gmra.mxu1 %v12910_v17  ;;  %1751 = vmatpush.bf16.msrb.mxu0 %v12949_v7 }
  0x36   : > { %1574 = vmatpush.bf16.msrb.mxu1 %v12941_v41 }
  0x39   : > { %1752 = vmatpush.bf16.msrb.mxu0 %v12948_v14 }
  0x3a   : > { %1575 = vmatpush.bf16.msrb.mxu1 %v12940_v47 }
  0x44   : > { %562 = vmatmul.bf16.gmra.mxu0 %v12891_v18 }
  0x45   : > { %841 = vmatmul.bf16.gmra.mxu1 %v12911_v19 }
  0x54   : > { %567 = vmatmul.bf16.gmra.mxu0 %v12892_v20 }
  0x55   : > { %846 = vmatmul.bf16.gmra.mxu1 %v12912_v21 }
  0x64   : > { %572 = vmatmul.bf16.gmra.mxu0 %v12893_v22 }
  0x65   : > { %851 = vmatmul.bf16.gmra.mxu1 %v12913_v23 }
  0x74   : > { %577 = vmatmul.bf16.gmra.mxu0 %v12894_v24 }
  0x75   : > { %856 = vmatmul.bf16.gmra.mxu1 %v12914_v25 }
  0x84   : > { %582 = vmatmul.bf16.gmra.mxu0 %v12895_v26 }
  0x85   : > { %861 = vmatmul.bf16.gmra.mxu1 %v12915_v27 }
  0x94   : > { %587 = vmatmul.bf16.gmra.mxu0 %v12896_v28 }
  0x95   : > { %866 = vmatmul.bf16.gmra.mxu1 %v12916_v29 }
  0xa4   : > { %592 = vmatmul.bf16.gmra.mxu0 %v12897_v30 }
  0xa5   : > { %871 = vmatmul.bf16.gmra.mxu1 %v12917_v31 }
  0xb1   : > { %v558_v37 = vpop.f32.mrf.mxu0 }
  0xb2   : > { %v559_v38 = vadd.f32 %v13817_v33, %v558_v37  ;;  %v837_v40 = vpop.f32.mrf.mxu1 }
  0xb3   : > { %v838_v43 = vadd.f32 %v13823_v36, %v837_v40 }
  0xb4   : > { %v618_v42 = vmax.f32 %v559_v38, 0.0  ;;  %597 = vmatmul.bf16.gmra.mxu0 %v12898_v35 }
  0xb5   : > { %v881_v46 = vmax.f32 %v838_v43, 0.0  ;;  %876 = vmatmul.bf16.gmra.mxu1 %v770_v39 }
  0xb6   : > { %v642_v45 = vpack.c.bf16 %v618_v42, %v618_v42 }
  0xb7   : > { %v898_v48 = vpack.c.bf16 %v881_v46, %v881_v46 }
  0xb8   : > { %667 = vst.msk [vmem:[#allocation2] sm:$0xf] %vm666_vm0, %v642_v45 }
  0xb9   : > { %v560_v49 = vpop.f32.mrf.mxu0  ;;  %915 = vst.msk [vmem:[#allocation2 + $0x60] sm:$0xf] %vm666_vm0, %v898_v48 }
  0xba   : > { %v561_v51 = vadd.f32 %v13817_v33, %v560_v49  ;;  %v839_v52 = vpop.f32.mrf.mxu1 }
  0xbb   : > { %v840_v54 = vadd.f32 %v13823_v36, %v839_v52 }
  0xbc   : > { %v619_v53 = vmax.f32 %v561_v51, 0.0 }
  0xbd   : > { %v882_v56 = vmax.f32 %v840_v54, 0.0 }
  0xbe   : > { %v643_v55 = vpack.c.bf16 %v619_v53, %v619_v53 }
  0xbf   : > { %v899_v58 = vpack.c.bf16 %v882_v56, %v882_v56  ;;  %v1225_v10 = vld [vmem:[#allocation2] sm:$0xe] }
  0xc0   : > { %668 = vst.msk [vmem:[#allocation2 + $0x4] sm:$0xf] %vm666_vm0, %v643_v55  ;;  %v1503_v16 = vld [vmem:[#allocation2] sm:$0xc]  ;;  %v1234_v18 = vunpack.c.l.b16 %v1225_v10 }
  0xc1   : > { %v563_v59 = vpop.f32.mrf.mxu0  ;;  %916 = vst.msk [vmem:[#allocation2 + $0x64] sm:$0xf] %vm666_vm0, %v899_v58  ;;  %v1512_v23 = vunpack.c.l.b16 %v1503_v16 }
  0xc2   : > { %v564_v60 = vadd.f32 %v13817_v33, %v563_v59  ;;  %v842_v61 = vpop.f32.mrf.mxu1 }
  0xc3   : > { %v843_v63 = vadd.f32 %v13823_v36, %v842_v61 }
  0xc4   : > { %v620_v62 = vmax.f32 %v564_v60, 0.0  ;;  %602 = vmatmul.bf16.gmra.mxu0 %v12899_v57 }
  0xc5   : > { %v883_v1 = vmax.f32 %v843_v63, 0.0 }
  0xc6   : > { %v644_v0 = vpack.c.bf16 %v620_v62, %v620_v62 }
  0xc7   : > { %v900_v2 = vpack.c.bf16 %v883_v1, %v883_v1  ;;  %v13299_v5 = vld [vmem:[#allocation2] sm:$0xff]   ;;  %v12901_v1 = vld [vmem:[%s13792_s13 + $0x58] sm:$0xff]  ;;  %s378_s13 = scalar_lea.vmem [#allocation4], %s377_s14 }
  0xc8   : > { %669 = vst.msk [vmem:[#allocation2 + $0x8] sm:$0xf] %vm666_vm0, %v644_v0  ;;  %v13301_v12 = vunpack.c.h.b16 %v13299_v5  ;;  %v1002_v20 = vshll.u32 %v13299_v5, 16  ;;  %v1000_v35 = vshrl.u32 %v13299_v5, 16  ;;  %s10362_s24 = sshll.u32 %s378_s13, 4  ;;  %s10363_s24 = int_to_ptr.vmem [resolvable:$true] %s10362_s24 }
  0xc9   : > { %v565_v3 = vpop.f32.mrf.mxu0  ;;  %917 = vst.msk [vmem:[#allocation2 + $0x68] sm:$0xf] %vm666_vm0, %v900_v2 }
  0xca   : > { %v566_v4 = vadd.f32 %v13817_v33, %v565_v3  ;;  %v844_v6 = vpop.f32.mrf.mxu1  ;;  %v13862_v22 = vpack.c.b16 %v13301_v12, %v1234_v18  ;;  %v1514_v27 = vpack.c.b16 %v13301_v12, %v1512_v23  ;;  %v1004_v28 = vrot.slane %v1002_v20, 1 }
  0xcb   : > { %v845_v9 = vadd.f32 %v13823_v36, %v844_v6 }
  0xcc   : > { %v621_v8 = vmax.f32 %v566_v4, 0.0  ;;  %v1362_v31 = vshrl.u32 %v13862_v22, 16  ;;  %v1365_v32 = vshll.u32 %v13862_v22, 16  ;;  %v1517_v39 = vrot.slane %v1514_v27, 2 }
  0xcd   : > { %v884_v13 = vmax.f32 %v845_v9, 0.0  ;;  %v1005_v45 = vor.u32 %v1004_v28, %v1000_v35 }
  0xce   : > { %v645_v11 = vpack.c.bf16 %v621_v8, %v621_v8  ;;  %v1364_v46 = vrot.slane %v1362_v31, 1  ;;  %v1367_v47 = vrot.slane %v1365_v32, 2 }
  0xcf   : > { %v901_v17 = vpack.c.bf16 %v884_v13, %v884_v13  ;;  %v1987_v53 = vld [vmem:[#allocation2 + $0x8] sm:$0xc] }
  0xd0   : > { %670 = vst.msk [vmem:[#allocation2 + $0xc] sm:$0xf] %vm666_vm0, %v645_v11  ;;  %v1633_v58 = vld [vmem:[#allocation2 + $0x8] sm:$0xe]  ;;  %v1996_v61 = vunpack.c.l.b16 %v1987_v53  ;;  %v1368_v63 = vor.u32 %v1367_v47, %v1364_v46 }
  0xd1   : > { %v568_v19 = vpop.f32.mrf.mxu0  ;;  %918 = vst.msk [vmem:[#allocation2 + $0x6c] sm:$0xf] %vm666_vm0, %v901_v17  ;;  %v2264_v62 = vld [vmem:[#allocation2 + $0x8] sm:$0x8]  ;;  %v1670_v3 = vunpack.c.l.b16 %v1633_v58 }
  0xd2   : > { %v569_v21 = vadd.f32 %v13817_v33, %v568_v19  ;;  %v847_v24 = vpop.f32.mrf.mxu1  ;;  %v2273_v9 = vunpack.c.l.b16 %v2264_v62 }
  0xd3   : > { %v848_v26 = vadd.f32 %v13823_v36, %v847_v24 }
  0xd4   : > { %v622_v25 = vmax.f32 %v569_v21, 0.0  ;;  %607 = vmatmul.bf16.gmra.mxu0 %v12900_v15 }
  0xd5   : > { %v885_v30 = vmax.f32 %v848_v26, 0.0 }
  0xd6   : > { %v646_v29 = vpack.c.bf16 %v622_v25, %v622_v25 }
  0xd7   : > { %v13867_v34 = vld [vmem:[#allocation2 + $0x8] sm:$0xff]  ;;  %v902_v37 = vpack.c.bf16 %v885_v30, %v885_v30 }
  0xd8   : > { %671 = vst.msk [vmem:[#allocation2 + $0x10] sm:$0xf] %vm666_vm0, %v646_v29  ;;  %v1518_v40 = vrot.slane %v13867_v34, 2  ;;  %v1007_v41 = vshll.u32 %v13867_v34, 16  ;;  %v1011_v42 = vshrl.u32 %v13867_v34, 16 }
  0xd9   : > { %v570_v38 = vpop.f32.mrf.mxu0  ;;  %v1634_v43 = vld [vmem:[#allocation2 + $0xc] sm:$0xf]  ;;  %919 = vst.msk [vmem:[#allocation2 + $0x70] sm:$0xf] %vm666_vm0, %v902_v37 }
  0xda   : > { %v571_v44 = vadd.f32 %v13817_v33, %v570_v38  ;;  %v1519_v48 = vsel %vm1516_vm1, %v1517_v39, %v1518_v40  ;;  %v1009_v49 = vrot.slane %v1007_v41, 1  ;;  %v1370_v50 = vrot.slane %v1007_v41, 2  ;;  %v849_v52 = vpop.f32.mrf.mxu1 }
  0xdb   : > { %v1369_v51 = vrot.slane %v1011_v42, 1  ;;  %10680 = vmatmul.msk.bf16.vlgmr.msrb.gmra.mxu1 %vm1074_vm2, %v1519_v48  ;;  %v850_v55 = vadd.f32 %v13823_v36, %v849_v52  ;;  %v1671_v56 = vunpack.c.l.b16 %v1634_v43 }
  0xdc   : > { %v623_v54 = vmax.f32 %v571_v44, 0.0  ;;  %v1010_v57 = vsel %vm998_vm3, %v1005_v45, %v1009_v49  ;;  %v1013_v21 = vor.u32 %v1011_v42, %v1009_v49 }
  0xdd   : > { %10604 = vmatmul.msk.bf16.vlgmr.msra.gmra.mxu2 %vm1074_vm2, %v1010_v57  ;;  %v886_v60 = vmax.f32 %v850_v55, 0.0  ;;  %v13882_v0 = vor.u32 %v1370_v50, %v1369_v51  ;;  %v13886_v4 = vpack.c.b16 %v1671_v56, %v1996_v61  ;;  %v13894_v8 = vpack.c.b16 %v1671_v56, %v1670_v3 }
  0xde   : > { %v647_v59 = vpack.c.bf16 %v623_v54, %v623_v54  ;;  %v2275_v14 = vpack.c.b16 %v1671_v56, %v2273_v9 }
  0xdf   : > { %v903_v2 = vpack.c.bf16 %v886_v60, %v886_v60  ;;  %v13890_v6 = vsel %vm1360_vm4, %v1368_v63, %v13882_v0  ;;  %v2123_v13 = vshrl.u32 %v13886_v4, 16  ;;  %v2126_v15 = vshll.u32 %v13886_v4, 16 }
  0xe0   : > { %672 = vst.msk [vmem:[#allocation2 + $0x14] sm:$0xf] %vm666_vm0, %v647_v59  ;;  %v1816_v18 = vshrl.u32 %v13894_v8, 16  ;;  %v2278_v25 = vrot.slane %v2275_v14, 3  ;;  %v1819_v30 = vshll.u32 %v13894_v8, 16  ;;  %v2000_v61 = vrot.slane %v13886_v4, 2 }
  0xe1   : > { %v573_v5 = vpop.f32.mrf.mxu0  ;;  %920 = vst.msk [vmem:[#allocation2 + $0x74] sm:$0xf] %vm666_vm0, %v903_v2  ;;  %v2125_v24 = vrot.slane %v2123_v13, 2  ;;  %v2128_v29 = vrot.slane %v2126_v15, 3 }
  0xe2   : > { %v574_v7 = vadd.f32 %v13817_v33, %v573_v5  ;;  %v852_v10 = vpop.f32.mrf.mxu1  ;;  %v1818_v37 = vrot.slane %v1816_v18, 1  ;;  %v1821_v50 = vrot.slane %v1819_v30, 2 }
  0xe3   : > { %v853_v12 = vadd.f32 %v13823_v36, %v852_v10  ;;  %v2129_v49 = vor.u32 %v2128_v29, %v2125_v24 }
  0xe4   : > { %v624_v11 = vmax.f32 %v574_v7, 0.0  ;;  %612 = vmatmul.bf16.gmra.mxu0 %v12901_v1  ;;  %v1694_v1 = vrot.slane %v13894_v8, 1  ;;  %v1822_v2 = vor.u32 %v1821_v50, %v1818_v37 }
  0xe5   : > { %v887_v17 = vmax.f32 %v853_v12, 0.0 }
  0xe6   : > { %v648_v16 = vpack.c.bf16 %v624_v11, %v624_v11 }
  0xe7   : > { %v13900_v19 = vld [vmem:[#allocation2 + $0x10] sm:$0xff]  ;;  %v904_v23 = vpack.c.bf16 %v887_v17, %v887_v17 }
  0xe8   : > { %v13902_v20 = vld [vmem:[#allocation2 + $0x10] sm:$0xff]  ;;  %673 = vst.msk [vmem:[#allocation2 + $0x18] sm:$0xf] %vm666_vm0, %v648_v16  ;;  %v1520_v27 = vrot.slane %v13900_v19, 2  ;;  %v1015_v28 = vshll.u32 %v13900_v19, 16  ;;  %v1019_v41 = vshrl.u32 %v13900_v19, 16 }
  0xe9   : > { %v575_v26 = vpop.f32.mrf.mxu0  ;;  %921 = vst.msk [vmem:[#allocation2 + $0x78] sm:$0xf] %vm666_vm0, %v904_v23  ;;  %v1824_v32 = vshrl.u32 %v13902_v20, 16  ;;  %v1827_v35 = vshll.u32 %v13902_v20, 16  ;;  %v2279_v43 = vrot.slane %v13902_v20, 3  ;;  %v1695_v55 = vrot.slane %v13902_v20, 1 }
  0xea   : > { %v576_v31 = vadd.f32 %v13817_v33, %v575_v26  ;;  %v1521_v38 = vsel %vm1516_vm1, %v1518_v40, %v1520_v27  ;;  %v1017_v39 = vrot.slane %v1015_v28, 1  ;;  %v854_v42 = vpop.f32.mrf.mxu1  ;;  %v1373_v57 = vrot.slane %v1019_v41, 1  ;;  %v13964_v16 = vld [vmem:[#allocation2 + $0x14] sm:$0xf]  ;;  %v2394_v17 = vld [vmem:[#allocation2 + $0x10] sm:$0xc] }
  0xeb   : > { %10681 = vmatmul.msk.bf16.gmra.mxu1 %vm1074_vm2, %v1521_v38  ;;  %v855_v45 = vadd.f32 %v13823_v36, %v854_v42  ;;  %v2130_v46 = vrot.slane %v1824_v32, 2  ;;  %v2131_v47 = vrot.slane %v1827_v35, 3  ;;  %v13925_v40 = vsel %vm2277_vm6, %v2278_v25, %v2279_v43 }
  0xec   : > { %v625_v44 = vmax.f32 %v576_v31, 0.0  ;;  %v1018_v48 = vsel %vm998_vm3, %v1013_v21, %v1017_v39  ;;  %v1826_v54 = vrot.slane %v1824_v32, 1  ;;  %v1829_v56 = vrot.slane %v1827_v35, 2 }
  0xed   : > { %10605 = vmatmul.msk.bf16.gmra.mxu2 %vm1074_vm2, %v1018_v48  ;;  %v888_v52 = vmax.f32 %v855_v45, 0.0  ;;  %v13928_v53 = vor.u32 %v2131_v47, %v2130_v46  ;;  %v1374_v58 = vrot.slane %v1015_v28, 2  ;;  %v2001_v62 = vrot.slane %v13902_v20, 2 }
  0xee   : > { %v649_v51 = vpack.c.bf16 %v625_v44, %v625_v44  ;;  %v13939_v3 = vor.u32 %v1829_v56, %v1826_v54  ;;  %v1696_v4 = vsel %vm1238_vm7, %v1694_v1, %v1695_v55  ;;  %v18790_v26 = vunpack.c.l.b16 %v13964_v16 }
  0xef   : > { %v905_v59 = vpack.c.bf16 %v888_v52, %v888_v52  ;;  %v13934_v60 = vsel %vm2121_vm5, %v2129_v49, %v13928_v53  ;;  %v13941_v5 = vor.u32 %v1374_v58, %v1373_v57  ;;  %v13948_v9 = vsel %vm1516_vm1, %v2000_v61, %v2001_v62 }
  0xf0   : > { %674 = vst.msk [vmem:[#allocation2 + $0x1c] sm:$0xf] %vm666_vm0, %v649_v51  ;;  %v13955_v10 = vsel %vm1360_vm4, %v1822_v2, %v13939_v3  ;;  %v2431_v28 = vunpack.c.l.b16 %v2394_v17  ;;  %v1021_v30 = vor.u32 %v1019_v41, %v1017_v39 }
  0xf1   : > { %v578_v63 = vpop.f32.mrf.mxu0  ;;  %922 = vst.msk [vmem:[#allocation2 + $0x7c] sm:$0xf] %vm666_vm0, %v905_v59  ;;  %v13960_v11 = vsel %vm1360_vm4, %v13882_v0, %v13941_v5 }
  0xf2   : > { %v579_v7 = vadd.f32 %v13817_v33, %v578_v63  ;;  %18967 = vst [vmem:[#allocation9_spill] sm:$0xff] %v13948_v9  ;;  %v857_v8 = vpop.f32.mrf.mxu1  ;;  %v13999_v49 = vpack.c.b16 %v18790_v26, %v2431_v28 }
  0xf3   : > { %v858_v13 = vadd.f32 %v13823_v36, %v857_v8 }
  0xf4   : > { %v626_v12 = vmax.f32 %v579_v7, 0.0  ;;  %10724 = vmatmul.msk.bf16.vlgmr.msrb.gmra.mxu0 %vm1074_vm2, %v1696_v4  ;;  %v2455_v7 = vrot.slane %v13999_v49, 2  ;;  %v2580_v20 = vshll.u32 %v13999_v49, 16 }
  0xf5   : > { %v889_v15 = vmax.f32 %v858_v13, 0.0 }
  0xf6   : > { %v650_v14 = vpack.c.bf16 %v626_v12, %v626_v12 }
  0xf7   : > { %v13966_v18 = vld [vmem:[#allocation2 + $0x18] sm:$0xff]  ;;  %v906_v23 = vpack.c.bf16 %v889_v15, %v889_v15 }
  0xf8   : > { %v13968_v21 = vld [vmem:[#allocation2 + $0x18] sm:$0xff]  ;;  %675 = vst.msk [vmem:[#allocation2 + $0x20] sm:$0xf] %vm666_vm0, %v650_v14  ;;  %v1522_v0 = vrot.slane %v13966_v18, 2  ;;  %v1023_v25 = vshll.u32 %v13966_v18, 16  ;;  %v1027_v38 = vshrl.u32 %v13966_v18, 16 }
  0xf9   : > { %v580_v24 = vpop.f32.mrf.mxu0  ;;  %923 = vst.msk [vmem:[#allocation2 + $0x80] sm:$0xf] %vm666_vm0, %v906_v23  ;;  %v1833_v31 = vshrl.u32 %v13968_v21, 16  ;;  %v1836_v32 = vshll.u32 %v13968_v21, 16  ;;  %v2281_v44 = vrot.slane %v13968_v21, 3  ;;  %v13995_v48 = vld [vmem:[#allocation2 + $0x18] sm:$0xff] }
  0xfa   : > { %v581_v29 = vadd.f32 %v13817_v33, %v580_v24  ;;  %v1523_v35 = vsel %vm1516_vm1, %v1520_v27, %v1522_v0  ;;  %v1025_v37 = vrot.slane %v1023_v25, 1  ;;  %v859_v42 = vpop.f32.mrf.mxu1  ;;  %v1697_v51 = vrot.slane %v13968_v21, 1 }
  0xfb   : > { %10682 = vmatmul.msk.bf16.gmra.mxu1 %vm1074_vm2, %v1523_v35  ;;  %v860_v39 = vadd.f32 %v13823_v36, %v859_v42  ;;  %v2134_v41 = vrot.slane %v1833_v31, 2  ;;  %v2135_v46 = vrot.slane %v1836_v32, 3  ;;  %v13993_v27 = vsel %vm2277_vm6, %v2279_v43, %v2281_v44 }
  0xfc   : > { %v627_v45 = vmax.f32 %v581_v29, 0.0  ;;  %v1026_v47 = vsel %vm998_vm3, %v1021_v30, %v1025_v37  ;;  %v1835_v56 = vrot.slane %v1833_v31, 1  ;;  %v1838_v57 = vrot.slane %v1836_v32, 2 }
  0xfd   : > { %10606 = vmatmul.msk.bf16.gmra.mxu2 %vm1074_vm2, %v1026_v47  ;;  %v890_v52 = vmax.f32 %v860_v39, 0.0  ;;  %v14003_v54 = vor.u32 %v2135_v46, %v2134_v41  ;;  %v1377_v58 = vrot.slane %v1027_v38, 1  ;;  %v1378_v59 = vrot.slane %v1023_v25, 2 }
  0xfe   : > { %v651_v50 = vpack.c.bf16 %v627_v45, %v627_v45  ;;  %v14011_v1 = vor.u32 %v1838_v57, %v1835_v56  ;;  %v2456_v4 = vrot.slane %v13995_v48, 2  ;;  %v2003_v12 = vrot.slane %v13968_v21, 2 }
  0xff   : > { %v907_v43 = vpack.c.bf16 %v890_v52, %v890_v52  ;;  %v14009_v61 = vsel %vm2121_vm5, %v13928_v53, %v14003_v54  ;;  %v14013_v2 = vor.u32 %v1378_v59, %v1377_v58  ;;  %v1698_v53 = vsel %vm1238_vm7, %v1695_v55, %v1697_v51 }
 0x100   : > { %676 = vst.msk [vmem:[#allocation2 + $0x24] sm:$0xf] %vm666_vm0, %v651_v50  ;;  %v14028_v14 = vsel %vm1360_vm4, %v13939_v3, %v14011_v1  ;;  %v14038_v17 = vsel %vm1516_vm1, %v2455_v7, %v2456_v4  ;;  %v14047_v3 = vsel %vm1516_vm1, %v2001_v62, %v2003_v12  ;;  %v2577_v35 = vshrl.u32 %v13999_v49, 16 }
 0x101   : > { %v583_v63 = vpop.f32.mrf.mxu0  ;;  %924 = vst.msk [vmem:[#allocation2 + $0x84] sm:$0xf] %vm666_vm0, %v907_v43  ;;  %v14033_v15 = vsel %vm1360_vm4, %v13941_v5, %v14013_v2  ;;  %v1029_v42 = vor.u32 %v1027_v38, %v1025_v37  ;;  %v18789_v58 = vshrl.u32 %v13995_v48, 16  ;;  %v18788_v59 = vshll.u32 %v13995_v48, 16 }
 0x102   : > { %v584_v8 = vadd.f32 %v13817_v33, %v583_v63  ;;  %v862_v13 = vpop.f32.mrf.mxu1  ;;  %18968 = vst [vmem:[#allocation10_spill] sm:$0xff] %v14038_v17 }
 0x103   : > { %v863_v55 = vadd.f32 %v13823_v36, %v862_v13  ;;  %18969 = vst [vmem:[#allocation11_spill] sm:$0xff] %v14047_v3 }
 0x104   : > { %v628_v23 = vmax.f32 %v584_v8, 0.0  ;;  %10725 = vmatmul.msk.bf16.gmra.mxu0 %vm1074_vm2, %v1698_v53 }
 0x105   : > { %v891_v5 = vmax.f32 %v863_v55, 0.0 }
 0x106   : > { %v652_v24 = vpack.c.bf16 %v628_v23, %v628_v23 }
 0x107   : > { %v14049_v25 = vld [vmem:[#allocation2 + $0x20] sm:$0xff]  ;;  %v908_v29 = vpack.c.bf16 %v891_v5, %v891_v5 }
 0x108   : > { %v14051_v28 = vld [vmem:[#allocation2 + $0x20] sm:$0xff]  ;;  %677 = vst.msk [vmem:[#allocation2 + $0x28] sm:$0xf] %vm666_vm0, %v652_v24  ;;  %v1524_v31 = vrot.slane %v14049_v25, 2  ;;  %v1031_v32 = vshll.u32 %v14049_v25, 16  ;;  %v1035_v47 = vshrl.u32 %v14049_v25, 16 }
 0x109   : > { %v585_v30 = vpop.f32.mrf.mxu0  ;;  %925 = vst.msk [vmem:[#allocation2 + $0x88] sm:$0xf] %vm666_vm0, %v908_v29  ;;  %v1842_v45 = vshrl.u32 %v14051_v28, 16  ;;  %v1845_v39 = vshll.u32 %v14051_v28, 16  ;;  %v2283_v49 = vrot.slane %v14051_v28, 3  ;;  %v1699_v63 = vrot.slane %v14051_v28, 1 }
 0x10a   : > { %v586_v62 = vadd.f32 %v13817_v33, %v585_v30  ;;  %v1525_v41 = vsel %vm1516_vm1, %v1522_v0, %v1524_v31  ;;  %v1033_v46 = vrot.slane %v1031_v32, 1  ;;  %v864_v50 = vpop.f32.mrf.mxu1  ;;  %v14085_v53 = vld [vmem:[#allocation2 + $0x20] sm:$0xff]  ;;  %v1381_v55 = vrot.slane %v1035_v47, 1 }
 0x10b   : > { %10683 = vmatmul.msk.bf16.gmra.mxu1 %vm1074_vm2, %v1525_v41  ;;  %v865_v37 = vadd.f32 %v13823_v36, %v864_v50  ;;  %v2138_v38 = vrot.slane %v1842_v45, 2  ;;  %v2139_v56 = vrot.slane %v1845_v39, 3  ;;  %v14077_v0 = vsel %vm2277_vm6, %v2281_v44, %v2283_v49 }
 0x10c   : > { %v629_v52 = vmax.f32 %v586_v62, 0.0  ;;  %v1034_v57 = vsel %vm998_vm3, %v1029_v42, %v1033_v46  ;;  %v1844_v13 = vrot.slane %v1842_v45, 1  ;;  %v1847_v23 = vrot.slane %v1845_v39, 2 }
 0x10d   : > { %10607 = vmatmul.msk.bf16.gmra.mxu2 %vm1074_vm2, %v1034_v57  ;;  %v892_v7 = vmax.f32 %v865_v37, 0.0  ;;  %v14083_v8 = vor.u32 %v2139_v56, %v2138_v38  ;;  %v1382_v24 = vrot.slane %v1031_v32, 2  ;;  %v2579_v29 = vrot.slane %v2577_v35, 2 }
 0x10e   : > { %v653_v43 = vpack.c.bf16 %v629_v52, %v629_v52  ;;  %v2582_v30 = vrot.slane %v2580_v20, 3  ;;  %v14093_v42 = vor.u32 %v1847_v23, %v1844_v13  ;;  %v2587_v45 = vrot.slane %v18789_v58, 2 }
 0x10f   : > { %v909_v44 = vpack.c.bf16 %v892_v7, %v892_v7  ;;  %v14091_v5 = vsel %vm2121_vm5, %v14003_v54, %v14083_v8  ;;  %v14095_v41 = vor.u32 %v1382_v24, %v1381_v55  ;;  %v2590_v32 = vrot.slane %v18788_v59, 3 }
 0x110   : > { %678 = vst.msk [vmem:[#allocation2 + $0x2c] sm:$0xf] %vm666_vm0, %v653_v43  ;;  %v2458_v54 = vrot.slane %v14085_v53, 2  ;;  %v1700_v35 = vsel %vm1238_vm7, %v1697_v51, %v1699_v63  ;;  %v14112_v50 = vsel %vm1360_vm4, %v14011_v1, %v14093_v42  ;;  %v2005_v1 = vrot.slane %v14051_v28, 2 }
 0x111   : > { %v588_v62 = vpop.f32.mrf.mxu0  ;;  %926 = vst.msk [vmem:[#allocation2 + $0x8c] sm:$0xf] %vm666_vm0, %v909_v44  ;;  %v14117_v52 = vsel %vm1360_vm4, %v14013_v2, %v14095_v41  ;;  %v2583_v56 = vor.u32 %v2582_v30, %v2579_v29  ;;  %v14129_v57 = vor.u32 %v2590_v32, %v2587_v45  ;;  %v1037_v29 = vor.u32 %v1035_v47, %v1033_v46 }
 0x112   : > { %v589_v39 = vadd.f32 %v13817_v33, %v588_v62  ;;  %v867_v20 = vpop.f32.mrf.mxu1  ;;  %18970 = vst [vmem:[#allocation12_spill] sm:$0xff] %v14117_v52  ;;  %v14126_v51 = vsel %vm1516_vm1, %v2456_v4, %v2458_v54  ;;  %v14140_v23 = vsel %vm1516_vm1, %v2003_v12, %v2005_v1  ;;  %v18796_v45 = vshrl.u32 %v14085_v53, 16 }
 0x113   : > { %v868_v38 = vadd.f32 %v13823_v36, %v867_v20  ;;  %18971 = vst [vmem:[#allocation13_spill] sm:$0xff] %v14126_v51  ;;  %v14144_v4 = vsel %vm2121_vm5, %v2583_v56, %v14129_v57 }
 0x114   : > { %v630_v37 = vmax.f32 %v589_v39, 0.0  ;;  %10726 = vmatmul.msk.bf16.gmra.mxu0 %vm1074_vm2, %v1700_v35  ;;  %18972 = vst [vmem:[#allocation14_spill] sm:$0xff] %v14140_v23 }
 0x115   : > { %v893_v2 = vmax.f32 %v868_v38, 0.0  ;;  %18973 = vst [vmem:[#allocation15_spill] sm:$0xff] %v14144_v4 }
 0x116   : > { %v654_v43 = vpack.c.bf16 %v630_v37, %v630_v37 }
 0x117   : > { %v14131_v7 = vld [vmem:[#allocation2 + $0x28] sm:$0xff]  ;;  %v910_v55 = vpack.c.bf16 %v893_v2, %v893_v2 }
 0x118   : > { %v14133_v13 = vld [vmem:[#allocation2 + $0x28] sm:$0xff]  ;;  %679 = vst.msk [vmem:[#allocation2 + $0x30] sm:$0xf] %vm666_vm0, %v654_v43  ;;  %v18792_v44 = vrot.slane %v14131_v7, 2  ;;  %v1039_v30 = vshll.u32 %v14131_v7, 16  ;;  %v1043_v46 = vshrl.u32 %v14131_v7, 16 }
 0x119   : > { %v590_v24 = vpop.f32.mrf.mxu0  ;;  %927 = vst.msk [vmem:[#allocation2 + $0x90] sm:$0xf] %vm666_vm0, %v910_v55  ;;  %v1851_v21 = vshrl.u32 %v14133_v13, 16  ;;  %v1854_v12 = vshll.u32 %v14133_v13, 16  ;;  %v18791_v35 = vrot.slane %v14133_v13, 3  ;;  %v14171_v2 = vld [vmem:[#allocation2 + $0x28] sm:$0xff] }
 0x11a   : > { %v591_v62 = vadd.f32 %v13817_v33, %v590_v24  ;;  %v1527_v32 = vsel %vm1516_vm1, %v1524_v31, %v18792_v44  ;;  %v1041_v39 = vrot.slane %v1039_v30, 1  ;;  %v869_v47 = vpop.f32.mrf.mxu1  ;;  %v18795_v55 = vshll.u32 %v14085_v53, 16 }
 0x11b   : > { %10684 = vmatmul.msk.bf16.gmra.mxu1 %vm1074_vm2, %v1527_v32  ;;  %v870_v37 = vadd.f32 %v13823_v36, %v869_v47  ;;  %v2142_v38 = vrot.slane %v1851_v21, 2  ;;  %v2143_v56 = vrot.slane %v1854_v12, 3  ;;  %v14169_v31 = vsel %vm2277_vm6, %v2283_v49, %v18791_v35 }
 0x11c   : > { %v631_v20 = vmax.f32 %v591_v62, 0.0  ;;  %v1042_v43 = vsel %vm998_vm3, %v1037_v29, %v1041_v39  ;;  %v18800_v62 = vrot.slane %v14133_v13, 1  ;;  %v1853_v29 = vrot.slane %v1851_v21, 1 }
 0x11d   : > { %10608 = vmatmul.msk.bf16.gmra.mxu2 %vm1074_vm2, %v1042_v43  ;;  %v894_v32 = vmax.f32 %v870_v37, 0.0  ;;  %v14176_v47 = vor.u32 %v2143_v56, %v2142_v38  ;;  %v1856_v59 = vrot.slane %v1854_v12, 2  ;;  %v1385_v58 = vrot.slane %v1043_v46, 1 }
 0x11e   : > { %v655_v24 = vpack.c.bf16 %v631_v20, %v631_v20  ;;  %v1386_v26 = vrot.slane %v1039_v30, 2  ;;  %v2596_v20 = vrot.slane %v18796_v45, 2  ;;  %v18794_v21 = vshrl.u32 %v14171_v2, 16 }
 0x11f   : > { %v911_v49 = vpack.c.bf16 %v894_v32, %v894_v32  ;;  %v14182_v35 = vsel %vm2121_vm5, %v14083_v8, %v14176_v47  ;;  %v14186_v44 = vor.u32 %v1856_v59, %v1853_v29  ;;  %v2599_v30 = vrot.slane %v18795_v55, 3 }
 0x120   : > { %680 = vst.msk [vmem:[#allocation2 + $0x34] sm:$0xf] %vm666_vm0, %v655_v24  ;;  %v14188_v37 = vor.u32 %v1386_v26, %v1385_v58  ;;  %v18793_v8 = vshll.u32 %v14171_v2, 16  ;;  %v18799_v38 = vrot.slane %v14171_v2, 2  ;;  %v1702_v26 = vsel %vm1238_vm7, %v1699_v63, %v18800_v62 }
 0x121   : > { %v593_v43 = vpop.f32.mrf.mxu0  ;;  %928 = vst.msk [vmem:[#allocation2 + $0x94] sm:$0xf] %vm666_vm0, %v911_v49  ;;  %v14205_v59 = vsel %vm1360_vm4, %v14093_v42, %v14186_v44  ;;  %v18797_v42 = vrot.slane %v14133_v13, 2  ;;  %v14222_v29 = vor.u32 %v2599_v30, %v2596_v20 }
 0x122   : > { %v594_v12 = vadd.f32 %v13817_v33, %v593_v43  ;;  %v872_v58 = vpop.f32.mrf.mxu1  ;;  %v14210_v56 = vsel %vm1360_vm4, %v14095_v41, %v14188_v37  ;;  %v14219_v63 = vsel %vm1516_vm1, %v2458_v54, %v18799_v38  ;;  %v2605_v41 = vrot.slane %v18794_v21, 2 }
 0x123   : > { %18974 = vst [vmem:[#allocation16_spill] sm:$0xff] %v14210_v56  ;;  %v873_v32 = vadd.f32 %v13823_v36, %v872_v58  ;;  %v14237_v54 = vsel %vm1516_vm1, %v2005_v1, %v18797_v42  ;;  %v14242_v20 = vsel %vm2121_vm5, %v14129_v57, %v14222_v29  ;;  %v12933_v58 = vld [vmem:[%s18778_s3 + $0x8] sm:$0xff]  ;;  %v1045_v21 = vor.u32 %v1043_v46, %v1041_v39 }
 0x124   : > { %v632_v24 = vmax.f32 %v594_v12, 0.0  ;;  %10727 = vmatmul.msk.bf16.gmra.mxu0 %vm1074_vm2, %v1702_v26  ;;  %18975 = vst [vmem:[#allocation17_spill] sm:$0xff] %v14219_v63  ;;  %v2608_v12 = vrot.slane %v18793_v8, 3  ;;  %1182 = vmatpush.bf16.msrb.mxu3 %v12933_v58 }
 0x125   : > { %v895_v43 = vmax.f32 %v873_v32, 0.0  ;;  %18976 = vst [vmem:[#allocation18_spill] sm:$0xff] %v14237_v54 }
 0x126   : > { %v656_v49 = vpack.c.bf16 %v632_v24, %v632_v24  ;;  %18977 = vst [vmem:[#allocation19_spill] sm:$0xff] %v14242_v20  ;;  %v12937_v24 = vld [vmem:[%s18778_s3 + $0x28] sm:$0xff]  ;;  %v14251_v28 = vor.u32 %v2608_v12, %v2605_v41  ;;  %v18978_v41 = vrot.slane %v14131_v7, 2 }
 0x127   : > { %v14228_v36 = vld [vmem:[#allocation2 + $0x30] sm:$0xff]  ;;  %v912_v30 = vpack.c.bf16 %v895_v43, %v895_v43  ;;  %1296 = vmatpush.bf16.msrb.mxu2 %v12937_v24 }
 0x128   : > { %v14230_v26 = vld [vmem:[#allocation2 + $0x30] sm:$0xff]  ;;  %681 = vst.msk [vmem:[#allocation2 + $0x38] sm:$0xf] %vm666_vm0, %v656_v49  ;;  %v18798_v32 = vrot.slane %v14228_v36, 2  ;;  %v1047_v8 = vshll.u32 %v14228_v36, 16  ;;  %v18981_v20 = vshrl.u32 %v14228_v36, 16 }
 0x129   : > { %v595_v1 = vpop.f32.mrf.mxu0  ;;  %929 = vst.msk [vmem:[#allocation2 + $0x98] sm:$0xf] %vm666_vm0, %v912_v30  ;;  %v1860_v49 = vshrl.u32 %v14230_v26, 16  ;;  %v1863_v43 = vshll.u32 %v14230_v26, 16  ;;  %v18803_v39 = vrot.slane %v14230_v26, 3  ;;  %v12936_v30 = vld [vmem:[%s18778_s3 + $0x20] sm:$0xff] }
 0x12a   : > { %v596_v57 = vadd.f32 %v13817_v33, %v595_v1  ;;  %v1529_v12 = vsel %vm1516_vm1, %v18978_v41, %v18798_v32  ;;  %v14264_v55 = vrot.slane %v1047_v8, 1  ;;  %v874_v1 = vpop.f32.mrf.mxu1  ;;  %v12932_v41 = vld [vmem:[%s18778_s3] sm:$0xff]  ;;  %v18802_v32 = vrot.slane %v14230_v26, 1 }
 0x12b   : > { %10685 = vmatmul.msk.bf16.gmra.mxu1 %vm1074_vm2, %v1529_v12  ;;  %v2146_v58 = vrot.slane %v1860_v49, 2  ;;  %v2147_v24 = vrot.slane %v1863_v43, 3  ;;  %v18979_v1 = vrot.slane %v14133_v13, 3  ;;  %1183 = vmatpush.bf16.msrb.mxu3 %v12932_v41  ;;  %v1862_v62 = vrot.slane %v1860_v49, 1 }
 0x12c   : > { %v633_v46 = vmax.f32 %v596_v57, 0.0  ;;  %v1050_v42 = vsel %vm998_vm3, %v1045_v21, %v14264_v55  ;;  %1297 = vmatpush.bf16.msrb.mxu2 %v12936_v30  ;;  %v14288_v21 = vld [vmem:[#allocation2 + $0x30] sm:$0xff]  ;;  %v1865_v45 = vrot.slane %v1863_v43, 2  ;;  %v1389_v4 = vrot.slane %v18981_v20, 1 }
 0x12d   : > { %v14282_v57 = vsel %vm2277_vm6, %v18979_v1, %v18803_v39  ;;  %10609 = vmatmul.msk.bf16.gmra.mxu2 %vm1074_vm2, %v1050_v42  ;;  %v14286_v38 = vor.u32 %v2147_v24, %v2146_v58  ;;  %18980 = vst [vmem:[#allocation20_spill] sm:$0xff] %v14288_v21  ;;  %v1390_v54 = vrot.slane %v1047_v8, 2  ;;  %v18982_v49 = vrot.slane %v14133_v13, 1 }
 0x12e   : > { %v657_v12 = vpack.c.bf16 %v633_v46, %v633_v46  ;;  %v14298_v58 = vor.u32 %v1865_v45, %v1862_v62 }
 0x12f   : > { %v14296_v42 = vsel %vm2121_vm5, %v14176_v47, %v14286_v38  ;;  %v14300_v24 = vor.u32 %v1390_v54, %v1389_v4  ;;  %v1704_v8 = vsel %vm1238_vm7, %v18982_v49, %v18802_v32  ;;  %v18801_v4 = vrot.slane %v14288_v21, 2  ;;  %v947_v47 = vld [vmem:[#allocation2 + $0x38] sm:$0xf] }
 0x130   : > { %682 = vst.msk [vmem:[#allocation2 + $0x3c] sm:$0xf] %vm666_vm0, %v657_v12  ;;  %v14311_v43 = vsel %vm1360_vm4, %v14186_v44, %v14298_v58  ;;  %v18985_v54 = vrot.slane %v14171_v2, 2  ;;  %v18804_v44 = vrot.slane %v14230_v26, 2  ;;  %v18988_v49 = vrot.slane %v14133_v13, 2 }
 0x131   : > { %v598_v46 = vpop.f32.mrf.mxu0  ;;  %18983 = vst [vmem:[#allocation21_spill] sm:$0xff] %v14311_v43  ;;  %v14316_v45 = vsel %vm1360_vm4, %v14188_v37, %v14300_v24  ;;  %v14331_v37 = vsel %vm2121_vm5, %v14222_v29, %v14251_v28  ;;  %v12955_v29 = vld [vmem:[%s18778_s3 + $0x88] sm:$0xff] }
 0x132   : > { %v599_v30 = vadd.f32 %v13817_v33, %v598_v46  ;;  %v877_v20 = vpop.f32.mrf.mxu1  ;;  %18984 = vst [vmem:[#allocation22_spill] sm:$0xff] %v14316_v45  ;;  %v14325_v41 = vsel %vm1516_vm1, %v18985_v54, %v18801_v4  ;;  %2205 = vmatpush.bf16.msra.mxu1 %v12955_v29 }
 0x133   : > { %18986 = vst [vmem:[#allocation23_spill] sm:$0xff] %v14325_v41  ;;  %v988_v20 = vunpack.c.l.b16 %v947_v47 }
 0x134   : > { %v634_v62 = vmax.f32 %v599_v30, 0.0  ;;  %10728 = vmatmul.msk.bf16.gmra.mxu0 %vm1074_vm2, %v1704_v8  ;;  %18987 = vst [vmem:[#allocation24_spill] sm:$0xff] %v14331_v37  ;;  %v14340_v8 = vsel %vm1516_vm1, %v18988_v49, %v18804_v44 }
 0x135   : > { %18989 = vst [vmem:[#allocation25_spill] sm:$0xff] %v14340_v8 }
 0x136   : > { %v658_v1 = vpack.c.bf16 %v634_v62, %v634_v62 }
 0x137   : > { %v1504_v12 = vld [vmem:[#allocation2 + $0x3c] sm:$0x7] }
 0x138   : > { %v948_v46 = vld [vmem:[#allocation2 + $0x3c] sm:$0x1]  ;;  %683 = vst.msk [vmem:[#allocation2 + $0x40] sm:$0xf] %vm666_vm0, %v658_v1  ;;  %v1513_v54 = vunpack.c.l.b16 %v1504_v12  ;;  %v12954_v12 = vld [vmem:[%s18778_s3 + $0x80] sm:$0xff] }
 0x139   : > { %v14333_v30 = vld [vmem:[#allocation2 + $0x38] sm:$0xff]  ;;  %v989_v4 = vunpack.c.l.b16 %v948_v46  ;;  %v600_v32 = vpop.f32.mrf.mxu0  ;;  %2206 = vmatpush.bf16.msra.mxu1 %v12954_v12 }
 0x13a   : > { %v1226_v62 = vld [vmem:[#allocation2 + $0x3c] sm:$0x3]  ;;  %v1869_v39 = vshrl.u32 %v14333_v30, 16  ;;  %v1872_v37 = vshll.u32 %v14333_v30, 16  ;;  %v601_v13 = vadd.f32 %v13817_v33, %v600_v32  ;;  %v14349_v49 = vpack.c.b16 %v1513_v54, %v988_v20  ;;  %v879_v1 = vpop.f32.mrf.mxu1 }
 0x13b   : > { %v1235_v41 = vunpack.c.l.b16 %v1226_v62  ;;  %v14351_v44 = vpack.c.b16 %v989_v4, %v988_v20  ;;  %v18806_v47 = vrot.slane %v14333_v30, 3  ;;  %v18990_v32 = vshrl.u32 %v14228_v36, 16 }
 0x13c   : > { %v2150_v46 = vrot.slane %v1869_v39, 2  ;;  %v2151_v8 = vrot.slane %v1872_v37, 3  ;;  %v635_v23 = vmax.f32 %v601_v13, 0.0  ;;  %v18991_v1 = vrot.slane %v14230_v26, 3 }
 0x13d   : > { %v1055_v62 = vshll.u32 %v14351_v44, 16  ;;  %v14359_v33 = vpack.c.b16 %v1235_v41, %v988_v20  ;;  %v1053_v4 = vor.u32 %v18990_v32, %v14264_v55  ;;  %v1059_v54 = vshrl.u32 %v14351_v44, 16 }
 0x13e   : > { %v14365_v29 = vor.u32 %v2151_v8, %v2150_v46  ;;  %v14372_v13 = vsel %vm2277_vm6, %v18991_v1, %v18806_v47  ;;  %v659_v63 = vpack.c.bf16 %v635_v23, %v635_v23  ;;  %v18992_v3 = vrot.slane %v14349_v49, 2  ;;  %v12939_v46 = vld [vmem:[%s18778_s3 + $0x38] sm:$0xff] }
 0x13f   : > { %v18993_v41 = vrot.slane %v14228_v36, 2  ;;  %v1057_v51 = vrot.slane %v1055_v62, 1  ;;  %v1871_v55 = vrot.slane %v1869_v39, 1  ;;  %v18805_v8 = vrot.slane %v14333_v30, 1  ;;  %v14391_v39 = vld [vmem:[#allocation2 + $0x38] sm:$0xff] }
 0x140   : > { %v14387_v23 = vsel %vm2121_vm5, %v14286_v38, %v14365_v29  ;;  %v1874_v32 = vrot.slane %v1872_v37, 2  ;;  %684 = vst.msk [vmem:[#allocation2 + $0x44] sm:$0xf] %vm666_vm0, %v659_v63  ;;  %v1394_v62 = vshrl.u32 %v14359_v33, 16  ;;  %v1397_v1 = vshll.u32 %v14359_v33, 16 }
 0x141   : > { %v1531_v20 = vsel %vm1516_vm1, %v18993_v41, %v18992_v3  ;;  %v1058_v3 = vsel %vm998_vm3, %v1053_v4, %v1057_v51  ;;  %v1061_v12 = vor.u32 %v1059_v54, %v1057_v51  ;;  %v603_v41 = vpop.f32.mrf.mxu0  ;;  %v14401_v38 = vld [vmem:[%s18777_s2] ss:$0 sm:$0xff]  ;;  %v18994_v4 = vrot.slane %v14230_v26, 1 }
 0x142   : > { %10686 = vmatmul.msk.bf16.gmra.mxu1 %vm1074_vm2, %v1531_v20  ;;  %10610 = vmatmul.msk.bf16.gmra.mxu2 %vm1074_vm2, %v1058_v3  ;;  %v14396_v20 = vor.u32 %v1874_v32, %v1871_v55  ;;  %v604_v63 = vadd.f32 %v14401_v38, %v603_v41  ;;  %v1396_v51 = vrot.slane %v1394_v62, 1  ;;  %v1399_v37 = vrot.slane %v1397_v1, 2 }
 0x143   : > { %10611 = vmatmul.msk.bf16.vlgmr.msra.gmra.mxu3 %vm1074_vm2, %v1061_v12  ;;  %v1706_v54 = vsel %vm1238_vm7, %v18994_v4, %v18805_v8  ;;  %v2464_v12 = vrot.slane %v14391_v39, 2  ;;  %v2011_v62 = vrot.slane %v14333_v30, 2  ;;  %v19005_v56 = vrot.slane %v14333_v30, 3 }
 0x144   : > { %1444 = vmatpush.bf16.msra.mxu3 %v12939_v46  ;;  %v14413_v55 = vsel %vm1360_vm4, %v14298_v58, %v14396_v20  ;;  %v636_v32 = vmax.f32 %v604_v63, 0.0  ;;  %10729 = vmatmul.msk.bf16.gmra.mxu0 %vm1074_vm2, %v1706_v54  ;;  %v14416_v3 = vor.u32 %v1399_v37, %v1396_v51  ;;  %v18998_v46 = vrot.slane %v14288_v21, 2 }
 0x145   : > { %18995 = vst [vmem:[#allocation26_spill] sm:$0xff] %v14413_v55  ;;  %v19000_v54 = vrot.slane %v14230_v26, 2  ;;  %v1239_v26 = vrot.slane %v13862_v22, 1  ;;  %v19004_v55 = vrot.slane %v14349_v49, 2  ;;  %v18813_v49 = vshrl.u32 %v14391_v39, 16 }
 0x146   : > { %18996 = vst [vmem:[#allocation27_spill] sm:$0xff] %v14416_v3  ;;  %v660_v1 = vpack.c.bf16 %v636_v32, %v636_v32  ;;  %v14423_v41 = vsel %vm1360_vm4, %v14300_v24, %v14416_v3  ;;  %v14428_v58 = vsel %vm1516_vm1, %v18998_v46, %v2464_v12  ;;  %v18814_v46 = vshll.u32 %v14288_v21, 16 }
 0x147   : > { %18997 = vst [vmem:[#allocation28_spill] sm:$0xff] %v14423_v41  ;;  %v14430_v63 = vld [vmem:[#allocation2 + $0x40] sm:$0xff]   ;;  %v14436_v32 = vsel %vm1516_vm1, %v19000_v54, %v2011_v62 }
 0x148   : > { %18999 = vst [vmem:[#allocation29_spill] sm:$0xff] %v14428_v58  ;;  %v1648_v4 = vld [vmem:[#allocation2 + $0x44] sm:$0x3]  ;;  %v1684_v24 = vunpack.c.l.b16 %v14430_v63 }
 0x149   : > { %v1988_v51 = vld [vmem:[#allocation2 + $0x44] sm:$0x7]  ;;  %19001 = vst [vmem:[#allocation30_spill] sm:$0xff] %v14436_v32  ;;  %v1685_v8 = vunpack.c.l.b16 %v1648_v4  ;;  %v605_v9 = vpop.f32.mrf.mxu0  ;;  %v19003_v4 = vshrl.u32 %v14288_v21, 16 }
 0x14a   : > { %685 = vst.msk [vmem:[#allocation2 + $0x48] sm:$0xf] %vm666_vm0, %v660_v1  ;;  %v1997_v47 = vunpack.c.l.b16 %v1988_v51  ;;  %v606_v58 = vadd.f32 %v14401_v38, %v605_v9  ;;  %v12957_v9 = vld [vmem:[%s18778_s3 + $0x98] sm:$0xff] }
 0x14b   : > { %v14442_v17 = vpack.c.b16 %v1685_v8, %v1684_v24  ;;  %v2614_v51 = vrot.slane %v19003_v4, 2  ;;  %v18815_v8 = vrot.slane %v14430_v63, 3  ;;  %2335 = vmatpush.bf16.msra.mxu0 %v12957_v9 }
 0x14c   : > { %v14444_v3 = vpack.c.b16 %v1997_v47, %v1684_v24  ;;  %v637_v37 = vmax.f32 %v606_v58, 0.0  ;;  %v14456_v47 = vld [vmem:[#allocation2 + $0x40] sm:$0xff]  ;;  %v2617_v58 = vrot.slane %v18814_v46, 3 }
 0x14d   : > { %v1878_v22 = vshrl.u32 %v14442_v17, 16  ;;  %v1881_v24 = vshll.u32 %v14442_v17, 16  ;;  %v1707_v41 = vrot.slane %v14442_v17, 1  ;;  %v14471_v43 = vsel %vm2277_vm6, %v19005_v56, %v18815_v8  ;;  %v12956_v56 = vld [vmem:[%s18778_s3 + $0x90] sm:$0xff] }
 0x14e   : > { %19002 = vst [vmem:[#allocation31_spill] sm:$0xff] %v14444_v3  ;;  %v2155_v1 = vshrl.u32 %v14444_v3, 16  ;;  %v2158_v32 = vshll.u32 %v14444_v3, 16  ;;  %v661_v54 = vpack.c.bf16 %v637_v37, %v637_v37  ;;  %v19006_v37 = vrot.slane %v13867_v34, 1 }
 0x14f   : > { %v1880_v52 = vrot.slane %v1878_v22, 1  ;;  %v1883_v21 = vrot.slane %v1881_v24, 2  ;;  %v18810_v24 = vrot.slane %v14444_v3, 2  ;;  %2336 = vmatpush.bf16.msra.mxu0 %v12956_v56 }
 0x150   : > { %v2157_v45 = vrot.slane %v2155_v1, 2  ;;  %v2160_v4 = vrot.slane %v2158_v32, 3  ;;  %686 = vst.msk [vmem:[#allocation2 + $0x4c] sm:$0xf] %vm666_vm0, %v661_v54  ;;  %v1241_v32 = vsel %vm1238_vm7, %v1239_v26, %v19006_v37  ;;  %v18811_v54 = vrot.slane %v14456_v47, 2 }
 0x151   : > { %v608_v9 = vpop.f32.mrf.mxu0  ;;  %v14485_v22 = vor.u32 %v1883_v21, %v1880_v52  ;;  %v2618_v26 = vor.u32 %v2617_v58, %v2614_v51  ;;  %v19007_v37 = vrot.slane %v14333_v30, 1  ;;  %v14514_v30 = vsel %vm1516_vm1, %v2011_v62, %v18810_v24 }
 0x152   : > { %10687 = vmatmul.msk.bf16.gmra.mxu1 %vm1074_vm2, %v19004_v55  ;;  %v14477_v1 = vor.u32 %v2160_v4, %v2157_v45  ;;  %v18812_v55 = vshll.u32 %v14391_v39, 16  ;;  %10640 = vmatmul.msk.bf16.vlgmr.msrb.gmra.mxu2 %vm1074_vm2, %v1241_v32  ;;  %v609_v45 = vadd.f32 %v14401_v38, %v608_v9  ;;  %v13440_v4 = vld [vmem:[#allocation2] sm:$0xff]   ;;  %v14509_v51 = vsel %vm1516_vm1, %v2464_v12, %v18811_v54  ;;  %v14534_v54 = vld [vmem:[#allocation2 + $0x2c] sm:$0xff] }
 0x153   : > { %10620 = vmatmul.msk.bf16.vlgmr.msrb.gmra.mxu3 %vm1074_vm2, %v13440_v4  ;;  %v1708_v32 = vsel %vm1238_vm7, %v19007_v37, %v1707_v41  ;;  %v14504_v21 = vsel %vm1360_vm4, %v14396_v20, %v14485_v22  ;;  %v2623_v20 = vrot.slane %v18813_v49, 2  ;;  %v18816_v37 = vshrl.u32 %v14456_v47, 16  ;;  %19010 = vst [vmem:[#allocation34_spill] sm:$0xff] %v14534_v54 }
 0x154   : > { %v14499_v52 = vsel %vm2121_vm5, %v14365_v29, %v14477_v1  ;;  %v14518_v29 = vsel %vm2121_vm5, %v14251_v28, %v2618_v26  ;;  %v638_v58 = vmax.f32 %v609_v45, 0.0  ;;  %10730 = vmatmul.msk.bf16.gmra.mxu0 %vm1074_vm2, %v1708_v32  ;;  %v2626_v9 = vrot.slane %v18812_v55, 3  ;;  %v3993_v45 = vld [vmem:[#allocation2 + $0x24] sm:$0xff]  }
 0x155   : > { %19008 = vst [vmem:[#allocation32_spill] sm:$0xff] %v14518_v29  ;;  %v18817_v28 = vshll.u32 %v14456_v47, 16  ;;  %v4316_v55 = vld [vmem:[#allocation2 + $0x24] sm:$0xe] }
 0x156   : > { %v662_v12 = vpack.c.bf16 %v638_v58, %v638_v58  ;;  %v2627_v56 = vor.u32 %v2626_v9, %v2623_v20  ;;  %v1242_v20 = vrot.slane %v13900_v19, 1  ;;  %v14537_v9 = vunpack.c.h.b16 %v3993_v45 }
 0x157   : > { %v2635_v49 = vrot.slane %v18817_v28, 3  ;;  %v4325_v8 = vunpack.c.l.b16 %v4316_v55  ;;  %v19012_v19 = vrot.slane %v13867_v34, 1 }
 0x158   : > { %687 = vst.msk [vmem:[#allocation2 + $0x50] sm:$0xf] %vm666_vm0, %v662_v12  ;;  %v14526_v62 = vpop.f32.mrf.mxu1  ;;  %v14531_v32 = vsel %vm2121_vm5, %v2618_v26, %v2627_v56  ;;  %v2632_v12 = vrot.slane %v18816_v37, 2  ;;  %v18820_v26 = vshrl.u32 %v14534_v54, 16 }
 0x159   : > { %v610_v4 = vpop.f32.mrf.mxu0  ;;  %19009 = vst [vmem:[#allocation33_spill] sm:$0xff] %v14531_v32  ;;  %v14553_v45 = vpack.c.b16 %v14537_v9, %v4325_v8  ;;  %v14567_v8 = vld [vmem:[#allocation2 + $0x28] sm:$0xff] }
 0x15a   : > { %v611_v24 = vadd.f32 %v14401_v38, %v610_v4  ;;  %19011 = vst [vmem:[#allocation35_spill] sm:$0xff] %v14537_v9  ;;  %v14546_v4 = vor.u32 %v2635_v49, %v2632_v12  ;;  %v14569_v12 = vld [vmem:[#allocation2 + $0x30] sm:$0xff]  ;;  %v18826_v32 = vrot.slane %v14567_v8, 3 }
 0x15b   : > { %19013 = vst [vmem:[#allocation36_spill] sm:$0xff] %v14553_v45  ;;  %v3253_v29 = vrot.slane %v14569_v12, 3 }
 0x15c   : > { %v639_v58 = vmax.f32 %v611_v24, 0.0  ;;  %v1243_v24 = vsel %vm1238_vm7, %v19012_v19, %v1242_v20  ;;  %v14561_v49 = vsel %vm2121_vm5, %v2627_v56, %v14546_v4  ;;  %19015 = vst [vmem:[#allocation38_spill] sm:$0xff] %v14567_v8  ;;  %v4458_v19 = vrot.slane %v18820_v26, 1 }
 0x15d   : > { %19014 = vst [vmem:[#allocation37_spill] sm:$0xff] %v14561_v49  ;;  %v4451_v56 = vshrl.u32 %v14553_v45, 16 }
 0x15e   : > { %v663_v46 = vpack.c.bf16 %v639_v58, %v639_v58  ;;  %v13441_v58 = vld [vmem:[#allocation2 + $0x8] sm:$0xff] }
 0x15f   : > { %v4453_v49 = vrot.slane %v4451_v56, 1 }
 0x160   : > { %688 = vst.msk [vmem:[#allocation2 + $0x54] sm:$0xf] %vm666_vm0, %v663_v46  ;;  %v14556_v55 = vpop.f32.mrf.mxu2  ;;  %v14565_v34 = vpop.f32.mrf.mxu1 }
 0x161   : > { %v613_v37 = vpop.f32.mrf.mxu0 }
 0x162   : > { %10784 = vmatmul.msk.bf16.vlgmr.msra.gmra.mxu1 %vm1074_vm2, %v13934_v60  ;;  %10641 = vmatmul.msk.bf16.gmra.mxu2 %vm1074_vm2, %v1243_v24  ;;  %v18822_v60 = vshll.u32 %v14534_v54, 16  ;;  %v614_v46 = vadd.f32 %v14401_v38, %v613_v37  ;;  %v4454_v37 = vshll.u32 %v14553_v45, 16  ;;  %v14590_v45 = vsel %vm2277_vm6, %v18826_v32, %v3253_v29 }
 0x163   : > { %10621 = vmatmul.msk.bf16.gmra.mxu3 %vm1074_vm2, %v13441_v58  ;;  %19017 = vst [vmem:[#allocation40_spill] sm:$0xff] %v14590_v45 }
 0x164   : > { %v640_v24 = vmax.f32 %v614_v46, 0.0  ;;  %10731 = vmatmul.msk.bf16.gmra.mxu0 %vm1074_vm2, %v1707_v41  ;;  %v4459_v58 = vrot.slane %v18822_v60, 2  ;;  %v4456_v9 = vrot.slane %v4454_v37, 2  ;;  %v14585_v41 = vld [vmem:[#allocation2 + $0x34] sm:$0xff] }
 0x165   : > { %19016 = vst [vmem:[#allocation39_spill] sm:$0xff] %v14585_v41  ;;  %v18827_v37 = vshrl.u32 %v14585_v41, 16  ;;  %v18828_v3 = vshll.u32 %v14585_v41, 16 }
 0x166   : > { %v664_v28 = vpack.c.bf16 %v640_v24, %v640_v24  ;;  %v4460_v26 = vor.u32 %v4459_v58, %v4458_v19  ;;  %v4457_v24 = vor.u32 %v4456_v9, %v4453_v49 }
 0x167   : > { %v4462_v49 = vrot.slane %v18827_v37, 1 }
 0x168   : > { %689 = vst.msk [vmem:[#allocation2 + $0x58] sm:$0xf] %vm666_vm0, %v664_v28  ;;  %v14583_v46 = vpop.f32.mrf.mxu2  ;;  %v1582_v60 = vpop.f32.mrf.mxu1  ;;  %v14594_v54 = vsel %vm1360_vm4, %v4457_v24, %v4460_v26  ;;  %v1244_v28 = vrot.slane %v13966_v18, 1 }
 0x169   : > { %v615_v17 = vpop.f32.mrf.mxu0  ;;  %19018 = vst [vmem:[#allocation41_spill] sm:$0xff] %v14594_v54  ;;  %v14648_v54 = vld [vmem:[#allocation2 + $0x40] sm:$0xff] }
 0x16a   : > { %v616_v56 = vadd.f32 %v14401_v38, %v615_v17  ;;  %v1245_v9 = vsel %vm1238_vm7, %v1242_v20, %v1244_v28  ;;  %v13442_v17 = vld [vmem:[#allocation2 + $0x10] sm:$0xff]  ;;  %v14614_v20 = vld [vmem:[#allocation2 + $0x38] sm:$0xff]  ;;  %19022 = vst [vmem:[#allocation45_spill] sm:$0xff] %v14648_v54 }
 0x16c   : > { %v641_v19 = vmax.f32 %v616_v56, 0.0  ;;  %v4463_v56 = vrot.slane %v18828_v3, 2  ;;  %v1246_v3 = vrot.slane %v14049_v25, 1 }
 0x16e   : > { %v665_v58 = vpack.c.bf16 %v641_v19, %v641_v19  ;;  %v4464_v19 = vor.u32 %v4463_v56, %v4462_v49 }
 0x170   : > { %690 = vst.msk [vmem:[#allocation2 + $0x5c] sm:$0xf] %vm666_vm0, %v665_v58  ;;  %v1113_v60 = vpop.f32.mrf.mxu2  ;;  %v1584_v24 = vpop.f32.mrf.mxu1  ;;  %v14619_v58 = vsel %vm1360_vm4, %v4460_v26, %v4464_v19  ;;  %v1247_v26 = vsel %vm1238_vm7, %v1244_v28, %v1246_v3  ;;  %vm7837_vm0 = vmand %vm7835_vm14, %vm7836_vm15 }
 0x171   : > { %v14604_v38 = vpop.f32.mrf.mxu0  ;;  %19019 = vst [vmem:[#allocation42_spill] sm:$0xff] %v14619_v58  ;;  %v14624_v24 = vld [vmem:[#allocation2 + $0x3c] sm:$0xff] }
 0x172   : > { %10785 = vmatmul.msk.bf16.gmra.mxu1 %vm1074_vm2, %v14009_v61  ;;  %10642 = vmatmul.msk.bf16.gmra.mxu2 %vm1074_vm2, %v1245_v9  ;;  %v12938_v61 = vld [vmem:[%s18778_s3 + $0x30] sm:$0xff]  ;;  %v3255_v9 = vrot.slane %v14614_v20, 3  ;;  %19020 = vst [vmem:[#allocation43_spill] sm:$0xff] %v14624_v24  ;;  %v18830_v49 = vshll.u32 %v14624_v24, 16 }
 0x173   : > { %10622 = vmatmul.msk.bf16.gmra.mxu3 %vm1074_vm2, %v13442_v17 }
 0x174   : > { %10804 = vmatmul.msk.bf16.vlgmr.msra.gmra.mxu0 %vm1074_vm2, %v13925_v40  ;;  %1445 = vmatpush.bf16.msra.mxu3 %v12938_v61  ;;  %v14627_v32 = vsel %vm2277_vm6, %v3253_v29, %v3255_v9  ;;  %v18829_v40 = vshrl.u32 %v14624_v24, 16  ;;  %v4467_v58 = vrot.slane %v18830_v49, 2 }
 0x175   : > { %19021 = vst [vmem:[#allocation44_spill] sm:$0xff] %v14627_v32  ;;  %v14665_v32 = vld [vmem:[#allocation2 + $0x44] sm:$0xff] }
 0x176   : > { %v4466_v29 = vrot.slane %v18829_v40, 1  ;;  %19025 = vst [vmem:[#allocation48_spill] sm:$0xff] %v14665_v32 }
 0x178   : > { %v1115_v17 = vpop.f32.mrf.mxu2  ;;  %v14629_v37 = vpop.f32.mrf.mxu1 }
 0x179   : > { %v14622_v60 = vpop.f32.mrf.mxu0 }
 0x180   : > { %v14638_v56 = vpop.f32.mrf.mxu2  ;;  %v14644_v17 = vpop.f32.mrf.mxu1 }
 0x181   : > { %v1759_v61 = vpop.f32.mrf.mxu0 }
 0x182   : > { %10786 = vmatmul.msk.bf16.gmra.mxu1 %vm1074_vm2, %v14091_v5  ;;  %10643 = vmatmul.msk.bf16.gmra.mxu2 %vm1074_vm2, %v1247_v26  ;;  %v4468_v5 = vor.u32 %v4467_v58, %v4466_v29  ;;  %v18831_v26 = vrot.slane %v14648_v54, 3 }
 0x183   : > { %10623 = vmatmul.msk.bf16.gmra.mxu3 %vm1074_vm2, %v13966_v18 }
 0x184   : > { %10805 = vmatmul.msk.bf16.gmra.mxu0 %vm1074_vm2, %v13993_v27  ;;  %v14653_v28 = vsel %vm1360_vm4, %v4464_v19, %v4468_v5  ;;  %v14661_v18 = vsel %vm2277_vm6, %v3255_v9, %v18831_v26  ;;  %v1248_v27 = vrot.slane %v14131_v7, 1  ;;  %v18833_v19 = vshrl.u32 %v14665_v32, 16 }
 0x185   : > { %19023 = vst [vmem:[#allocation46_spill] sm:$0xff] %v14653_v28  ;;  %v19026_v28 = vshll.u32 %v14665_v32, 16 }
 0x186   : > { %19024 = vst [vmem:[#allocation47_spill] sm:$0xff] %v14661_v18  ;;  %v1249_v29 = vsel %vm1238_vm7, %v1246_v3, %v1248_v27  ;;  %v4470_v58 = vrot.slane %v18833_v19, 1 }
 0x187   : > { %v4471_v54 = vrot.slane %v19026_v28, 2 }
 0x188   : > { %v14656_v40 = vpop.f32.mrf.mxu2  ;;  %v14663_v49 = vpop.f32.mrf.mxu1 }
 0x189   : > { %v1761_v61 = vpop.f32.mrf.mxu0 }
 0x190   : > { %v14676_v9 = vpop.f32.mrf.mxu2  ;;  %v1594_v26 = vpop.f32.mrf.mxu1 }
 0x191   : > { %v14674_v61 = vpop.f32.mrf.mxu0  ;;  %v1250_v26 = vrot.slane %v14228_v36, 1 }
 0x192   : > { %10787 = vmatmul.msk.bf16.gmra.mxu1 %vm1074_vm2, %v14182_v35  ;;  %10644 = vmatmul.msk.bf16.gmra.mxu2 %vm1074_vm2, %v1249_v29  ;;  %v14686_v35 = vor.u32 %v4471_v54, %v4470_v58 }
 0x193   : > { %10624 = vmatmul.msk.bf16.gmra.mxu3 %vm1074_vm2, %v14049_v25  ;;  %v1251_v28 = vsel %vm1238_vm7, %v1248_v27, %v1250_v26 }
 0x194   : > { %10806 = vmatmul.msk.bf16.gmra.mxu0 %vm1074_vm2, %v14077_v0  ;;  %v14690_v3 = vsel %vm1360_vm4, %v4468_v5, %v14686_v35 }
 0x195   : > { %19027 = vst [vmem:[#allocation49_spill] sm:$0xff] %v14690_v3 }
 0x198   : > { %v1125_v18 = vpop.f32.mrf.mxu2  ;;  %v1597_v25 = vpop.f32.mrf.mxu1 }
 0x199   : > { %v14692_v29 = vpop.f32.mrf.mxu0  ;;  %v1252_v25 = vrot.slane %v14359_v33, 1  ;;  %v12953_v33 = vld [vmem:[%s18778_s3 + $0x78] sm:$0xff] }
 0x19a   : > { %2057 = vmatpush.bf16.msrb.mxu3 %v12953_v33 }
 0x1a0   : > { %v1128_v54 = vpop.f32.mrf.mxu2  ;;  %v14703_v5 = vpop.f32.mrf.mxu1 }
 0x1a1   : > { %v14699_v0 = vpop.f32.mrf.mxu0 }
 0x1a2   : > { %10788 = vmatmul.msk.bf16.gmra.mxu1 %vm1074_vm2, %v14296_v42  ;;  %10645 = vmatmul.msk.bf16.gmra.mxu2 %vm1074_vm2, %v1251_v28  ;;  %v12951_v42 = vld [vmem:[%s18778_s3 + $0x68] sm:$0xff] }
 0x1a3   : > { %10625 = vmatmul.msk.bf16.gmra.mxu3 %vm1074_vm2, %v14131_v7  ;;  %1928 = vmatpush.bf16.msra.mxu2 %v12951_v42  ;;  %v12950_v7 = vld [vmem:[%s18778_s3 + $0x60] sm:$0xff] }
 0x1a4   : > { %10807 = vmatmul.msk.bf16.gmra.mxu0 %vm1074_vm2, %v14169_v31  ;;  %v1253_v31 = vsel %vm1238_vm7, %v1250_v26, %v1252_v25 }
 0x1a7   : > { %1929 = vmatpush.bf16.msra.mxu2 %v12950_v7 }
 0x1a8   : > { %v14707_v58 = vpop.f32.mrf.mxu2  ;;  %v14712_v27 = vpop.f32.mrf.mxu1 }
 0x1a9   : > { %v1771_v18 = vpop.f32.mrf.mxu0 }
 0x1b0   : > { %v14722_v54 = vpop.f32.mrf.mxu2  ;;  %v1604_v18 = vpop.f32.mrf.mxu1 }
 0x1b1   : > { %v1774_v28 = vpop.f32.mrf.mxu0 }
 0x1b2   : > { %10789 = vmatmul.msk.bf16.gmra.mxu1 %vm1074_vm2, %v14387_v23  ;;  %10646 = vmatmul.msk.bf16.gmra.mxu2 %vm1074_vm2, %v1253_v31  ;;  %v12969_v23 = vld [vmem:[%s18778_s3 + $0xc8] sm:$0xff] }
 0x1b3   : > { %10626 = vmatmul.msk.bf16.gmra.mxu3 %vm1074_vm2, %v14228_v36  ;;  %2818 = vmatpush.bf16.msrb.mxu1 %v12969_v23  ;;  %v12968_v36 = vld [vmem:[%s18778_s3 + $0xc0] sm:$0xff] }
 0x1b4   : > { %10808 = vmatmul.msk.bf16.gmra.mxu0 %vm1074_vm2, %v14282_v57 }
 0x1b7   : > { %2819 = vmatpush.bf16.msrb.mxu1 %v12968_v36 }
 0x1b8   : > { %v1135_v42 = vpop.f32.mrf.mxu2 }
 0x1b9   : > { %v14734_v26 = vpop.f32.mrf.mxu0 }
 0x1bf   : > { %v1607_v7 = vpop.f32.mrf.mxu1 }
 0x1c0   : > { %v2748_v7 = vld [vmem:[#allocation2 + $0x10] sm:$0x8] }
 0x1c1   : > { %v14742_v57 = vpop.f32.mrf.mxu0 }
 0x1c2   : > { %10790 = vmatmul.msk.bf16.gmra.mxu1 %vm1074_vm2, %v14499_v52  ;;  %10647 = vmatmul.msk.bf16.gmra.mxu2 %vm1074_vm2, %v1252_v25  ;;  %v12971_v25 = vld [vmem:[%s18778_s3 + $0xd8] sm:$0xff] }
 0x1c3   : > { %10627 = vmatmul.msk.bf16.gmra.mxu3 %vm1074_vm2, %v14351_v44  ;;  %2966 = vmatpush.bf16.msrb.mxu0 %v12971_v25  ;;  %v2757_v25 = vunpack.c.l.b16 %v2748_v7 }
 0x1c4   : > { %10809 = vmatmul.msk.bf16.gmra.mxu0 %vm1074_vm2, %v14372_v13  ;;  %v12970_v13 = vld [vmem:[%s18778_s3 + $0xd0] sm:$0xff] }
 0x1c5   : > { %v1138_v31 = vpop.f32.mrf.mxu2 }
 0x1c6   : > { %v14750_v33 = vpop.f32.mrf.mxu3 }
 0x1c7   : > { %v14746_v28 = vpop.f32.mrf.mxu1  ;;  %2967 = vmatpush.bf16.msrb.mxu0 %v12970_v13 }
 0x1c9   : > { %v1781_v18 = vpop.f32.mrf.mxu0 }
 0x1cd   : > { %v14752_v23 = vpop.f32.mrf.mxu2 }
 0x1ce   : > { %v14756_v52 = vpop.f32.mrf.mxu3 }
 0x1cf   : > { %v14754_v42 = vpop.f32.mrf.mxu1 }
 0x1d1   : > { %v1784_v44 = vpop.f32.mrf.mxu0 }
 0x1d2   : > { %10791 = vmatmul.msk.bf16.gmra.mxu1 %vm1074_vm2, %v14477_v1  ;;  %10744 = vmatmul.msk.bf16.vlgmr.msra.gmra.mxu2 %vm1074_vm2, %v13955_v10  ;;  %v19029_v10 = vunpack.c.l.b16 %v13964_v16 }
 0x1d3   : > { %10660 = vmatmul.msk.bf16.vlgmr.msra.gmra.mxu3 %vm1074_vm2, %v13890_v6  ;;  %v13443_v6 = vld [vmem:[#allocation2 + $0x18] sm:$0xff] }
 0x1d4   : > { %10810 = vmatmul.msk.bf16.gmra.mxu0 %vm1074_vm2, %v14471_v43  ;;  %v2759_v44 = vpack.c.b16 %v19029_v10, %v2757_v25  ;;  %v2762_v45 = vrot.slane %v13443_v6, 3  ;;  %v19034_v25 = vshrl.u32 %v13995_v48, 16  ;;  %v19035_v10 = vshll.u32 %v13995_v48, 16  ;;  %v12952_v48 = vld [vmem:[%s18778_s3 + $0x70] sm:$0xff] }
 0x1d5   : > { %v1299_v36 = vpop.f32.mrf.mxu2  ;;  %2058 = vmatpush.bf16.msrb.mxu3 %v12952_v48 }
 0x1d6   : > { %v1185_v1 = vpop.f32.mrf.mxu3  ;;  %v2761_v41 = vrot.slane %v2759_v44, 3 }
 0x1d7   : > { %v14770_v31 = vpop.f32.mrf.mxu1  ;;  %v1186_v18 = vadd.f32 %v1185_v1, %v14556_v55  ;;  %v19032_v1 = vrot.slane %v14430_v63, 3 }
 0x1d8   : > { %19028 = vst [vmem:[#allocation50_spill] sm:$0xff] %v14770_v31  ;;  %v2763_v13 = vsel %vm2277_vm6, %v2761_v41, %v2762_v45 }
 0x1d9   : > { %v14777_v19 = vadd.f32 %v1299_v36, %v1186_v18  ;;  %v14779_v3 = vpop.f32.mrf.mxu0  ;;  %v2764_v18 = vrot.slane %v14085_v53, 3 }
 0x1dd   : > { %v1301_v32 = vpop.f32.mrf.mxu2 }
 0x1de   : > { %v1187_v31 = vpop.f32.mrf.mxu3 }
 0x1df   : > { %v14781_v24 = vpop.f32.mrf.mxu1  ;;  %v1188_v43 = vadd.f32 %v1187_v31, %v14583_v46  ;;  %v2887_v31 = vshll.u32 %v2759_v44, 16 }
 0x1e0   : > { %19030 = vst [vmem:[#allocation51_spill] sm:$0xff] %v14781_v24 }
 0x1e1   : > { %v14786_v55 = vadd.f32 %v1301_v32, %v1188_v43  ;;  %v14788_v16 = vpop.f32.mrf.mxu0  ;;  %v2884_v32 = vshrl.u32 %v2759_v44, 16  ;;  %v2889_v63 = vrot.slane %v2887_v31, 4 }
 0x1e2   : > { %10888 = vmatmul.msk.bf16.vlgmr.msrb.gmra.mxu1 %vm1074_vm2, %v2763_v13  ;;  %10745 = vmatmul.msk.bf16.gmra.mxu2 %vm1074_vm2, %v14028_v14  ;;  %v2891_v14 = vrot.slane %v19034_v25, 3 }
 0x1e3   : > { %10661 = vmatmul.msk.bf16.gmra.mxu3 %vm1074_vm2, %v13960_v11  ;;  %v2892_v11 = vrot.slane %v19035_v10, 4 }
 0x1e4   : > { %10811 = vmatmul.msk.bf16.gmra.mxu0 %vm1074_vm2, %v19032_v1  ;;  %v2765_v1 = vsel %vm2277_vm6, %v2762_v45, %v2764_v18 }
 0x1e5   : > { %v1304_v7 = vpop.f32.mrf.mxu2 }
 0x1e6   : > { %v1190_v46 = vpop.f32.mrf.mxu3  ;;  %v2886_v7 = vrot.slane %v2884_v32, 3 }
 0x1e7   : > { %v14794_v36 = vpop.f32.mrf.mxu1  ;;  %v2893_v46 = vor.u32 %v2892_v11, %v2891_v14 }
 0x1e8   : > { %19031 = vst [vmem:[#allocation52_spill] sm:$0xff] %v14794_v36  ;;  %v2890_v25 = vor.u32 %v2889_v63, %v2886_v7 }
 0x1e9   : > { %v14799_v41 = vpop.f32.mrf.mxu0 }
 0x1ea   : > { %19033 = vst [vmem:[#allocation53_spill] sm:$0xff] %v14799_v41  ;;  %v2894_v32 = vsel %vm2882_vm8, %v2890_v25, %v2893_v46 }
 0x1ed   : > { %v1306_v6 = vpop.f32.mrf.mxu2 }
 0x1ee   : > { %v1192_v13 = vpop.f32.mrf.mxu3  ;;  %v19038_v6 = vshrl.u32 %v14085_v53, 16 }
 0x1ef   : > { %v2213_v43 = vpop.f32.mrf.mxu1  ;;  %v19039_v13 = vshll.u32 %v14085_v53, 16 }
 0x1f0   : > { %v2895_v43 = vrot.slane %v19038_v6, 3 }
 0x1f1   : > { %v14810_v44 = vpop.f32.mrf.mxu0  ;;  %v2896_v7 = vrot.slane %v19039_v13, 4 }
 0x1f2   : > { %10889 = vmatmul.msk.bf16.gmra.mxu1 %vm1074_vm2, %v2765_v1  ;;  %10746 = vmatmul.msk.bf16.gmra.mxu2 %vm1074_vm2, %v14112_v50  ;;  %19036 = vst [vmem:[#allocation54_spill] sm:$0xff] %v14810_v44 }
 0x1f3   : > { %10662 = vmatmul.msk.bf16.gmra.mxu3 %vm1074_vm2, %v14033_v15  ;;  %v2766_v15 = vrot.slane %v14171_v2, 3 }
 0x1f4   : > { %10908 = vmatmul.msk.bf16.vlgmr.msrb.gmra.mxu0 %vm1074_vm2, %v2894_v32  ;;  %v2897_v32 = vor.u32 %v2896_v7, %v2895_v43  ;;  %v19043_v7 = vld [vmem:[#allocation20_spill] sm:$0xff] }
 0x1f5   : > { %v1309_v45 = vpop.f32.mrf.mxu2 }
 0x1f6   : > { %v1195_v14 = vpop.f32.mrf.mxu3  ;;  %v2898_v53 = vsel %vm2882_vm8, %v2893_v46, %v2897_v32 }
 0x1f7   : > { %v2215_v31 = vpop.f32.mrf.mxu1  ;;  %v1196_v50 = vadd.f32 %v1195_v14, %v14638_v56  ;;  %v2767_v56 = vsel %vm2277_vm6, %v2764_v18, %v2766_v15  ;;  %v19041_v14 = vld [vmem:[#allocation12_spill] sm:$0xff] }
 0x1f9   : > { %v14820_v10 = vadd.f32 %v1309_v45, %v1196_v50  ;;  %v14822_v11 = vpop.f32.mrf.mxu0 }
 0x1fa   : > { %19037 = vst [vmem:[#allocation55_spill] sm:$0xff] %v14822_v11 }
 0x1fd   : > { %v1311_v63 = vpop.f32.mrf.mxu2 }
 0x1fe   : > { %v1197_v25 = vpop.f32.mrf.mxu3 }
 0x1ff   : > { %v14829_v1 = vpop.f32.mrf.mxu1  ;;  %v1198_v48 = vadd.f32 %v1197_v25, %v14656_v40 }
 0x200   : > { %19040 = vst [vmem:[#allocation56_spill] sm:$0xff] %v14829_v1 }
 0x201   : > { %v14834_v45 = vadd.f32 %v1311_v63, %v1198_v48  ;;  %v2343_v31 = vpop.f32.mrf.mxu0  ;;  %v2768_v63 = vrot.slane %v19043_v7, 3  ;;  %v19045_v48 = vshll.u32 %v14171_v2, 16 }
 0x202   : > { %10890 = vmatmul.msk.bf16.gmra.mxu1 %vm1074_vm2, %v2767_v56  ;;  %10747 = vmatmul.msk.bf16.gmra.mxu2 %vm1074_vm2, %v14205_v59  ;;  %v19044_v59 = vshrl.u32 %v14171_v2, 16 }
 0x203   : > { %10663 = vmatmul.msk.bf16.gmra.mxu3 %vm1074_vm2, %v19041_v14  ;;  %v2900_v56 = vrot.slane %v19045_v48, 4 }
 0x204   : > { %10909 = vmatmul.msk.bf16.gmra.mxu0 %vm1074_vm2, %v2898_v53  ;;  %v2899_v25 = vrot.slane %v19044_v59, 3  ;;  %v2769_v53 = vsel %vm2277_vm6, %v2766_v15, %v2768_v63  ;;  %v2770_v15 = vrot.slane %v14391_v39, 3 }
 0x205   : > { %v1314_v50 = vpop.f32.mrf.mxu2 }
 0x206   : > { %v1200_v40 = vpop.f32.mrf.mxu3 }
 0x207   : > { %v14841_v6 = vpop.f32.mrf.mxu1  ;;  %v1201_v18 = vadd.f32 %v1200_v40, %v14676_v9  ;;  %v2901_v9 = vor.u32 %v2900_v56, %v2899_v25  ;;  %v19051_v25 = vshrl.u32 %v19043_v7, 16 }
 0x208   : > { %19042 = vst [vmem:[#allocation12_spill] sm:$0xff] %v14841_v6 }
 0x209   : > { %v14845_v43 = vadd.f32 %v1314_v50, %v1201_v18  ;;  %v2345_v13 = vpop.f32.mrf.mxu0  ;;  %v19047_v50 = vld [vmem:[#allocation21_spill] sm:$0xff]  ;;  %v19049_v18 = vld [vmem:[#allocation16_spill] sm:$0xff]  ;;  %v2902_v2 = vsel %vm2882_vm8, %v2897_v32, %v2901_v9  ;;  %v2903_v56 = vrot.slane %v19051_v25, 3  ;;  %v19055_v25 = vld [vmem:[#allocation22_spill] sm:$0xff] }
 0x20d   : > { %v1316_v46 = vpop.f32.mrf.mxu2 }
 0x20e   : > { %v1202_v14 = vpop.f32.mrf.mxu3 }
 0x20f   : > { %v14852_v31 = vpop.f32.mrf.mxu1  ;;  %v19052_v14 = vshll.u32 %v19043_v7, 16 }
 0x210   : > { %19046 = vst [vmem:[#allocation20_spill] sm:$0xff] %v14852_v31 }
 0x211   : > { %v14858_v40 = vpop.f32.mrf.mxu0 }
 0x212   : > { %10891 = vmatmul.msk.bf16.gmra.mxu1 %vm1074_vm2, %v2769_v53  ;;  %10748 = vmatmul.msk.bf16.gmra.mxu2 %vm1074_vm2, %v19047_v50  ;;  %19048 = vst [vmem:[#allocation21_spill] sm:$0xff] %v14858_v40  ;;  %v2904_v53 = vrot.slane %v19052_v14, 4 }
 0x213   : > { %10664 = vmatmul.msk.bf16.gmra.mxu3 %vm1074_vm2, %v19049_v18 }
 0x214   : > { %10910 = vmatmul.msk.bf16.gmra.mxu0 %vm1074_vm2, %v2902_v2  ;;  %v2905_v2 = vor.u32 %v2904_v53, %v2903_v56 }
 0x215   : > { %v1319_v13 = vpop.f32.mrf.mxu2 }
 0x216   : > { %v1205_v48 = vpop.f32.mrf.mxu3  ;;  %v2771_v13 = vsel %vm2277_vm6, %v2768_v63, %v2770_v15  ;;  %v2906_v7 = vsel %vm2882_vm8, %v2901_v9, %v2905_v2 }
 0x217   : > { %v2225_v59 = vpop.f32.mrf.mxu1  ;;  %v19053_v48 = vld [vmem:[#allocation26_spill] sm:$0xff] }
 0x219   : > { %v14864_v46 = vpop.f32.mrf.mxu0 }
 0x21a   : > { %19050 = vst [vmem:[#allocation16_spill] sm:$0xff] %v14864_v46 }
 0x21d   : > { %v1321_v50 = vpop.f32.mrf.mxu2 }
 0x21e   : > { %v1207_v18 = vpop.f32.mrf.mxu3 }
 0x21f   : > { %v2228_v31 = vpop.f32.mrf.mxu1  ;;  %v1208_v32 = vadd.f32 %v1207_v18, %v14707_v58  ;;  %v2772_v18 = vrot.slane %v14456_v47, 3 }
 0x221   : > { %v14874_v59 = vadd.f32 %v1321_v50, %v1208_v32  ;;  %v14878_v46 = vpop.f32.mrf.mxu0  ;;  %v12965_v50 = vld [vmem:[%s18778_s3 + $0xa8] sm:$0xff]  ;;  %v19057_v32 = vshrl.u32 %v14391_v39, 16 }
 0x222   : > { %10892 = vmatmul.msk.bf16.gmra.mxu1 %vm1074_vm2, %v2771_v13  ;;  %10749 = vmatmul.msk.bf16.gmra.mxu2 %vm1074_vm2, %v19053_v48  ;;  %19054 = vst [vmem:[#allocation26_spill] sm:$0xff] %v14878_v46  ;;  %v19058_v13 = vshll.u32 %v14391_v39, 16 }
 0x223   : > { %10665 = vmatmul.msk.bf16.gmra.mxu3 %vm1074_vm2, %v19055_v25  ;;  %v2907_v9 = vrot.slane %v19057_v32, 3  ;;  %2512 = vmatpush.bf16.msrb.mxu2 %v12965_v50  ;;  %v19060_v50 = vld [vmem:[#allocation28_spill] sm:$0xff] }
 0x224   : > { %10911 = vmatmul.msk.bf16.gmra.mxu0 %vm1074_vm2, %v2906_v7  ;;  %v2908_v48 = vrot.slane %v19058_v13, 4  ;;  %v12967_v13 = vld [vmem:[%s18778_s3 + $0xb8] sm:$0xff] }
 0x225   : > { %v1324_v31 = vpop.f32.mrf.mxu2  ;;  %2689 = vmatpush.bf16.msra.mxu3 %v12967_v13 }
 0x226   : > { %v1210_v58 = vpop.f32.mrf.mxu3  ;;  %v2909_v32 = vor.u32 %v2908_v48, %v2907_v9 }
 0x227   : > { %v14883_v14 = vpop.f32.mrf.mxu1  ;;  %v1211_v63 = vadd.f32 %v1210_v58, %v14722_v54  ;;  %v14901_v58 = vld [vmem:[#allocation2 + $0x48] sm:$0xf]  }
 0x228   : > { %19056 = vst [vmem:[#allocation22_spill] sm:$0xff] %v14883_v14  ;;  %v14933_v14 = vld [vmem:[#allocation2 + $0x60] sm:$0xff] }
 0x229   : > { %v14887_v56 = vadd.f32 %v1324_v31, %v1211_v63  ;;  %v2355_v53 = vpop.f32.mrf.mxu0  ;;  %v14899_v31 = vld [vmem:[#allocation2 + $0x48] sm:$0xff]   ;;  %v2773_v63 = vsel %vm2277_vm6, %v2770_v15, %v2772_v18  ;;  %v2910_v15 = vsel %vm2882_vm8, %v2905_v2, %v2909_v32  ;;  %v19063_v2 = vshll.u32 %v14456_v47, 16  ;;  %19065 = vst [vmem:[#allocation59_spill] sm:$0xff] %v14933_v14 }
 0x22a   : > { %v12964_v53 = vld [vmem:[%s18778_s3 + $0xa0] sm:$0xff]  ;;  %v2774_v48 = vrot.slane %v14899_v31, 3 }
 0x22b   : > { %2513 = vmatpush.bf16.msrb.mxu2 %v12964_v53  ;;  %v19062_v53 = vshrl.u32 %v14456_v47, 16 }
 0x22c   : > { %v2775_v13 = vsel %vm2277_vm6, %v2772_v18, %v2774_v48  ;;  %v18844_v18 = vshrl.u32 %v14933_v14, 16 }
 0x22d   : > { %v1326_v25 = vpop.f32.mrf.mxu2 }
 0x22e   : > { %v1212_v54 = vpop.f32.mrf.mxu3 }
 0x22f   : > { %v14897_v7 = vpop.f32.mrf.mxu1 }
 0x230   : > { %19059 = vst [vmem:[#allocation57_spill] sm:$0xff] %v14897_v7 }
 0x231   : > { %v2358_v39 = vpop.f32.mrf.mxu0 }
 0x232   : > { %10893 = vmatmul.msk.bf16.gmra.mxu1 %vm1074_vm2, %v2773_v63  ;;  %10750 = vmatmul.msk.bf16.gmra.mxu2 %vm1074_vm2, %v14504_v21  ;;  %v12993_v21 = vld [vmem:[%s18778_s3 + $0x108] sm:$0xff]  ;;  %v2911_v39 = vrot.slane %v19062_v53, 3 }
 0x233   : > { %10666 = vmatmul.msk.bf16.gmra.mxu3 %vm1074_vm2, %v19060_v50  ;;  %3482 = vmatpush.bf16.msra.mxu1 %v12993_v21  ;;  %v2912_v50 = vrot.slane %v19063_v2, 4  ;;  %v14935_v21 = vld [vmem:[#allocation2 + $0x68] sm:$0xff] }
 0x234   : > { %10912 = vmatmul.msk.bf16.gmra.mxu0 %vm1074_vm2, %v2910_v15  ;;  %v12992_v15 = vld [vmem:[%s18778_s3 + $0x100] sm:$0xff]  ;;  %19066 = vst [vmem:[#allocation60_spill] sm:$0xff] %v14935_v21 }
 0x235   : > { %v1329_v25 = vpop.f32.mrf.mxu2 }
 0x236   : > { %v1215_v9 = vpop.f32.mrf.mxu3 }
 0x237   : > { %v2235_v54 = vpop.f32.mrf.mxu1  ;;  %v14931_v9 = vld [vmem:[#allocation2 + $0x58] sm:$0xff]  ;;  %3483 = vmatpush.bf16.msra.mxu1 %v12992_v15 }
 0x238   : > { %19064 = vst [vmem:[#allocation58_spill] sm:$0xff] %v14931_v9  ;;  %v18840_v2 = vshrl.u32 %v14931_v9, 16  ;;  %v18841_v46 = vshll.u32 %v14931_v9, 16 }
 0x239   : > { %v14921_v63 = vpop.f32.mrf.mxu0 }
 0x23a   : > { %19061 = vst [vmem:[#allocation28_spill] sm:$0xff] %v14921_v63 }
 0x23d   : > { %v1331_v25 = vpop.f32.mrf.mxu2 }
 0x23e   : > { %v1217_v7 = vpop.f32.mrf.mxu3 }
 0x23f   : > { %v2238_v54 = vpop.f32.mrf.mxu1  ;;  %v1218_v53 = vadd.f32 %v1217_v7, %v14752_v23  ;;  %v19068_v7 = vld [vmem:[#allocation27_spill] sm:$0xff] }
 0x240   : > { %v2913_v54 = vor.u32 %v2912_v50, %v2911_v39  ;;  %v18845_v39 = vshll.u32 %v14933_v14, 16  ;;  %v5137_v50 = vrot.slane %v18840_v2, 1  ;;  %v2916_v2 = vshrl.u32 %v14899_v31, 16 }
 0x241   : > { %v14941_v63 = vadd.f32 %v1331_v25, %v1218_v53  ;;  %v14946_v6 = vpop.f32.mrf.mxu0  ;;  %v5138_v25 = vrot.slane %v18841_v46, 2  ;;  %v2919_v46 = vshll.u32 %v14899_v31, 16 }
 0x242   : > { %10894 = vmatmul.msk.bf16.gmra.mxu1 %vm1074_vm2, %v2775_v13  ;;  %10751 = vmatmul.msk.bf16.gmra.mxu2 %vm1074_vm2, %v14485_v22  ;;  %19067 = vst [vmem:[#allocation61_spill] sm:$0xff] %v14946_v6  ;;  %v2914_v13 = vsel %vm2882_vm8, %v2909_v32, %v2913_v54  ;;  %v5141_v22 = vrot.slane %v18844_v18, 1  ;;  %v19070_v32 = vshrl.u32 %v14935_v21, 16  ;;  %v19071_v18 = vshll.u32 %v14935_v21, 16 }
 0x243   : > { %10667 = vmatmul.msk.bf16.gmra.mxu3 %vm1074_vm2, %v19068_v7  ;;  %v14963_v40 = vor.u32 %v5138_v25, %v5137_v50  ;;  %v5142_v7 = vrot.slane %v18845_v39, 2  ;;  %v2918_v14 = vrot.slane %v2916_v2, 3  ;;  %v2921_v31 = vrot.slane %v2919_v46, 4  ;;  %v4317_v2 = vld [vmem:[#allocation2 + $0x60] sm:$0x3] }
 0x244   : > { %10913 = vmatmul.msk.bf16.gmra.mxu0 %vm1074_vm2, %v2914_v13  ;;  %v5145_v9 = vrot.slane %v19070_v32, 1  ;;  %v5146_v6 = vrot.slane %v19071_v18, 2 }
 0x245   : > { %v1334_v15 = vpop.f32.mrf.mxu2  ;;  %v5143_v1 = vor.u32 %v5142_v7, %v5141_v22  ;;  %v19077_v7 = vld [vmem:[#allocation10_spill] sm:$0xff] }
 0x246   : > { %v1220_v23 = vpop.f32.mrf.mxu3  ;;  %v14974_v13 = vor.u32 %v5146_v6, %v5145_v9  ;;  %v14988_v6 = vor.u32 %v2921_v31, %v2918_v14  ;;  %v12983_v9 = vld [vmem:[#allocation2 + $0x20] sm:$0xff] }
 0x247   : > { %v14960_v53 = vpop.f32.mrf.mxu1  ;;  %v14980_v25 = vsel %vm1360_vm4, %v14963_v40, %v5143_v1  ;;  %v3381_v31 = vshll.u32 %v12983_v9, 16 }
 0x248   : > { %19069 = vst [vmem:[#allocation27_spill] sm:$0xff] %v14960_v53  ;;  %v1221_v53 = vadd.f32 %v1220_v23, %v14750_v33  ;;  %v14984_v32 = vsel %vm1360_vm4, %v5143_v1, %v14974_v13  ;;  %v12982_v33 = vld [vmem:[#allocation2 + $0x18] sm:$0xf0]  ;;  %v2923_v14 = vsel %vm2882_vm8, %v2913_v54, %v14988_v6  ;;  %v15013_v54 = vld [vmem:[#allocation2 + $0x54] sm:$0xff] }
 0x249   : > { %19072 = vst [vmem:[#allocation62_spill] sm:$0xff] %v14974_v13  ;;  %v2365_v39 = vpop.f32.mrf.mxu0  ;;  %v13001_v1 = vld [vmem:[%s18778_s3 + $0x118] sm:$0xff] }
 0x24a   : > { %v14976_v50 = vadd.f32 %v1334_v15, %v1221_v53  ;;  %19073 = vst [vmem:[#allocation63_spill] sm:$0xff] %v14980_v25  ;;  %v10974_v15 = vld [vmem:[#allocation2 + $0x18] sm:$0x8]  ;;  %3644 = vmatpush.bf16.msra.mxu0 %v13001_v1  ;;  %v3383_v1 = vrot.slane %v3381_v31, 4  ;;  %v18852_v25 = vshrl.u32 %v15013_v54, 16 }
 0x24b   : > { %19074 = vst [vmem:[#allocation64_spill] sm:$0xff] %v14984_v32  ;;  %v14992_v39 = vor.u32 %v12982_v33, %v10974_v15  ;;  %v4326_v15 = vunpack.c.l.b16 %v4317_v2 }
 0x24d   : > { %v1336_v21 = vpop.f32.mrf.mxu2  ;;  %19076 = vst [vmem:[#allocation66_spill] sm:$0xff] %v14992_v39  ;;  %v3370_v33 = vshrl.u32 %v14992_v39, 16 }
 0x24e   : > { %v1222_v23 = vpop.f32.mrf.mxu3 }
 0x24f   : > { %v14986_v18 = vpop.f32.mrf.mxu1  ;;  %v1223_v22 = vadd.f32 %v1222_v23, %v14756_v52  ;;  %v3378_v52 = vshrl.u32 %v12983_v9, 16  ;;  %v19078_v23 = vld [vmem:[#allocation9_spill] sm:$0xff] }
 0x250   : > { %19075 = vst [vmem:[#allocation65_spill] sm:$0xff] %v14986_v18  ;;  %v3372_v18 = vrot.slane %v3370_v33, 3 }
 0x251   : > { %v14997_v46 = vadd.f32 %v1336_v21, %v1223_v22  ;;  %v2368_v53 = vpop.f32.mrf.mxu0  ;;  %v4007_v21 = vld [vmem:[#allocation2 + $0x5c] sm:$0xf]  ;;  %v3373_v22 = vshll.u32 %v14992_v39, 16  ;;  %19080 = vst [vmem:[#allocation9_spill] sm:$0xff] %v15013_v54 }
 0x252   : > { %10895 = vmatmul.msk.bf16.gmra.mxu1 %vm1074_vm2, %v2774_v48  ;;  %10848 = vmatmul.msk.bf16.vlgmr.msrb.gmra.mxu2 %vm1074_vm2, %v19077_v7  ;;  %v13000_v48 = vld [vmem:[%s18778_s3 + $0x110] sm:$0xff]  ;;  %v15015_v13 = vunpack.c.l.b16 %v4007_v21 }
 0x253   : > { %10764 = vmatmul.msk.bf16.vlgmr.msrb.gmra.mxu3 %vm1074_vm2, %v19078_v23  ;;  %v3380_v23 = vrot.slane %v3378_v52, 3  ;;  %3645 = vmatpush.bf16.msra.mxu0 %v13000_v48  ;;  %v3375_v39 = vrot.slane %v3373_v22, 4 }
 0x254   : > { %10914 = vmatmul.msk.bf16.gmra.mxu0 %vm1074_vm2, %v2923_v14  ;;  %19081 = vst [vmem:[#allocation67_spill] sm:$0xff] %v15015_v13  ;;  %v15020_v2 = vpack.c.b16 %v4326_v15, %v15015_v13  ;;  %v18853_v14 = vshll.u32 %v15013_v54, 16 }
 0x255   : > { %v1931_v53 = vpop.f32.mrf.mxu2  ;;  %v3384_v52 = vor.u32 %v3383_v1, %v3380_v23  ;;  %v3376_v21 = vor.u32 %v3375_v39, %v3372_v18 }
 0x256   : > { %v1447_v9 = vpop.f32.mrf.mxu3  ;;  %19082 = vst [vmem:[#allocation68_spill] sm:$0xff] %v15020_v2  ;;  %v4479_v48 = vrot.slane %v18853_v14, 2  ;;  %v4483_v33 = vshrl.u32 %v15020_v2, 16 }
 0x257   : > { %v15010_v7 = vpop.f32.mrf.mxu1  ;;  %v1487_v32 = vadd.f32 %v1447_v9, %v14777_v19  ;;  %v4478_v19 = vrot.slane %v18852_v25, 1  ;;  %v3385_v23 = vsel %vm2882_vm8, %v3376_v21, %v3384_v52 }
 0x258   : > { %19079 = vst [vmem:[#allocation10_spill] sm:$0xff] %v15010_v7  ;;  %v4485_v25 = vrot.slane %v4483_v33, 1 }
 0x259   : > { %v1617_v7 = vadd.f32 %v14526_v62, %v1487_v32  ;;  %v15024_v11 = vpop.f32.mrf.mxu0  ;;  %v4486_v32 = vshll.u32 %v15020_v2, 16  ;;  %v15039_v1 = vor.u32 %v4479_v48, %v4478_v19  ;;  %v3387_v19 = vshrl.u32 %v14567_v8, 16 }
 0x25a   : > { %19083 = vst [vmem:[#allocation69_spill] sm:$0xff] %v15024_v11  ;;  %v3390_v48 = vshll.u32 %v14567_v8, 16  ;;  %v13054_v11 = vld [vmem:[#allocation2 + $0x70] sm:$0xff]  ;;  %v15136_v8 = vld [vmem:[#allocation2 + $0x78] sm:$0xf] }
 0x25b   : > { %v1794_v31 = vadd.f32 %v14604_v38, %v1617_v7  ;;  %v13617_v7 = vld [vmem:[#allocation2 + $0x48] sm:$0x70]  ;;  %v4488_v14 = vrot.slane %v4486_v32, 2  ;;  %19106 = vst [vmem:[#allocation81_spill] sm:$0xff] %v15136_v8  ;;  %v5933_v54 = vrot.slane %v13054_v11, 3 }
 0x25c   : > { %v15050_v21 = vor.u32 %v13617_v7, %v14901_v58  ;;  %v3392_v7 = vrot.slane %v3390_v48, 4 }
 0x25d   : > { %v1933_v22 = vpop.f32.mrf.mxu2  ;;  %v15034_v62 = vadd.f32 %v1931_v53, %v1794_v31  ;;  %v15043_v39 = vor.u32 %v4488_v14, %v4485_v25  ;;  %v19087_v31 = vld [vmem:[#allocation13_spill] sm:$0xff] }
 0x25e   : > { %v1449_v9 = vpop.f32.mrf.mxu3  ;;  %v18854_v25 = vrot.slane %v15050_v21, 2 }
 0x25f   : > { %v15032_v15 = vpop.f32.mrf.mxu1  ;;  %v1488_v38 = vadd.f32 %v1449_v9, %v14786_v55  ;;  %19085 = vst [vmem:[#allocation71_spill] sm:$0xff] %v15043_v39  ;;  %v19088_v55 = vld [vmem:[#allocation11_spill] sm:$0xff] }
 0x260   : > { %19084 = vst [vmem:[#allocation70_spill] sm:$0xff] %v15032_v15 }
 0x261   : > { %v1618_v18 = vadd.f32 %v14565_v34, %v1488_v38  ;;  %v15045_v53 = vpop.f32.mrf.mxu0  ;;  %v15060_v34 = vsel %vm1360_vm4, %v15039_v1, %v15043_v39  ;;  %v3389_v38 = vrot.slane %v3387_v19, 3 }
 0x262   : > { %11032 = vmatmul.msk.bf16.vlgmr.msra.gmra.mxu1 %vm1074_vm2, %v3385_v23  ;;  %19086 = vst [vmem:[#allocation72_spill] sm:$0xff] %v15045_v53  ;;  %10849 = vmatmul.msk.bf16.gmra.mxu2 %vm1074_vm2, %v19087_v31  ;;  %v15078_v31 = vld [vmem:[#allocation2 + $0x70] sm:$0xff]  }
 0x263   : > { %10765 = vmatmul.msk.bf16.gmra.mxu3 %vm1074_vm2, %v19088_v55  ;;  %v1795_v33 = vadd.f32 %v14622_v60, %v1618_v18  ;;  %19089 = vst [vmem:[#allocation13_spill] sm:$0xff] %v15060_v34  ;;  %v19091_v60 = vrot.slane %v14456_v47, 2  ;;  %v15076_v18 = vld [vmem:[#allocation2 + $0x68] sm:$0xff]   ;;  %v15088_v47 = vld [vmem:[#allocation2 + $0x1c] sm:$0xf0]  ;;  %v15096_v34 = vld [vmem:[#allocation2 + $0x78] sm:$0xff]  }
 0x264   : > { %10915 = vmatmul.msk.bf16.gmra.mxu0 %vm1074_vm2, %v14988_v6  ;;  %19092 = vst [vmem:[#allocation73_spill] sm:$0xff] %v15076_v18  ;;  %v18857_v6 = vshrl.u32 %v15076_v18, 16  ;;  %v18862_v19 = vshrl.u32 %v15096_v34, 16 }
 0x265   : > { %v1936_v14 = vpop.f32.mrf.mxu2  ;;  %v15067_v58 = vadd.f32 %v1933_v22, %v1795_v33  ;;  %v15074_v23 = vsel %vm1516_vm1, %v19091_v60, %v18854_v25  ;;  %19093 = vst [vmem:[#allocation74_spill] sm:$0xff] %v15078_v31  ;;  %v18858_v22 = vshll.u32 %v15076_v18, 16  ;;  %v15084_v33 = vor.u32 %v3392_v7, %v3389_v38 }
 0x266   : > { %v1452_v9 = vpop.f32.mrf.mxu3  ;;  %v15086_v14 = vld [vmem:[#allocation2 + $0x1c] sm:$0xff]   ;;  %19096 = vst [vmem:[#allocation77_spill] sm:$0xff] %v15088_v47  ;;  %v6749_v48 = vrot.slane %v18857_v6, 3  ;;  %v19099_v47 = vshll.u32 %v15078_v31, 16 }
 0x267   : > { %v15063_v32 = vpop.f32.mrf.mxu1  ;;  %19095 = vst [vmem:[#allocation76_spill] sm:$0xff] %v15086_v14  ;;  %v18859_v9 = vshrl.u32 %v15078_v31, 16  ;;  %v6752_v60 = vrot.slane %v18858_v22, 4  ;;  %v3394_v2 = vsel %vm2882_vm8, %v3384_v52, %v15084_v33 }
 0x268   : > { %19090 = vst [vmem:[#allocation11_spill] sm:$0xff] %v15063_v32  ;;  %v6761_v22 = vrot.slane %v19099_v47, 4  ;;  %v12966_v47 = vld [vmem:[%s18778_s3 + $0xb0] sm:$0xff] }
 0x269   : > { %v15080_v55 = vpop.f32.mrf.mxu0  ;;  %19097 = vst [vmem:[#allocation78_spill] sm:$0xff] %v15096_v34  ;;  %v15098_v7 = vor.u32 %v6752_v60, %v6749_v48  ;;  %v6758_v6 = vrot.slane %v18859_v9, 3  ;;  %v15113_v60 = vld [vmem:[#allocation2 + $0x58] sm:$0xff]  ;;  %v3399_v9 = vshll.u32 %v14569_v12, 16  ;;  %2690 = vmatpush.bf16.msra.mxu3 %v12966_v47  ;;  %v13044_v47 = vld [vmem:[#allocation2 + $0x60] sm:$0xff] }
 0x26a   : > { %19094 = vst [vmem:[#allocation75_spill] sm:$0xff] %v15080_v55  ;;  %v18874_v15 = vrot.slane %v15113_v60, 3  ;;  %v5528_v36 = vshrl.u32 %v13044_v47, 16 }
 0x26b   : > { %19098 = vst [vmem:[#allocation79_spill] sm:$0xff] %v15098_v7  ;;  %v6762_v52 = vor.u32 %v6761_v22, %v6758_v6  ;;  %v3401_v53 = vrot.slane %v3399_v9, 4 }
 0x26c   : > { %19102 = vst [vmem:[#allocation80_spill] sm:$0xff] %v15113_v60 }
 0x26d   : > { %v1938_v25 = vpop.f32.mrf.mxu2  ;;  %v15130_v6 = vsel %vm2882_vm8, %v15098_v7, %v6762_v52 }
 0x26e   : > { %v1454_v38 = vpop.f32.mrf.mxu3  ;;  %v19100_v25 = vld [vmem:[#allocation17_spill] sm:$0xff] }
 0x26f   : > { %v2826_v39 = vpop.f32.mrf.mxu1  ;;  %v19103_v38 = vld [vmem:[#allocation14_spill] sm:$0xff] }
 0x270   : > { %v13052_v39 = vld [vmem:[#allocation2 + $0x60] sm:$0xff]  ;;  %19104 = vst [vmem:[#allocation14_spill] sm:$0xff] %v15130_v6 }
 0x271   : > { %v15111_v48 = vpop.f32.mrf.mxu0 }
 0x272   : > { %11033 = vmatmul.msk.bf16.gmra.mxu1 %vm1074_vm2, %v3394_v2  ;;  %10850 = vmatmul.msk.bf16.gmra.mxu2 %vm1074_vm2, %v19100_v25  ;;  %19101 = vst [vmem:[#allocation17_spill] sm:$0xff] %v15111_v48  ;;  %v3396_v2 = vshrl.u32 %v14569_v12, 16  ;;  %v6767_v25 = vrot.slane %v18862_v19, 3  ;;  %v19105_v12 = vshll.u32 %v15096_v34, 16  ;;  %v13053_v48 = vld [vmem:[#allocation2 + $0x68] sm:$0xff] }
 0x273   : > { %10766 = vmatmul.msk.bf16.gmra.mxu3 %vm1074_vm2, %v19103_v38  ;;  %v13045_v34 = vld [vmem:[#allocation2 + $0x68] sm:$0xff]  ;;  %v5931_v9 = vrot.slane %v13053_v48, 3 }
 0x274   : > { %11076 = vmatmul.msk.bf16.vlgmr.msra.gmra.mxu0 %vm1074_vm2, %v15086_v14  ;;  %v6770_v22 = vrot.slane %v19105_v12, 4  ;;  %v3398_v55 = vrot.slane %v3396_v2, 3  ;;  %v5929_v14 = vrot.slane %v13052_v39, 3  ;;  %v5915_v2 = vld [vmem:[#allocation2 + $0x7c] sm:$0x3] }
 0x275   : > { %v15124_v31 = vpop.f32.mrf.mxu2  ;;  %v5923_v48 = vunpack.c.l.b16 %v5915_v2  ;;  %v5540_v2 = vshll.u32 %v13045_v34, 16 }
 0x276   : > { %v1457_v38 = vpop.f32.mrf.mxu3  ;;  %v15138_v13 = vor.u32 %v6770_v22, %v6767_v25 }
 0x277   : > { %v2828_v32 = vpop.f32.mrf.mxu1  ;;  %v1491_v19 = vadd.f32 %v1457_v38, %v14820_v10  ;;  %v15149_v10 = vsel %vm2277_vm6, %v18874_v15, %v5929_v14  ;;  %v15151_v38 = vor.u32 %v3401_v53, %v3398_v55  ;;  %v15162_v53 = vsel %vm2277_vm6, %v5931_v9, %v5933_v54 }
 0x278   : > { %v13043_v32 = vld [vmem:[#allocation2 + $0x58] sm:$0xff]  ;;  %19107 = vst [vmem:[#allocation82_spill] sm:$0xff] %v15138_v13  ;;  %v15144_v12 = vsel %vm2882_vm8, %v6762_v52, %v15138_v13  ;;  %v5531_v52 = vshll.u32 %v13044_v47, 16  ;;  %v5530_v55 = vrot.slane %v5528_v36, 1  ;;  %v13046_v47 = vld [vmem:[#allocation2 + $0x70] sm:$0xff] }
 0x279   : > { %v15140_v6 = vpop.f32.mrf.mxu0  ;;  %19109 = vst [vmem:[#allocation84_spill] sm:$0xff] %v15144_v12  ;;  %v5519_v22 = vshrl.u32 %v13043_v32, 16  ;;  %v5522_v39 = vshll.u32 %v13043_v32, 16  ;;  %v5537_v32 = vshrl.u32 %v13045_v34, 16  ;;  %v3403_v11 = vsel %vm2882_vm8, %v15084_v33, %v15151_v38  ;;  %v5383_v33 = vld [vmem:[#allocation2 + $0x78] sm:$0xf] }
 0x27a   : > { %19108 = vst [vmem:[#allocation83_spill] sm:$0xff] %v15140_v6  ;;  %v15155_v6 = vsel %vm2277_vm6, %v5929_v14, %v5931_v9  ;;  %v5533_v25 = vrot.slane %v5531_v52, 2  ;;  %v19117_v52 = vld [vmem:[#allocation23_spill] sm:$0xff]  ;;  %v3408_v34 = vshll.u32 %v14614_v20, 16 }
 0x27b   : > { %19110 = vst [vmem:[#allocation85_spill] sm:$0xff] %v15149_v10  ;;  %v5521_v15 = vrot.slane %v5519_v22, 1  ;;  %v5524_v10 = vrot.slane %v5522_v39, 2  ;;  %v19115_v22 = vunpack.c.l.b16 %v15136_v8 }
 0x27c   : > { %19111 = vst [vmem:[#allocation86_spill] sm:$0xff] %v15155_v6  ;;  %v5534_v9 = vor.u32 %v5533_v25, %v5530_v55  ;;  %v15185_v25 = vld [vmem:[#allocation2 + $0x24] sm:$0xff] }
 0x27d   : > { %v15157_v12 = vpop.f32.mrf.mxu2  ;;  %19113 = vst [vmem:[#allocation88_spill] sm:$0xff] %v15162_v53  ;;  %v15168_v6 = vor.u32 %v5524_v10, %v5521_v15  ;;  %v15172_v39 = vpack.c.b16 %v5923_v48, %v19115_v22  ;;  %v5539_v10 = vrot.slane %v5537_v32, 1  ;;  %v5542_v48 = vrot.slane %v5540_v2, 2  ;;  %v19119_v22 = vld [vmem:[#allocation18_spill] sm:$0xff] }
 0x27e   : > { %v1459_v24 = vpop.f32.mrf.mxu3  ;;  %19120 = vst [vmem:[#allocation18_spill] sm:$0xff] %v15185_v25  ;;  %v2642_v32 = vshll.u32 %v15050_v21, 16 }
 0x27f   : > { %v15159_v44 = vpop.f32.mrf.mxu1  ;;  %v1492_v14 = vadd.f32 %v1459_v24, %v14834_v45  ;;  %19114 = vst [vmem:[#allocation89_spill] sm:$0xff] %v15168_v6  ;;  %v18876_v36 = vrot.slane %v15172_v39, 3  ;;  %v3405_v45 = vshrl.u32 %v14614_v20, 16  ;;  %v15181_v15 = vsel %vm1360_vm4, %v15168_v6, %v5534_v9  ;;  %v15202_v20 = vld [vmem:[#allocation2 + $0x60] sm:$0xff]  }
 0x280   : > { %19112 = vst [vmem:[#allocation87_spill] sm:$0xff] %v15159_v44  ;;  %v5543_v53 = vor.u32 %v5542_v48, %v5539_v10 }
 0x281   : > { %19116 = vst [vmem:[#allocation90_spill] sm:$0xff] %v15172_v39  ;;  %v2974_v24 = vpop.f32.mrf.mxu0  ;;  %v15191_v55 = vsel %vm2277_vm6, %v5933_v54, %v18876_v36  ;;  %v5409_v39 = vunpack.c.l.b16 %v5383_v33  ;;  %v3407_v36 = vrot.slane %v3405_v45, 3  ;;  %v1622_v48 = vadd.f32 %v14644_v17, %v1492_v14 }
 0x282   : > { %11034 = vmatmul.msk.bf16.gmra.mxu1 %vm1074_vm2, %v3403_v11  ;;  %10851 = vmatmul.msk.bf16.gmra.mxu2 %vm1074_vm2, %v19117_v52  ;;  %19118 = vst [vmem:[#allocation23_spill] sm:$0xff] %v15181_v15  ;;  %v5546_v11 = vshrl.u32 %v13046_v47, 16  ;;  %v5549_v52 = vshll.u32 %v13046_v47, 16  ;;  %v1621_v24 = vadd.f32 %v14629_v37, %v1491_v19  ;;  %v2639_v15 = vshrl.u32 %v15050_v21, 16 }
 0x283   : > { %10767 = vmatmul.msk.bf16.gmra.mxu3 %vm1074_vm2, %v19119_v22  ;;  %19121 = vst [vmem:[#allocation91_spill] sm:$0xff] %v15191_v55  ;;  %v2644_v47 = vrot.slane %v2642_v32, 3  ;;  %v3410_v19 = vrot.slane %v3408_v34, 4  ;;  %v15210_v41 = vpack.c.b16 %v5409_v39, %v5409_v39  ;;  %v1799_v14 = vadd.f32 %v14692_v29, %v1622_v48 }
 0x284   : > { %11077 = vmatmul.msk.bf16.gmra.mxu0 %vm1074_vm2, %v15185_v25  ;;  %19123 = vst [vmem:[#allocation93_spill] sm:$0xff] %v15202_v20  ;;  %v2641_v55 = vrot.slane %v2639_v15, 2  ;;  %v5548_v8 = vrot.slane %v5546_v11, 1  ;;  %v5551_v44 = vrot.slane %v5549_v52, 2  ;;  %v1798_v6 = vadd.f32 %v14674_v61, %v1621_v24  ;;  %v19128_v11 = vld [vmem:[#allocation29_spill] sm:$0xff] }
 0x285   : > { %v15196_v2 = vpop.f32.mrf.mxu2  ;;  %v18882_v25 = vshll.u32 %v15202_v20, 16  ;;  %19124 = vst [vmem:[#allocation94_spill] sm:$0xff] %v15210_v41  ;;  %v15221_v15 = vsel %vm1360_vm4, %v5534_v9, %v5543_v53  ;;  %v3411_v61 = vor.u32 %v3410_v19, %v3407_v36  ;;  %v5558_v36 = vshll.u32 %v15210_v41, 16 }
 0x286   : > { %v1462_v54 = vpop.f32.mrf.mxu3  ;;  %v15206_v60 = vor.u32 %v2644_v47, %v2641_v55  ;;  %v15213_v45 = vadd.f32 %v15124_v31, %v1798_v6  ;;  %19125 = vst [vmem:[#allocation95_spill] sm:$0xff] %v15221_v15  ;;  %v5552_v10 = vor.u32 %v5551_v44, %v5548_v8  ;;  %v5555_v6 = vshrl.u32 %v15210_v41, 16  ;;  %v13444_v47 = vld [vmem:[#allocation2 + $0x40] sm:$0xff] }
 0x287   : > { %v15198_v22 = vpop.f32.mrf.mxu1  ;;  %v1493_v37 = vadd.f32 %v1462_v54, %v14845_v43  ;;  %v3412_v8 = vsel %vm2882_vm8, %v15151_v38, %v3411_v61  ;;  %v15246_v24 = vadd.f32 %v15157_v12, %v1799_v14  ;;  %v19130_v54 = vld [vmem:[#allocation25_spill] sm:$0xff]  ;;  %v15252_v38 = vld [vmem:[#allocation2 + $0x2c] sm:$0xff]  ;;  %v3414_v19 = vshrl.u32 %v13444_v47, 16 }
 0x288   : > { %19122 = vst [vmem:[#allocation92_spill] sm:$0xff] %v15198_v22  ;;  %v18883_v22 = vshrl.u32 %v15202_v20, 16  ;;  %v15218_v43 = vsel %vm2121_vm5, %v14546_v4, %v15206_v60  ;;  %v15229_v31 = vsel %vm1360_vm4, %v5543_v53, %v5552_v10  ;;  %v6403_v4 = vrot.slane %v18882_v25, 4  ;;  %v15548_v20 = vld [vmem:[#allocation2 + $0x2c] sm:$0xff] }
 0x289   : > { %v2976_v33 = vpop.f32.mrf.mxu0  ;;  %19126 = vst [vmem:[#allocation96_spill] sm:$0xff] %v15229_v31  ;;  %v5557_v44 = vrot.slane %v5555_v6, 1  ;;  %v5560_v53 = vrot.slane %v5558_v36, 2  ;;  %v1623_v36 = vadd.f32 %v14663_v49, %v1493_v37 }
 0x28a   : > { %v6402_v39 = vrot.slane %v18883_v22, 3  ;;  %v3417_v33 = vshll.u32 %v13444_v47, 16  ;;  %v15273_v47 = vld [vmem:[#allocation2 + $0x74] sm:$0xff]  ;;  %v18885_v22 = vunpack.c.l.b16 %v15076_v18 }
 0x28b   : > { %v15248_v32 = vor.u32 %v5560_v53, %v5557_v44  ;;  %v13364_v44 = vld [vmem:[#allocation2 + $0x80] sm:$0xff]   ;;  %19135 = vst [vmem:[#allocation101_spill] sm:$0xff] %v15273_v47  ;;  %v1800_v37 = vadd.f32 %v14699_v0, %v1623_v36 }
 0x28c   : > { %v15237_v17 = vor.u32 %v6403_v4, %v6402_v39  ;;  %v3416_v4 = vrot.slane %v3414_v19, 3  ;;  %v3419_v6 = vrot.slane %v3417_v33, 4  ;;  %v15270_v53 = vld [vmem:[#allocation2 + $0x64] sm:$0xf]  ;;  %v15277_v33 = vld [vmem:[#allocation2 + $0x7c] sm:$0xff] }
 0x28d   : > { %v1948_v34 = vpop.f32.mrf.mxu2  ;;  %19129 = vst [vmem:[#allocation29_spill] sm:$0xff] %v15248_v32  ;;  %v15256_v29 = vsel %vm1360_vm4, %v5552_v10, %v15248_v32  ;;  %v6289_v10 = vld [vmem:[#allocation2 + $0x84] sm:$0x3]  ;;  %v18886_v25 = vunpack.c.l.b16 %v15270_v53  ;;  %v18891_v36 = vshll.u32 %v15277_v33, 16 }
 0x28e   : > { %v1464_v9 = vpop.f32.mrf.mxu3  ;;  %19127 = vst [vmem:[#allocation97_spill] sm:$0xff] %v15237_v17  ;;  %v15263_v12 = vsel %vm2882_vm8, %v15237_v17, %v15098_v7  ;;  %v6297_v19 = vunpack.c.l.b16 %v6289_v10  ;;  %v12981_v7 = vld [vmem:[%s18778_s3 + $0xe8] sm:$0xff] }
 0x28f   : > { %v15226_v55 = vpop.f32.mrf.mxu1  ;;  %19131 = vst [vmem:[#allocation25_spill] sm:$0xff] %v15256_v29  ;;  %v15265_v9 = vld [vmem:[#allocation2 + $0x88] sm:$0xff]   ;;  %3128 = vmatpush.bf16.msra.mxu2 %v12981_v7 }
 0x290   : > { %19132 = vst [vmem:[#allocation98_spill] sm:$0xff] %v15263_v12  ;;  %v15357_v7 = vld [vmem:[#allocation2 + $0x84] sm:$0xff] }
 0x291   : > { %v15243_v52 = vpop.f32.mrf.mxu0  ;;  %19133 = vst [vmem:[#allocation99_spill] sm:$0xff] %v15265_v9 }
 0x292   : > { %11035 = vmatmul.msk.bf16.gmra.mxu1 %vm1074_vm2, %v3412_v8  ;;  %10852 = vmatmul.msk.bf16.gmra.mxu2 %vm1074_vm2, %v19128_v11  ;;  %v6026_v8 = vld [vmem:[#allocation2 + $0x80] sm:$0xf]  ;;  %19134 = vst [vmem:[#allocation100_spill] sm:$0xff] %v15270_v53  ;;  %v12988_v11 = vld [vmem:[#allocation2 + $0x48] sm:$0xff] }
 0x293   : > { %10768 = vmatmul.msk.bf16.gmra.mxu3 %vm1074_vm2, %v19130_v54  ;;  %v3420_v54 = vor.u32 %v3419_v6, %v3416_v4  ;;  %19137 = vst [vmem:[#allocation103_spill] sm:$0xff] %v15277_v33  ;;  %v19138_v4 = vunpack.c.l.b16 %v15265_v9 }
 0x294   : > { %11078 = vmatmul.msk.bf16.gmra.mxu0 %vm1074_vm2, %v15252_v38  ;;  %19147 = vst [vmem:[#allocation110_spill] sm:$0xff] %v15357_v7 }
 0x295   : > { %v1951_v48 = vpop.f32.mrf.mxu2  ;;  %v3421_v10 = vsel %vm2882_vm8, %v3411_v61, %v3420_v54  ;;  %v3426_v61 = vshll.u32 %v12988_v11, 16 }
 0x296   : > { %v1467_v34 = vpop.f32.mrf.mxu3  ;;  %v15275_v48 = vunpack.c.l.b16 %v6026_v8 }
 0x297   : > { %v2838_v39 = vpop.f32.mrf.mxu1 }
 0x298   : > { %19136 = vst [vmem:[#allocation102_spill] sm:$0xff] %v15275_v48  ;;  %v13337_v39 = vunpack.c.h.b16 %v13364_v44  ;;  %v15291_v44 = vadd.f32 %v15196_v2, %v1800_v37  ;;  %v15296_v0 = vpack.c.b16 %v6297_v19, %v15275_v48  ;;  %v3423_v2 = vshrl.u32 %v12988_v11, 16  ;;  %v15311_v19 = vld [vmem:[#allocation2 + $0x34] sm:$0xff] }
 0x299   : > { %v15268_v14 = vpop.f32.mrf.mxu0  ;;  %v18894_v37 = vshrl.u32 %v15273_v47, 16 }
 0x29a   : > { %v15286_v6 = vpack.c.b16 %v19138_v4, %v13337_v39  ;;  %19140 = vst [vmem:[#allocation105_spill] sm:$0xff] %v15296_v0  ;;  %v15303_v39 = vpack.c.b16 %v18885_v22, %v18886_v25  ;;  %v6422_v22 = vshll.u32 %v15296_v0, 16 }
 0x29c   : > { %19139 = vst [vmem:[#allocation104_spill] sm:$0xff] %v15286_v6  ;;  %v3428_v6 = vrot.slane %v3426_v61, 4  ;;  %v6424_v29 = vrot.slane %v6422_v22, 4  ;;  %v15345_v61 = vld [vmem:[#allocation2 + $0x4c] sm:$0xff] }
 0x29d   : > { %v15279_v34 = vpop.f32.mrf.mxu2  ;;  %19141 = vst [vmem:[#allocation106_spill] sm:$0xff] %v15303_v39  ;;  %v3425_v39 = vrot.slane %v3423_v2, 3 }
 0x29e   : > { %v1469_v32 = vpop.f32.mrf.mxu3 }
 0x29f   : > { %v2841_v49 = vpop.f32.mrf.mxu1  ;;  %v1496_v8 = vadd.f32 %v1469_v32, %v14874_v59  ;;  %v19142_v32 = vld [vmem:[#allocation30_spill] sm:$0xff]  ;;  %v3429_v9 = vor.u32 %v3428_v6, %v3425_v39  ;;  %v18896_v6 = vshrl.u32 %v15345_v61, 16 }
 0x2a0   : > { %v18887_v49 = vshll.u32 %v15273_v47, 16 }
 0x2a1   : > { %v15307_v59 = vpop.f32.mrf.mxu0  ;;  %v1626_v39 = vadd.f32 %v14703_v5, %v1496_v8  ;;  %v12991_v5 = vld [vmem:[%s18778_s3 + $0xf8] sm:$0xff]  ;;  %v4474_v8 = vrot.slane %v18896_v6, 1 }
 0x2a2   : > { %11036 = vmatmul.msk.bf16.gmra.mxu1 %vm1074_vm2, %v3421_v10  ;;  %10853 = vmatmul.msk.bf16.gmra.mxu2 %vm1074_vm2, %v14509_v51  ;;  %v15316_v4 = vrot.slane %v18887_v49, 1  ;;  %v6419_v10 = vshrl.u32 %v15296_v0, 16  ;;  %v7329_v51 = vrot.slane %v18891_v36, 1 }
 0x2a3   : > { %10769 = vmatmul.msk.bf16.gmra.mxu3 %vm1074_vm2, %v19142_v32 }
 0x2a4   : > { %19143 = vst [vmem:[#allocation30_spill] sm:$0xff] %v15316_v4  ;;  %11079 = vmatmul.msk.bf16.gmra.mxu0 %vm1074_vm2, %v15311_v19  ;;  %v7326_v32 = vor.u32 %v18894_v37, %v15316_v4  ;;  %v6421_v12 = vrot.slane %v6419_v10, 3  ;;  %v12980_v10 = vld [vmem:[%s18778_s3 + $0xe0] sm:$0xff]  ;;  %3305 = vmatpush.bf16.msrb.mxu3 %v12991_v5  ;;  %v18901_v4 = vshll.u32 %v15357_v7, 16 }
 0x2a5   : > { %v15322_v25 = vpop.f32.mrf.mxu2  ;;  %3129 = vmatpush.bf16.msra.mxu2 %v12980_v10  ;;  %v1803_v10 = vadd.f32 %v14734_v26, %v1626_v39 }
 0x2a6   : > { %v1472_v49 = vpop.f32.mrf.mxu3  ;;  %v15333_v36 = vsel %vm998_vm3, %v7326_v32, %v7329_v51  ;;  %v15335_v31 = vor.u32 %v6424_v29, %v6421_v12  ;;  %v3430_v29 = vsel %vm2882_vm8, %v3420_v54, %v3429_v9  ;;  %v18898_v12 = vshll.u32 %v15345_v61, 16 }
 0x2a7   : > { %v15324_v11 = vpop.f32.mrf.mxu1  ;;  %v1497_v17 = vadd.f32 %v1472_v49, %v14887_v56  ;;  %19144 = vst [vmem:[#allocation107_spill] sm:$0xff] %v15333_v36 }
 0x2a8   : > { %19145 = vst [vmem:[#allocation108_spill] sm:$0xff] %v15335_v31  ;;  %v15343_v2 = vsel %vm2882_vm8, %v15138_v13, %v15335_v31 }
 0x2a9   : > { %v2986_v15 = vpop.f32.mrf.mxu0  ;;  %19146 = vst [vmem:[#allocation109_spill] sm:$0xff] %v15343_v2 }
 0x2aa   : > { %v12989_v15 = vld [vmem:[#allocation2 + $0x50] sm:$0xff] }
 0x2ab   : > { %v3432_v54 = vshrl.u32 %v12989_v15, 16 }
 0x2ad   : > { %v1958_v56 = vpop.f32.mrf.mxu2  ;;  %v3434_v31 = vrot.slane %v3432_v54, 3  ;;  %v1627_v54 = vadd.f32 %v14712_v27, %v1497_v17  ;;  %v13012_v27 = vld [vmem:[%s18778_s3 + $0x140] sm:$0xff] }
 0x2ae   : > { %v1474_v49 = vpop.f32.mrf.mxu3  ;;  %v15363_v56 = vld [vmem:[#allocation2 + $0x3c] sm:$0xff] }
 0x2af   : > { %v15347_v22 = vpop.f32.mrf.mxu1  ;;  %v3435_v49 = vshll.u32 %v12989_v15, 16  ;;  %v3556_v15 = vld [vmem:[#allocation2 + $0x58] sm:$0x1]  ;;  %v1804_v17 = vadd.f32 %v14742_v57, %v1627_v54  ;;  %v19151_v54 = vrot.slane %v15050_v21, 2 }
 0x2b0   : > { %v3593_v39 = vunpack.c.l.b16 %v3556_v15 }
 0x2b1   : > { %v2989_v32 = vpop.f32.mrf.mxu0  ;;  %v3437_v47 = vrot.slane %v3435_v49, 4 }
 0x2b2   : > { %11037 = vmatmul.msk.bf16.gmra.mxu1 %vm1074_vm2, %v3430_v29  ;;  %10854 = vmatmul.msk.bf16.gmra.mxu2 %vm1074_vm2, %v15074_v23  ;;  %v4475_v29 = vrot.slane %v18898_v12, 2  ;;  %v18902_v23 = vshrl.u32 %v15277_v33, 16  ;;  %v18911_v33 = vshrl.u32 %v15357_v7, 16 }
 0x2b3   : > { %10770 = vmatmul.msk.bf16.gmra.mxu3 %vm1074_vm2, %v14514_v30  ;;  %v15375_v30 = vld [vmem:[#allocation2 + $0x54] sm:$0xf] }
 0x2b4   : > { %11080 = vmatmul.msk.bf16.gmra.mxu0 %vm1074_vm2, %v15363_v56  ;;  %19148 = vst [vmem:[#allocation111_spill] sm:$0xff] %v15375_v30  ;;  %v4476_v36 = vor.u32 %v4475_v29, %v4474_v8  ;;  %v7333_v12 = vor.u32 %v18902_v23, %v7329_v51  ;;  %v18903_v26 = vunpack.c.l.b16 %v15375_v30  ;;  %v13013_v51 = vld [vmem:[%s18778_s3 + $0x148] sm:$0xff]  ;;  %v15411_v23 = vld [vmem:[#allocation2 + $0x50] sm:$0xff] }
 0x2b5   : > { %v1961_v32 = vpop.f32.mrf.mxu2  ;;  %4096 = vmatpush.bf16.msrb.mxu1 %v13013_v51  ;;  %v18904_v57 = vshrl.u32 %v15411_v23, 16 }
 0x2b6   : > { %v1477_v6 = vpop.f32.mrf.mxu3  ;;  %v15386_v5 = vsel %vm1360_vm4, %v14686_v35, %v4476_v36  ;;  %v15388_v32 = vld [vmem:[#allocation2 + $0x4c] sm:$0xff]  ;;  %v3438_v35 = vor.u32 %v3437_v47, %v3434_v31  ;;  %v15404_v8 = vpack.c.b16 %v3593_v39, %v18903_v26 }
 0x2b7   : > { %v2848_v37 = vpop.f32.mrf.mxu1  ;;  %19149 = vst [vmem:[#allocation112_spill] sm:$0xff] %v15386_v5  ;;  %v7336_v6 = vrot.slane %v18901_v4, 1  ;;  %v3749_v29 = vshll.u32 %v15388_v32, 16  ;;  %v3753_v51 = vshrl.u32 %v15388_v32, 16  ;;  %v15446_v26 = vld [vmem:[#allocation2 + $0x8c] sm:$0xff] }
 0x2b8   : > { %v15382_v37 = vadd.f32 %v15279_v34, %v1803_v10  ;;  %v3439_v47 = vsel %vm2882_vm8, %v3429_v9, %v3438_v35  ;;  %v18905_v9 = vshll.u32 %v15411_v23, 16  ;;  %v19187_v5 = vld [vmem:[#allocation32_spill] sm:$0xff] }
 0x2b9   : > { %v15397_v34 = vpop.f32.mrf.mxu0  ;;  %v15400_v49 = vsel %vm998_vm3, %v7333_v12, %v7336_v6  ;;  %4097 = vmatpush.bf16.msrb.mxu1 %v13012_v27  ;;  %v15416_v12 = vadd.f32 %v15322_v25, %v1804_v17  ;;  %v15419_v39 = vrot.slane %v3749_v29, 1  ;;  %v19152_v29 = vld [vmem:[#allocation31_spill] sm:$0xff]  ;;  %v7340_v2 = vor.u32 %v18911_v33, %v7336_v6  ;;  %v13015_v6 = vld [vmem:[%s18778_s3 + $0x158] sm:$0xff] }
 0x2ba   : > { %19150 = vst [vmem:[#allocation113_spill] sm:$0xff] %v15400_v49  ;;  %v19153_v27 = vrot.slane %v19152_v29, 2  ;;  %v15436_v17 = vld [vmem:[#allocation2 + $0x44] sm:$0xff]  ;;  %v18910_v49 = vshll.u32 %v15446_v26, 16  ;;  %4257 = vmatpush.bf16.msrb.mxu0 %v13015_v6 }
 0x2bb   : > { %v3755_v25 = vor.u32 %v3753_v51, %v15419_v39  ;;  %19154 = vst [vmem:[#allocation31_spill] sm:$0xff] %v15446_v26  ;;  %v13445_v33 = vld [vmem:[#allocation2 + $0x24] sm:$0xff]  }
 0x2bc   : > { %v7343_v13 = vrot.slane %v18910_v49, 1  ;;  %v19159_v49 = vld [vmem:[#allocation15_spill] sm:$0xff] }
 0x2bd   : > { %v1963_v15 = vpop.f32.mrf.mxu2 }
 0x2be   : > { %v1479_v4 = vpop.f32.mrf.mxu3 }
 0x2bf   : > { %v2851_v10 = vpop.f32.mrf.mxu1  ;;  %v1500_v31 = vadd.f32 %v1479_v4, %v14941_v63 }
 0x2c0   : > { %v3756_v10 = vshll.u32 %v15404_v8, 16 }
 0x2c1   : > { %v15427_v63 = vpop.f32.mrf.mxu0 }
 0x2c2   : > { %11038 = vmatmul.msk.bf16.gmra.mxu1 %vm1074_vm2, %v3439_v47  ;;  %10855 = vmatmul.msk.bf16.gmra.mxu2 %vm1074_vm2, %v19151_v54  ;;  %v15431_v4 = vrot.slane %v3756_v10, 1  ;;  %v5133_v47 = vrot.slane %v18904_v57, 1  ;;  %v5134_v54 = vrot.slane %v18905_v9, 2  ;;  %v15456_v57 = vsel %vm1360_vm4, %v4476_v36, %v15039_v1  ;;  %v12972_v36 = vld [vmem:[#allocation2 + $0x14] sm:$0xff] }
 0x2c3   : > { %10771 = vmatmul.msk.bf16.gmra.mxu3 %vm1074_vm2, %v19153_v27  ;;  %19156 = vst [vmem:[#allocation115_spill] sm:$0xff] %v15456_v57  ;;  %v15468_v1 = vsel %vm998_vm3, %v7340_v2, %v7343_v13 }
 0x2c4   : > { %v15442_v21 = vsel %vm998_vm3, %v3755_v25, %v15431_v4  ;;  %11081 = vmatmul.msk.bf16.gmra.mxu0 %vm1074_vm2, %v15436_v17  ;;  %v15452_v27 = vor.u32 %v5134_v54, %v5133_v47  ;;  %19158 = vst [vmem:[#allocation117_spill] sm:$0xff] %v15468_v1  ;;  %v4030_v1 = vunpack.c.l.b16 %v13445_v33  ;;  %v12973_v33 = vld [vmem:[#allocation2 + $0x1c] sm:$0xff] }
 0x2c5   : > { %v1966_v51 = vpop.f32.mrf.mxu2 }
 0x2c6   : > { %v1482_v29 = vpop.f32.mrf.mxu3 }
 0x2c7   : > { %v15448_v10 = vpop.f32.mrf.mxu1  ;;  %v1501_v25 = vadd.f32 %v1482_v29, %v14976_v50 }
 0x2c8   : > { %19155 = vst [vmem:[#allocation114_spill] sm:$0xff] %v15448_v10 }
 0x2c9   : > { %v2996_v9 = vpop.f32.mrf.mxu0 }
 0x2ca   : > { %v1630_v9 = vadd.f32 %v14746_v28, %v1500_v31  ;;  %v18914_v31 = vshrl.u32 %v15446_v26, 16  ;;  %v19166_v26 = vld [vmem:[#allocation50_spill] sm:$0xff] }
 0x2cc   : > { %v1807_v28 = vadd.f32 %v14779_v3, %v1630_v9  ;;  %v1631_v3 = vadd.f32 %v14754_v42, %v1501_v25 }
 0x2cd   : > { %v1968_v41 = vpop.f32.mrf.mxu2 }
 0x2ce   : > { %v1484_v54 = vpop.f32.mrf.mxu3  ;;  %v15498_v6 = vadd.f32 %v1963_v15, %v1807_v28  ;;  %v1808_v15 = vadd.f32 %v14788_v16, %v1631_v3  ;;  %v19168_v16 = vld [vmem:[#allocation19_spill] sm:$0xff] }
 0x2cf   : > { %v15465_v47 = vpop.f32.mrf.mxu1  ;;  %v1502_v50 = vadd.f32 %v1484_v54, %v14997_v46  ;;  %v13014_v46 = vld [vmem:[%s18778_s3 + $0x150] sm:$0xff] }
 0x2d0   : > { %19157 = vst [vmem:[#allocation116_spill] sm:$0xff] %v15465_v47  ;;  %4258 = vmatpush.bf16.msrb.mxu0 %v13014_v46  ;;  %v5914_v46 = vld [vmem:[#allocation2 + $0x50] sm:$0x8]  ;;  %v15519_v25 = vadd.f32 %v1966_v51, %v1808_v15  ;;  %v19170_v51 = vld [vmem:[#allocation53_spill] sm:$0xff] }
 0x2d1   : > { %v2999_v29 = vpop.f32.mrf.mxu0  ;;  %v1632_v53 = vadd.f32 %v19166_v26, %v1502_v50  ;;  %v19171_v50 = vld [vmem:[#allocation80_spill] sm:$0xff] }
 0x2d2   : > { %11039 = vmatmul.msk.bf16.gmra.mxu1 %vm1074_vm2, %v3438_v35  ;;  %10960 = vmatmul.msk.bf16.vlgmr.msra.gmra.mxu2 %vm1074_vm2, %v12972_v36  ;;  %v15502_v29 = vor.u32 %v18914_v31, %v7343_v13  ;;  %v19165_v13 = vld [vmem:[#allocation35_spill] sm:$0xff]  ;;  %v5922_v31 = vunpack.c.l.b16 %v5914_v46 }
 0x2d3   : > { %10868 = vmatmul.msk.bf16.vlgmr.msra.gmra.mxu3 %vm1074_vm2, %v19159_v49  ;;  %v15493_v49 = vsel %vm1360_vm4, %v15452_v27, %v14963_v40  ;;  %v1809_v15 = vadd.f32 %v19170_v51, %v1632_v53 }
 0x2d4   : > { %11082 = vmatmul.msk.bf16.gmra.mxu0 %vm1074_vm2, %v15388_v32  ;;  %19161 = vst [vmem:[#allocation118_spill] sm:$0xff] %v15502_v29  ;;  %v15505_v32 = vld [vmem:[#allocation2 + $0x54] sm:$0xf] }
 0x2d5   : > { %v15482_v2 = vpop.f32.mrf.mxu2  ;;  %19162 = vst [vmem:[#allocation119_spill] sm:$0xff] %v15505_v32  ;;  %v18919_v40 = vunpack.c.l.b16 %v15505_v32  ;;  %v15535_v26 = vadd.f32 %v1968_v41, %v1809_v15 }
 0x2d6   : > { %v2060_v54 = vpop.f32.mrf.mxu3 }
 0x2d7   : > { %v15484_v35 = vpop.f32.mrf.mxu1  ;;  %v15496_v36 = vadd.f32 %v2060_v54, %v15034_v62  ;;  %v4046_v54 = vpack.c.b16 %v19165_v13, %v4030_v1  ;;  %v5924_v29 = vpack.c.b16 %v18919_v40, %v5922_v31  ;;  %v11380_v31 = vld [vmem:[#allocation2 + $0x50] sm:$0xe]  ;;  %v19172_v40 = vrot.slane %v19171_v50, 3 }
 0x2d8   : > { %19160 = vst [vmem:[#allocation15_spill] sm:$0xff] %v15484_v35 }
 0x2d9   : > { %v15507_v9 = vpop.f32.mrf.mxu0  ;;  %v5926_v1 = vrot.slane %v5924_v29, 3 }
 0x2da   : > { %19163 = vst [vmem:[#allocation120_spill] sm:$0xff] %v15507_v9 }
 0x2dd   : > { %v15510_v7 = vpop.f32.mrf.mxu2 }
 0x2de   : > { %v2062_v28 = vpop.f32.mrf.mxu3 }
 0x2df   : > { %v15512_v62 = vpop.f32.mrf.mxu1  ;;  %v15517_v42 = vadd.f32 %v2062_v28, %v15067_v58  ;;  %v13042_v28 = vld [vmem:[#allocation2 + $0x50] sm:$0xf0] }
 0x2e0   : > { %19164 = vst [vmem:[#allocation121_spill] sm:$0xff] %v15512_v62 }
 0x2e1   : > { %v15525_v0 = vpop.f32.mrf.mxu0 }
 0x2e2   : > { %11160 = vmatmul.msk.bf16.vlgmr.msrb.gmra.mxu1 %vm1074_vm2, %v4046_v54  ;;  %19167 = vst [vmem:[#allocation35_spill] sm:$0xff] %v15525_v0  ;;  %10961 = vmatmul.msk.bf16.gmra.mxu2 %vm1074_vm2, %v12973_v33  ;;  %v15540_v33 = vsel %vm2277_vm6, %v5926_v1, %v19172_v40  ;;  %v12974_v40 = vld [vmem:[#allocation2 + $0x24] sm:$0xff]  ;;  %v4160_v1 = vshrl.u32 %v4046_v54, 16 }
 0x2e3   : > { %10869 = vmatmul.msk.bf16.gmra.mxu3 %vm1074_vm2, %v19168_v16  ;;  %19173 = vst [vmem:[#allocation19_spill] sm:$0xff] %v15540_v33  ;;  %v15542_v16 = vor.u32 %v13042_v28, %v11380_v31  ;;  %v19176_v31 = vld [vmem:[#allocation34_spill] sm:$0xff] }
 0x2e4   : > { %11083 = vmatmul.msk.bf16.gmra.mxu0 %vm1074_vm2, %v15404_v8  ;;  %v19177_v28 = vshll.u32 %v19176_v31, 16  ;;  %v13451_v0 = vld [vmem:[#allocation2 + $0x20] sm:$0xff] }
 0x2e5   : > { %v2520_v58 = vpop.f32.mrf.mxu2  ;;  %19174 = vst [vmem:[#allocation53_spill] sm:$0xff] %v15542_v16  ;;  %v5511_v57 = vshrl.u32 %v15542_v16, 16  ;;  %v5514_v53 = vshll.u32 %v15542_v16, 16  ;;  %v3249_v47 = vrot.slane %v13451_v0, 3 }
 0x2e6   : > { %v2065_v46 = vpop.f32.mrf.mxu3  ;;  %v4162_v58 = vshll.u32 %v4046_v54, 16  ;;  %v4168_v50 = vrot.slane %v19177_v28, 1 }
 0x2e7   : > { %v15530_v3 = vpop.f32.mrf.mxu1  ;;  %v5513_v41 = vrot.slane %v5511_v57, 1  ;;  %v5516_v15 = vrot.slane %v5514_v53, 2  ;;  %v12990_v57 = vld [vmem:[%s18778_s3 + $0xf0] sm:$0xff]  ;;  %v19180_v53 = vld [vmem:[#allocation89_spill] sm:$0xff] }
 0x2e8   : > { %19169 = vst [vmem:[#allocation50_spill] sm:$0xff] %v15530_v3  ;;  %v4164_v46 = vrot.slane %v4162_v58, 1  ;;  %3306 = vmatpush.bf16.msrb.mxu3 %v12990_v57  ;;  %v12975_v57 = vld [vmem:[#allocation2 + $0x2c] sm:$0xff] }
 0x2e9   : > { %v15544_v29 = vpop.f32.mrf.mxu0 }
 0x2ea   : > { %19175 = vst [vmem:[#allocation80_spill] sm:$0xff] %v15544_v29  ;;  %v4165_v33 = vor.u32 %v4164_v46, %v4160_v1  ;;  %v19223_v29 = vld [vmem:[#allocation67_spill] sm:$0xff] }
 0x2ec   : > { %v4169_v58 = vsel %vm998_vm3, %v4165_v33, %v4168_v50 }
 0x2ed   : > { %v2522_v48 = vpop.f32.mrf.mxu2 }
 0x2ee   : > { %v2067_v51 = vpop.f32.mrf.mxu3  ;;  %v5517_v48 = vor.u32 %v5516_v15, %v5513_v41 }
 0x2ef   : > { %v3490_v18 = vpop.f32.mrf.mxu1  ;;  %v19179_v51 = vld [vmem:[#allocation24_spill] sm:$0xff] }
 0x2f0   : > { %v15565_v54 = vsel %vm1360_vm4, %v5517_v48, %v19180_v53  ;;  %v15582_v53 = vld [vmem:[#allocation2 + $0x34] sm:$0xff] }
 0x2f1   : > { %v15555_v18 = vpop.f32.mrf.mxu0  ;;  %19181 = vst [vmem:[#allocation24_spill] sm:$0xff] %v15565_v54  ;;  %v19186_v54 = vshrl.u32 %v19176_v31, 16 }
 0x2f2   : > { %11161 = vmatmul.msk.bf16.gmra.mxu1 %vm1074_vm2, %v15548_v20  ;;  %10962 = vmatmul.msk.bf16.gmra.mxu2 %vm1074_vm2, %v12974_v40  ;;  %19178 = vst [vmem:[#allocation34_spill] sm:$0xff] %v15555_v18  ;;  %v19196_v18 = vld [vmem:[#allocation54_spill] sm:$0xff] }
 0x2f3   : > { %10870 = vmatmul.msk.bf16.gmra.mxu3 %vm1074_vm2, %v19179_v51  ;;  %v4172_v16 = vor.u32 %v19186_v54, %v4168_v50  ;;  %v15604_v50 = vld [vmem:[#allocation2 + $0x3c] sm:$0xff] }
 0x2f4   : > { %11180 = vmatmul.msk.bf16.vlgmr.msrb.gmra.mxu0 %vm1074_vm2, %v4169_v58  ;;  %v19184_v58 = vld [vmem:[#allocation39_spill] sm:$0xff] }
 0x2f5   : > { %v15567_v28 = vpop.f32.mrf.mxu2 }
 0x2f6   : > { %v2070_v46 = vpop.f32.mrf.mxu3 }
 0x2f7   : > { %v3492_v41 = vpop.f32.mrf.mxu1  ;;  %v15571_v15 = vadd.f32 %v2070_v46, %v15213_v45 }
 0x2f8   : > { %v19185_v41 = vshll.u32 %v19184_v58, 16 }
 0x2f9   : > { %v15573_v40 = vpop.f32.mrf.mxu0 }
 0x2fa   : > { %19182 = vst [vmem:[#allocation89_spill] sm:$0xff] %v15573_v40  ;;  %v4175_v45 = vrot.slane %v19185_v41, 1 }
 0x2fd   : > { %v15575_v1 = vpop.f32.mrf.mxu2 }
 0x2fe   : > { %v2072_v33 = vpop.f32.mrf.mxu3 }
 0x2ff   : > { %v15577_v51 = vpop.f32.mrf.mxu1  ;;  %v15580_v48 = vadd.f32 %v2072_v33, %v15246_v24  ;;  %v4176_v24 = vsel %vm998_vm3, %v4172_v16, %v4175_v45  ;;  %v19190_v16 = vld [vmem:[#allocation43_spill] sm:$0xff] }
 0x300   : > { %19183 = vst [vmem:[#allocation122_spill] sm:$0xff] %v15577_v51  ;;  %v19191_v54 = vshll.u32 %v19190_v16, 16 }
 0x301   : > { %v3652_v46 = vpop.f32.mrf.mxu0 }
 0x302   : > { %11162 = vmatmul.msk.bf16.gmra.mxu1 %vm1074_vm2, %v15582_v53  ;;  %10963 = vmatmul.msk.bf16.gmra.mxu2 %vm1074_vm2, %v12975_v57 }
 0x303   : > { %10871 = vmatmul.msk.bf16.gmra.mxu3 %vm1074_vm2, %v19187_v5  ;;  %v12976_v5 = vld [vmem:[#allocation2 + $0x34] sm:$0xff] }
 0x304   : > { %11181 = vmatmul.msk.bf16.gmra.mxu0 %vm1074_vm2, %v4176_v24 }
 0x305   : > { %v15594_v33 = vpop.f32.mrf.mxu2 }
 0x306   : > { %v2075_v30 = vpop.f32.mrf.mxu3 }
 0x307   : > { %v15596_v51 = vpop.f32.mrf.mxu1  ;;  %v15600_v41 = vadd.f32 %v2075_v30, %v15291_v44  ;;  %v19193_v44 = vshrl.u32 %v19184_v58, 16 }
 0x308   : > { %19188 = vst [vmem:[#allocation39_spill] sm:$0xff] %v15596_v51  ;;  %v4182_v51 = vrot.slane %v19191_v54, 1 }
 0x309   : > { %v3654_v57 = vpop.f32.mrf.mxu0  ;;  %v4179_v30 = vor.u32 %v19193_v44, %v4175_v45  ;;  %v19198_v45 = vld [vmem:[#allocation52_spill] sm:$0xff] }
 0x30a   : > { %v19194_v57 = vld [vmem:[#allocation33_spill] sm:$0xff]  ;;  %v2249_v44 = vadd.f32 %v19198_v45, %v15517_v42 }
 0x30d   : > { %v2532_v46 = vpop.f32.mrf.mxu2 }
 0x30e   : > { %v2077_v31 = vpop.f32.mrf.mxu3  ;;  %v4183_v46 = vsel %vm998_vm3, %v4179_v30, %v4182_v51 }
 0x30f   : > { %v15602_v32 = vpop.f32.mrf.mxu1  ;;  %v19195_v31 = vld [vmem:[#allocation51_spill] sm:$0xff] }
 0x310   : > { %19189 = vst [vmem:[#allocation32_spill] sm:$0xff] %v15602_v32  ;;  %v2248_v32 = vadd.f32 %v19195_v31, %v15496_v36 }
 0x311   : > { %v15611_v24 = vpop.f32.mrf.mxu0 }
 0x312   : > { %11163 = vmatmul.msk.bf16.gmra.mxu1 %vm1074_vm2, %v15604_v50  ;;  %10964 = vmatmul.msk.bf16.gmra.mxu2 %vm1074_vm2, %v12976_v5  ;;  %19192 = vst [vmem:[#allocation43_spill] sm:$0xff] %v15611_v24  ;;  %v2378_v5 = vadd.f32 %v19196_v18, %v2248_v32  ;;  %v12977_v32 = vld [vmem:[#allocation2 + $0x3c] sm:$0xff]  ;;  %v19199_v18 = vld [vmem:[#allocation48_spill] sm:$0xff] }
 0x313   : > { %10872 = vmatmul.msk.bf16.gmra.mxu3 %vm1074_vm2, %v19194_v57 }
 0x314   : > { %11182 = vmatmul.msk.bf16.gmra.mxu0 %vm1074_vm2, %v4183_v46  ;;  %v15625_v58 = vadd.f32 %v15482_v2, %v2378_v5  ;;  %v19201_v46 = vld [vmem:[#allocation55_spill] sm:$0xff] }
 0x315   : > { %v2535_v40 = vpop.f32.mrf.mxu2  ;;  %v2379_v31 = vadd.f32 %v19201_v46, %v2249_v44 }
 0x316   : > { %v2080_v54 = vpop.f32.mrf.mxu3  ;;  %v19200_v40 = vshll.u32 %v19199_v18, 16 }
 0x317   : > { %v3502_v3 = vpop.f32.mrf.mxu1  ;;  %v19203_v54 = vshrl.u32 %v19190_v16, 16 }
 0x318   : > { %v15634_v3 = vld [vmem:[#allocation2 + $0x44] sm:$0xff]  ;;  %v4189_v2 = vrot.slane %v19200_v40, 1 }
 0x319   : > { %v15622_v62 = vpop.f32.mrf.mxu0  ;;  %v4186_v5 = vor.u32 %v19203_v54, %v4182_v51  ;;  %v13003_v51 = vld [vmem:[%s18778_s3 + $0x128] sm:$0xff] }
 0x31a   : > { %19197 = vst [vmem:[#allocation33_spill] sm:$0xff] %v15622_v62  ;;  %3805 = vmatpush.bf16.msrb.mxu2 %v13003_v51  ;;  %v12978_v54 = vld [vmem:[#allocation2 + $0x44] sm:$0xff]  ;;  %v13005_v51 = vld [vmem:[%s18778_s3 + $0x138] sm:$0xff] }
 0x31b   : > { %v4190_v45 = vsel %vm998_vm3, %v4186_v5, %v4189_v2  ;;  %v19207_v5 = vshrl.u32 %v19199_v18, 16  ;;  %3934 = vmatpush.bf16.msra.mxu3 %v13005_v51  ;;  %v10950_v51 = vld [vmem:[#allocation2 + $0x4c] sm:$0xf] }
 0x31d   : > { %v15629_v57 = vpop.f32.mrf.mxu2 }
 0x31e   : > { %v2082_v24 = vpop.f32.mrf.mxu3 }
 0x31f   : > { %v3505_v30 = vpop.f32.mrf.mxu1  ;;  %v15632_v36 = vadd.f32 %v2082_v24, %v15382_v37  ;;  %v19204_v37 = vld [vmem:[#allocation37_spill] sm:$0xff]  ;;  %v15649_v24 = vadd.f32 %v15510_v7, %v2379_v31 }
 0x321   : > { %v15642_v42 = vpop.f32.mrf.mxu0 }
 0x322   : > { %11164 = vmatmul.msk.bf16.gmra.mxu1 %vm1074_vm2, %v15634_v3  ;;  %10965 = vmatmul.msk.bf16.gmra.mxu2 %vm1074_vm2, %v12977_v32  ;;  %19202 = vst [vmem:[#allocation51_spill] sm:$0xff] %v15642_v42  ;;  %v19222_v42 = vld [vmem:[#allocation26_spill] sm:$0xff] }
 0x323   : > { %10873 = vmatmul.msk.bf16.gmra.mxu3 %vm1074_vm2, %v19204_v37  ;;  %v4193_v37 = vor.u32 %v19207_v5, %v4189_v2  ;;  %v19209_v2 = vld [vmem:[#allocation56_spill] sm:$0xff] }
 0x324   : > { %11183 = vmatmul.msk.bf16.gmra.mxu0 %vm1074_vm2, %v4190_v45 }
 0x325   : > { %v15652_v30 = vpop.f32.mrf.mxu2 }
 0x326   : > { %v2085_v44 = vpop.f32.mrf.mxu3 }
 0x327   : > { %v15654_v40 = vpop.f32.mrf.mxu1  ;;  %v15658_v32 = vadd.f32 %v2085_v44, %v15416_v12  ;;  %v19208_v12 = vshll.u32 %v15345_v61, 16  ;;  %v13002_v44 = vld [vmem:[%s18778_s3 + $0x120] sm:$0xff] }
 0x328   : > { %19205 = vst [vmem:[#allocation54_spill] sm:$0xff] %v15654_v40  ;;  %3806 = vmatpush.bf16.msrb.mxu2 %v13002_v44 }
 0x329   : > { %v3664_v16 = vpop.f32.mrf.mxu0  ;;  %v4196_v45 = vrot.slane %v19208_v12, 1  ;;  %v19210_v12 = vld [vmem:[#allocation21_spill] sm:$0xff] }
 0x32b   : > { %v4197_v18 = vsel %vm998_vm3, %v4193_v37, %v4196_v45 }
 0x32d   : > { %v2542_v7 = vpop.f32.mrf.mxu2 }
 0x32e   : > { %v2087_v31 = vpop.f32.mrf.mxu3  ;;  %v2252_v7 = vadd.f32 %v19209_v2, %v15571_v15  ;;  %v19212_v15 = vld [vmem:[#allocation12_spill] sm:$0xff] }
 0x32f   : > { %v15663_v46 = vpop.f32.mrf.mxu1  ;;  %v2253_v2 = vadd.f32 %v19212_v15, %v15580_v48  ;;  %v19213_v48 = vshrl.u32 %v15345_v61, 16 }
 0x330   : > { %19206 = vst [vmem:[#allocation52_spill] sm:$0xff] %v15663_v46  ;;  %v2382_v44 = vadd.f32 %v19210_v12, %v2252_v7 }
 0x331   : > { %v3667_v16 = vpop.f32.mrf.mxu0  ;;  %v4200_v12 = vor.u32 %v19213_v48, %v4196_v45  ;;  %v19218_v45 = vld [vmem:[#allocation20_spill] sm:$0xff] }
 0x332   : > { %11165 = vmatmul.msk.bf16.gmra.mxu1 %vm1074_vm2, %v15345_v61  ;;  %10966 = vmatmul.msk.bf16.gmra.mxu2 %vm1074_vm2, %v12978_v54  ;;  %v15691_v37 = vadd.f32 %v15567_v28, %v2382_v44  ;;  %v19214_v44 = vld [vmem:[#allocation16_spill] sm:$0xff] }
 0x333   : > { %10874 = vmatmul.msk.bf16.gmra.mxu3 %vm1074_vm2, %v15218_v43  ;;  %v13021_v43 = vld [vmem:[%s18778_s3 + $0x188] sm:$0xff]  ;;  %v2383_v15 = vadd.f32 %v19214_v44, %v2253_v2 }
 0x334   : > { %11184 = vmatmul.msk.bf16.gmra.mxu0 %vm1074_vm2, %v4197_v18  ;;  %4662 = vmatpush.bf16.msra.mxu1 %v13021_v43  ;;  %v15703_v43 = vld [vmem:[#allocation2 + $0x54] sm:$0xff] }
 0x335   : > { %v2545_v31 = vpop.f32.mrf.mxu2 }
 0x336   : > { %v2090_v54 = vpop.f32.mrf.mxu3 }
 0x337   : > { %v3512_v5 = vpop.f32.mrf.mxu1  ;;  %v13020_v54 = vld [vmem:[%s18778_s3 + $0x180] sm:$0xff] }
 0x338   : > { %v12979_v5 = vld [vmem:[#allocation2 + $0x4c] sm:$0x10]  ;;  %4663 = vmatpush.bf16.msra.mxu1 %v13020_v54  ;;  %v15718_v54 = vadd.f32 %v15575_v1, %v2383_v15  ;;  %v19221_v1 = vld [vmem:[#allocation18_spill] sm:$0xff] }
 0x339   : > { %v15688_v16 = vpop.f32.mrf.mxu0  ;;  %v10951_v28 = vor.u32 %v12979_v5, %v10950_v51  ;;  %v2254_v5 = vadd.f32 %v19218_v45, %v15600_v41  ;;  %v3714_v15 = vshll.u32 %v19221_v1, 16 }
 0x33a   : > { %19211 = vst [vmem:[#allocation48_spill] sm:$0xff] %v15688_v16  ;;  %v19216_v16 = vld [vmem:[#allocation9_spill] sm:$0xff] }
 0x33b   : > { %v19217_v40 = vshll.u32 %v19216_v16, 16 }
 0x33d   : > { %v15695_v31 = vpop.f32.mrf.mxu2 }
 0x33e   : > { %v2092_v46 = vpop.f32.mrf.mxu3 }
 0x33f   : > { %v3515_v18 = vpop.f32.mrf.mxu1  ;;  %v15701_v7 = vadd.f32 %v2092_v46, %v15498_v6  ;;  %v4203_v6 = vrot.slane %v19217_v40, 1  ;;  %v4008_v46 = vld [vmem:[#allocation2 + $0x60] sm:$0x1] }
 0x340   : > { %v4045_v40 = vunpack.c.l.b16 %v4008_v46  ;;  %v3716_v46 = vrot.slane %v3714_v15, 1 }
 0x341   : > { %v15711_v18 = vpop.f32.mrf.mxu0  ;;  %v4204_v51 = vsel %vm998_vm3, %v4200_v12, %v4203_v6  ;;  %v2384_v12 = vadd.f32 %v19222_v42, %v2254_v5  ;;  %v19226_v5 = vshrl.u32 %v19216_v16, 16  ;;  %v13028_v16 = vld [vmem:[%s18778_s3 + $0x10] sm:$0xff] }
 0x342   : > { %11166 = vmatmul.msk.bf16.gmra.mxu1 %vm1074_vm2, %v15703_v43  ;;  %10967 = vmatmul.msk.bf16.gmra.mxu2 %vm1074_vm2, %v10951_v28  ;;  %19215 = vst [vmem:[#allocation55_spill] sm:$0xff] %v15711_v18  ;;  %v4053_v41 = vpack.c.b16 %v4045_v40, %v19223_v29 }
 0x343   : > { %10875 = vmatmul.msk.bf16.gmra.mxu3 %vm1074_vm2, %v15206_v60  ;;  %v19220_v60 = vld [vmem:[#allocation76_spill] sm:$0xff]  ;;  %v15736_v35 = vadd.f32 %v15594_v33, %v2384_v12  ;;  %v4207_v40 = vor.u32 %v19226_v5, %v4203_v6  ;;  %v3721_v5 = vshll.u32 %v15252_v38, 16 }
 0x344   : > { %11185 = vmatmul.msk.bf16.gmra.mxu0 %vm1074_vm2, %v4204_v51  ;;  %v3710_v18 = vshll.u32 %v19220_v60, 16  ;;  %v4208_v9 = vshll.u32 %v4053_v41, 16 }
 0x345   : > { %v15723_v2 = vpop.f32.mrf.mxu2 }
 0x346   : > { %v2095_v48 = vpop.f32.mrf.mxu3  ;;  %v3712_v45 = vrot.slane %v3710_v18, 1  ;;  %v19225_v18 = vld [vmem:[#allocation66_spill] sm:$0xff] }
 0x347   : > { %v15725_v28 = vpop.f32.mrf.mxu1  ;;  %v15729_v44 = vadd.f32 %v2095_v48, %v15519_v25  ;;  %v3708_v25 = vshrl.u32 %v19220_v60, 16  ;;  %v3248_v33 = vrot.slane %v19225_v18, 3  ;;  %v13029_v60 = vld [vmem:[%s18778_s3 + $0x18] sm:$0xff] }
 0x348   : > { %19219 = vst [vmem:[#allocation37_spill] sm:$0xff] %v15725_v28  ;;  %4925 = vmatpush.bf16.msra.mxu0 %v13029_v60  ;;  %v19229_v60 = vld [vmem:[#allocation22_spill] sm:$0xff] }
 0x349   : > { %v3674_v62 = vpop.f32.mrf.mxu0  ;;  %v3250_v0 = vsel %vm2277_vm6, %v3248_v33, %v3249_v47 }
 0x34a   : > { %v3713_v62 = vor.u32 %v3712_v45, %v3708_v25  ;;  %v4592_v45 = vld [vmem:[#allocation2 + $0x24] sm:$0xc] }
 0x34c   : > { %v3717_v12 = vsel %vm998_vm3, %v3713_v62, %v3716_v46  ;;  %4926 = vmatpush.bf16.msra.mxu0 %v13028_v16 }
 0x34d   : > { %v15738_v28 = vpop.f32.mrf.mxu2 }
 0x34e   : > { %v2097_v48 = vpop.f32.mrf.mxu3 }
 0x34f   : > { %v15740_v51 = vpop.f32.mrf.mxu1  ;;  %v15744_v42 = vadd.f32 %v2097_v48, %v15535_v26  ;;  %v4210_v26 = vrot.slane %v4208_v9, 1  ;;  %v4601_v9 = vunpack.c.l.b16 %v4592_v45  ;;  %v3723_v45 = vrot.slane %v3721_v5, 1 }
 0x350   : > { %19224 = vst [vmem:[#allocation56_spill] sm:$0xff] %v15740_v51  ;;  %v4212_v51 = vshrl.u32 %v4053_v41, 16 }
 0x351   : > { %v3677_v15 = vpop.f32.mrf.mxu0  ;;  %v4211_v6 = vsel %vm998_vm3, %v4207_v40, %v4210_v26  ;;  %v4603_v33 = vpack.c.b16 %v19165_v13, %v4601_v9  ;;  %v4606_v40 = vrot.slane %v15548_v20, 2 }
 0x352   : > { %11167 = vmatmul.msk.bf16.gmra.mxu1 %vm1074_vm2, %v4053_v41  ;;  %11096 = vmatmul.msk.bf16.vlgmr.msrb.gmra.mxu2 %vm1074_vm2, %v3717_v12  ;;  %v2257_v15 = vadd.f32 %v19229_v60, %v15632_v36  ;;  %v19230_v60 = vld [vmem:[#allocation28_spill] sm:$0xff]  ;;  %v19233_v41 = vld [vmem:[#allocation57_spill] sm:$0xff] }
 0x353   : > { %11012 = vmatmul.msk.bf16.vlgmr.msrb.gmra.mxu3 %vm1074_vm2, %v3250_v0 }
 0x354   : > { %11186 = vmatmul.msk.bf16.gmra.mxu0 %vm1074_vm2, %v4211_v6 }
 0x355   : > { %v15761_v25 = vpop.f32.mrf.mxu2 }
 0x356   : > { %v2692_v62 = vpop.f32.mrf.mxu3 }
 0x357   : > { %v15763_v48 = vpop.f32.mrf.mxu1  ;;  %v15767_v18 = vadd.f32 %v2692_v62, %v15625_v58  ;;  %v3718_v58 = vshrl.u32 %v19221_v1, 16  ;;  %v19231_v1 = vld [vmem:[#allocation38_spill] sm:$0xff] }
 0x358   : > { %19227 = vst [vmem:[#allocation21_spill] sm:$0xff] %v15763_v48  ;;  %v4605_v48 = vrot.slane %v4603_v33, 2  ;;  %v19232_v33 = vrot.slane %v19231_v1, 3 }
 0x359   : > { %v15771_v12 = vpop.f32.mrf.mxu0  ;;  %v3720_v9 = vor.u32 %v3718_v58, %v3716_v46 }
 0x35a   : > { %19228 = vst [vmem:[#allocation12_spill] sm:$0xff] %v15771_v12  ;;  %v4607_v62 = vsel %vm1516_vm1, %v4605_v48, %v4606_v40  ;;  %v2387_v12 = vadd.f32 %v19230_v60, %v2257_v15  ;;  %v3252_v5 = vsel %vm2277_vm6, %v3249_v47, %v19232_v33  ;;  %v2258_v48 = vadd.f32 %v19233_v41, %v15658_v32  ;;  %v15803_v15 = vld [vmem:[#allocation2 + $0x48] sm:$0xff]  }
 0x35b   : > { %v3724_v36 = vsel %vm998_vm3, %v3720_v9, %v3723_v45  ;;  %v4845_v9 = vshll.u32 %v15803_v15, 16  ;;  %v3728_v47 = vshll.u32 %v15311_v19, 16 }
 0x35c   : > { %v15796_v46 = vadd.f32 %v15629_v57, %v2387_v12  ;;  %v4608_v57 = vrot.slane %v15582_v53, 2  ;;  %v4843_v12 = vshrl.u32 %v15803_v15, 16 }
 0x35d   : > { %v15776_v0 = vpop.f32.mrf.mxu2  ;;  %v4847_v60 = vrot.slane %v4845_v9, 1 }
 0x35e   : > { %v2694_v16 = vpop.f32.mrf.mxu3 }
 0x35f   : > { %v15778_v6 = vpop.f32.mrf.mxu1  ;;  %v15782_v13 = vadd.f32 %v2694_v16, %v15649_v24  ;;  %v4214_v24 = vor.u32 %v4212_v51, %v4210_v26 }
 0x361   : > { %v15788_v10 = vpop.f32.mrf.mxu0 }
 0x362   : > { %11240 = vmatmul.msk.bf16.vlgmr.msra.gmra.mxu1 %vm1074_vm2, %v4607_v62  ;;  %11097 = vmatmul.msk.bf16.gmra.mxu2 %vm1074_vm2, %v3724_v36  ;;  %v19235_v36 = vld [vmem:[#allocation61_spill] sm:$0xff] }
 0x363   : > { %11013 = vmatmul.msk.bf16.gmra.mxu3 %vm1074_vm2, %v3252_v5  ;;  %v2388_v51 = vadd.f32 %v19235_v36, %v2258_v48  ;;  %v3725_v5 = vshrl.u32 %v15252_v38, 16  ;;  %v4848_v48 = vor.u32 %v4847_v60, %v4843_v12  ;;  %v19236_v36 = vshll.u32 %v15411_v23, 16  ;;  %v13004_v38 = vld [vmem:[%s18778_s3 + $0x130] sm:$0xff] }
 0x364   : > { %11187 = vmatmul.msk.bf16.gmra.mxu0 %vm1074_vm2, %v4214_v24  ;;  %v3730_v24 = vrot.slane %v3728_v47, 1  ;;  %3935 = vmatpush.bf16.msra.mxu3 %v13004_v38 }
 0x365   : > { %v3136_v58 = vpop.f32.mrf.mxu2  ;;  %v15812_v32 = vadd.f32 %v15652_v30, %v2388_v51  ;;  %v19238_v51 = vld [vmem:[#allocation40_spill] sm:$0xff] }
 0x366   : > { %v2697_v62 = vpop.f32.mrf.mxu3  ;;  %v4609_v58 = vsel %vm1516_vm1, %v4606_v40, %v4608_v57 }
 0x367   : > { %v15800_v16 = vpop.f32.mrf.mxu1  ;;  %v3727_v62 = vor.u32 %v3725_v5, %v3723_v45  ;;  %v4610_v5 = vrot.slane %v15604_v50, 2 }
 0x368   : > { %19234 = vst [vmem:[#allocation16_spill] sm:$0xff] %v15800_v16  ;;  %v4852_v16 = vrot.slane %v19236_v36, 1  ;;  %v3732_v36 = vshrl.u32 %v15311_v19, 16 }
 0x369   : > { %v15808_v26 = vpop.f32.mrf.mxu0  ;;  %v3731_v30 = vsel %vm998_vm3, %v3727_v62, %v3730_v24  ;;  %v4611_v38 = vsel %vm1516_vm1, %v4608_v57, %v4610_v5 }
 0x36a   : > { %v4853_v40 = vsel %vm998_vm3, %v4848_v48, %v4852_v16 }
 0x36d   : > { %v3138_v1 = vpop.f32.mrf.mxu2 }
 0x36e   : > { %v2699_v41 = vpop.f32.mrf.mxu3  ;;  %v3735_v1 = vshll.u32 %v15363_v56, 16 }
 0x36f   : > { %v4104_v33 = vpop.f32.mrf.mxu1  ;;  %v19240_v41 = vld [vmem:[#allocation27_spill] sm:$0xff] }
 0x371   : > { %v15822_v9 = vpop.f32.mrf.mxu0 }
 0x372   : > { %11241 = vmatmul.msk.bf16.gmra.mxu1 %vm1074_vm2, %v4609_v58  ;;  %11098 = vmatmul.msk.bf16.gmra.mxu2 %vm1074_vm2, %v3731_v30  ;;  %19237 = vst [vmem:[#allocation9_spill] sm:$0xff] %v15822_v9  ;;  %v2261_v58 = vadd.f32 %v19240_v41, %v15701_v7  ;;  %v3737_v30 = vrot.slane %v3735_v1, 1  ;;  %v19243_v41 = vld [vmem:[#allocation69_spill] sm:$0xff]  ;;  %v19244_v1 = vld [vmem:[#allocation58_spill] sm:$0xff] }
 0x373   : > { %11014 = vmatmul.msk.bf16.gmra.mxu3 %vm1074_vm2, %v19238_v51 }
 0x374   : > { %11276 = vmatmul.msk.bf16.vlgmr.msra.gmra.mxu0 %vm1074_vm2, %v4853_v40  ;;  %v3734_v40 = vor.u32 %v3732_v36, %v3730_v24 }
 0x375   : > { %v15830_v45 = vpop.f32.mrf.mxu2 }
 0x376   : > { %v2702_v12 = vpop.f32.mrf.mxu3  ;;  %v3738_v7 = vsel %vm998_vm3, %v3734_v40, %v3737_v30  ;;  %v19248_v40 = vld [vmem:[#allocation72_spill] sm:$0xff] }
 0x377   : > { %v4106_v47 = vpop.f32.mrf.mxu1  ;;  %v15834_v60 = vadd.f32 %v2702_v12, %v15691_v37 }
 0x378   : > { %v19242_v47 = vshrl.u32 %v15411_v23, 16  ;;  %v19247_v23 = vld [vmem:[#allocation65_spill] sm:$0xff] }
 0x379   : > { %v15837_v33 = vpop.f32.mrf.mxu0 }
 0x37a   : > { %19239 = vst [vmem:[#allocation20_spill] sm:$0xff] %v15837_v33  ;;  %v4856_v12 = vor.u32 %v19242_v47, %v4852_v16  ;;  %v2391_v33 = vadd.f32 %v19243_v41, %v2261_v58  ;;  %v2262_v16 = vadd.f32 %v19247_v23, %v15729_v44  ;;  %v4612_v47 = vrot.slane %v15634_v3, 2  ;;  %v19249_v44 = vld [vmem:[#allocation10_spill] sm:$0xff] }
 0x37c   : > { %v15862_v57 = vadd.f32 %v15695_v31, %v2391_v33  ;;  %v2392_v31 = vadd.f32 %v19248_v40, %v2262_v16  ;;  %v4613_v23 = vsel %vm1516_vm1, %v4610_v5, %v4612_v47  ;;  %v19250_v16 = vshrl.u32 %v19244_v1, 16 }
 0x37d   : > { %v15842_v62 = vpop.f32.mrf.mxu2 }
 0x37e   : > { %v2704_v51 = vpop.f32.mrf.mxu3 }
 0x37f   : > { %v15844_v48 = vpop.f32.mrf.mxu1  ;;  %v15848_v37 = vadd.f32 %v2704_v51, %v15718_v54  ;;  %v19246_v54 = vld [vmem:[#allocation44_spill] sm:$0xff] }
 0x380   : > { %19241 = vst [vmem:[#allocation76_spill] sm:$0xff] %v15844_v48  ;;  %v19245_v48 = vshll.u32 %v19244_v1, 16 }
 0x381   : > { %v4265_v19 = vpop.f32.mrf.mxu0 }
 0x382   : > { %11242 = vmatmul.msk.bf16.gmra.mxu1 %vm1074_vm2, %v4611_v38  ;;  %11099 = vmatmul.msk.bf16.gmra.mxu2 %vm1074_vm2, %v3738_v7  ;;  %v4860_v9 = vrot.slane %v19245_v48, 1  ;;  %v3742_v38 = vshll.u32 %v15436_v17, 16  ;;  %v2263_v7 = vadd.f32 %v19249_v44, %v15744_v42  ;;  %v19252_v44 = vld [vmem:[#allocation59_spill] sm:$0xff] }
 0x383   : > { %11015 = vmatmul.msk.bf16.gmra.mxu3 %vm1074_vm2, %v19246_v54  ;;  %v3739_v54 = vshrl.u32 %v15363_v56, 16  ;;  %v19253_v56 = vshll.u32 %v19252_v44, 16 }
 0x384   : > { %v4861_v24 = vsel %vm998_vm3, %v4856_v12, %v4860_v9  ;;  %v15879_v12 = vadd.f32 %v15723_v2, %v2392_v31  ;;  %v4864_v40 = vor.u32 %v19250_v16, %v4860_v9  ;;  %v19251_v31 = vld [vmem:[#allocation75_spill] sm:$0xff]  ;;  %v19255_v9 = vld [vmem:[#allocation70_spill] sm:$0xff] }
 0x385   : > { %v15867_v36 = vpop.f32.mrf.mxu2  ;;  %11277 = vmatmul.msk.bf16.gmra.mxu0 %vm1074_vm2, %v4861_v24  ;;  %v2861_v1 = vadd.f32 %v19255_v9, %v15767_v18  ;;  %v13452_v9 = vld [vmem:[#allocation2 + $0x48] sm:$0xff] }
 0x386   : > { %v2707_v51 = vpop.f32.mrf.mxu3 }
 0x387   : > { %v15869_v58 = vpop.f32.mrf.mxu1  ;;  %v15873_v48 = vadd.f32 %v2707_v51, %v15736_v35  ;;  %v3744_v35 = vrot.slane %v3742_v38, 1  ;;  %v3741_v51 = vor.u32 %v3739_v54, %v3737_v30  ;;  %v4868_v38 = vrot.slane %v19253_v56, 1 }
 0x389   : > { %v4267_v33 = vpop.f32.mrf.mxu0  ;;  %v3745_v2 = vsel %vm998_vm3, %v3741_v51, %v3744_v35  ;;  %v4869_v30 = vsel %vm998_vm3, %v4864_v40, %v4868_v38  ;;  %v19256_v51 = vld [vmem:[#allocation17_spill] sm:$0xff]  ;;  %v19257_v40 = vld [vmem:[#allocation11_spill] sm:$0xff] }
 0x38a   : > { %v2393_v33 = vadd.f32 %v19251_v31, %v2263_v7  ;;  %v3009_v16 = vadd.f32 %v19256_v51, %v2861_v1  ;;  %v4614_v31 = vrot.slane %v15345_v61, 2  ;;  %v19258_v61 = vshrl.u32 %v19252_v44, 16 }
 0x38c   : > { %v15900_v5 = vadd.f32 %v15738_v28, %v2393_v33  ;;  %v15912_v28 = vadd.f32 %v15761_v25, %v3009_v16  ;;  %v2862_v33 = vadd.f32 %v19257_v40, %v15782_v13  ;;  %v4615_v1 = vsel %vm1516_vm1, %v4612_v47, %v4614_v31  ;;  %v19262_v40 = vld [vmem:[#allocation45_spill] sm:$0xff] }
 0x38d   : > { %v3148_v41 = vpop.f32.mrf.mxu2  ;;  %v4872_v25 = vor.u32 %v19258_v61, %v4868_v38  ;;  %v19263_v47 = vrot.slane %v19262_v40, 3 }
 0x38e   : > { %v2709_v24 = vpop.f32.mrf.mxu3  ;;  %v19254_v41 = vld [vmem:[#allocation47_spill] sm:$0xff] }
 0x38f   : > { %v15883_v19 = vpop.f32.mrf.mxu1 }
 0x391   : > { %v15893_v42 = vpop.f32.mrf.mxu0 }
 0x392   : > { %11243 = vmatmul.msk.bf16.gmra.mxu1 %vm1074_vm2, %v4613_v23  ;;  %11100 = vmatmul.msk.bf16.gmra.mxu2 %vm1074_vm2, %v3745_v2  ;;  %v3746_v23 = vshrl.u32 %v15436_v17, 16 }
 0x393   : > { %11016 = vmatmul.msk.bf16.gmra.mxu3 %vm1074_vm2, %v19254_v41 }
 0x394   : > { %v3748_v41 = vor.u32 %v3746_v23, %v3744_v35  ;;  %v4805_v35 = vld [vmem:[#allocation2 + $0x70] sm:$0x7] }
 0x395   : > { %v3151_v54 = vpop.f32.mrf.mxu2  ;;  %11278 = vmatmul.msk.bf16.gmra.mxu0 %vm1074_vm2, %v4869_v30  ;;  %v19261_v23 = vld [vmem:[#allocation83_spill] sm:$0xff] }
 0x396   : > { %v2712_v24 = vpop.f32.mrf.mxu3  ;;  %v3259_v54 = vrot.slane %v13452_v9, 3  ;;  %v3752_v51 = vsel %vm998_vm3, %v3748_v41, %v15419_v39  ;;  %v3010_v16 = vadd.f32 %v19261_v23, %v2862_v33 }
 0x397   : > { %v4116_v7 = vpop.f32.mrf.mxu1 }
 0x398   : > { %v19259_v7 = vld [vmem:[#allocation60_spill] sm:$0xff]  ;;  %v15938_v44 = vadd.f32 %v15776_v0, %v3010_v16  ;;  %v13017_v0 = vld [vmem:[%s18778_s3 + $0x168] sm:$0xff] }
 0x399   : > { %v15908_v2 = vpop.f32.mrf.mxu0  ;;  %v19260_v24 = vshll.u32 %v19259_v7, 16  ;;  %4386 = vmatpush.bf16.msra.mxu2 %v13017_v0  ;;  %v13453_v16 = vld [vmem:[#allocation2 + $0x50] sm:$0xff] }
 0x39a   : > { %v3261_v40 = vrot.slane %v13453_v16, 3 }
 0x39b   : > { %v4876_v13 = vrot.slane %v19260_v24, 1 }
 0x39d   : > { %v15916_v18 = vpop.f32.mrf.mxu2  ;;  %v4877_v38 = vsel %vm998_vm3, %v4872_v25, %v4876_v13 }
 0x39e   : > { %v2714_v30 = vpop.f32.mrf.mxu3 }
 0x39f   : > { %v4119_v56 = vpop.f32.mrf.mxu1  ;;  %v15919_v17 = vadd.f32 %v2714_v30, %v15796_v46  ;;  %v4835_v30 = vunpack.c.l.b16 %v4805_v35  ;;  %v4616_v35 = vrot.slane %v15703_v43, 2 }
 0x3a0   : > { %v3260_v56 = vsel %vm2277_vm6, %v19263_v47, %v3259_v54  ;;  %v19264_v47 = vshrl.u32 %v19259_v7, 16 }
 0x3a1   : > { %v15931_v46 = vpop.f32.mrf.mxu0 }
 0x3a2   : > { %11244 = vmatmul.msk.bf16.gmra.mxu1 %vm1074_vm2, %v4615_v1  ;;  %11101 = vmatmul.msk.bf16.gmra.mxu2 %vm1074_vm2, %v3752_v51  ;;  %v15949_v1 = vpack.c.b16 %v4835_v30, %v4835_v30  ;;  %v4593_v30 = vld [vmem:[#allocation2 + $0x60] sm:$0x7] }
 0x3a3   : > { %11017 = vmatmul.msk.bf16.gmra.mxu3 %vm1074_vm2, %v3260_v56  ;;  %v4880_v56 = vor.u32 %v19264_v47, %v4876_v13  ;;  %v4602_v7 = vunpack.c.l.b16 %v4593_v30  ;;  %v13040_v13 = vld [vmem:[%s18778_s3 + $0x40] sm:$0xff]  ;;  %v13033_v30 = vld [vmem:[%s18778_s3 + $0x38] sm:$0xff] }
 0x3a4   : > { %v4882_v25 = vshll.u32 %v15949_v1, 16  ;;  %5194 = vmatpush.bf16.msrb.mxu1 %v13033_v30  ;;  %v11338_v30 = vld [vmem:[#allocation2 + $0x48] sm:$0xc] }
 0x3a5   : > { %v15941_v39 = vpop.f32.mrf.mxu2  ;;  %11279 = vmatmul.msk.bf16.gmra.mxu0 %vm1074_vm2, %v4877_v38  ;;  %v4604_v47 = vpack.c.b16 %v4602_v7, %v19223_v29 }
 0x3a6   : > { %v2717_v33 = vpop.f32.mrf.mxu3  ;;  %v4884_v38 = vrot.slane %v4882_v25, 1  ;;  %v13019_v25 = vld [vmem:[%s18778_s3 + $0x178] sm:$0xff] }
 0x3a7   : > { %v15943_v41 = vpop.f32.mrf.mxu1  ;;  %v15947_v9 = vadd.f32 %v2717_v33, %v15812_v32  ;;  %v4617_v32 = vsel %vm1516_vm1, %v4614_v31, %v4616_v35  ;;  %v13041_v33 = vld [vmem:[%s18778_s3 + $0x48] sm:$0xff]  ;;  %v3262_v31 = vsel %vm2277_vm6, %v3259_v54, %v3261_v40  ;;  %4533 = vmatpush.bf16.msrb.mxu3 %v13019_v25 }
 0x3a8   : > { %5330 = vmatpush.bf16.msrb.mxu0 %v13041_v33 }
 0x3a9   : > { %v4277_v61 = vpop.f32.mrf.mxu0 }
 0x3aa   : > { %v13016_v61 = vld [vmem:[%s18778_s3 + $0x160] sm:$0xff] }
 0x3ab   : > { %4387 = vmatpush.bf16.msra.mxu2 %v13016_v61  ;;  %v4618_v61 = vrot.slane %v4604_v47, 2  ;;  %v13564_v47 = vld [vmem:[#allocation2 + $0x1c] sm:$0xe] }
 0x3ac   : > { %5331 = vmatpush.bf16.msrb.mxu0 %v13040_v13  ;;  %v13032_v13 = vld [vmem:[%s18778_s3 + $0x30] sm:$0xff] }
 0x3ad   : > { %v3158_v24 = vpop.f32.mrf.mxu2  ;;  %5195 = vmatpush.bf16.msrb.mxu1 %v13032_v13 }
 0x3ae   : > { %v2719_v23 = vpop.f32.mrf.mxu3  ;;  %v4885_v24 = vsel %vm998_vm3, %v4880_v56, %v4884_v38 }
 0x3af   : > { %v15955_v51 = vpop.f32.mrf.mxu1 }
 0x3b1   : > { %v4280_v0 = vpop.f32.mrf.mxu0 }
 0x3b2   : > { %11245 = vmatmul.msk.bf16.gmra.mxu1 %vm1074_vm2, %v4617_v32  ;;  %11102 = vmatmul.msk.bf16.gmra.mxu2 %vm1074_vm2, %v15442_v21  ;;  %v19265_v21 = vld [vmem:[#allocation87_spill] sm:$0xff]  ;;  %v3760_v0 = vshrl.u32 %v15404_v8, 16 }
 0x3b3   : > { %11018 = vmatmul.msk.bf16.gmra.mxu3 %vm1074_vm2, %v3262_v31  ;;  %v2865_v23 = vadd.f32 %v19265_v21, %v15834_v60  ;;  %v19266_v31 = vld [vmem:[#allocation92_spill] sm:$0xff]  ;;  %v4619_v21 = vsel %vm1516_vm1, %v4616_v35, %v4618_v61  ;;  %v2867_v35 = vadd.f32 %v15226_v55, %v15873_v48  ;;  %v19268_v55 = vld [vmem:[#allocation77_spill] sm:$0xff] }
 0x3b4   : > { %v2866_v25 = vadd.f32 %v19266_v31, %v15848_v37  ;;  %v3762_v8 = vor.u32 %v3760_v0, %v15431_v4  ;;  %v13565_v48 = vor.u32 %v13564_v47, %v19268_v55  ;;  %v13035_v0 = vld [vmem:[#allocation2 + $0x50] sm:$0xff] }
 0x3b5   : > { %v3161_v16 = vpop.f32.mrf.mxu2  ;;  %11280 = vmatmul.msk.bf16.gmra.mxu0 %vm1074_vm2, %v4885_v24  ;;  %v3013_v33 = vadd.f32 %v15243_v52, %v2865_v23  ;;  %v5284_v47 = vrot.slane %v13035_v0, 2 }
 0x3b6   : > { %v2722_v32 = vpop.f32.mrf.mxu3  ;;  %v3014_v37 = vadd.f32 %v15268_v14, %v2866_v25  ;;  %v13339_v25 = vld [vmem:[#allocation2 + $0x48] sm:$0xf0] }
 0x3b7   : > { %v4126_v54 = vpop.f32.mrf.mxu1  ;;  %v15990_v60 = vadd.f32 %v15830_v45, %v3013_v33  ;;  %v4886_v45 = vshrl.u32 %v15949_v1, 16 }
 0x3b9   : > { %v15987_v56 = vpop.f32.mrf.mxu0  ;;  %v4888_v16 = vor.u32 %v4886_v45, %v4884_v38  ;;  %v3015_v38 = vadd.f32 %v15307_v59, %v2867_v35  ;;  %v13454_v45 = vld [vmem:[#allocation2 + $0x24] sm:$0xff]  ;;  %v3877_v35 = vrot.slane %v13565_v48, 1 }
 0x3bb   : > { %v16027_v33 = vadd.f32 %v15867_v36, %v3015_v38  ;;  %v19270_v36 = vld [vmem:[#allocation36_spill] sm:$0xff] }
 0x3bd   : > { %v15995_v29 = vpop.f32.mrf.mxu2 }
 0x3be   : > { %v2724_v52 = vpop.f32.mrf.mxu3 }
 0x3bf   : > { %v4129_v7 = vpop.f32.mrf.mxu1  ;;  %v16001_v24 = vadd.f32 %v2724_v52, %v15862_v57  ;;  %v16013_v57 = vadd.f32 %v15842_v62, %v3014_v37  ;;  %v4329_v37 = vrot.slane %v19270_v36, 1 }
 0x3c0   : > { %v13340_v7 = vld [vmem:[#allocation2 + $0x48] sm:$0xe] }
 0x3c1   : > { %v16009_v23 = vpop.f32.mrf.mxu0 }
 0x3c2   : > { %11246 = vmatmul.msk.bf16.gmra.mxu1 %vm1074_vm2, %v4619_v21  ;;  %11103 = vmatmul.msk.bf16.gmra.mxu2 %vm1074_vm2, %v3762_v8  ;;  %v3878_v8 = vrot.slane %v13454_v45, 1  ;;  %v2870_v45 = vadd.f32 %v15324_v11, %v15919_v17 }
 0x3c3   : > { %11019 = vmatmul.msk.bf16.gmra.mxu3 %vm1074_vm2, %v3261_v40  ;;  %v13034_v40 = vld [vmem:[#allocation2 + $0x48] sm:$0xf0] }
 0x3c4   : > { %v11339_v31 = vor.u32 %v13034_v40, %v11338_v30  ;;  %v3018_v17 = vadd.f32 %v15397_v34, %v2870_v45 }
 0x3c5   : > { %v16017_v54 = vpop.f32.mrf.mxu2  ;;  %11281 = vmatmul.msk.bf16.gmra.mxu0 %vm1074_vm2, %v4888_v16  ;;  %v16039_v16 = vor.u32 %v13340_v7, %v13339_v25 }
 0x3c6   : > { %v2727_v14 = vpop.f32.mrf.mxu3 }
 0x3c7   : > { %v16019_v32 = vpop.f32.mrf.mxu1  ;;  %v16023_v4 = vadd.f32 %v2727_v14, %v15879_v12  ;;  %v4330_v12 = vrot.slane %v15548_v20, 1  ;;  %v5283_v14 = vrot.slane %v11339_v31, 2  ;;  %v3879_v20 = vsel %vm1238_vm7, %v3877_v35, %v3878_v8 }
 0x3c8   : > { %19267 = vst [vmem:[#allocation18_spill] sm:$0xff] %v16019_v32  ;;  %v5129_v38 = vshll.u32 %v16039_v16, 16  ;;  %v4332_v35 = vrot.slane %v15582_v53, 1 }
 0x3c9   : > { %v4287_v62 = vpop.f32.mrf.mxu0  ;;  %v4331_v30 = vsel %vm1238_vm7, %v4329_v37, %v4330_v12 }
 0x3ca   : > { %v5285_v62 = vsel %vm1516_vm1, %v5283_v14, %v5284_v47  ;;  %v5131_v25 = vrot.slane %v5129_v38, 2  ;;  %v4333_v11 = vsel %vm1238_vm7, %v4330_v12, %v4332_v35 }
 0x3cd   : > { %v16030_v13 = vpop.f32.mrf.mxu2 }
 0x3ce   : > { %v2729_v21 = vpop.f32.mrf.mxu3 }
 0x3cf   : > { %v16032_v52 = vpop.f32.mrf.mxu1  ;;  %v16036_v59 = vadd.f32 %v2729_v21, %v15900_v5  ;;  %v5126_v5 = vshrl.u32 %v16039_v16, 16 }
 0x3d0   : > { %19269 = vst [vmem:[#allocation26_spill] sm:$0xff] %v16032_v52 }
 0x3d1   : > { %v4290_v40 = vpop.f32.mrf.mxu0  ;;  %v5128_v31 = vrot.slane %v5126_v5, 1 }
 0x3d2   : > { %11247 = vmatmul.msk.bf16.gmra.mxu1 %vm1074_vm2, %v4618_v61  ;;  %11200 = vmatmul.msk.bf16.vlgmr.msra.gmra.mxu2 %vm1074_vm2, %v4331_v30  ;;  %v13455_v30 = vld [vmem:[#allocation2 + $0x2c] sm:$0xff] }
 0x3d3   : > { %11116 = vmatmul.msk.bf16.vlgmr.msra.gmra.mxu3 %vm1074_vm2, %v3879_v20  ;;  %v5132_v21 = vor.u32 %v5131_v25, %v5128_v31  ;;  %v3880_v40 = vrot.slane %v13455_v30, 1  ;;  %v13036_v20 = vld [vmem:[#allocation2 + $0x58] sm:$0xff] }
 0x3d5   : > { %v16049_v55 = vpop.f32.mrf.mxu2  ;;  %11368 = vmatmul.msk.bf16.vlgmr.msrb.gmra.mxu0 %vm1074_vm2, %v5285_v62  ;;  %v5136_v5 = vsel %vm1360_vm4, %v5132_v21, %v15452_v27  ;;  %v3881_v53 = vsel %vm1238_vm7, %v3878_v8, %v3880_v40  ;;  %v5286_v62 = vrot.slane %v13036_v20, 2 }
 0x3d6   : > { %v3308_v48 = vpop.f32.mrf.mxu3 }
 0x3d7   : > { %v16051_v61 = vpop.f32.mrf.mxu1  ;;  %v16055_v0 = vadd.f32 %v3308_v48, %v15912_v28  ;;  %v5287_v27 = vsel %vm1516_vm1, %v5284_v47, %v5286_v62  ;;  %v2871_v48 = vadd.f32 %v15347_v22, %v15947_v9  ;;  %v4334_v47 = vrot.slane %v15604_v50, 1  ;;  %v13456_v22 = vld [vmem:[#allocation2 + $0x34] sm:$0xff] }
 0x3d8   : > { %19271 = vst [vmem:[#allocation67_spill] sm:$0xff] %v16051_v61  ;;  %v3882_v9 = vrot.slane %v13456_v22, 1  ;;  %v13018_v50 = vld [vmem:[%s18778_s3 + $0x170] sm:$0xff] }
 0x3d9   : > { %v16057_v7 = vpop.f32.mrf.mxu0  ;;  %v3019_v25 = vadd.f32 %v15427_v63, %v2871_v48  ;;  %4534 = vmatpush.bf16.msrb.mxu3 %v13018_v50  ;;  %v19277_v48 = vld [vmem:[#allocation114_spill] sm:$0xff] }
 0x3da   : > { %19272 = vst [vmem:[#allocation66_spill] sm:$0xff] %v16057_v7 }
 0x3db   : > { %v16092_v21 = vadd.f32 %v15941_v39, %v3019_v25  ;;  %v3883_v39 = vsel %vm1238_vm7, %v3880_v40, %v3882_v9  ;;  %v13038_v40 = vld [vmem:[#allocation2 + $0x68] sm:$0xff] }
 0x3dc   : > { %v5290_v22 = vrot.slane %v13038_v40, 2 }
 0x3dd   : > { %v16061_v36 = vpop.f32.mrf.mxu2 }
 0x3de   : > { %v3310_v14 = vpop.f32.mrf.mxu3 }
 0x3df   : > { %v16063_v37 = vpop.f32.mrf.mxu1  ;;  %v16067_v28 = vadd.f32 %v3310_v14, %v15938_v44  ;;  %v16080_v44 = vadd.f32 %v15916_v18, %v3018_v17  ;;  %v13037_v18 = vld [vmem:[#allocation2 + $0x60] sm:$0xff] }
 0x3e0   : > { %v5288_v20 = vrot.slane %v13037_v18, 2 }
 0x3e1   : > { %v16074_v38 = vpop.f32.mrf.mxu0 }
 0x3e2   : > { %11326 = vmatmul.msk.bf16.vlgmr.msrb.gmra.mxu1 %vm1074_vm2, %v5136_v5  ;;  %19273 = vst [vmem:[#allocation22_spill] sm:$0xff] %v16074_v38  ;;  %11201 = vmatmul.msk.bf16.gmra.mxu2 %vm1074_vm2, %v4333_v11  ;;  %v4335_v5 = vsel %vm1238_vm7, %v4332_v35, %v4334_v47  ;;  %v5289_v11 = vsel %vm1516_vm1, %v5286_v62, %v5288_v20  ;;  %v4336_v62 = vrot.slane %v15634_v3, 1 }
 0x3e3   : > { %11117 = vmatmul.msk.bf16.gmra.mxu3 %vm1074_vm2, %v3881_v53 }
 0x3e5   : > { %v3813_v12 = vpop.f32.mrf.mxu2  ;;  %11369 = vmatmul.msk.bf16.gmra.mxu0 %vm1074_vm2, %v5287_v27 }
 0x3e6   : > { %v3313_v34 = vpop.f32.mrf.mxu3  ;;  %v2874_v12 = vadd.f32 %v19277_v48, %v16001_v24 }
 0x3e7   : > { %v16085_v31 = vpop.f32.mrf.mxu1 }
 0x3e9   : > { %v16089_v8 = vpop.f32.mrf.mxu0 }
 0x3ea   : > { %19274 = vst [vmem:[#allocation28_spill] sm:$0xff] %v16089_v8 }
 0x3ed   : > { %v3815_v45 = vpop.f32.mrf.mxu2 }
 0x3ee   : > { %v3315_v30 = vpop.f32.mrf.mxu3  ;;  %v13457_v45 = vld [vmem:[#allocation2 + $0x3c] sm:$0xff] }
 0x3ef   : > { %v4670_v14 = vpop.f32.mrf.mxu1 }
 0x3f0   : > { %v3884_v14 = vrot.slane %v13457_v45, 1  ;;  %v13039_v45 = vld [vmem:[#allocation2 + $0x70] sm:$0x10] }
 0x3f1   : > { %v16099_v63 = vpop.f32.mrf.mxu0 }
 0x3f2   : > { %11327 = vmatmul.msk.bf16.gmra.mxu1 %vm1074_vm2, %v15493_v49  ;;  %11202 = vmatmul.msk.bf16.gmra.mxu2 %vm1074_vm2, %v4335_v5  ;;  %19275 = vst [vmem:[#allocation38_spill] sm:$0xff] %v16099_v63  ;;  %v4337_v5 = vsel %vm1238_vm7, %v4334_v47, %v4336_v62 }
 0x3f3   : > { %11118 = vmatmul.msk.bf16.gmra.mxu3 %vm1074_vm2, %v3883_v39  ;;  %v19279_v39 = vld [vmem:[#allocation120_spill] sm:$0xff] }
 0x3f4   : > { %v3022_v24 = vadd.f32 %v19279_v39, %v2874_v12 }
 0x3f5   : > { %v16107_v17 = vpop.f32.mrf.mxu2  ;;  %11370 = vmatmul.msk.bf16.gmra.mxu0 %vm1074_vm2, %v5289_v11  ;;  %v3885_v11 = vsel %vm1238_vm7, %v3882_v9, %v3884_v14  ;;  %v5020_v9 = vld [vmem:[#allocation2 + $0x70] sm:$0xf] }
 0x3f6   : > { %v3318_v35 = vpop.f32.mrf.mxu3  ;;  %v16133_v3 = vadd.f32 %v15995_v29, %v3022_v24  ;;  %v19281_v29 = vld [vmem:[#allocation35_spill] sm:$0xff] }
 0x3f7   : > { %v4672_v49 = vpop.f32.mrf.mxu1  ;;  %v16111_v53 = vadd.f32 %v3318_v35, %v15990_v60  ;;  %v19278_v60 = vld [vmem:[#allocation63_spill] sm:$0xff] }
 0x3f8   : > { %v19280_v49 = vld [vmem:[#allocation116_spill] sm:$0xff]  ;;  %v19282_v24 = vld [vmem:[#allocation15_spill] sm:$0xff] }
 0x3f9   : > { %v16113_v27 = vpop.f32.mrf.mxu0  ;;  %v2875_v35 = vadd.f32 %v19280_v49, %v16023_v4  ;;  %v13458_v49 = vld [vmem:[#allocation2 + $0x4c] sm:$0xff] }
 0x3fa   : > { %19276 = vst [vmem:[#allocation57_spill] sm:$0xff] %v16113_v27  ;;  %v13459_v27 = vld [vmem:[#allocation2 + $0x44] sm:$0xff] }
 0x3fb   : > { %v3886_v63 = vrot.slane %v13459_v27, 1 }
 0x3fd   : > { %v16117_v34 = vpop.f32.mrf.mxu2  ;;  %v3887_v27 = vsel %vm1238_vm7, %v3884_v14, %v3886_v63 }
 0x3fe   : > { %v3320_v18 = vpop.f32.mrf.mxu3 }
 0x3ff   : > { %v16119_v25 = vpop.f32.mrf.mxu1  ;;  %v16123_v30 = vadd.f32 %v3320_v18, %v16013_v57  ;;  %v5291_v57 = vsel %vm1516_vm1, %v5288_v20, %v5290_v22  ;;  %v11358_v18 = vld [vmem:[#allocation2 + $0x70] sm:$0xf]  ;;  %v5028_v20 = vunpack.c.l.b16 %v5020_v9 }
 0x400   : > { %v11359_v4 = vor.u32 %v13039_v45, %v11358_v18  ;;  %v19284_v18 = vld [vmem:[#allocation80_spill] sm:$0xff] }
 0x401   : > { %v16154_v8 = vpack.c.b16 %v5028_v20, %v5028_v20 }
 0x402   : > { %11328 = vmatmul.msk.bf16.gmra.mxu1 %vm1074_vm2, %v19278_v60  ;;  %11203 = vmatmul.msk.bf16.gmra.mxu2 %vm1074_vm2, %v4337_v5  ;;  %v4933_v50 = vpop.f32.mrf.mxu0  ;;  %v3023_v60 = vadd.f32 %v19281_v29, %v2875_v35  ;;  %v19283_v35 = vld [vmem:[#allocation64_spill] sm:$0xff]  ;;  %v5292_v9 = vrot.slane %v11359_v4, 2 }
 0x403   : > { %11119 = vmatmul.msk.bf16.gmra.mxu3 %vm1074_vm2, %v3885_v11  ;;  %v2876_v50 = vadd.f32 %v19282_v24, %v16036_v59  ;;  %v13058_v59 = vld [vmem:[%s18778_s3 + $0x88] sm:$0xff]  ;;  %v19286_v24 = vld [vmem:[#allocation121_spill] sm:$0xff] }
 0x404   : > { %v16148_v39 = vadd.f32 %v16017_v54, %v3023_v60  ;;  %v5150_v60 = vshrl.u32 %v16154_v8, 16  ;;  %5871 = vmatpush.bf16.msra.mxu0 %v13058_v59  ;;  %v5293_v4 = vsel %vm1516_vm1, %v5290_v22, %v5292_v9  ;;  %v19287_v59 = vld [vmem:[#allocation34_spill] sm:$0xff] }
 0x405   : > { %v16138_v40 = vpop.f32.mrf.mxu2  ;;  %11371 = vmatmul.msk.bf16.gmra.mxu0 %vm1074_vm2, %v5291_v57  ;;  %v3024_v45 = vadd.f32 %v19284_v18, %v2876_v50  ;;  %v3525_v50 = vadd.f32 %v19286_v24, %v16055_v0 }
 0x406   : > { %v3323_v48 = vpop.f32.mrf.mxu3 }
 0x407   : > { %v16140_v47 = vpop.f32.mrf.mxu1  ;;  %v16144_v12 = vadd.f32 %v3323_v48, %v16027_v33  ;;  %v4338_v33 = vrot.slane %v13458_v49, 1  ;;  %v16174_v20 = vadd.f32 %v16030_v13, %v3024_v45  ;;  %v3687_v13 = vadd.f32 %v19287_v59, %v3525_v50  ;;  %v19289_v45 = vld [vmem:[#allocation50_spill] sm:$0xff]  ;;  %v13460_v50 = vld [vmem:[#allocation2 + $0x4c] sm:$0xff] }
 0x409   : > { %v4339_v54 = vsel %vm1238_vm7, %v4336_v62, %v4338_v33  ;;  %v13057_v62 = vld [vmem:[%s18778_s3 + $0x80] sm:$0xff]  ;;  %v16187_v0 = vadd.f32 %v16049_v55, %v3687_v13 }
 0x40a   : > { %v4935_v5 = vpop.f32.mrf.mxu0  ;;  %5872 = vmatpush.bf16.msra.mxu0 %v13057_v62  ;;  %v13055_v62 = vld [vmem:[%s18778_s3 + $0x70] sm:$0xff] }
 0x40b   : > { %v5153_v5 = vshll.u32 %v16154_v8, 16 }
 0x40d   : > { %v3825_v11 = vpop.f32.mrf.mxu2 }
 0x40e   : > { %v3325_v48 = vpop.f32.mrf.mxu3 }
 0x40f   : > { %v16152_v57 = vpop.f32.mrf.mxu1  ;;  %v5152_v48 = vrot.slane %v5150_v60, 1 }
 0x412   : > { %11329 = vmatmul.msk.bf16.gmra.mxu1 %vm1074_vm2, %v19283_v35  ;;  %11204 = vmatmul.msk.bf16.gmra.mxu2 %vm1074_vm2, %v4339_v54  ;;  %v16164_v29 = vpop.f32.mrf.mxu0  ;;  %v5155_v35 = vrot.slane %v5153_v5, 2  ;;  %v13056_v54 = vld [vmem:[%s18778_s3 + $0x78] sm:$0xff]  ;;  %v5642_v5 = vld [vmem:[#allocation2 + $0x50] sm:$0xc] }
 0x413   : > { %19285 = vst [vmem:[#allocation61_spill] sm:$0xff] %v16164_v29  ;;  %11120 = vmatmul.msk.bf16.gmra.mxu3 %vm1074_vm2, %v3887_v27  ;;  %5735 = vmatpush.bf16.msra.mxu1 %v13056_v54  ;;  %v3526_v27 = vadd.f32 %v19289_v45, %v16067_v28  ;;  %v5670_v28 = vunpack.c.l.b16 %v5642_v5  ;;  %v19291_v54 = vld [vmem:[#allocation89_spill] sm:$0xff]  ;;  %v3865_v45 = vld [vmem:[#allocation2 + $0x58] sm:$0x3] }
 0x414   : > { %v5156_v22 = vor.u32 %v5155_v35, %v5152_v48  ;;  %v4340_v48 = vrot.slane %v15703_v43, 1  ;;  %v19293_v43 = vld [vmem:[#allocation119_spill] sm:$0xff] }
 0x415   : > { %v3828_v14 = vpop.f32.mrf.mxu2  ;;  %11372 = vmatmul.msk.bf16.gmra.mxu0 %vm1074_vm2, %v5293_v4  ;;  %v3688_v59 = vadd.f32 %v19291_v54, %v3526_v27  ;;  %v19295_v54 = vld [vmem:[#allocation111_spill] sm:$0xff] }
 0x416   : > { %v3328_v49 = vpop.f32.mrf.mxu3  ;;  %v3888_v14 = vrot.slane %v13460_v50, 1  ;;  %v4341_v35 = vsel %vm1238_vm7, %v4338_v33, %v4340_v48  ;;  %v3874_v50 = vunpack.c.l.b16 %v3865_v45 }
 0x417   : > { %v4682_v11 = vpop.f32.mrf.mxu1  ;;  %v19290_v49 = vld [vmem:[#allocation62_spill] sm:$0xff]  ;;  %5736 = vmatpush.bf16.msra.mxu1 %v13055_v62  ;;  %v19294_v62 = vunpack.c.l.b16 %v19293_v43 }
 0x418   : > { %v5157_v55 = vsel %vm1360_vm4, %v19290_v49, %v5156_v22 }
 0x41a   : > { %v16184_v18 = vpop.f32.mrf.mxu0 }
 0x41b   : > { %19288 = vst [vmem:[#allocation40_spill] sm:$0xff] %v16184_v18 }
 0x41d   : > { %v16191_v4 = vpop.f32.mrf.mxu2 }
 0x41e   : > { %v3330_v24 = vpop.f32.mrf.mxu3 }
 0x41f   : > { %v4685_v60 = vpop.f32.mrf.mxu1  ;;  %v16197_v11 = vadd.f32 %v3330_v24, %v16080_v44  ;;  %v3889_v44 = vsel %vm1238_vm7, %v3886_v63, %v3888_v14  ;;  %v5682_v24 = vpack.c.b16 %v19294_v62, %v5670_v28 }
 0x420   : > { %v16211_v60 = vadd.f32 %v16061_v36, %v3688_v59  ;;  %v19296_v36 = vunpack.c.l.b16 %v19295_v54 }
 0x421   : > { %v5783_v63 = vshrl.u32 %v5682_v24, 16 }
 0x422   : > { %11330 = vmatmul.msk.bf16.gmra.mxu1 %vm1074_vm2, %v5157_v55  ;;  %11205 = vmatmul.msk.bf16.gmra.mxu2 %vm1074_vm2, %v4341_v35  ;;  %v16206_v13 = vpop.f32.mrf.mxu0  ;;  %v5786_v55 = vshll.u32 %v5682_v24, 16  ;;  %v3876_v59 = vpack.c.b16 %v3874_v50, %v19296_v36 }
 0x423   : > { %19292 = vst [vmem:[#allocation27_spill] sm:$0xff] %v16206_v13  ;;  %11121 = vmatmul.msk.bf16.gmra.mxu3 %vm1074_vm2, %v3889_v44  ;;  %v16225_v44 = vld [vmem:[#allocation2 + $0x58] sm:$0xff]  ;;  %v5785_v45 = vrot.slane %v5783_v63, 2  ;;  %v13026_v63 = vld [vmem:[%s18778_s3] sm:$0xff] }
 0x424   : > { %v5791_v28 = vshrl.u32 %v16225_v44, 16  ;;  %v5794_v43 = vshll.u32 %v16225_v44, 16  ;;  %v5788_v62 = vrot.slane %v5786_v55, 3  ;;  %v3890_v50 = vrot.slane %v3876_v59, 1 }
 0x425   : > { %v16215_v5 = vpop.f32.mrf.mxu2  ;;  %11373 = vmatmul.msk.bf16.gmra.mxu0 %vm1074_vm2, %v5292_v9  ;;  %v13027_v9 = vld [vmem:[%s18778_s3 + $0x8] sm:$0xff] }
 0x426   : > { %v3333_v27 = vpop.f32.mrf.mxu3  ;;  %4987 = vmatpush.bf16.msrb.mxu2 %v13027_v9  ;;  %v5793_v36 = vrot.slane %v5791_v28, 2  ;;  %v5796_v18 = vrot.slane %v5794_v43, 3  ;;  %v5789_v29 = vor.u32 %v5788_v62, %v5785_v45  ;;  %v3891_v9 = vsel %vm1238_vm7, %v3888_v14, %v3890_v50  ;;  %v16250_v14 = vld [vmem:[#allocation2 + $0x60] sm:$0xff] }
 0x427   : > { %v16217_v33 = vpop.f32.mrf.mxu1  ;;  %v16221_v49 = vadd.f32 %v3333_v27, %v16092_v21  ;;  %v5803_v62 = vshll.u32 %v16250_v14, 16 }
 0x42a   : > { %v4945_v35 = vpop.f32.mrf.mxu0  ;;  %4988 = vmatpush.bf16.msrb.mxu2 %v13026_v63 }
 0x42b   : > { %v19297_v35 = vld [vmem:[#allocation68_spill] sm:$0xff] }
 0x42c   : > { %v4342_v13 = vrot.slane %v19297_v35, 1  ;;  %v19299_v35 = vld [vmem:[#allocation43_spill] sm:$0xff] }
 0x42d   : > { %v3835_v21 = vpop.f32.mrf.mxu2 }
 0x42e   : > { %v3335_v54 = vpop.f32.mrf.mxu3  ;;  %v4343_v61 = vsel %vm1238_vm7, %v4340_v48, %v4342_v13  ;;  %v5797_v21 = vor.u32 %v5796_v18, %v5793_v36  ;;  %v19298_v48 = vld [vmem:[#allocation122_spill] sm:$0xff]  ;;  %v5800_v18 = vshrl.u32 %v16250_v14, 16 }
 0x42f   : > { %v16232_v27 = vpop.f32.mrf.mxu1  ;;  %v3529_v28 = vadd.f32 %v19298_v48, %v16111_v53 }
 0x430   : > { %v5798_v59 = vsel %vm2121_vm5, %v5789_v29, %v5797_v21  ;;  %v5688_v29 = vrot.slane %v5682_v24, 2  ;;  %v5802_v53 = vrot.slane %v5800_v18, 2  ;;  %v19302_v24 = vld [vmem:[#allocation33_spill] sm:$0xff] }
 0x431   : > { %v3691_v54 = vadd.f32 %v19299_v35, %v3529_v28 }
 0x432   : > { %11331 = vmatmul.msk.bf16.gmra.mxu1 %vm1074_vm2, %v5156_v22  ;;  %11206 = vmatmul.msk.bf16.gmra.mxu2 %vm1074_vm2, %v4343_v61  ;;  %v4948_v55 = vpop.f32.mrf.mxu0  ;;  %v13031_v22 = vld [vmem:[%s18778_s3 + $0x28] sm:$0xff] }
 0x433   : > { %11122 = vmatmul.msk.bf16.gmra.mxu3 %vm1074_vm2, %v3891_v9  ;;  %v16258_v63 = vadd.f32 %v16107_v17, %v3691_v54  ;;  %v5805_v55 = vrot.slane %v5803_v62, 3  ;;  %v19301_v9 = vld [vmem:[#allocation39_spill] sm:$0xff] }
 0x434   : > { %5078 = vmatpush.bf16.msra.mxu3 %v13031_v22  ;;  %v3530_v22 = vadd.f32 %v19301_v9, %v16123_v30 }
 0x435   : > { %v3838_v43 = vpop.f32.mrf.mxu2  ;;  %11476 = vmatmul.msk.bf16.vlgmr.msra.gmra.mxu0 %vm1074_vm2, %v5798_v59  ;;  %v5806_v17 = vor.u32 %v5805_v55, %v5802_v53  ;;  %v16289_v55 = vld [vmem:[#allocation2 + $0x68] sm:$0xff] }
 0x436   : > { %v3338_v61 = vpop.f32.mrf.mxu3  ;;  %v5689_v43 = vrot.slane %v16225_v44, 2  ;;  %v3692_v18 = vadd.f32 %v19302_v24, %v3530_v22 }
 0x437   : > { %v4692_v45 = vpop.f32.mrf.mxu1  ;;  %v5807_v44 = vsel %vm2121_vm5, %v5797_v21, %v5806_v17  ;;  %v19306_v21 = vld [vmem:[#allocation51_spill] sm:$0xff] }
 0x438   : > { %v5690_v28 = vsel %vm1516_vm1, %v5688_v29, %v5689_v43  ;;  %v16276_v30 = vadd.f32 %v16117_v34, %v3692_v18  ;;  %v5809_v34 = vshrl.u32 %v16289_v55, 16 }
 0x43a   : > { %v16255_v36 = vpop.f32.mrf.mxu0 }
 0x43b   : > { %19300 = vst [vmem:[#allocation69_spill] sm:$0xff] %v16255_v36  ;;  %v16341_v36 = vld [vmem:[#allocation2 + $0x50] sm:$0xff] }
 0x43d   : > { %v16262_v59 = vpop.f32.mrf.mxu2 }
 0x43e   : > { %v3340_v45 = vpop.f32.mrf.mxu3 }
 0x43f   : > { %v4695_v48 = vpop.f32.mrf.mxu1  ;;  %v16266_v61 = vadd.f32 %v3340_v45, %v16133_v3  ;;  %v19304_v3 = vld [vmem:[#allocation32_spill] sm:$0xff]  ;;  %v5811_v45 = vrot.slane %v5809_v34, 2 }
 0x440   : > { %v3531_v35 = vadd.f32 %v19304_v3, %v16144_v12  ;;  %v5691_v12 = vrot.slane %v16250_v14, 2  ;;  %v19309_v14 = vld [vmem:[#allocation41_spill] sm:$0xff] }
 0x442   : > { %11458 = vmatmul.msk.bf16.vlgmr.msra.gmra.mxu1 %vm1074_vm2, %v5690_v28  ;;  %11207 = vmatmul.msk.bf16.gmra.mxu2 %vm1074_vm2, %v4342_v13  ;;  %v16272_v62 = vpop.f32.mrf.mxu0  ;;  %v3693_v9 = vadd.f32 %v19306_v21, %v3531_v35  ;;  %v5692_v3 = vsel %vm1516_vm1, %v5689_v43, %v5691_v12  ;;  %v16322_v21 = vld [vmem:[#allocation2 + $0x70] sm:$0xff] }
 0x443   : > { %19303 = vst [vmem:[#allocation58_spill] sm:$0xff] %v16272_v62  ;;  %11123 = vmatmul.msk.bf16.gmra.mxu3 %vm1074_vm2, %v3890_v50  ;;  %v5812_v50 = vshll.u32 %v16289_v55, 16 }
 0x444   : > { %v16296_v48 = vadd.f32 %v16138_v40, %v3693_v9  ;;  %v5821_v9 = vshll.u32 %v16322_v21, 16 }
 0x445   : > { %v16281_v54 = vpop.f32.mrf.mxu2  ;;  %11477 = vmatmul.msk.bf16.gmra.mxu0 %vm1074_vm2, %v5807_v44  ;;  %v5814_v28 = vrot.slane %v5812_v50, 3 }
 0x446   : > { %v3343_v53 = vpop.f32.mrf.mxu3 }
 0x447   : > { %v16283_v29 = vpop.f32.mrf.mxu1  ;;  %v16287_v13 = vadd.f32 %v3343_v53, %v16148_v39  ;;  %v5815_v35 = vor.u32 %v5814_v28, %v5811_v45  ;;  %v5823_v28 = vrot.slane %v5821_v9, 3 }
 0x448   : > { %19305 = vst [vmem:[#allocation44_spill] sm:$0xff] %v16283_v29 }
 0x449   : > { %v5816_v53 = vsel %vm2121_vm5, %v5806_v17, %v5815_v35  ;;  %v5693_v17 = vrot.slane %v16289_v55, 2 }
 0x44a   : > { %v4955_v22 = vpop.f32.mrf.mxu0 }
 0x44b   : > { %v5694_v62 = vsel %vm1516_vm1, %v5691_v12, %v5693_v17 }
 0x44d   : > { %v16298_v24 = vpop.f32.mrf.mxu2 }
 0x44e   : > { %v3345_v18 = vpop.f32.mrf.mxu3 }
 0x44f   : > { %v16300_v39 = vpop.f32.mrf.mxu1  ;;  %v16303_v44 = vadd.f32 %v3345_v18, %v16174_v20  ;;  %v19312_v18 = vld [vmem:[#allocation54_spill] sm:$0xff] }
 0x450   : > { %19307 = vst [vmem:[#allocation65_spill] sm:$0xff] %v16300_v39 }
 0x452   : > { %11459 = vmatmul.msk.bf16.gmra.mxu1 %vm1074_vm2, %v5692_v3  ;;  %11290 = vmatmul.msk.bf16.vlgmr.msrb.gmra.mxu2 %vm1074_vm2, %v15803_v15  ;;  %v16309_v40 = vpop.f32.mrf.mxu0  ;;  %v5818_v15 = vshrl.u32 %v16322_v21, 16  ;;  %v3534_v3 = vadd.f32 %v19312_v18, %v16197_v11  ;;  %v19315_v18 = vld [vmem:[#allocation42_spill] sm:$0xff] }
 0x453   : > { %19308 = vst [vmem:[#allocation72_spill] sm:$0xff] %v16309_v40  ;;  %11220 = vmatmul.msk.bf16.vlgmr.msrb.gmra.mxu3 %vm1074_vm2, %v19309_v14 }
 0x454   : > { %v5820_v45 = vrot.slane %v5818_v15, 2  ;;  %v19314_v15 = vld [vmem:[#allocation48_spill] sm:$0xff] }
 0x455   : > { %v16314_v34 = vpop.f32.mrf.mxu2  ;;  %11478 = vmatmul.msk.bf16.gmra.mxu0 %vm1074_vm2, %v5816_v53  ;;  %v3696_v9 = vadd.f32 %v19314_v15, %v3534_v3 }
 0x456   : > { %v3937_v20 = vpop.f32.mrf.mxu3 }
 0x457   : > { %v16316_v50 = vpop.f32.mrf.mxu1  ;;  %v16320_v43 = vadd.f32 %v3937_v20, %v16187_v0  ;;  %v5653_v0 = vld [vmem:[#allocation2 + $0x7c] sm:$0x1] }
 0x458   : > { %19310 = vst [vmem:[#allocation10_spill] sm:$0xff] %v16316_v50  ;;  %v5681_v55 = vunpack.c.l.b16 %v5653_v0  ;;  %v19335_v50 = vld [vmem:[#allocation93_spill] sm:$0xff] }
 0x459   : > { %v19336_v39 = vshrl.u32 %v19335_v50, 16  ;;  %v19337_v38 = vshll.u32 %v19335_v50, 16 }
 0x45a   : > { %v16326_v22 = vpop.f32.mrf.mxu0 }
 0x45b   : > { %19311 = vst [vmem:[#allocation75_spill] sm:$0xff] %v16326_v22  ;;  %v5824_v22 = vor.u32 %v5823_v28, %v5820_v45  ;;  %v19318_v28 = vld [vmem:[#allocation52_spill] sm:$0xff]  ;;  %v6170_v29 = vrot.slane %v19337_v38, 3 }
 0x45c   : > { %v3535_v3 = vadd.f32 %v19318_v28, %v16221_v49 }
 0x45d   : > { %v16331_v14 = vpop.f32.mrf.mxu2  ;;  %v5825_v12 = vsel %vm2121_vm5, %v5815_v35, %v5824_v22 }
 0x45e   : > { %v3939_v20 = vpop.f32.mrf.mxu3 }
 0x45f   : > { %v16333_v53 = vpop.f32.mrf.mxu1  ;;  %v16336_v40 = vadd.f32 %v3939_v20, %v16211_v60  ;;  %v16348_v60 = vadd.f32 %v16191_v4, %v3696_v9  ;;  %v19316_v20 = vld [vmem:[#allocation81_spill] sm:$0xff]  ;;  %v19320_v9 = vld [vmem:[#allocation55_spill] sm:$0xff] }
 0x460   : > { %19313 = vst [vmem:[#allocation59_spill] sm:$0xff] %v16333_v53  ;;  %v3697_v53 = vadd.f32 %v19320_v9, %v3535_v3  ;;  %v13066_v3 = vld [vmem:[%s18778_s3 + $0xc8] sm:$0xff]  ;;  %v16372_v9 = vld [vmem:[#allocation2 + $0x58] sm:$0xff] }
 0x461   : > { %6347 = vmatpush.bf16.msrb.mxu0 %v13066_v3 }
 0x462   : > { %11460 = vmatmul.msk.bf16.gmra.mxu1 %vm1074_vm2, %v5694_v62  ;;  %11291 = vmatmul.msk.bf16.gmra.mxu2 %vm1074_vm2, %v16341_v36  ;;  %v5338_v11 = vpop.f32.mrf.mxu0  ;;  %v19317_v62 = vunpack.c.l.b16 %v19316_v20  ;;  %v5695_v20 = vrot.slane %v16322_v21, 2  ;;  %v19322_v21 = vld [vmem:[#allocation46_spill] sm:$0xff] }
 0x463   : > { %11221 = vmatmul.msk.bf16.gmra.mxu3 %vm1074_vm2, %v19315_v18 }
 0x464   : > { %v16353_v45 = vpack.c.b16 %v5681_v55, %v19317_v62  ;;  %v16365_v55 = vadd.f32 %v16215_v5, %v3697_v53  ;;  %v13030_v53 = vld [vmem:[%s18778_s3 + $0x20] sm:$0xff] }
 0x465   : > { %v4394_v0 = vpop.f32.mrf.mxu2  ;;  %11479 = vmatmul.msk.bf16.gmra.mxu0 %vm1074_vm2, %v5825_v12  ;;  %v5696_v12 = vsel %vm1516_vm1, %v5693_v17, %v5695_v20  ;;  %v13065_v17 = vld [vmem:[%s18778_s3 + $0xc0] sm:$0xff]  ;;  %5079 = vmatpush.bf16.msra.mxu3 %v13030_v53 }
 0x466   : > { %v3942_v11 = vpop.f32.mrf.mxu3  ;;  %v5827_v18 = vshrl.u32 %v16353_v45, 16  ;;  %v5830_v4 = vshll.u32 %v16353_v45, 16  ;;  %6348 = vmatpush.bf16.msrb.mxu0 %v13065_v17 }
 0x467   : > { %v16357_v15 = vpop.f32.mrf.mxu1 }
 0x468   : > { %19319 = vst [vmem:[#allocation47_spill] sm:$0xff] %v16357_v15  ;;  %v5829_v62 = vrot.slane %v5827_v18, 2  ;;  %v5832_v49 = vrot.slane %v5830_v4, 3 }
 0x46a   : > { %v5340_v35 = vpop.f32.mrf.mxu0  ;;  %v5833_v11 = vor.u32 %v5832_v49, %v5829_v62  ;;  %v13064_v49 = vld [vmem:[%s18778_s3 + $0xb8] sm:$0xff] }
 0x46b   : > { %6245 = vmatpush.bf16.msrb.mxu1 %v13064_v49  ;;  %v19328_v49 = vld [vmem:[#allocation49_spill] sm:$0xff] }
 0x46d   : > { %v4396_v28 = vpop.f32.mrf.mxu2 }
 0x46e   : > { %v3944_v15 = vpop.f32.mrf.mxu3 }
 0x46f   : > { %v5202_v0 = vpop.f32.mrf.mxu1  ;;  %v5834_v15 = vsel %vm2121_vm5, %v5824_v22, %v5833_v11  ;;  %v19324_v22 = vld [vmem:[#allocation37_spill] sm:$0xff] }
 0x470   : > { %v5697_v0 = vrot.slane %v16353_v45, 2  ;;  %v19326_v45 = vld [vmem:[#allocation12_spill] sm:$0xff] }
 0x472   : > { %11461 = vmatmul.msk.bf16.gmra.mxu1 %vm1074_vm2, %v5696_v12  ;;  %11292 = vmatmul.msk.bf16.gmra.mxu2 %vm1074_vm2, %v16372_v9  ;;  %v16376_v5 = vpop.f32.mrf.mxu0  ;;  %v3538_v12 = vadd.f32 %v19324_v22, %v16266_v61  ;;  %v16414_v61 = vld [vmem:[#allocation2 + $0x60] sm:$0xff] }
 0x473   : > { %19321 = vst [vmem:[#allocation70_spill] sm:$0xff] %v16376_v5  ;;  %11222 = vmatmul.msk.bf16.gmra.mxu3 %vm1074_vm2, %v19322_v21 }
 0x475   : > { %v16387_v18 = vpop.f32.mrf.mxu2  ;;  %11480 = vmatmul.msk.bf16.gmra.mxu0 %vm1074_vm2, %v5834_v15  ;;  %v5698_v15 = vsel %vm1516_vm1, %v5695_v20, %v5697_v0 }
 0x476   : > { %v3947_v35 = vpop.f32.mrf.mxu3 }
 0x477   : > { %v5204_v4 = vpop.f32.mrf.mxu1  ;;  %v16391_v62 = vadd.f32 %v3947_v35, %v16258_v63  ;;  %v13063_v63 = vld [vmem:[%s18778_s3 + $0xb0] sm:$0xff] }
 0x478   : > { %6246 = vmatpush.bf16.msrb.mxu1 %v13063_v63  ;;  %v3700_v4 = vadd.f32 %v19326_v45, %v3538_v12  ;;  %v6017_v12 = vld [vmem:[#allocation2 + $0x5c] sm:$0xf]  ;;  %v6288_v63 = vld [vmem:[#allocation2 + $0x58] sm:$0x8] }
 0x479   : > { %v6016_v45 = vld [vmem:[#allocation2 + $0x58] sm:$0xc] }
 0x47a   : > { %v16396_v28 = vpop.f32.mrf.mxu0  ;;  %v6044_v5 = vunpack.c.l.b16 %v6016_v45  ;;  %v13047_v45 = vld [vmem:[%s18778_s3 + $0x50] sm:$0xff] }
 0x47b   : > { %19323 = vst [vmem:[#allocation17_spill] sm:$0xff] %v16396_v28  ;;  %v6296_v28 = vunpack.c.l.b16 %v6288_v63  ;;  %v13468_v63 = vld [vmem:[#allocation2 + $0x60] sm:$0xff]  }
 0x47d   : > { %v16401_v3 = vpop.f32.mrf.mxu2 }
 0x47e   : > { %v3949_v17 = vpop.f32.mrf.mxu3 }
 0x47f   : > { %v16403_v21 = vpop.f32.mrf.mxu1  ;;  %v16409_v53 = vadd.f32 %v3949_v17, %v16276_v30  ;;  %v16423_v30 = vadd.f32 %v16262_v59, %v3700_v4  ;;  %v13048_v59 = vld [vmem:[%s18778_s3 + $0x58] sm:$0xff] }
 0x480   : > { %19325 = vst [vmem:[#allocation11_spill] sm:$0xff] %v16403_v21  ;;  %5463 = vmatpush.bf16.msra.mxu2 %v13048_v59 }
 0x482   : > { %11462 = vmatmul.msk.bf16.gmra.mxu1 %vm1074_vm2, %v5698_v15  ;;  %11293 = vmatmul.msk.bf16.gmra.mxu2 %vm1074_vm2, %v16414_v61  ;;  %v16418_v35 = vpop.f32.mrf.mxu0 }
 0x483   : > { %19327 = vst [vmem:[#allocation60_spill] sm:$0xff] %v16418_v35  ;;  %11223 = vmatmul.msk.bf16.gmra.mxu3 %vm1074_vm2, %v19328_v49  ;;  %v16433_v35 = vunpack.c.l.b16 %v6017_v12 }
 0x484   : > { %5464 = vmatpush.bf16.msra.mxu2 %v13047_v45 }
 0x485   : > { %v16425_v22 = vpop.f32.mrf.mxu2  ;;  %11481 = vmatmul.msk.bf16.gmra.mxu0 %vm1074_vm2, %v5833_v11  ;;  %19330 = vst [vmem:[#allocation45_spill] sm:$0xff] %v16433_v35  ;;  %v16439_v4 = vpack.c.b16 %v16433_v35, %v6296_v28  ;;  %v16451_v28 = vld [vmem:[#allocation2 + $0x68] sm:$0xff] }
 0x486   : > { %v3952_v17 = vpop.f32.mrf.mxu3 }
 0x487   : > { %v16427_v20 = vpop.f32.mrf.mxu1  ;;  %v16431_v15 = vadd.f32 %v3952_v17, %v16296_v48  ;;  %19331 = vst [vmem:[#allocation87_spill] sm:$0xff] %v16439_v4  ;;  %v16444_v48 = vpack.c.b16 %v16433_v35, %v6044_v5  ;;  %v6300_v12 = vrot.slane %v16439_v4, 3  ;;  %v6301_v17 = vrot.slane %v13468_v63, 3  ;;  %v19334_v5 = vld [vmem:[#allocation112_spill] sm:$0xff] }
 0x488   : > { %19329 = vst [vmem:[#allocation83_spill] sm:$0xff] %v16427_v20 }
 0x489   : > { %19333 = vst [vmem:[#allocation77_spill] sm:$0xff] %v16444_v48  ;;  %v6302_v59 = vsel %vm2277_vm6, %v6300_v12, %v6301_v17 }
 0x48a   : > { %v5350_v49 = vpop.f32.mrf.mxu0 }
 0x48d   : > { %v4406_v11 = vpop.f32.mrf.mxu2 }
 0x48e   : > { %v3954_v21 = vpop.f32.mrf.mxu3 }
 0x48f   : > { %v16441_v20 = vpop.f32.mrf.mxu1  ;;  %v6157_v21 = vshrl.u32 %v16444_v48, 16 }
 0x490   : > { %19332 = vst [vmem:[#allocation92_spill] sm:$0xff] %v16441_v20 }
 0x491   : > { %v6159_v20 = vrot.slane %v6157_v21, 2  ;;  %v13470_v21 = vld [vmem:[#allocation2 + $0x68] sm:$0xff]  }
 0x492   : > { %11463 = vmatmul.msk.bf16.gmra.mxu1 %vm1074_vm2, %v5697_v0  ;;  %11294 = vmatmul.msk.bf16.gmra.mxu2 %vm1074_vm2, %v16451_v28  ;;  %v5353_v49 = vpop.f32.mrf.mxu0  ;;  %v6160_v0 = vshll.u32 %v16444_v48, 16 }
 0x493   : > { %11224 = vmatmul.msk.bf16.gmra.mxu3 %vm1074_vm2, %v19334_v5  ;;  %v6167_v49 = vrot.slane %v19336_v39, 2  ;;  %v16474_v39 = vrot.slane %v13470_v21, 3 }
 0x494   : > { %v6162_v4 = vrot.slane %v6160_v0, 3 }
 0x495   : > { %v4409_v11 = vpop.f32.mrf.mxu2  ;;  %11548 = vmatmul.msk.bf16.vlgmr.msrb.gmra.mxu0 %vm1074_vm2, %v6302_v59  ;;  %v6171_v48 = vor.u32 %v6170_v29, %v6167_v49  ;;  %v19340_v29 = vld [vmem:[#allocation115_spill] sm:$0xff]  ;;  %v6304_v50 = vsel %vm2277_vm6, %v6301_v17, %v16474_v39  ;;  %v19342_v59 = vld [vmem:[#allocation73_spill] sm:$0xff] }
 0x496   : > { %v3957_v35 = vpop.f32.mrf.mxu3  ;;  %v6163_v5 = vor.u32 %v6162_v4, %v6159_v20 }
 0x497   : > { %v5214_v63 = vpop.f32.mrf.mxu1 }
 0x498   : > { %v6172_v35 = vsel %vm2121_vm5, %v6163_v5, %v6171_v48  ;;  %v19344_v5 = vshll.u32 %v19342_v59, 16 }
 0x49a   : > { %v16465_v52 = vpop.f32.mrf.mxu0 }
 0x49b   : > { %19338 = vst [vmem:[#allocation36_spill] sm:$0xff] %v16465_v52 }
 0x49d   : > { %v16467_v45 = vpop.f32.mrf.mxu2 }
 0x49e   : > { %v3959_v11 = vpop.f32.mrf.mxu3 }
 0x49f   : > { %v5217_v12 = vpop.f32.mrf.mxu1  ;;  %v16470_v63 = vadd.f32 %v3959_v11, %v16348_v60 }
 0x4a0   : > { %v6179_v12 = vrot.slane %v19344_v5, 3 }
 0x4a2   : > { %11530 = vmatmul.msk.bf16.vlgmr.msrb.gmra.mxu1 %vm1074_vm2, %v6172_v35  ;;  %11295 = vmatmul.msk.bf16.gmra.mxu2 %vm1074_vm2, %v15949_v1  ;;  %v16478_v38 = vpop.f32.mrf.mxu0  ;;  %v19343_v1 = vshrl.u32 %v19342_v59, 16 }
 0x4a3   : > { %19339 = vst [vmem:[#allocation114_spill] sm:$0xff] %v16478_v38  ;;  %11225 = vmatmul.msk.bf16.gmra.mxu3 %vm1074_vm2, %v19340_v29  ;;  %v19346_v29 = vld [vmem:[#allocation53_spill] sm:$0xff] }
 0x4a4   : > { %v6176_v49 = vrot.slane %v19343_v1, 2  ;;  %v5416_v38 = vrot.slane %v19346_v29, 1 }
 0x4a5   : > { %v16484_v60 = vpop.f32.mrf.mxu2  ;;  %11549 = vmatmul.msk.bf16.gmra.mxu0 %vm1074_vm2, %v6304_v50 }
 0x4a6   : > { %v3962_v4 = vpop.f32.mrf.mxu3  ;;  %v6180_v35 = vor.u32 %v6179_v12, %v6176_v49  ;;  %v19348_v49 = vld [vmem:[#allocation13_spill] sm:$0xff] }
 0x4a7   : > { %v16486_v20 = vpop.f32.mrf.mxu1  ;;  %v16490_v0 = vadd.f32 %v3962_v4, %v16365_v55  ;;  %v13472_v55 = vld [vmem:[#allocation2 + $0x70] sm:$0xff]  }
 0x4a8   : > { %19341 = vst [vmem:[#allocation63_spill] sm:$0xff] %v16486_v20  ;;  %v6181_v50 = vsel %vm2121_vm5, %v6171_v48, %v6180_v35  ;;  %v13471_v20 = vld [vmem:[#allocation2 + $0x58] sm:$0xff]  ;;  %v6305_v4 = vrot.slane %v13472_v55, 3 }
 0x4a9   : > { %v5417_v7 = vrot.slane %v13471_v20, 1 }
 0x4aa   : > { %v5360_v11 = vpop.f32.mrf.mxu0  ;;  %v16512_v48 = vsel %vm2277_vm6, %v16474_v39, %v6305_v4 }
 0x4ab   : > { %v5418_v1 = vsel %vm1238_vm7, %v5416_v38, %v5417_v7  ;;  %v19349_v11 = vld [vmem:[#allocation74_spill] sm:$0xff] }
 0x4ad   : > { %v4416_v21 = vpop.f32.mrf.mxu2 }
 0x4ae   : > { %v3964_v52 = vpop.f32.mrf.mxu3  ;;  %v19350_v21 = vshrl.u32 %v19349_v11, 16 }
 0x4af   : > { %v16496_v17 = vpop.f32.mrf.mxu1  ;;  %v13050_v52 = vld [vmem:[%s18778_s3 + $0x68] sm:$0xff] }
 0x4b0   : > { %19345 = vst [vmem:[#allocation120_spill] sm:$0xff] %v16496_v17  ;;  %5599 = vmatpush.bf16.msrb.mxu3 %v13050_v52  ;;  %v6185_v29 = vrot.slane %v19350_v21, 2 }
 0x4b2   : > { %11531 = vmatmul.msk.bf16.gmra.mxu1 %vm1074_vm2, %v6181_v50  ;;  %11406 = vmatmul.msk.bf16.vlgmr.msra.gmra.mxu2 %vm1074_vm2, %v5418_v1  ;;  %v16503_v5 = vpop.f32.mrf.mxu0  ;;  %v19351_v50 = vshll.u32 %v19349_v11, 16  ;;  %v13474_v11 = vld [vmem:[#allocation2 + $0x78] sm:$0xff]  }
 0x4b3   : > { %19347 = vst [vmem:[#allocation116_spill] sm:$0xff] %v16503_v5  ;;  %11226 = vmatmul.msk.bf16.gmra.mxu3 %vm1074_vm2, %v19348_v49  ;;  %v19353_v5 = vld [vmem:[#allocation56_spill] sm:$0xff] }
 0x4b4   : > { %v6188_v55 = vrot.slane %v19351_v50, 3  ;;  %v3539_v17 = vadd.f32 %v19353_v5, %v16287_v13  ;;  %v16533_v50 = vrot.slane %v13474_v11, 3  ;;  %v19361_v11 = vld [vmem:[#allocation78_spill] sm:$0xff] }
 0x4b5   : > { %v4419_v20 = vpop.f32.mrf.mxu2  ;;  %11550 = vmatmul.msk.bf16.gmra.mxu0 %vm1074_vm2, %v16512_v48 }
 0x4b6   : > { %v3967_v38 = vpop.f32.mrf.mxu3  ;;  %v6189_v49 = vor.u32 %v6188_v55, %v6185_v29  ;;  %v3701_v13 = vadd.f32 %v15788_v10, %v3539_v17  ;;  %v19356_v55 = vld [vmem:[#allocation71_spill] sm:$0xff] }
 0x4b7   : > { %v5224_v12 = vpop.f32.mrf.mxu1 }
 0x4b8   : > { %v13473_v12 = vld [vmem:[#allocation2 + $0x60] sm:$0xff]  ;;  %v6190_v21 = vsel %vm2121_vm5, %v6180_v35, %v6189_v49  ;;  %v3862_v10 = vadd.f32 %v16281_v54, %v3701_v13 }
 0x4b9   : > { %v5419_v32 = vrot.slane %v13473_v12, 1  ;;  %v19357_v35 = vld [vmem:[#allocation21_spill] sm:$0xff] }
 0x4ba   : > { %v16520_v1 = vpop.f32.mrf.mxu0  ;;  %v3540_v12 = vadd.f32 %v19357_v35, %v16303_v44 }
 0x4bb   : > { %19352 = vst [vmem:[#allocation35_spill] sm:$0xff] %v16520_v1  ;;  %v5420_v29 = vsel %vm1238_vm7, %v5417_v7, %v5419_v32  ;;  %v6027_v1 = vld [vmem:[#allocation2 + $0x84] sm:$0x1] }
 0x4bc   : > { %v3702_v44 = vadd.f32 %v15808_v26, %v3540_v12 }
 0x4bd   : > { %v16524_v59 = vpop.f32.mrf.mxu2 }
 0x4be   : > { %19354 = vst [vmem:[#allocation15_spill] sm:$0xff] %v16524_v59  ;;  %v3969_v52 = vpop.f32.mrf.mxu3  ;;  %v3863_v13 = vadd.f32 %v16298_v24, %v3702_v44 }
 0x4bf   : > { %v16526_v20 = vpop.f32.mrf.mxu1  ;;  %v16529_v38 = vadd.f32 %v3969_v52, %v16423_v30  ;;  %v16542_v30 = vsel %vm2277_vm6, %v6305_v4, %v16533_v50  ;;  %v19363_v4 = vshll.u32 %v19361_v11, 16 }
 0x4c0   : > { %19355 = vst [vmem:[#allocation64_spill] sm:$0xff] %v16526_v20 }
 0x4c2   : > { %11532 = vmatmul.msk.bf16.gmra.mxu1 %vm1074_vm2, %v6190_v21  ;;  %11407 = vmatmul.msk.bf16.gmra.mxu2 %vm1074_vm2, %v5420_v29  ;;  %v5879_v5 = vpop.f32.mrf.mxu0  ;;  %v19362_v29 = vshrl.u32 %v19361_v11, 16  ;;  %v5031_v11 = vrot.slane %v16039_v16, 1 }
 0x4c3   : > { %11227 = vmatmul.msk.bf16.gmra.mxu3 %vm1074_vm2, %v19356_v55  ;;  %v6197_v55 = vrot.slane %v19363_v4, 3  ;;  %v5032_v4 = vrot.slane %v16341_v36, 1 }
 0x4c4   : > { %v6194_v5 = vrot.slane %v19362_v29, 2 }
 0x4c5   : > { %v16546_v52 = vpop.f32.mrf.mxu2  ;;  %11551 = vmatmul.msk.bf16.gmra.mxu0 %vm1074_vm2, %v16542_v30  ;;  %v5033_v36 = vsel %vm1238_vm7, %v5031_v11, %v5032_v4  ;;  %v16595_v11 = vld [vmem:[%s18779_s4] ss:$0 sm:$0xff] }
 0x4c6   : > { %19358 = vst [vmem:[#allocation80_spill] sm:$0xff] %v16546_v52  ;;  %v3972_v7 = vpop.f32.mrf.mxu3  ;;  %v6198_v20 = vor.u32 %v6197_v55, %v6194_v5  ;;  %v4139_v52 = vadd.f32 %v15778_v6, %v16320_v43  ;;  %v19365_v6 = vld [vmem:[#allocation105_spill] sm:$0xff] }
 0x4c7   : > { %v16548_v21 = vpop.f32.mrf.mxu1  ;;  %v16553_v17 = vadd.f32 %v3972_v7, %v3862_v10  ;;  %v13475_v10 = vld [vmem:[#allocation2 + $0x68] sm:$0xff]  ;;  %v6309_v43 = vrot.slane %v19365_v6, 3  ;;  %v19366_v5 = vld [vmem:[#allocation9_spill] sm:$0xff] }
 0x4c8   : > { %19359 = vst [vmem:[#allocation121_spill] sm:$0xff] %v16548_v21  ;;  %v6055_v21 = vunpack.c.l.b16 %v6027_v1  ;;  %v5421_v7 = vrot.slane %v13475_v10, 1  ;;  %v6199_v26 = vsel %vm2121_vm5, %v6189_v49, %v6198_v20  ;;  %v19364_v1 = vld [vmem:[#allocation102_spill] sm:$0xff]  ;;  %v4300_v55 = vadd.f32 %v19366_v5, %v4139_v52  ;;  %v19368_v5 = vld [vmem:[#allocation20_spill] sm:$0xff] }
 0x4c9   : > { %19360 = vst [vmem:[#allocation34_spill] sm:$0xff] %v16553_v17  ;;  %v6310_v44 = vsel %vm2277_vm6, %v16533_v50, %v6309_v43 }
 0x4ca   : > { %v5881_v35 = vpop.f32.mrf.mxu0  ;;  %v16571_v12 = vpack.c.b16 %v6055_v21, %v19364_v1  ;;  %v5422_v24 = vsel %vm1238_vm7, %v5419_v32, %v5421_v7 }
 0x4cb   : > { %v19367_v35 = vld [vmem:[#allocation16_spill] sm:$0xff] }
 0x4cc   : > { %v6201_v49 = vshrl.u32 %v16571_v12, 16  ;;  %v6204_v21 = vshll.u32 %v16571_v12, 16  ;;  %v4140_v32 = vadd.f32 %v19367_v35, %v16336_v40  ;;  %v13073_v35 = vld [vmem:[%s18778_s3 + $0x100] sm:$0xff] }
 0x4cd   : > { %v16562_v59 = vpop.f32.mrf.mxu2 }
 0x4ce   : > { %v3974_v29 = vpop.f32.mrf.mxu3  ;;  %v6206_v6 = vrot.slane %v6204_v21, 3  ;;  %v4301_v40 = vadd.f32 %v19368_v5, %v4140_v32 }
 0x4cf   : > { %v5743_v54 = vpop.f32.mrf.mxu1  ;;  %v16567_v17 = vadd.f32 %v3974_v29, %v3863_v13  ;;  %v4429_v13 = vadd.f32 %v16314_v34, %v4300_v55 }
 0x4d0   : > { %v4430_v32 = vadd.f32 %v16331_v14, %v4301_v40  ;;  %v13072_v40 = vld [vmem:[%s18778_s3 + $0xf8] sm:$0xff] }
 0x4d1   : > { %6691 = vmatpush.bf16.msra.mxu1 %v13072_v40 }
 0x4d2   : > { %11533 = vmatmul.msk.bf16.gmra.mxu1 %vm1074_vm2, %v6199_v26  ;;  %11408 = vmatmul.msk.bf16.gmra.mxu2 %vm1074_vm2, %v5422_v24  ;;  %v16578_v16 = vpop.f32.mrf.mxu0  ;;  %v6203_v26 = vrot.slane %v6201_v49, 2 }
 0x4d3   : > { %11308 = vmatmul.msk.bf16.vlgmr.msra.gmra.mxu3 %vm1074_vm2, %v5033_v36  ;;  %v13074_v36 = vld [vmem:[%s18778_s3 + $0x108] sm:$0xff] }
 0x4d4   : > { %v6207_v55 = vor.u32 %v6206_v6, %v6203_v26  ;;  %6827 = vmatpush.bf16.msra.mxu0 %v13074_v36  ;;  %v5034_v6 = vrot.slane %v16372_v9, 1  ;;  %v19369_v9 = vld [vmem:[#allocation100_spill] sm:$0xff] }
 0x4d5   : > { %v16588_v54 = vpop.f32.mrf.mxu2  ;;  %11552 = vmatmul.msk.bf16.gmra.mxu0 %vm1074_vm2, %v6310_v44 }
 0x4d6   : > { %v4536_v10 = vpop.f32.mrf.mxu3  ;;  %v6208_v26 = vsel %vm2121_vm5, %v6198_v20, %v6207_v55  ;;  %v5035_v20 = vsel %vm1238_vm7, %v5032_v4, %v5034_v6 }
 0x4d7   : > { %v5745_v52 = vpop.f32.mrf.mxu1  ;;  %v4576_v29 = vadd.f32 %v4536_v10, %v4429_v13  ;;  %v6598_v10 = vld [vmem:[#allocation2 + $0x60] sm:$0x8] }
 0x4d8   : > { %v13476_v52 = vld [vmem:[#allocation2 + $0x70] sm:$0xff]  ;;  %6828 = vmatpush.bf16.msra.mxu0 %v13073_v35  ;;  %v6626_v36 = vunpack.c.l.b16 %v6598_v10 }
 0x4d9   : > { %v4705_v24 = vadd.f32 %v16063_v37, %v4576_v29  ;;  %v5423_v13 = vrot.slane %v13476_v52, 1 }
 0x4da   : > { %v16602_v44 = vpop.f32.mrf.mxu0 }
 0x4db   : > { %v4725_v34 = vadd.f32 %v16595_v11, %v4705_v24  ;;  %v5424_v14 = vsel %vm1238_vm7, %v5421_v7, %v5423_v13  ;;  %v19370_v7 = vunpack.c.l.b16 %v19369_v9 }
 0x4dd   : > { %v4741_v49 = vmax.f32 %v4725_v34, 0.0  ;;  %v16608_v21 = vpop.f32.mrf.mxu2 }
 0x4de   : > { %v4538_v29 = vpop.f32.mrf.mxu3 }
 0x4df   : > { %v16610_v37 = vpop.f32.mrf.mxu1  ;;  %v4757_v5 = vpack.c.bf16 %v4741_v49, %v4741_v49  ;;  %v4577_v24 = vadd.f32 %v4538_v29, %v4430_v32  ;;  %v6638_v32 = vpack.c.b16 %v19370_v7, %v6626_v36  ;;  %v19372_v7 = vld [vmem:[#allocation94_spill] sm:$0xff] }
 0x4e1   : > { %4774 = vst.msk [vmem:[#allocation3] sm:$0xf] %vm4773_vm9, %v4757_v5  ;;  %v4706_v34 = vadd.f32 %v16085_v31, %v4577_v24  ;;  %v13071_v31 = vld [vmem:[%s18778_s3 + $0xf0] sm:$0xff]  ;;  %v6739_v24 = vshrl.u32 %v6638_v32, 16 }
 0x4e2   : > { %11534 = vmatmul.msk.bf16.gmra.mxu1 %vm1074_vm2, %v6208_v26  ;;  %11409 = vmatmul.msk.bf16.gmra.mxu2 %vm1074_vm2, %v5424_v14  ;;  %v16623_v49 = vpop.f32.mrf.mxu0  ;;  %v6742_v26 = vshll.u32 %v6638_v32, 16 }
 0x4e3   : > { %v4726_v35 = vadd.f32 %v16595_v11, %v4706_v34  ;;  %11309 = vmatmul.msk.bf16.gmra.mxu3 %vm1074_vm2, %v5035_v20  ;;  %6692 = vmatpush.bf16.msra.mxu1 %v13071_v31  ;;  %v13049_v34 = vld [vmem:[%s18778_s3 + $0x60] sm:$0xff]  ;;  %v6741_v36 = vrot.slane %v6739_v24, 3  ;;  %v19371_v20 = vld [vmem:[#allocation76_spill] sm:$0xff]  ;;  %v5425_v31 = vrot.slane %v19372_v7, 1 }
 0x4e4   : > { %5600 = vmatpush.bf16.msrb.mxu3 %v13049_v34  ;;  %v6744_v40 = vrot.slane %v6742_v26, 4  ;;  %v13060_v24 = vld [vmem:[%s18778_s3 + $0x98] sm:$0xff] }
 0x4e5   : > { %v4742_v52 = vmax.f32 %v4726_v35, 0.0  ;;  %v4995_v10 = vpop.f32.mrf.mxu2  ;;  %11553 = vmatmul.msk.bf16.gmra.mxu0 %vm1074_vm2, %v6309_v43  ;;  %v4143_v35 = vadd.f32 %v19371_v20, %v16391_v62  ;;  %5973 = vmatpush.bf16.msrb.mxu2 %v13060_v24 }
 0x4e6   : > { %v4541_v5 = vpop.f32.mrf.mxu3  ;;  %v5036_v10 = vrot.slane %v16414_v61, 1  ;;  %v19373_v61 = vld [vmem:[#allocation79_spill] sm:$0xff] }
 0x4e7   : > { %v16633_v29 = vpop.f32.mrf.mxu1  ;;  %v4758_v4 = vpack.c.bf16 %v4742_v52, %v4742_v52  ;;  %v6745_v5 = vor.u32 %v6744_v40, %v6741_v36  ;;  %v4304_v34 = vadd.f32 %v15893_v42, %v4143_v35 }
 0x4e8   : > { %v5037_v26 = vsel %vm1238_vm7, %v5034_v6, %v5036_v10 }
 0x4e9   : > { %4775 = vst.msk [vmem:[#allocation3 + $0x4] sm:$0xf] %vm4773_vm9, %v4758_v4  ;;  %v5426_v4 = vsel %vm1238_vm7, %v5423_v13, %v5425_v31  ;;  %v4144_v13 = vadd.f32 %v15869_v58, %v16409_v53  ;;  %v4433_v36 = vadd.f32 %v16387_v18, %v4304_v34  ;;  %v6644_v53 = vrot.slane %v6638_v32, 3 }
 0x4ea   : > { %v5891_v14 = vpop.f32.mrf.mxu0  ;;  %v5038_v34 = vrot.slane %v16451_v28, 1 }
 0x4eb   : > { %v4305_v35 = vadd.f32 %v15908_v2, %v4144_v13  ;;  %v19374_v13 = vld [vmem:[#allocation14_spill] sm:$0xff] }
 0x4ed   : > { %v4997_v9 = vpop.f32.mrf.mxu2 }
 0x4ee   : > { %v4543_v52 = vpop.f32.mrf.mxu3  ;;  %v13059_v9 = vld [vmem:[%s18778_s3 + $0x90] sm:$0xff] }
 0x4ef   : > { %v16642_v43 = vpop.f32.mrf.mxu1  ;;  %5974 = vmatpush.bf16.msrb.mxu2 %v13059_v9  ;;  %v4145_v52 = vadd.f32 %v15883_v19, %v16431_v15 }
 0x4f1   : > { %v4306_v15 = vadd.f32 %v15931_v46, %v4145_v52 }
 0x4f2   : > { %11535 = vmatmul.msk.bf16.gmra.mxu1 %vm1074_vm2, %v6207_v55  ;;  %11410 = vmatmul.msk.bf16.gmra.mxu2 %vm1074_vm2, %v5426_v4  ;;  %v5894_v62 = vpop.f32.mrf.mxu0  ;;  %v6754_v55 = vsel %vm2882_vm8, %v6745_v5, %v19373_v61 }
 0x4f3   : > { %11310 = vmatmul.msk.bf16.gmra.mxu3 %vm1074_vm2, %v5037_v26  ;;  %v6646_v26 = vsel %vm2277_vm6, %v6644_v53, %v16474_v39  ;;  %v4435_v46 = vadd.f32 %v16425_v22, %v4306_v15  ;;  %v19375_v22 = vld [vmem:[#allocation19_spill] sm:$0xff]  ;;  %v4149_v15 = vadd.f32 %v15955_v51, %v16490_v0 }
 0x4f5   : > { %v16659_v14 = vpop.f32.mrf.mxu2  ;;  %11620 = vmatmul.msk.bf16.vlgmr.msra.gmra.mxu0 %vm1074_vm2, %v6754_v55 }
 0x4f6   : > { %v4546_v40 = vpop.f32.mrf.mxu3 }
 0x4f7   : > { %v5755_v42 = vpop.f32.mrf.mxu1  ;;  %v4580_v20 = vadd.f32 %v4546_v40, %v4433_v36 }
 0x4f9   : > { %v4709_v6 = vadd.f32 %v16119_v25, %v4580_v20  ;;  %v4434_v25 = vadd.f32 %v16401_v3, %v4305_v35  ;;  %v5039_v3 = vsel %vm1238_vm7, %v5036_v10, %v5038_v34 }
 0x4fa   : > { %v16668_v7 = vpop.f32.mrf.mxu0 }
 0x4fb   : > { %v4729_v58 = vadd.f32 %v16595_v11, %v4709_v6 }
 0x4fd   : > { %v4745_v18 = vmax.f32 %v4729_v58, 0.0  ;;  %v16673_v5 = vpop.f32.mrf.mxu2  ;;  %v5040_v58 = vrot.slane %v16154_v8, 1 }
 0x4fe   : > { %v4548_v2 = vpop.f32.mrf.mxu3 }
 0x4ff   : > { %v5758_v4 = vpop.f32.mrf.mxu1  ;;  %v4761_v24 = vpack.c.bf16 %v4745_v18, %v4745_v18  ;;  %v4581_v62 = vadd.f32 %v4548_v2, %v4434_v25  ;;  %v5041_v52 = vsel %vm1238_vm7, %v5038_v34, %v5040_v58  ;;  %v4148_v18 = vadd.f32 %v15943_v41, %v16470_v63  ;;  %v19376_v25 = vld [vmem:[#allocation84_spill] sm:$0xff]  ;;  %v16715_v2 = vld [vmem:[#allocation2 + $0x80] sm:$0xff]   ;;  %v13062_v34 = vld [vmem:[%s18778_s3 + $0xa8] sm:$0xff] }
 0x500   : > { %6109 = vmatpush.bf16.msra.mxu3 %v13062_v34 }
 0x501   : > { %4778 = vst.msk [vmem:[#allocation3 + $0x10] sm:$0xf] %vm4773_vm9, %v4761_v24  ;;  %v4710_v19 = vadd.f32 %v16140_v47, %v4581_v62  ;;  %v6774_v24 = vshrl.u32 %v16715_v2, 16  ;;  %v6777_v62 = vshll.u32 %v16715_v2, 16 }
 0x502   : > { %11602 = vmatmul.msk.bf16.vlgmr.msra.gmra.mxu1 %vm1074_vm2, %v6646_v26  ;;  %11411 = vmatmul.msk.bf16.gmra.mxu2 %vm1074_vm2, %v5425_v31  ;;  %v16684_v32 = vpop.f32.mrf.mxu0  ;;  %v4309_v26 = vadd.f32 %v15987_v56, %v4148_v18 }
 0x503   : > { %v4730_v28 = vadd.f32 %v16595_v11, %v4710_v19  ;;  %11311 = vmatmul.msk.bf16.gmra.mxu3 %vm1074_vm2, %v5039_v3  ;;  %v6776_v41 = vrot.slane %v6774_v24, 3  ;;  %v6779_v63 = vrot.slane %v6777_v62, 4 }
 0x505   : > { %v4746_v61 = vmax.f32 %v4730_v28, 0.0  ;;  %v16689_v39 = vpop.f32.mrf.mxu2  ;;  %11621 = vmatmul.msk.bf16.gmra.mxu0 %vm1074_vm2, %v19374_v13 }
 0x506   : > { %v4551_v47 = vpop.f32.mrf.mxu3 }
 0x507   : > { %v16691_v55 = vpop.f32.mrf.mxu1  ;;  %v4762_v31 = vpack.c.bf16 %v4746_v61, %v4746_v61  ;;  %v4582_v42 = vadd.f32 %v4551_v47, %v4435_v46  ;;  %v4438_v61 = vadd.f32 %v16467_v45, %v4309_v26  ;;  %v6609_v46 = vld [vmem:[#allocation2 + $0x8c] sm:$0x3]  ;;  %v19378_v45 = vld [vmem:[#allocation82_spill] sm:$0xff]  ;;  %v6651_v26 = vrot.slane %v16715_v2, 3  ;;  %v19382_v2 = vld [vmem:[#allocation24_spill] sm:$0xff] }
 0x509   : > { %4779 = vst.msk [vmem:[#allocation3 + $0x14] sm:$0xf] %vm4773_vm9, %v4762_v31  ;;  %v4711_v10 = vadd.f32 %v16152_v57, %v4582_v42  ;;  %v6780_v31 = vor.u32 %v6779_v63, %v6776_v41  ;;  %v6637_v42 = vunpack.c.l.b16 %v6609_v46 }
 0x50a   : > { %v5901_v36 = vpop.f32.mrf.mxu0 }
 0x50b   : > { %v4731_v40 = vadd.f32 %v16595_v11, %v4711_v10  ;;  %v4310_v36 = vadd.f32 %v16009_v23, %v4149_v15 }
 0x50d   : > { %v4747_v20 = vmax.f32 %v4731_v40, 0.0  ;;  %v5007_v6 = vpop.f32.mrf.mxu2  ;;  %v19377_v40 = vld [vmem:[#allocation85_spill] sm:$0xff]  ;;  %v4439_v23 = vadd.f32 %v16484_v60, %v4310_v36  ;;  %v19383_v36 = vld [vmem:[#allocation18_spill] sm:$0xff] }
 0x50e   : > { %v4553_v9 = vpop.f32.mrf.mxu3  ;;  %v19379_v6 = vld [vmem:[#allocation99_spill] sm:$0xff] }
 0x50f   : > { %v16699_v35 = vpop.f32.mrf.mxu1  ;;  %v4763_v53 = vpack.c.bf16 %v4747_v20, %v4747_v20  ;;  %v6781_v20 = vsel %vm2882_vm8, %v19378_v45, %v6780_v31  ;;  %v19380_v9 = vunpack.c.l.b16 %v19379_v6  ;;  %v19384_v45 = vld [vmem:[#allocation66_spill] sm:$0xff] }
 0x511   : > { %4780 = vst.msk [vmem:[#allocation3 + $0x18] sm:$0xf] %vm4773_vm9, %v4763_v53 }
 0x512   : > { %11603 = vmatmul.msk.bf16.gmra.mxu1 %vm1074_vm2, %v16512_v48  ;;  %11494 = vmatmul.msk.bf16.vlgmr.msrb.gmra.mxu2 %vm1074_vm2, %v19375_v22  ;;  %v16707_v57 = vpop.f32.mrf.mxu0 }
 0x513   : > { %11312 = vmatmul.msk.bf16.gmra.mxu3 %vm1074_vm2, %v5041_v52 }
 0x515   : > { %v5010_v4 = vpop.f32.mrf.mxu2  ;;  %11622 = vmatmul.msk.bf16.gmra.mxu0 %vm1074_vm2, %v19376_v25 }
 0x516   : > { %v4556_v48 = vpop.f32.mrf.mxu3 }
 0x517   : > { %v5765_v8 = vpop.f32.mrf.mxu1 }
 0x51a   : > { %v16723_v19 = vpop.f32.mrf.mxu0 }
 0x51d   : > { %v16727_v3 = vpop.f32.mrf.mxu2 }
 0x51e   : > { %v4558_v56 = vpop.f32.mrf.mxu3 }
 0x51f   : > { %v16729_v28 = vpop.f32.mrf.mxu1  ;;  %v4585_v47 = vadd.f32 %v4558_v56, %v4438_v61  ;;  %v6652_v56 = vsel %vm2277_vm6, %v16533_v50, %v6651_v26 }
 0x521   : > { %v4714_v10 = vadd.f32 %v16217_v33, %v4585_v47 }
 0x522   : > { %11604 = vmatmul.msk.bf16.gmra.mxu1 %vm1074_vm2, %v16542_v30  ;;  %11495 = vmatmul.msk.bf16.gmra.mxu2 %vm1074_vm2, %v19377_v40  ;;  %v6355_v51 = vpop.f32.mrf.mxu0  ;;  %v16744_v30 = vpack.c.b16 %v6637_v42, %v19380_v9  ;;  %v4152_v40 = vadd.f32 %v19383_v36, %v16529_v38  ;;  %v13086_v9 = vld [vmem:[%s18778_s3 + $0x148] sm:$0xff] }
 0x523   : > { %v4734_v0 = vadd.f32 %v16595_v11, %v4714_v10  ;;  %11313 = vmatmul.msk.bf16.gmra.mxu3 %vm1074_vm2, %v5040_v58  ;;  %7267 = vmatpush.bf16.msrb.mxu0 %v13086_v9 }
 0x524   : > { %v6783_v58 = vshrl.u32 %v16744_v30, 16  ;;  %v6786_v8 = vshll.u32 %v16744_v30, 16  ;;  %v6653_v38 = vrot.slane %v16744_v30, 3 }
 0x525   : > { %v4750_v53 = vmax.f32 %v4734_v0, 0.0  ;;  %v16746_v22 = vpop.f32.mrf.mxu2  ;;  %11623 = vmatmul.msk.bf16.gmra.mxu0 %vm1074_vm2, %v6781_v20  ;;  %v4313_v20 = vadd.f32 %v19384_v45, %v4152_v40 }
 0x526   : > { %v4561_v52 = vpop.f32.mrf.mxu3  ;;  %v6785_v34 = vrot.slane %v6783_v58, 3  ;;  %v6788_v41 = vrot.slane %v6786_v8, 4  ;;  %v19388_v8 = vld [vmem:[#allocation15_spill] sm:$0xff] }
 0x527   : > { %v16748_v33 = vpop.f32.mrf.mxu1  ;;  %v4766_v18 = vpack.c.bf16 %v4750_v53, %v4750_v53  ;;  %v4586_v4 = vadd.f32 %v4561_v52, %v4439_v23  ;;  %v13085_v53 = vld [vmem:[%s18778_s3 + $0x140] sm:$0xff] }
 0x528   : > { %v6789_v47 = vor.u32 %v6788_v41, %v6785_v34  ;;  %v19386_v23 = vld [vmem:[#allocation34_spill] sm:$0xff]  ;;  %v6654_v34 = vsel %vm2277_vm6, %v6651_v26, %v6653_v38  ;;  %7268 = vmatpush.bf16.msrb.mxu0 %v13085_v53  ;;  %v19389_v41 = vld [vmem:[#allocation44_spill] sm:$0xff]  ;;  %v19396_v53 = vld [vmem:[#allocation65_spill] sm:$0xff] }
 0x529   : > { %4783 = vst.msk [vmem:[#allocation3 + $0x24] sm:$0xf] %vm4773_vm9, %v4766_v18  ;;  %v4715_v48 = vadd.f32 %v16232_v27, %v4586_v4  ;;  %v19381_v27 = vld [vmem:[#allocation86_spill] sm:$0xff] }
 0x52a   : > { %v6357_v24 = vpop.f32.mrf.mxu0  ;;  %v6790_v10 = vsel %vm2882_vm8, %v6780_v31, %v6789_v47  ;;  %v13080_v31 = vld [vmem:[%s18778_s3 + $0x138] sm:$0xff]  ;;  %v19387_v52 = vld [vmem:[#allocation26_spill] sm:$0xff] }
 0x52b   : > { %v4735_v62 = vadd.f32 %v16595_v11, %v4715_v48  ;;  %7145 = vmatpush.bf16.msrb.mxu1 %v13080_v31  ;;  %v4153_v18 = vadd.f32 %v19387_v52, %v19386_v23  ;;  %v4442_v48 = vadd.f32 %v19388_v8, %v4313_v20  ;;  %v13079_v24 = vld [vmem:[%s18778_s3 + $0x130] sm:$0xff]  ;;  %v13061_v26 = vld [vmem:[%s18778_s3 + $0xa0] sm:$0xff] }
 0x52c   : > { %6110 = vmatpush.bf16.msra.mxu3 %v13061_v26  ;;  %v19397_v52 = vld [vmem:[#allocation28_spill] sm:$0xff] }
 0x52d   : > { %v4751_v63 = vmax.f32 %v4735_v62, 0.0  ;;  %v5017_v60 = vpop.f32.mrf.mxu2  ;;  %v13067_v26 = vld [vmem:[%s18778_s3 + $0xd0] sm:$0xff] }
 0x52e   : > { %v4563_v61 = vpop.f32.mrf.mxu3  ;;  %v19390_v60 = vld [vmem:[#allocation22_spill] sm:$0xff] }
 0x52f   : > { %v6253_v15 = vpop.f32.mrf.mxu1  ;;  %v4767_v46 = vpack.c.bf16 %v4751_v63, %v4751_v63  ;;  %7146 = vmatpush.bf16.msrb.mxu1 %v13079_v24  ;;  %v19391_v61 = vld [vmem:[#allocation88_spill] sm:$0xff] }
 0x530   : > { %v4314_v15 = vadd.f32 %v19390_v60, %v4153_v18  ;;  %v16826_v24 = vld [vmem:[#allocation2 + $0x6c] sm:$0xf0] }
 0x531   : > { %4784 = vst.msk [vmem:[#allocation3 + $0x28] sm:$0xf] %vm4773_vm9, %v4767_v46 }
 0x532   : > { %11605 = vmatmul.msk.bf16.gmra.mxu1 %vm1074_vm2, %v6652_v56  ;;  %11496 = vmatmul.msk.bf16.gmra.mxu2 %vm1074_vm2, %v19381_v27  ;;  %v16764_v42 = vpop.f32.mrf.mxu0  ;;  %v19393_v27 = vld [vmem:[#allocation23_spill] sm:$0xff] }
 0x533   : > { %11424 = vmatmul.msk.bf16.vlgmr.msrb.gmra.mxu3 %vm1074_vm2, %v19382_v2  ;;  %v19394_v2 = vld [vmem:[#allocation67_spill] sm:$0xff] }
 0x535   : > { %v16771_v51 = vpop.f32.mrf.mxu2  ;;  %11624 = vmatmul.msk.bf16.gmra.mxu0 %vm1074_vm2, %v6790_v10  ;;  %v4154_v10 = vadd.f32 %v19394_v2, %v16567_v17  ;;  %v13068_v17 = vld [vmem:[%s18778_s3 + $0xd8] sm:$0xff]  ;;  %v19400_v2 = vld [vmem:[#allocation91_spill] sm:$0xff] }
 0x536   : > { %v4566_v0 = vpop.f32.mrf.mxu3  ;;  %6463 = vmatpush.bf16.msra.mxu2 %v13068_v17 }
 0x537   : > { %v6255_v50 = vpop.f32.mrf.mxu1  ;;  %v19395_v0 = vld [vmem:[#allocation80_spill] sm:$0xff]  ;;  %v4315_v18 = vadd.f32 %v19397_v52, %v4154_v10 }
 0x538   : > { %v4443_v45 = vadd.f32 %v19395_v0, %v4314_v15  ;;  %v16850_v52 = vld [vmem:[#allocation2 + $0x6c] sm:$0xff]  }
 0x53a   : > { %v16775_v6 = vpop.f32.mrf.mxu0  ;;  %6464 = vmatpush.bf16.msra.mxu2 %v13067_v26  ;;  %v19407_v26 = vld [vmem:[#allocation90_spill] sm:$0xff] }
 0x53b   : > { %19385 = vst [vmem:[#allocation50_spill] sm:$0xff] %v16775_v6 }
 0x53d   : > { %v16789_v4 = vpop.f32.mrf.mxu2 }
 0x53e   : > { %v4568_v30 = vpop.f32.mrf.mxu3 }
 0x53f   : > { %v16791_v58 = vpop.f32.mrf.mxu1  ;;  %v4589_v62 = vadd.f32 %v4568_v30, %v4442_v48 }
 0x541   : > { %v4718_v63 = vadd.f32 %v19389_v41, %v4589_v62  ;;  %v4444_v41 = vadd.f32 %v16562_v59, %v4315_v18  ;;  %v19403_v18 = vld [vmem:[#allocation73_spill] sm:$0xff] }
 0x542   : > { %11606 = vmatmul.msk.bf16.gmra.mxu1 %vm1074_vm2, %v6654_v34  ;;  %11497 = vmatmul.msk.bf16.gmra.mxu2 %vm1074_vm2, %v19391_v61  ;;  %v16803_v46 = vpop.f32.mrf.mxu0  ;;  %v7086_v61 = vld [vmem:[#allocation2 + $0x64] sm:$0xe] }
 0x543   : > { %19392 = vst [vmem:[#allocation62_spill] sm:$0xff] %v16803_v46  ;;  %v4738_v56 = vadd.f32 %v16595_v11, %v4718_v63  ;;  %11425 = vmatmul.msk.bf16.gmra.mxu3 %vm1074_vm2, %v19393_v27  ;;  %v19437_v46 = vld [vmem:[#allocation72_spill] sm:$0xff] }
 0x545   : > { %v4754_v36 = vmax.f32 %v4738_v56, 0.0  ;;  %v5471_v40 = vpop.f32.mrf.mxu2  ;;  %11625 = vmatmul.msk.bf16.gmra.mxu0 %vm1074_vm2, %v6789_v47  ;;  %v16824_v47 = vld [vmem:[#allocation2 + $0x6c] sm:$0xff]   ;;  %v19399_v56 = vld [vmem:[#allocation10_spill] sm:$0xff] }
 0x546   : > { %v4571_v20 = vpop.f32.mrf.mxu3  ;;  %v19401_v40 = vld [vmem:[#allocation95_spill] sm:$0xff] }
 0x547   : > { %v16813_v50 = vpop.f32.mrf.mxu1  ;;  %v4770_v9 = vpack.c.bf16 %v4754_v36, %v4754_v36  ;;  %v4590_v31 = vadd.f32 %v4571_v20, %v4443_v45  ;;  %v7094_v36 = vunpack.c.l.b16 %v7086_v61 }
 0x549   : > { %4787 = vst.msk [vmem:[#allocation3 + $0x34] sm:$0xf] %vm4773_vm9, %v4770_v9  ;;  %v4719_v23 = vadd.f32 %v19396_v53, %v4590_v31  ;;  %v4792_v31 = vld [vmem:[#allocation3 + $0x3c] sm:$0x1] }
 0x54a   : > { %v6367_v8 = vpop.f32.mrf.mxu0 }
 0x54b   : > { %v4739_v48 = vadd.f32 %v16595_v11, %v4719_v23  ;;  %v19404_v8 = vunpack.c.l.b16 %v19403_v18 }
 0x54d   : > { %v4755_v30 = vmax.f32 %v4739_v48, 0.0  ;;  %v5473_v62 = vpop.f32.mrf.mxu2  ;;  %v7096_v17 = vpack.c.b16 %v19404_v8, %v7094_v36  ;;  %v19410_v36 = vld [vmem:[#allocation96_spill] sm:$0xff] }
 0x54e   : > { %v4573_v63 = vpop.f32.mrf.mxu3  ;;  %v7099_v62 = vrot.slane %v16850_v52, 1 }
 0x54f   : > { %v16828_v34 = vpop.f32.mrf.mxu1  ;;  %v4771_v60 = vpack.c.bf16 %v4755_v30, %v4755_v30  ;;  %v4591_v15 = vadd.f32 %v4573_v63, %v4444_v41  ;;  %v7098_v30 = vrot.slane %v7096_v17, 1  ;;  %v19406_v41 = vld [vmem:[#allocation57_spill] sm:$0xff] }
 0x550   : > { %19398 = vst [vmem:[#allocation89_spill] sm:$0xff] %v16828_v34  ;;  %v4993_v63 = vadd.f32 %v16608_v21, %v19406_v41 }
 0x551   : > { %4788 = vst.msk [vmem:[#allocation3 + $0x38] sm:$0xf] %vm4773_vm9, %v4771_v60  ;;  %v4720_v27 = vadd.f32 %v19399_v56, %v4591_v15 }
 0x552   : > { %11607 = vmatmul.msk.bf16.gmra.mxu1 %vm1074_vm2, %v6653_v38  ;;  %11498 = vmatmul.msk.bf16.gmra.mxu2 %vm1074_vm2, %v19400_v2  ;;  %v6370_v10 = vpop.f32.mrf.mxu0  ;;  %v19402_v38 = vld [vmem:[#allocation38_spill] sm:$0xff]  ;;  %v19408_v2 = vrot.slane %v19407_v26, 3  ;;  %v19416_v26 = vld [vmem:[#allocation25_spill] sm:$0xff] }
 0x553   : > { %v4740_v59 = vadd.f32 %v16595_v11, %v4720_v27  ;;  %11426 = vmatmul.msk.bf16.gmra.mxu3 %vm1074_vm2, %v19401_v40  ;;  %v4991_v0 = vadd.f32 %v16588_v54, %v19402_v38  ;;  %v7100_v27 = vsel %vm1238_vm7, %v7098_v30, %v7099_v62  ;;  %v13478_v40 = vld [vmem:[#allocation2 + $0x74] sm:$0xff]  ;;  %v19412_v38 = vld [vmem:[#allocation87_spill] sm:$0xff] }
 0x555   : > { %v4756_v45 = vmax.f32 %v4740_v59, 0.0  ;;  %v16844_v20 = vpop.f32.mrf.mxu2  ;;  %11708 = vmatmul.msk.bf16.vlgmr.msrb.gmra.mxu0 %vm1074_vm2, %v16824_v47 }
 0x556   : > { %v5081_v53 = vpop.f32.mrf.mxu3 }
 0x557   : > { %v6265_v9 = vpop.f32.mrf.mxu1  ;;  %v4772_v11 = vpack.c.bf16 %v4756_v45, %v4756_v45  ;;  %v16848_v23 = vadd.f32 %v5081_v53, %v4991_v0  ;;  %v6395_v0 = vshrl.u32 %v19412_v38, 16  ;;  %v6398_v45 = vshll.u32 %v19412_v38, 16 }
 0x559   : > { %v4793_v48 = vsel %vm4791_vm12, %v4772_v11, %v4792_v31  ;;  %v16879_v31 = vld [vmem:[#allocation2 + $0x74] sm:$0xff]   ;;  %v6397_v53 = vrot.slane %v6395_v0, 3  ;;  %v6400_v11 = vrot.slane %v6398_v45, 4  ;;  %v13479_v0 = vld [vmem:[#allocation2 + $0x7c] sm:$0xff] }
 0x55a   : > { %4794 = vst [vmem:[#allocation3 + $0x3c] sm:$0x1] %v4793_v48  ;;  %v16854_v54 = vpop.f32.mrf.mxu0  ;;  %v7101_v8 = vrot.slane %v16879_v31, 1 }
 0x55b   : > { %19405 = vst [vmem:[#allocation119_spill] sm:$0xff] %v16854_v54  ;;  %v6401_v30 = vor.u32 %v6400_v11, %v6397_v53  ;;  %v16901_v53 = vld [vmem:[#allocation2 + $0x7c] sm:$0xff]  }
 0x55d   : > { %v16859_v60 = vpop.f32.mrf.mxu2 }
 0x55e   : > { %v5083_v61 = vpop.f32.mrf.mxu3 }
 0x55f   : > { %v6268_v15 = vpop.f32.mrf.mxu1  ;;  %v16861_v56 = vadd.f32 %v5083_v61, %v4993_v63  ;;  %v7102_v63 = vsel %vm1238_vm7, %v7099_v62, %v7101_v8 }
 0x560   : > { %v19414_v15 = vld [vmem:[#allocation97_spill] sm:$0xff] }
 0x561   : > { %v6405_v61 = vsel %vm2882_vm8, %v6401_v30, %v19414_v15 }
 0x562   : > { %11674 = vmatmul.msk.bf16.vlgmr.msrb.gmra.mxu1 %vm1074_vm2, %v7100_v27  ;;  %11499 = vmatmul.msk.bf16.gmra.mxu2 %vm1074_vm2, %v19408_v2  ;;  %v16868_v10 = vpop.f32.mrf.mxu0  ;;  %v13070_v2 = vld [vmem:[%s18778_s3 + $0xe8] sm:$0xff] }
 0x563   : > { %19409 = vst [vmem:[#allocation111_spill] sm:$0xff] %v16868_v10  ;;  %11427 = vmatmul.msk.bf16.gmra.mxu3 %vm1074_vm2, %v19410_v36  ;;  %v19417_v36 = vld [vmem:[#allocation61_spill] sm:$0xff] }
 0x564   : > { %6555 = vmatpush.bf16.msrb.mxu3 %v13070_v2 }
 0x565   : > { %v16872_v21 = vpop.f32.mrf.mxu2  ;;  %11709 = vmatmul.msk.bf16.gmra.mxu0 %vm1074_vm2, %v13478_v40  ;;  %v5001_v40 = vadd.f32 %v16659_v14, %v19417_v36  ;;  %v19422_v36 = vld [vmem:[#allocation29_spill] sm:$0xff] }
 0x566   : > { %v5086_v9 = vpop.f32.mrf.mxu3 }
 0x567   : > { %v16874_v59 = vpop.f32.mrf.mxu1 }
 0x568   : > { %19411 = vst [vmem:[#allocation68_spill] sm:$0xff] %v16874_v59 }
 0x56a   : > { %v6377_v18 = vpop.f32.mrf.mxu0 }
 0x56b   : > { %v7103_v18 = vrot.slane %v16901_v53, 1 }
 0x56d   : > { %v5483_v17 = vpop.f32.mrf.mxu2 }
 0x56e   : > { %v5088_v41 = vpop.f32.mrf.mxu3  ;;  %v19419_v17 = vld [vmem:[#allocation40_spill] sm:$0xff] }
 0x56f   : > { %v16882_v48 = vpop.f32.mrf.mxu1  ;;  %v5003_v30 = vadd.f32 %v16673_v5, %v19419_v17 }
 0x570   : > { %19413 = vst [vmem:[#allocation122_spill] sm:$0xff] %v16882_v48 }
 0x572   : > { %11675 = vmatmul.msk.bf16.gmra.mxu1 %vm1074_vm2, %v7102_v63  ;;  %11566 = vmatmul.msk.bf16.vlgmr.msra.gmra.mxu2 %vm1074_vm2, %v6405_v61  ;;  %v16889_v27 = vpop.f32.mrf.mxu0  ;;  %v7104_v61 = vsel %vm1238_vm7, %v7101_v8, %v7103_v18 }
 0x573   : > { %19415 = vst [vmem:[#allocation43_spill] sm:$0xff] %v16889_v27  ;;  %11428 = vmatmul.msk.bf16.gmra.mxu3 %vm1074_vm2, %v19416_v26  ;;  %v19421_v26 = vld [vmem:[#allocation98_spill] sm:$0xff] }
 0x574   : > { %v16931_v27 = vld [vmem:[#allocation2 + $0x60] sm:$0xff]  }
 0x575   : > { %v5486_v62 = vpop.f32.mrf.mxu2  ;;  %11710 = vmatmul.msk.bf16.gmra.mxu0 %vm1074_vm2, %v13479_v0  ;;  %v13480_v0 = vld [vmem:[#allocation2 + $0x84] sm:$0xff] }
 0x576   : > { %v5091_v45 = vpop.f32.mrf.mxu3 }
 0x577   : > { %v6275_v38 = vpop.f32.mrf.mxu1  ;;  %v16899_v9 = vadd.f32 %v5091_v45, %v5001_v40  ;;  %v19423_v40 = vld [vmem:[#allocation27_spill] sm:$0xff] }
 0x578   : > { %v5006_v5 = vadd.f32 %v16689_v39, %v19423_v40  ;;  %v6063_v39 = vrot.slane %v16931_v27, 2  ;;  %v13100_v40 = vld [vmem:[%s18778_s3 + $0x188] sm:$0xff] }
 0x579   : > { %7745 = vmatpush.bf16.msra.mxu0 %v13100_v40 }
 0x57a   : > { %v16903_v11 = vpop.f32.mrf.mxu0 }
 0x57b   : > { %19418 = vst [vmem:[#allocation39_spill] sm:$0xff] %v16903_v11 }
 0x57d   : > { %v16908_v41 = vpop.f32.mrf.mxu2 }
 0x57e   : > { %v5093_v63 = vpop.f32.mrf.mxu3 }
 0x57f   : > { %v16910_v14 = vpop.f32.mrf.mxu1  ;;  %v16912_v15 = vadd.f32 %v5093_v63, %v5003_v30  ;;  %v19425_v30 = vld [vmem:[#allocation104_spill] sm:$0xff] }
 0x580   : > { %19420 = vst [vmem:[#allocation33_spill] sm:$0xff] %v16910_v14  ;;  %v7105_v63 = vrot.slane %v19425_v30, 1 }
 0x582   : > { %11676 = vmatmul.msk.bf16.gmra.mxu1 %vm1074_vm2, %v7104_v61  ;;  %11567 = vmatmul.msk.bf16.gmra.mxu2 %vm1074_vm2, %v19421_v26  ;;  %v6835_v2 = vpop.f32.mrf.mxu0 }
 0x583   : > { %11429 = vmatmul.msk.bf16.gmra.mxu3 %vm1074_vm2, %v19422_v36  ;;  %v19426_v36 = vld [vmem:[#allocation77_spill] sm:$0xff] }
 0x584   : > { %v6062_v11 = vrot.slane %v19426_v36, 2  ;;  %v13483_v36 = vld [vmem:[#allocation2 + $0x8c] sm:$0xff] }
 0x585   : > { %v16922_v62 = vpop.f32.mrf.mxu2  ;;  %11711 = vmatmul.msk.bf16.gmra.mxu0 %vm1074_vm2, %v13480_v0  ;;  %v7106_v0 = vsel %vm1238_vm7, %v7103_v18, %v7105_v63 }
 0x586   : > { %v5096_v8 = vpop.f32.mrf.mxu3 }
 0x587   : > { %v16924_v38 = vpop.f32.mrf.mxu1  ;;  %v16927_v45 = vadd.f32 %v5096_v8, %v5006_v5  ;;  %v6064_v8 = vsel %vm1516_vm1, %v6062_v11, %v6063_v39  ;;  %v13092_v11 = vld [vmem:[%s18778_s3 + $0x178] sm:$0xff] }
 0x588   : > { %19424 = vst [vmem:[#allocation32_spill] sm:$0xff] %v16924_v38  ;;  %7609 = vmatpush.bf16.msra.mxu1 %v13092_v11  ;;  %v19429_v38 = vld [vmem:[#allocation69_spill] sm:$0xff] }
 0x58a   : > { %v6837_v17 = vpop.f32.mrf.mxu0 }
 0x58b   : > { %v13099_v17 = vld [vmem:[%s18778_s3 + $0x180] sm:$0xff] }
 0x58c   : > { %7746 = vmatpush.bf16.msra.mxu0 %v13099_v17  ;;  %v5013_v17 = vadd.f32 %v16727_v3, %v19429_v38 }
 0x58d   : > { %v5493_v61 = vpop.f32.mrf.mxu2 }
 0x58e   : > { %v5098_v2 = vpop.f32.mrf.mxu3  ;;  %v13482_v61 = vld [vmem:[#allocation2 + $0x88] sm:$0xff]  }
 0x58f   : > { %v6699_v26 = vpop.f32.mrf.mxu1 }
 0x590   : > { %v7095_v26 = vunpack.c.h.b16 %v13482_v61 }
 0x592   : > { %11677 = vmatmul.msk.bf16.gmra.mxu1 %vm1074_vm2, %v7106_v0  ;;  %11568 = vmatmul.msk.bf16.gmra.mxu2 %vm1074_vm2, %v19374_v13  ;;  %v16941_v5 = vpop.f32.mrf.mxu0  ;;  %v7097_v40 = vpack.c.b16 %v7095_v26, %v7095_v26  ;;  %v13091_v26 = vld [vmem:[%s18778_s3 + $0x170] sm:$0xff] }
 0x593   : > { %19427 = vst [vmem:[#allocation51_spill] sm:$0xff] %v16941_v5  ;;  %11512 = vmatmul.msk.bf16.vlgmr.msra.gmra.mxu3 %vm1074_vm2, %v6064_v8  ;;  %v7198_v8 = vld [vmem:[#allocation2 + $0x94] sm:$0x7]  ;;  %7610 = vmatpush.bf16.msra.mxu1 %v13091_v26 }
 0x594   : > { %v7107_v5 = vrot.slane %v7097_v40, 1  ;;  %v7224_v11 = vunpack.c.l.b16 %v7198_v8 }
 0x595   : > { %v16948_v18 = vpop.f32.mrf.mxu2  ;;  %11712 = vmatmul.msk.bf16.gmra.mxu0 %vm1074_vm2, %v13483_v36 }
 0x596   : > { %v5101_v13 = vpop.f32.mrf.mxu3  ;;  %v7108_v40 = vsel %vm1238_vm7, %v7105_v63, %v7107_v5  ;;  %v19432_v63 = vld [vmem:[#allocation58_spill] sm:$0xff] }
 0x597   : > { %v6701_v2 = vpop.f32.mrf.mxu1  ;;  %v13484_v13 = vld [vmem:[#allocation2 + $0x68] sm:$0xff]   ;;  %v5016_v8 = vadd.f32 %v16746_v22, %v19432_v63 }
 0x598   : > { %v6065_v14 = vrot.slane %v13484_v13, 2  ;;  %v13567_v13 = vld [vmem:[#allocation2 + $0x6c] sm:$0xe] }
 0x599   : > { %v19434_v63 = vld [vmem:[#allocation59_spill] sm:$0xff]  ;;  %v16996_v54 = vor.u32 %v13567_v13, %v16826_v24 }
 0x59a   : > { %v16954_v0 = vpop.f32.mrf.mxu0  ;;  %v6066_v38 = vsel %vm1516_vm1, %v6063_v39, %v6065_v14 }
 0x59b   : > { %19428 = vst [vmem:[#allocation41_spill] sm:$0xff] %v16954_v0  ;;  %v16975_v0 = vpack.c.b16 %v7224_v11, %v7224_v11  ;;  %v13093_v11 = vld [vmem:[#allocation2 + $0x6c] sm:$0xf0]  ;;  %v7541_v24 = vshrl.u32 %v16996_v54, 16 }
 0x59c   : > { %19436 = vst [vmem:[#allocation52_spill] sm:$0xff] %v16996_v54 }
 0x59d   : > { %v16958_v61 = vpop.f32.mrf.mxu2 }
 0x59e   : > { %v5103_v36 = vpop.f32.mrf.mxu3 }
 0x59f   : > { %v16960_v2 = vpop.f32.mrf.mxu1  ;;  %v16965_v10 = vadd.f32 %v5103_v36, %v5013_v17  ;;  %v13069_v17 = vld [vmem:[%s18778_s3 + $0xe0] sm:$0xff] }
 0x5a0   : > { %19430 = vst [vmem:[#allocation54_spill] sm:$0xff] %v16960_v2  ;;  %6556 = vmatpush.bf16.msrb.mxu3 %v13069_v17  ;;  %v13094_v2 = vld [vmem:[#allocation2 + $0x74] sm:$0xff] }
 0x5a1   : > { %v7699_v59 = vrot.slane %v13094_v2, 2 }
 0x5a2   : > { %11678 = vmatmul.msk.bf16.gmra.mxu1 %vm1074_vm2, %v7108_v40  ;;  %11569 = vmatmul.msk.bf16.gmra.mxu2 %vm1074_vm2, %v19376_v25  ;;  %v16971_v3 = vpop.f32.mrf.mxu0  ;;  %v11774_v40 = vld [vmem:[#allocation2 + $0x6c] sm:$0xc] }
 0x5a3   : > { %19431 = vst [vmem:[#allocation48_spill] sm:$0xff] %v16971_v3  ;;  %11513 = vmatmul.msk.bf16.gmra.mxu3 %vm1074_vm2, %v6066_v38  ;;  %v13076_v3 = vld [vmem:[%s18778_s3 + $0x118] sm:$0xff]  ;;  %v11775_v22 = vor.u32 %v13093_v11, %v11774_v40 }
 0x5a4   : > { %6919 = vmatpush.bf16.msrb.mxu2 %v13076_v3  ;;  %v13075_v3 = vld [vmem:[%s18778_s3 + $0x110] sm:$0xff] }
 0x5a5   : > { %v5981_v26 = vpop.f32.mrf.mxu2  ;;  %11713 = vmatmul.msk.bf16.gmra.mxu0 %vm1074_vm2, %v16975_v0 }
 0x5a6   : > { %v5106_v25 = vpop.f32.mrf.mxu3  ;;  %v5226_v26 = vadd.f32 %v19434_v63, %v16848_v23  ;;  %v19438_v23 = vld [vmem:[#allocation109_spill] sm:$0xff] }
 0x5a7   : > { %v16982_v36 = vpop.f32.mrf.mxu1  ;;  %v16986_v39 = vadd.f32 %v5106_v25, %v5016_v8  ;;  %v13485_v8 = vld [vmem:[#allocation2 + $0x70] sm:$0xff]  }
 0x5a8   : > { %19433 = vst [vmem:[#allocation42_spill] sm:$0xff] %v16982_v36  ;;  %v6067_v25 = vrot.slane %v13485_v8, 2  ;;  %v5362_v34 = vadd.f32 %v19437_v46, %v5226_v26  ;;  %6920 = vmatpush.bf16.msrb.mxu2 %v13075_v3  ;;  %v19439_v46 = vld [vmem:[#allocation47_spill] sm:$0xff]  ;;  %v19440_v26 = vld [vmem:[#allocation101_spill] sm:$0xff] }
 0x5a9   : > { %v5227_v13 = vadd.f32 %v19439_v46, %v16861_v56 }
 0x5aa   : > { %v6847_v38 = vpop.f32.mrf.mxu0  ;;  %v6068_v40 = vsel %vm1516_vm1, %v6065_v14, %v6067_v25  ;;  %v5495_v63 = vadd.f32 %v16771_v51, %v5362_v34 }
 0x5ab   : > { %v7698_v38 = vrot.slane %v11775_v22, 2 }
 0x5ad   : > { %v5983_v36 = vpop.f32.mrf.mxu2  ;;  %v7700_v2 = vsel %vm1516_vm1, %v7698_v38, %v7699_v59  ;;  %v19442_v38 = vshll.u32 %v19440_v26, 16 }
 0x5ae   : > { %v5108_v17 = vpop.f32.mrf.mxu3 }
 0x5af   : > { %v16993_v48 = vpop.f32.mrf.mxu1  ;;  %v19441_v17 = vshrl.u32 %v19440_v26, 16 }
 0x5b0   : > { %19435 = vst [vmem:[#allocation81_spill] sm:$0xff] %v16993_v48  ;;  %v19443_v48 = vld [vmem:[#allocation75_spill] sm:$0xff] }
 0x5b1   : > { %v7548_v8 = vrot.slane %v19441_v17, 1  ;;  %v5363_v56 = vadd.f32 %v19443_v48, %v5227_v13  ;;  %v19445_v13 = vld [vmem:[#allocation108_spill] sm:$0xff] }
 0x5b2   : > { %11679 = vmatmul.msk.bf16.gmra.mxu1 %vm1074_vm2, %v7107_v5  ;;  %11570 = vmatmul.msk.bf16.gmra.mxu2 %vm1074_vm2, %v19438_v23  ;;  %v6850_v36 = vpop.f32.mrf.mxu0  ;;  %v7544_v5 = vshll.u32 %v16996_v54, 16 }
 0x5b3   : > { %11514 = vmatmul.msk.bf16.gmra.mxu3 %vm1074_vm2, %v6068_v40  ;;  %v7543_v36 = vrot.slane %v7541_v24, 1  ;;  %v7549_v40 = vrot.slane %v19442_v38, 2  ;;  %v5496_v34 = vadd.f32 %v16789_v4, %v5363_v56 }
 0x5b4   : > { %v7546_v3 = vrot.slane %v7544_v5, 2 }
 0x5b5   : > { %v17012_v11 = vpop.f32.mrf.mxu2  ;;  %11804 = vmatmul.msk.bf16.vlgmr.msra.gmra.mxu0 %vm1074_vm2, %v7700_v2  ;;  %v7550_v54 = vor.u32 %v7549_v40, %v7548_v8  ;;  %v13095_v2 = vld [vmem:[#allocation2 + $0x7c] sm:$0xff]  ;;  %v19448_v40 = vld [vmem:[#allocation103_spill] sm:$0xff] }
 0x5b6   : > { %v5602_v14 = vpop.f32.mrf.mxu3  ;;  %v7701_v48 = vrot.slane %v13095_v2, 2  ;;  %v19449_v56 = vshrl.u32 %v19448_v40, 16  ;;  %v19450_v2 = vshll.u32 %v19448_v40, 16 }
 0x5b7   : > { %v6711_v22 = vpop.f32.mrf.mxu1  ;;  %v17018_v23 = vadd.f32 %v5602_v14, %v5495_v63  ;;  %v17028_v63 = vld [vmem:[#allocation2 + $0x78] sm:$0xff]  }
 0x5b8   : > { %v7547_v22 = vor.u32 %v7546_v3, %v7543_v36  ;;  %v6069_v24 = vrot.slane %v17028_v63, 2  ;;  %v7702_v4 = vsel %vm1516_vm1, %v7699_v59, %v7701_v48 }
 0x5ba   : > { %v17023_v46 = vpop.f32.mrf.mxu0  ;;  %v7551_v14 = vsel %vm1360_vm4, %v7547_v22, %v7550_v54  ;;  %v6070_v8 = vsel %vm1516_vm1, %v6067_v25, %v6069_v24  ;;  %v7552_v22 = vrot.slane %v19449_v56, 1  ;;  %v13096_v25 = vld [vmem:[#allocation2 + $0x84] sm:$0xff] }
 0x5bb   : > { %19444 = vst [vmem:[#allocation55_spill] sm:$0xff] %v17023_v46  ;;  %v6071_v46 = vrot.slane %v16571_v12, 2  ;;  %v19453_v56 = vld [vmem:[#allocation70_spill] sm:$0xff] }
 0x5bc   : > { %v13078_v12 = vld [vmem:[%s18778_s3 + $0x128] sm:$0xff] }
 0x5bd   : > { %v17025_v6 = vpop.f32.mrf.mxu2  ;;  %7043 = vmatpush.bf16.msra.mxu3 %v13078_v12 }
 0x5be   : > { %v5604_v17 = vpop.f32.mrf.mxu3 }
 0x5bf   : > { %v6714_v51 = vpop.f32.mrf.mxu1  ;;  %v17031_v5 = vadd.f32 %v5604_v17, %v5496_v34 }
 0x5c0   : > { %v7553_v51 = vrot.slane %v19450_v2, 2  ;;  %v19454_v2 = vld [vmem:[#allocation106_spill] sm:$0xff] }
 0x5c2   : > { %11762 = vmatmul.msk.bf16.vlgmr.msra.gmra.mxu1 %vm1074_vm2, %v7551_v14  ;;  %11571 = vmatmul.msk.bf16.gmra.mxu2 %vm1074_vm2, %v19445_v13  ;;  %v17037_v26 = vpop.f32.mrf.mxu0  ;;  %v7554_v17 = vor.u32 %v7553_v51, %v7552_v22  ;;  %v19451_v14 = vld [vmem:[#allocation11_spill] sm:$0xff] }
 0x5c3   : > { %19446 = vst [vmem:[#allocation46_spill] sm:$0xff] %v17037_v26  ;;  %11515 = vmatmul.msk.bf16.gmra.mxu3 %vm1074_vm2, %v6070_v8  ;;  %v5230_v13 = vadd.f32 %v19451_v14, %v16899_v9  ;;  %v6072_v9 = vsel %vm1516_vm1, %v6069_v24, %v6071_v46 }
 0x5c5   : > { %v17042_v36 = vpop.f32.mrf.mxu2  ;;  %11805 = vmatmul.msk.bf16.gmra.mxu0 %vm1074_vm2, %v7702_v4  ;;  %v7555_v4 = vsel %vm1360_vm4, %v7550_v54, %v7554_v17  ;;  %v5366_v40 = vadd.f32 %v19453_v56, %v5230_v13 }
 0x5c6   : > { %v5607_v38 = vpop.f32.mrf.mxu3 }
 0x5c7   : > { %v17044_v3 = vpop.f32.mrf.mxu1  ;;  %v7703_v38 = vrot.slane %v13096_v25, 2  ;;  %v5499_v14 = vadd.f32 %v16844_v20, %v5366_v40 }
 0x5c8   : > { %19447 = vst [vmem:[#allocation37_spill] sm:$0xff] %v17044_v3 }
 0x5c9   : > { %v7704_v54 = vsel %vm1516_vm1, %v7701_v48, %v7703_v38  ;;  %v19460_v48 = vld [vmem:[#allocation17_spill] sm:$0xff] }
 0x5ca   : > { %v6857_v34 = vpop.f32.mrf.mxu0 }
 0x5cd   : > { %v5993_v59 = vpop.f32.mrf.mxu2 }
 0x5ce   : > { %v5609_v26 = vpop.f32.mrf.mxu3  ;;  %v19457_v59 = vld [vmem:[#allocation110_spill] sm:$0xff] }
 0x5cf   : > { %v17053_v8 = vpop.f32.mrf.mxu1  ;;  %v19456_v26 = vld [vmem:[#allocation83_spill] sm:$0xff] }
 0x5d0   : > { %19452 = vst [vmem:[#allocation12_spill] sm:$0xff] %v17053_v8  ;;  %v5231_v51 = vadd.f32 %v19456_v26, %v16912_v15  ;;  %v13097_v26 = vld [vmem:[#allocation2 + $0x8c] sm:$0xff] }
 0x5d2   : > { %11763 = vmatmul.msk.bf16.gmra.mxu1 %vm1074_vm2, %v7555_v4  ;;  %11638 = vmatmul.msk.bf16.vlgmr.msrb.gmra.mxu2 %vm1074_vm2, %v19454_v2  ;;  %v17061_v22 = vpop.f32.mrf.mxu0  ;;  %v19458_v4 = vshrl.u32 %v19457_v59, 16  ;;  %v5367_v8 = vadd.f32 %v19460_v48, %v5231_v51  ;;  %v7705_v51 = vrot.slane %v13097_v26, 2  ;;  %v19464_v48 = vld [vmem:[#allocation31_spill] sm:$0xff] }
 0x5d3   : > { %19455 = vst [vmem:[#allocation49_spill] sm:$0xff] %v17061_v22  ;;  %11516 = vmatmul.msk.bf16.gmra.mxu3 %vm1074_vm2, %v6072_v9  ;;  %v19459_v9 = vshll.u32 %v19457_v59, 16  ;;  %v19463_v59 = vld [vmem:[#allocation60_spill] sm:$0xff]  ;;  %v19465_v26 = vshrl.u32 %v19464_v48, 16 }
 0x5d4   : > { %v7556_v56 = vrot.slane %v19458_v4, 1  ;;  %v5500_v12 = vadd.f32 %v16859_v60, %v5367_v8  ;;  %v7706_v4 = vsel %vm1516_vm1, %v7703_v38, %v7705_v51  ;;  %v13098_v38 = vld [vmem:[#allocation2 + $0x94] sm:$0x10] }
 0x5d5   : > { %v5996_v34 = vpop.f32.mrf.mxu2  ;;  %11806 = vmatmul.msk.bf16.gmra.mxu0 %vm1074_vm2, %v7704_v54  ;;  %v7557_v22 = vrot.slane %v19459_v9, 2  ;;  %v19462_v54 = vld [vmem:[#allocation92_spill] sm:$0xff] }
 0x5d6   : > { %v5612_v13 = vpop.f32.mrf.mxu3  ;;  %v5232_v34 = vadd.f32 %v19462_v54, %v16927_v45  ;;  %v7560_v54 = vrot.slane %v19465_v26, 1 }
 0x5d7   : > { %v6721_v25 = vpop.f32.mrf.mxu1  ;;  %v17073_v24 = vadd.f32 %v5612_v13, %v5499_v14  ;;  %v7558_v15 = vor.u32 %v7557_v22, %v7556_v56 }
 0x5d8   : > { %v5368_v22 = vadd.f32 %v19463_v59, %v5232_v34  ;;  %v19466_v34 = vshll.u32 %v19464_v48, 16  ;;  %v13308_v48 = vunpack.c.l.b16 %v16931_v27 }
 0x5d9   : > { %v7559_v13 = vsel %vm1360_vm4, %v7554_v17, %v7558_v15 }
 0x5da   : > { %v17080_v3 = vpop.f32.mrf.mxu0  ;;  %v5501_v17 = vadd.f32 %v16872_v21, %v5368_v22  ;;  %v13144_v21 = vld [vmem:[%s18780_s5 + $0x130] sm:$0xff] }
 0x5db   : > { %19461 = vst [vmem:[#allocation112_spill] sm:$0xff] %v17080_v3 }
 0x5dd   : > { %v17084_v20 = vpop.f32.mrf.mxu2 }
 0x5de   : > { %v5614_v25 = vpop.f32.mrf.mxu3 }
 0x5df   : > { %v17086_v40 = vpop.f32.mrf.mxu1  ;;  %v17089_v14 = vadd.f32 %v5614_v25, %v5500_v12  ;;  %v7561_v12 = vrot.slane %v19466_v34, 2  ;;  %v11794_v25 = vld [vmem:[#allocation2 + $0x94] sm:$0xf] }
 0x5e0   : > { %v11795_v22 = vor.u32 %v13098_v38, %v11794_v25  ;;  %v19467_v25 = vld [vmem:[#allocation45_spill] sm:$0xff] }
 0x5e1   : > { %v6513_v38 = vpack.c.b16 %v13308_v48, %v19467_v25  ;;  %v13131_v48 = vld [vmem:[%s18780_s5 + $0xd0] sm:$0xff] }
 0x5e2   : > { %11764 = vmatmul.msk.bf16.gmra.mxu1 %vm1074_vm2, %v7559_v13  ;;  %11639 = vmatmul.msk.bf16.gmra.mxu2 %vm1074_vm2, %v16850_v52  ;;  %v7275_v45 = vpop.f32.mrf.mxu0  ;;  %v13145_v13 = vld [vmem:[%s18780_s5 + $0x138] sm:$0xff] }
 0x5e3   : > { %11517 = vmatmul.msk.bf16.gmra.mxu3 %vm1074_vm2, %v6071_v46  ;;  %v7435_v46 = vld [vmem:[#allocation2 + $0x94] sm:$0xf]  ;;  %v7562_v45 = vor.u32 %v7561_v12, %v7560_v54  ;;  %8383 = vmatpush.bf16.msrb.mxu0 %v13145_v13  ;;  %v13143_v54 = vld [vmem:[%s18780_s5 + $0x128] sm:$0xff]  ;;  %v7707_v12 = vrot.slane %v11795_v22, 2 }
 0x5e5   : > { %v17098_v56 = vpop.f32.mrf.mxu2  ;;  %11807 = vmatmul.msk.bf16.gmra.mxu0 %vm1074_vm2, %v7706_v4  ;;  %v7443_v4 = vunpack.c.l.b16 %v7435_v46  ;;  %v7563_v34 = vsel %vm1360_vm4, %v7558_v15, %v7562_v45  ;;  %v13132_v46 = vld [vmem:[%s18780_s5 + $0xd8] sm:$0xff] }
 0x5e6   : > { %v5617_v8 = vpop.f32.mrf.mxu3  ;;  %8219 = vmatpush.bf16.msrb.mxu1 %v13132_v46  ;;  %v19469_v46 = vld [vmem:[#allocation36_spill] sm:$0xff] }
 0x5e7   : > { %v17100_v60 = vpop.f32.mrf.mxu1  ;;  %v17104_v9 = vadd.f32 %v5617_v8, %v5501_v17  ;;  %v17118_v3 = vpack.c.b16 %v7443_v4, %v7443_v4  ;;  %8384 = vmatpush.bf16.msrb.mxu0 %v13144_v21  ;;  %v7708_v4 = vsel %vm1516_vm1, %v7705_v51, %v7707_v12  ;;  %v19468_v21 = vld [vmem:[#allocation63_spill] sm:$0xff]  ;;  %vm9351_vm1 = vcmask 1040384  }
 0x5e8   : > { %v5235_v22 = vadd.f32 %v19468_v21, %v16965_v10  ;;  %v13163_v10 = vld [vmem:[%s18780_s5 + $0x1b8] sm:$0xff]  ;;  %v13130_v51 = vld [vmem:[%s18780_s5 + $0xc8] sm:$0xff] }
 0x5e9   : > { %v7565_v15 = vshrl.u32 %v17118_v3, 16  ;;  %v7568_v13 = vshll.u32 %v17118_v3, 16 }
 0x5ea   : > { %v7277_v59 = vpop.f32.mrf.mxu0  ;;  %8220 = vmatpush.bf16.msrb.mxu1 %v13131_v48  ;;  %v5371_v25 = vadd.f32 %v19469_v46, %v5235_v22  ;;  %v13129_v48 = vld [vmem:[%s18780_s5 + $0xc0] sm:$0xff] }
 0x5eb   : > { %8385 = vmatpush.bf16.msrb.mxu0 %v13143_v54  ;;  %v13142_v59 = vld [vmem:[%s18780_s5 + $0x120] sm:$0xff]  ;;  %v7570_v54 = vrot.slane %v7568_v13, 2  ;;  %v19470_v13 = vld [vmem:[#allocation120_spill] sm:$0xff] }
 0x5ec   : > { %v19471_v46 = vld [vmem:[#allocation114_spill] sm:$0xff] }
 0x5ed   : > { %v6003_v17 = vpop.f32.mrf.mxu2 }
 0x5ee   : > { %v5619_v26 = vpop.f32.mrf.mxu3  ;;  %8221 = vmatpush.bf16.msrb.mxu1 %v13130_v51 }
 0x5ef   : > { %v7153_v8 = vpop.f32.mrf.mxu1  ;;  %8386 = vmatpush.bf16.msrb.mxu0 %v13142_v59  ;;  %v5236_v59 = vadd.f32 %v19470_v13, %v16986_v39  ;;  %v13382_v39 = vld [vmem:[#allocation2 + $0x64] sm:$0xff]  }
 0x5f2   : > { %11765 = vmatmul.msk.bf16.gmra.mxu1 %vm1074_vm2, %v7563_v34  ;;  %11640 = vmatmul.msk.bf16.gmra.mxu2 %vm1074_vm2, %v16879_v31  ;;  %v17130_v27 = vpop.f32.mrf.mxu0  ;;  %v7567_v34 = vrot.slane %v7565_v15, 1  ;;  %v13162_v15 = vld [vmem:[%s18780_s5 + $0x1b0] sm:$0xff] }
 0x5f3   : > { %11584 = vmatmul.msk.bf16.vlgmr.msrb.gmra.mxu3 %vm1074_vm2, %v6513_v38  ;;  %8605 = vmatpush.bf16.msra.mxu0 %v13163_v10  ;;  %v5372_v10 = vadd.f32 %v19471_v46, %v5236_v59 }
 0x5f4   : > { %8222 = vmatpush.bf16.msrb.mxu1 %v13129_v48  ;;  %v13148_v48 = vld [vmem:[%s18780_s5 + $0x150] sm:$0xff] }
 0x5f5   : > { %v17141_v17 = vpop.f32.mrf.mxu2  ;;  %11808 = vmatmul.msk.bf16.gmra.mxu0 %vm1074_vm2, %v7708_v4  ;;  %v7571_v4 = vor.u32 %v7570_v54, %v7567_v34 }
 0x5f6   : > { %v5622_v26 = vpop.f32.mrf.mxu3 }
 0x5f7   : > { %v7155_v8 = vpop.f32.mrf.mxu1  ;;  %v7572_v54 = vsel %vm1360_vm4, %v7562_v45, %v7571_v4  ;;  %8606 = vmatpush.bf16.msra.mxu0 %v13162_v15  ;;  %v13160_v45 = vld [vmem:[%s18780_s5 + $0x1a0] sm:$0xff] }
 0x5f8   : > { %v5504_v8 = vadd.f32 %v16908_v41, %v5371_v25  ;;  %v13161_v41 = vld [vmem:[%s18780_s5 + $0x1a8] sm:$0xff]  ;;  %v13149_v25 = vld [vmem:[%s18780_s5 + $0x158] sm:$0xff]  ;;  %v13077_v15 = vld [vmem:[%s18778_s3 + $0x120] sm:$0xff] }
 0x5f9   : > { %8434 = vmatpush.bf16.msra.mxu1 %v13149_v25  ;;  %7044 = vmatpush.bf16.msra.mxu3 %v13077_v15 }
 0x5fa   : > { %v17154_v38 = vpop.f32.mrf.mxu0 }
 0x5fb   : > { %8607 = vmatpush.bf16.msra.mxu0 %v13161_v41 }
 0x5fd   : > { %v17161_v21 = vpop.f32.mrf.mxu2  ;;  %8435 = vmatpush.bf16.msra.mxu1 %v13148_v48 }
 0x5fe   : > { %v5624_v26 = vpop.f32.mrf.mxu3 }
 0x5ff   : > { %v17163_v22 = vpop.f32.mrf.mxu1  ;;  %v17169_v34 = vadd.f32 %v5624_v26, %v5504_v8  ;;  %v5505_v8 = vadd.f32 %v16922_v62, %v5372_v10  ;;  %8608 = vmatpush.bf16.msra.mxu0 %v13160_v45  ;;  %v13141_v62 = vld [vmem:[#allocation3 + $0x14] sm:$0x10]  ;;  %v19473_v10 = vld [vmem:[#allocation64_spill] sm:$0xff]  ;;  %v13146_v45 = vld [vmem:[%s18780_s5 + $0x140] sm:$0xff] }
 0x600   : > { %v5767_v41 = vadd.f32 %v19473_v10, %v17018_v23  ;;  %v13087_v23 = vld [vmem:[%s18778_s3 + $0x150] sm:$0xff] }
 0x602   : > { %11766 = vmatmul.msk.bf16.gmra.mxu1 %vm1074_vm2, %v7572_v54  ;;  %11641 = vmatmul.msk.bf16.gmra.mxu2 %vm1074_vm2, %v16901_v53  ;;  %v17182_v51 = vpop.f32.mrf.mxu0 }
 0x603   : > { %19472 = vst [vmem:[#allocation93_spill] sm:$0xff] %v17182_v51  ;;  %11585 = vmatmul.msk.bf16.gmra.mxu3 %vm1074_vm2, %v13382_v39  ;;  %v13147_v39 = vld [vmem:[%s18780_s5 + $0x148] sm:$0xff] }
 0x604   : > { %8436 = vmatpush.bf16.msra.mxu1 %v13147_v39 }
 0x605   : > { %v6471_v13 = vpop.f32.mrf.mxu2  ;;  %11809 = vmatmul.msk.bf16.gmra.mxu0 %vm1074_vm2, %v7707_v12  ;;  %v13088_v12 = vld [vmem:[%s18778_s3 + $0x158] sm:$0xff] }
 0x606   : > { %v5627_v26 = vpop.f32.mrf.mxu3  ;;  %7391 = vmatpush.bf16.msra.mxu2 %v13088_v12  ;;  %v13181_v12 = vld [vmem:[%s18780_s5 + $0x238] sm:$0xff] }
 0x607   : > { %v17191_v59 = vpop.f32.mrf.mxu1  ;;  %v17198_v54 = vadd.f32 %v5627_v26, %v5505_v8  ;;  %v12053_v8 = vld [vmem:[#allocation3 + $0x14] sm:$0xc]  ;;  %v13384_v26 = vld [vmem:[#allocation2 + $0x6c] sm:$0xff]  }
 0x608   : > { %v12054_v48 = vor.u32 %v13141_v62, %v12053_v8  ;;  %8437 = vmatpush.bf16.msra.mxu1 %v13146_v45  ;;  %v19476_v62 = vld [vmem:[#allocation121_spill] sm:$0xff]  ;;  %v13180_v8 = vld [vmem:[%s18780_s5 + $0x230] sm:$0xff] }
 0x609   : > { %v5768_v10 = vadd.f32 %v19476_v62, %v17031_v5  ;;  %v6870_v5 = vld [vmem:[#allocation2 + $0x8c] sm:$0x7] }
 0x60a   : > { %v7287_v46 = vpop.f32.mrf.mxu0  ;;  %7392 = vmatpush.bf16.msra.mxu2 %v13087_v23 }
 0x60b   : > { %v19475_v46 = vld [vmem:[#allocation116_spill] sm:$0xff] }
 0x60c   : > { %v5903_v51 = vadd.f32 %v19475_v46, %v5767_v41 }
 0x60d   : > { %v6473_v25 = vpop.f32.mrf.mxu2 }
 0x60e   : > { %v5629_v13 = vpop.f32.mrf.mxu3  ;;  %v6005_v45 = vadd.f32 %v16948_v18, %v5903_v51  ;;  %v13179_v18 = vld [vmem:[%s18780_s5 + $0x228] sm:$0xff]  ;;  %v6876_v51 = vunpack.c.l.b16 %v6870_v5 }
 0x60f   : > { %v17208_v15 = vpop.f32.mrf.mxu1 }
 0x610   : > { %19474 = vst [vmem:[#allocation115_spill] sm:$0xff] %v17208_v15 }
 0x612   : > { %11767 = vmatmul.msk.bf16.gmra.mxu1 %vm1074_vm2, %v7571_v4  ;;  %11642 = vmatmul.msk.bf16.gmra.mxu2 %vm1074_vm2, %v19425_v30  ;;  %v7290_v39 = vpop.f32.mrf.mxu0  ;;  %v8351_v4 = vrot.slane %v12054_v48, 2  ;;  %v13128_v48 = vld [vmem:[#allocation3 + $0x10] sm:$0x30] }
 0x613   : > { %11586 = vmatmul.msk.bf16.gmra.mxu3 %vm1074_vm2, %v13384_v26  ;;  %v19477_v26 = vld [vmem:[#allocation35_spill] sm:$0xff]  ;;  %v11974_v39 = vld [vmem:[#allocation3 + $0x10] sm:$0x8] }
 0x614   : > { %v5904_v23 = vadd.f32 %v19477_v26, %v5768_v10  ;;  %v13167_v10 = vld [vmem:[%s18780_s5 + $0x1d8] sm:$0xff] }
 0x615   : > { %v17226_v41 = vpop.f32.mrf.mxu2  ;;  %12071 = vmatmul.msk.bf16.vlgmr.msrb.gmra.mxu0 %vm7889_vm13, %v8351_v4 }
 0x616   : > { %v6112_v13 = vpop.f32.mrf.mxu3  ;;  %8823 = vmatpush.bf16.msrb.mxu0 %v13181_v12  ;;  %v13159_v12 = vld [vmem:[#allocation3 + $0x24] sm:$0x30] }
 0x617   : > { %v7165_v25 = vpop.f32.mrf.mxu1  ;;  %v17233_v46 = vadd.f32 %v6112_v13, %v6005_v45  ;;  %v6006_v45 = vadd.f32 %v16958_v61, %v5904_v23  ;;  %v13385_v61 = vld [vmem:[#allocation2 + $0x74] sm:$0xff]  }
 0x618   : > { %v11975_v25 = vor.u32 %v13128_v48, %v11974_v39  ;;  %v13166_v23 = vld [vmem:[%s18780_s5 + $0x1d0] sm:$0xff] }
 0x61a   : > { %v17236_v62 = vpop.f32.mrf.mxu0  ;;  %8824 = vmatpush.bf16.msrb.mxu0 %v13180_v8  ;;  %v8187_v26 = vrot.slane %v11975_v25, 3  ;;  %v13178_v8 = vld [vmem:[%s18780_s5 + $0x220] sm:$0xff] }
 0x61b   : > { %19478 = vst [vmem:[#allocation53_spill] sm:$0xff] %v17236_v62  ;;  %v12161_v62 = vld [vmem:[#allocation3 + $0x24] sm:$0x8] }
 0x61c   : > { %v12162_v39 = vor.u32 %v13159_v12, %v12161_v62  ;;  %v13165_v12 = vld [vmem:[%s18780_s5 + $0x1c8] sm:$0xff] }
 0x61d   : > { %v17241_v4 = vpop.f32.mrf.mxu2 }
 0x61e   : > { %v6114_v13 = vpop.f32.mrf.mxu3  ;;  %8825 = vmatpush.bf16.msrb.mxu0 %v13179_v18  ;;  %v17263_v25 = vrot.slane %v12162_v39, 3  ;;  %v5771_v39 = vadd.f32 %v16610_v37, %v17073_v24 }
 0x61f   : > { %v7168_v15 = vpop.f32.mrf.mxu1  ;;  %v17250_v48 = vadd.f32 %v6114_v13, %v6006_v45 }
 0x620   : > { %v17253_v15 = vpack.c.b16 %v6876_v51, %v6876_v51  ;;  %19480 = vst [vmem:[#allocation74_spill] sm:$0xff] %v17263_v25  ;;  %v7316_v51 = vshll.u32 %v16824_v47, 16  ;;  %v5907_v24 = vadd.f32 %v16578_v16, %v5771_v39 }
 0x622   : > { %11992 = vmatmul.msk.bf16.vlgmr.msrb.gmra.mxu1 %vm7889_vm13, %v8187_v26  ;;  %11643 = vmatmul.msk.bf16.gmra.mxu2 %vm1074_vm2, %v17253_v15  ;;  %v17260_v5 = vpop.f32.mrf.mxu0  ;;  %v7318_v13 = vrot.slane %v7316_v51, 1  ;;  %v13164_v26 = vld [vmem:[%s18780_s5 + $0x1c0] sm:$0xff]  ;;  %v6009_v39 = vadd.f32 %v17012_v11, %v5907_v24  ;;  %v5773_v11 = vadd.f32 %v16642_v43, %v17104_v9  ;;  %v8833_v9 = vld [vmem:[#allocation3 + $0x38] sm:$0xe] }
 0x623   : > { %8656 = vmatpush.bf16.msrb.mxu1 %v13167_v10  ;;  %19479 = vst [vmem:[#allocation13_spill] sm:$0xff] %v17260_v5  ;;  %8826 = vmatpush.bf16.msrb.mxu0 %v13178_v8  ;;  %v7314_v10 = vshrl.u32 %v16824_v47, 16  ;;  %v13321_v5 = vunpack.c.h.b16 %v17028_v63  ;;  %v13185_v47 = vld [vmem:[%s18780_s5 + $0x258] sm:$0xff]  ;;  %v13184_v63 = vld [vmem:[%s18780_s5 + $0x250] sm:$0xff] }
 0x624   : > { %11587 = vmatmul.msk.bf16.gmra.mxu3 %vm1074_vm2, %v13385_v61 }
 0x625   : > { %v17265_v62 = vpop.f32.mrf.mxu2  ;;  %12179 = vmatmul.msk.bf16.vlgmr.msra.gmra.mxu0 %vm7889_vm13, %v17263_v25  ;;  %v6517_v37 = vpack.c.b16 %v19364_v1, %v13321_v5  ;;  %v5772_v1 = vadd.f32 %v16633_v29, %v17089_v14  ;;  %v13182_v29 = vld [vmem:[%s18780_s5 + $0x240] sm:$0xff] }
 0x626   : > { %v6117_v45 = vpop.f32.mrf.mxu3 }
 0x627   : > { %v17267_v18 = vpop.f32.mrf.mxu1  ;;  %8657 = vmatpush.bf16.msrb.mxu1 %v13166_v23  ;;  %v7319_v23 = vor.u32 %v7318_v13, %v7314_v10  ;;  %v19481_v45 = vld [vmem:[#allocation30_spill] sm:$0xff] }
 0x628   : > { %v13090_v13 = vld [vmem:[%s18778_s3 + $0x168] sm:$0xff] }
 0x629   : > { %7493 = vmatpush.bf16.msrb.mxu3 %v13090_v13  ;;  %v8615_v13 = vld [vmem:[#allocation3 + $0x28] sm:$0x7] }
 0x62a   : > { %v7297_v8 = vpop.f32.mrf.mxu0 }
 0x62b   : > { %8658 = vmatpush.bf16.msrb.mxu1 %v13165_v12  ;;  %v8393_v12 = vld [vmem:[#allocation3 + $0x24] sm:$0x7]  ;;  %v7323_v8 = vsel %vm998_vm3, %v7319_v23, %v19481_v45 }
 0x62d   : > { %v6483_v61 = vpop.f32.mrf.mxu2 }
 0x62e   : > { %v6119_v51 = vpop.f32.mrf.mxu3  ;;  %v13183_v61 = vld [vmem:[%s18780_s5 + $0x248] sm:$0xff] }
 0x62f   : > { %v17281_v25 = vpop.f32.mrf.mxu1  ;;  %8659 = vmatpush.bf16.msrb.mxu1 %v13164_v26  ;;  %v8782_v26 = vld [vmem:[#allocation3 + $0x38] sm:$0x7]  ;;  %v5908_v51 = vadd.f32 %v16602_v44, %v5772_v1  ;;  %v5909_v1 = vadd.f32 %v16623_v49, %v5773_v11  ;;  %v6966_v11 = vshrl.u32 %v19454_v2, 16 }
 0x632   : > { %12096 = vmatmul.msk.bf16.vlgmr.msra.gmra.mxu1 %vm7889_vm13, %v8393_v12  ;;  %11726 = vmatmul.msk.bf16.vlgmr.msra.gmra.mxu2 %vm1074_vm2, %v7323_v8  ;;  %v17296_v10 = vpop.f32.mrf.mxu0  ;;  %v6506_v12 = vld [vmem:[#allocation2 + $0x84] sm:$0x7] }
 0x633   : > { %8878 = vmatpush.bf16.msra.mxu1 %v13185_v47  ;;  %v6512_v24 = vunpack.c.l.b16 %v6506_v12 }
 0x634   : > { %11588 = vmatmul.msk.bf16.gmra.mxu3 %vm1074_vm2, %v6517_v37  ;;  %v6010_v37 = vadd.f32 %v17025_v6, %v5908_v51  ;;  %v6968_v51 = vshll.u32 %v19454_v2, 16 }
 0x635   : > { %v6486_v16 = vpop.f32.mrf.mxu2  ;;  %12287 = vmatmul.msk.bf16.vlgmr.msrb.gmra.mxu0 %vm7889_vm13, %v8782_v26  ;;  %v6518_v26 = vpack.c.b16 %v6512_v24, %v6512_v24  ;;  %v6972_v24 = vshll.u32 %v16850_v52, 16  ;;  %v5776_v52 = vadd.f32 %v16691_v55, %v17169_v34 }
 0x636   : > { %v6122_v23 = vpop.f32.mrf.mxu3  ;;  %v19482_v16 = vld [vmem:[#allocation107_spill] sm:$0xff] }
 0x637   : > { %v7175_v5 = vpop.f32.mrf.mxu1  ;;  %8879 = vmatpush.bf16.msra.mxu1 %v13184_v63  ;;  %v17309_v47 = vadd.f32 %v6122_v23, %v6009_v39  ;;  %v6011_v39 = vadd.f32 %v17042_v36, %v5909_v1  ;;  %v8844_v23 = vunpack.c.l.b16 %v8833_v9  ;;  %v6974_v1 = vrot.slane %v6972_v24, 1 }
 0x638   : > { %v6979_v24 = vshll.u32 %v16879_v31, 16 }
 0x639   : > { %v17339_v12 = vpack.c.b16 %v8844_v23, %v8844_v23 }
 0x63a   : > { %v17315_v14 = vpop.f32.mrf.mxu0 }
 0x63b   : > { %8880 = vmatpush.bf16.msra.mxu1 %v13183_v61  ;;  %19483 = vst [vmem:[#allocation56_spill] sm:$0xff] %v17339_v12 }
 0x63d   : > { %v17319_v45 = vpop.f32.mrf.mxu2 }
 0x63e   : > { %v6124_v44 = vpop.f32.mrf.mxu3 }
 0x63f   : > { %v17321_v8 = vpop.f32.mrf.mxu1  ;;  %8881 = vmatpush.bf16.msra.mxu1 %v13182_v29  ;;  %v17324_v63 = vadd.f32 %v6124_v44, %v6010_v37  ;;  %v6970_v37 = vrot.slane %v6968_v51, 1  ;;  %v5912_v51 = vadd.f32 %v16668_v7, %v5776_v52  ;;  %v19485_v52 = vld [vmem:[#allocation117_spill] sm:$0xff] }
 0x641   : > { %v6971_v36 = vor.u32 %v6970_v37, %v6966_v11  ;;  %v13487_v11 = vld [vmem:[#allocation2 + $0x6c] sm:$0xff]   ;;  %v6014_v55 = vadd.f32 %v17084_v20, %v5912_v51  ;;  %v13089_v20 = vld [vmem:[%s18778_s3 + $0x160] sm:$0xff] }
 0x642   : > { %12204 = vmatmul.msk.bf16.vlgmr.msrb.gmra.mxu1 %vm7889_vm13, %v8615_v13  ;;  %11727 = vmatmul.msk.bf16.gmra.mxu2 %vm1074_vm2, %v19482_v16  ;;  %v7753_v43 = vpop.f32.mrf.mxu0  ;;  %v18936_v16 = vrot.slane %v17339_v12, 1  ;;  %v6976_v37 = vshrl.u32 %v13487_v11, 16  ;;  %v7348_v11 = vshll.u32 %v16975_v0, 16 }
 0x643   : > { %v19484_v43 = vld [vmem:[#allocation113_spill] sm:$0xff]  ;;  %v6975_v2 = vsel %vm998_vm3, %v6971_v36, %v6974_v1  ;;  %7494 = vmatpush.bf16.msrb.mxu3 %v13089_v20 }
 0x644   : > { %11589 = vmatmul.msk.bf16.gmra.mxu3 %vm1074_vm2, %v6518_v26  ;;  %v6978_v36 = vor.u32 %v6976_v37, %v6974_v1  ;;  %v13107_v37 = vld [vmem:[%s18780_s5 + $0x30] sm:$0xff] }
 0x645   : > { %v17331_v5 = vpop.f32.mrf.mxu2 }
 0x646   : > { %v6127_v61 = vpop.f32.mrf.mxu3 }
 0x647   : > { %v17333_v6 = vpop.f32.mrf.mxu1  ;;  %v17337_v29 = vadd.f32 %v6127_v61, %v6011_v39 }
 0x64a   : > { %v7755_v49 = vpop.f32.mrf.mxu0 }
 0x64d   : > { %v6493_v44 = vpop.f32.mrf.mxu2 }
 0x64e   : > { %v6129_v26 = vpop.f32.mrf.mxu3  ;;  %v5777_v44 = vadd.f32 %v16699_v35, %v17198_v54  ;;  %v13108_v54 = vld [vmem:[%s18780_s5 + $0x38] sm:$0xff] }
 0x64f   : > { %v7617_v13 = vpop.f32.mrf.mxu1  ;;  %7897 = vmatpush.bf16.msrb.mxu2 %v13108_v54 }
 0x650   : > { %v5913_v7 = vadd.f32 %v16684_v32, %v5777_v44  ;;  %v13488_v44 = vld [vmem:[#allocation2 + $0x74] sm:$0xff]  }
 0x652   : > { %12312 = vmatmul.msk.bf16.vlgmr.msra.gmra.mxu1 %vm7889_vm13, %v18936_v16  ;;  %11728 = vmatmul.msk.bf16.gmra.mxu2 %vm1074_vm2, %v19484_v43  ;;  %v17349_v9 = vpop.f32.mrf.mxu0  ;;  %v6981_v43 = vrot.slane %v6979_v24, 1  ;;  %v6015_v32 = vadd.f32 %v17098_v56, %v5913_v7  ;;  %v13106_v56 = vld [vmem:[%s18780_s5 + $0x28] sm:$0xff] }
 0x653   : > { %7898 = vmatpush.bf16.msrb.mxu2 %v13107_v37  ;;  %v13105_v37 = vld [vmem:[%s18780_s5 + $0x20] sm:$0xff] }
 0x654   : > { %11656 = vmatmul.msk.bf16.vlgmr.msra.gmra.mxu3 %vm1074_vm2, %v6975_v2  ;;  %v6982_v35 = vsel %vm998_vm3, %v6978_v36, %v6981_v43  ;;  %v6277_v36 = vadd.f32 %v16729_v28, %v17233_v46 }
 0x655   : > { %v17355_v39 = vpop.f32.mrf.mxu2 }
 0x656   : > { %v6132_v23 = vpop.f32.mrf.mxu3 }
 0x657   : > { %v7619_v61 = vpop.f32.mrf.mxu1  ;;  %7899 = vmatpush.bf16.msrb.mxu2 %v13106_v56 }
 0x65a   : > { %v17358_v49 = vpop.f32.mrf.mxu0 }
 0x65b   : > { %7900 = vmatpush.bf16.msrb.mxu2 %v13105_v37 }
 0x65d   : > { %v17363_v13 = vpop.f32.mrf.mxu2 }
 0x65e   : > { %v6134_v34 = vpop.f32.mrf.mxu3 }
 0x65f   : > { %v17365_v26 = vpop.f32.mrf.mxu1  ;;  %v17368_v2 = vadd.f32 %v6134_v34, %v6014_v55  ;;  %v6983_v55 = vshrl.u32 %v13488_v44, 16  ;;  %v6986_v34 = vshll.u32 %v16901_v53, 16  ;;  %v6379_v53 = vadd.f32 %v16707_v57, %v6277_v36  ;;  %v13112_v36 = vld [vmem:[%s18780_s5 + $0x50] sm:$0xff] }
 0x661   : > { %v6985_v54 = vor.u32 %v6983_v55, %v6981_v43  ;;  %v13113_v43 = vld [vmem:[%s18780_s5 + $0x58] sm:$0xff]  ;;  %v6495_v44 = vadd.f32 %v17141_v17, %v6379_v53  ;;  %v13111_v17 = vld [vmem:[%s18780_s5 + $0x48] sm:$0xff] }
 0x662   : > { %11729 = vmatmul.msk.bf16.gmra.mxu2 %vm1074_vm2, %v19485_v52  ;;  %v17373_v31 = vpop.f32.mrf.mxu0 }
 0x663   : > { %7994 = vmatpush.bf16.msra.mxu2 %v13113_v43 }
 0x664   : > { %11657 = vmatmul.msk.bf16.gmra.mxu3 %vm1074_vm2, %v6982_v35  ;;  %v7350_v35 = vrot.slane %v7348_v11, 1  ;;  %v6278_v11 = vadd.f32 %v16748_v33, %v17250_v48  ;;  %v6993_v33 = vshll.u32 %v19425_v30, 16  ;;  %v7352_v48 = vshrl.u32 %v16975_v0, 16 }
 0x665   : > { %v6927_v1 = vpop.f32.mrf.mxu2 }
 0x666   : > { %v6137_v23 = vpop.f32.mrf.mxu3  ;;  %v6988_v1 = vrot.slane %v6986_v34, 1  ;;  %v6380_v56 = vadd.f32 %v16723_v19, %v6278_v11  ;;  %v7354_v43 = vor.u32 %v7352_v48, %v7350_v35  ;;  %v13110_v11 = vld [vmem:[%s18780_s5 + $0x40] sm:$0xff] }
 0x667   : > { %v17383_v61 = vpop.f32.mrf.mxu1  ;;  %v17386_v51 = vadd.f32 %v6137_v23, %v6015_v32  ;;  %v19486_v32 = vld [vmem:[#allocation118_spill] sm:$0xff]  ;;  %7995 = vmatpush.bf16.msra.mxu2 %v13112_v36  ;;  %v6997_v36 = vshrl.u32 %v19425_v30, 16 }
 0x668   : > { %v7351_v23 = vsel %vm998_vm3, %v19486_v32, %v7350_v35  ;;  %v6989_v46 = vsel %vm998_vm3, %v6985_v54, %v6988_v1 }
 0x66a   : > { %v7765_v24 = vpop.f32.mrf.mxu0 }
 0x66b   : > { %7996 = vmatpush.bf16.msra.mxu2 %v13111_v17 }
 0x66d   : > { %v6929_v7 = vpop.f32.mrf.mxu2 }
 0x66e   : > { %v6139_v20 = vpop.f32.mrf.mxu3 }
 0x66f   : > { %v17398_v52 = vpop.f32.mrf.mxu1  ;;  %v13489_v20 = vld [vmem:[#allocation2 + $0x7c] sm:$0xff]   ;;  %7997 = vmatpush.bf16.msra.mxu2 %v13110_v11 }
 0x670   : > { %v6990_v54 = vshrl.u32 %v13489_v20, 16  ;;  %v7000_v20 = vshll.u32 %v17253_v15, 16 }
 0x672   : > { %11730 = vmatmul.msk.bf16.gmra.mxu2 %vm1074_vm2, %v7351_v23  ;;  %v7768_v28 = vpop.f32.mrf.mxu0  ;;  %v6496_v23 = vadd.f32 %v17161_v21, %v6380_v56  ;;  %v6992_v37 = vor.u32 %v6990_v54, %v6988_v1 }
 0x673   : > { %v6995_v28 = vrot.slane %v6993_v33, 1  ;;  %v6281_v33 = vadd.f32 %v16791_v58, %v17309_v47  ;;  %v13121_v58 = vld [vmem:[%s18780_s5 + $0x90] sm:$0xff]  ;;  %v13104_v47 = vld [vmem:[%s18780_s5 + $0x18] sm:$0xff] }
 0x674   : > { %11658 = vmatmul.msk.bf16.gmra.mxu3 %vm1074_vm2, %v6989_v46 }
 0x675   : > { %v17414_v57 = vpop.f32.mrf.mxu2  ;;  %v6996_v0 = vsel %vm998_vm3, %v6992_v37, %v6995_v28  ;;  %v13122_v37 = vld [vmem:[%s18780_s5 + $0x98] sm:$0xff]  ;;  %v6383_v11 = vadd.f32 %v16764_v42, %v6281_v33  ;;  %v6282_v42 = vadd.f32 %v16813_v50, %v17324_v63  ;;  %7937 = vmatpush.bf16.msra.mxu3 %v13104_v47  ;;  %v13109_v33 = vld [vmem:[#allocation3] sm:$0x10]  ;;  %v13119_v50 = vld [vmem:[%s18780_s5 + $0x80] sm:$0xff] }
 0x676   : > { %v6558_v55 = vpop.f32.mrf.mxu3  ;;  %v19488_v63 = vld [vmem:[#allocation89_spill] sm:$0xff] }
 0x677   : > { %v7629_v24 = vpop.f32.mrf.mxu1  ;;  %v17417_v34 = vadd.f32 %v6558_v55, %v6495_v44  ;;  %v7851_v44 = vld [vmem:[#allocation3] sm:$0xe] }
 0x678   : > { %v7862_v35 = vunpack.c.l.b16 %v7851_v44 }
 0x67a   : > { %v17423_v7 = vpop.f32.mrf.mxu0  ;;  %v7863_v54 = vpack.c.b16 %v7862_v35, %v7862_v35 }
 0x67d   : > { %v17430_v32 = vpop.f32.mrf.mxu2 }
 0x67e   : > { %v6560_v53 = vpop.f32.mrf.mxu3 }
 0x67f   : > { %v7632_v19 = vpop.f32.mrf.mxu1  ;;  %v17433_v46 = vadd.f32 %v6560_v53, %v6496_v23  ;;  %v6999_v23 = vor.u32 %v6997_v36, %v6995_v28  ;;  %v7002_v53 = vrot.slane %v7000_v20, 1  ;;  %v13120_v36 = vld [vmem:[%s18780_s5 + $0x88] sm:$0xff] }
 0x680   : > { %v19487_v20 = vld [vmem:[#allocation50_spill] sm:$0xff] }
 0x682   : > { %11731 = vmatmul.msk.bf16.gmra.mxu2 %vm1074_vm2, %v7354_v43  ;;  %v17439_v24 = vpop.f32.mrf.mxu0  ;;  %v7864_v43 = vrot.slane %v7863_v54, 1  ;;  %v6384_v54 = vadd.f32 %v19487_v20, %v6282_v42  ;;  %v13136_v42 = vld [vmem:[%s18780_s5 + $0xf8] sm:$0xff] }
 0x684   : > { %11659 = vmatmul.msk.bf16.gmra.mxu3 %vm1074_vm2, %v6996_v0  ;;  %v7003_v0 = vsel %vm998_vm3, %v6999_v23, %v7002_v53  ;;  %v6283_v23 = vadd.f32 %v19488_v63, %v17337_v29 }
 0x685   : > { %v17443_v21 = vpop.f32.mrf.mxu2 }
 0x686   : > { %v6563_v55 = vpop.f32.mrf.mxu3 }
 0x687   : > { %v17445_v1 = vpop.f32.mrf.mxu1  ;;  %v6499_v55 = vadd.f32 %v17226_v41, %v6383_v11  ;;  %v6500_v11 = vadd.f32 %v17241_v4, %v6384_v54  ;;  %v13135_v4 = vld [vmem:[%s18780_s5 + $0xf0] sm:$0xff] }
 0x68a   : > { %v7775_v56 = vpop.f32.mrf.mxu0 }
 0x68d   : > { %v6939_v17 = vpop.f32.mrf.mxu2 }
 0x68e   : > { %v6565_v19 = vpop.f32.mrf.mxu3 }
 0x68f   : > { %v17451_v48 = vpop.f32.mrf.mxu1  ;;  %v11862_v19 = vld [vmem:[#allocation3] sm:$0xc] }
 0x690   : > { %v11863_v41 = vor.u32 %v13109_v33, %v11862_v19  ;;  %v13134_v33 = vld [vmem:[%s18780_s5 + $0xe8] sm:$0xff] }
 0x692   : > { %11834 = vmatmul.msk.bf16.vlgmr.msrb.gmra.mxu2 %vm7889_vm13, %v7864_v43  ;;  %v17458_v30 = vpop.f32.mrf.mxu0 }
 0x693   : > { %8103 = vmatpush.bf16.msrb.mxu2 %v13122_v37 }
 0x694   : > { %11660 = vmatmul.msk.bf16.gmra.mxu3 %vm1074_vm2, %v7003_v0  ;;  %v7004_v0 = vshrl.u32 %v17253_v15, 16 }
 0x695   : > { %v6942_v28 = vpop.f32.mrf.mxu2 }
 0x696   : > { %v6568_v35 = vpop.f32.mrf.mxu3  ;;  %v7962_v28 = vrot.slane %v11863_v41, 2 }
 0x697   : > { %v7639_v44 = vpop.f32.mrf.mxu1  ;;  %v17471_v56 = vadd.f32 %v6568_v35, %v6499_v55  ;;  %8104 = vmatpush.bf16.msrb.mxu2 %v13121_v58  ;;  %v19489_v55 = vld [vmem:[#allocation62_spill] sm:$0xff] }
 0x698   : > { %v7006_v44 = vor.u32 %v7004_v0, %v7002_v53  ;;  %v6385_v29 = vadd.f32 %v19489_v55, %v6283_v23  ;;  %v19490_v23 = vld [vmem:[#allocation52_spill] sm:$0xff] }
 0x699   : > { %v13490_v0 = vld [vmem:[#allocation2 + $0x74] sm:$0xff] }
 0x69a   : > { %v8390_v17 = vpop.f32.mrf.mxu0  ;;  %v6501_v20 = vadd.f32 %v17265_v62, %v6385_v29  ;;  %v13152_v29 = vld [vmem:[%s18780_s5 + $0x170] sm:$0xff] }
 0x69b   : > { %8105 = vmatpush.bf16.msrb.mxu2 %v13120_v36  ;;  %v13103_v17 = vld [vmem:[%s18780_s5 + $0x10] sm:$0xff] }
 0x69c   : > { %7938 = vmatpush.bf16.msra.mxu3 %v13103_v17  ;;  %v13151_v17 = vld [vmem:[%s18780_s5 + $0x168] sm:$0xff] }
 0x69d   : > { %v17482_v37 = vpop.f32.mrf.mxu2 }
 0x69e   : > { %v6570_v58 = vpop.f32.mrf.mxu3 }
 0x69f   : > { %v17484_v43 = vpop.f32.mrf.mxu1  ;;  %v17488_v47 = vadd.f32 %v6570_v58, %v6500_v11  ;;  %8106 = vmatpush.bf16.msrb.mxu2 %v13119_v50  ;;  %v13133_v50 = vld [vmem:[%s18780_s5 + $0xe0] sm:$0xff]  ;;  %v7446_v11 = vrot.slane %v19490_v23, 1  ;;  %v7447_v58 = vrot.slane %v13490_v0, 1 }
 0x6a0   : > { %v19493_v23 = vld [vmem:[#allocation122_spill] sm:$0xff] }
 0x6a1   : > { %v7448_v55 = vsel %vm1238_vm7, %v7446_v11, %v7447_v58 }
 0x6a2   : > { %11880 = vmatmul.msk.bf16.vlgmr.msra.gmra.mxu2 %vm7889_vm13, %v7962_v28  ;;  %v17495_v35 = vpop.f32.mrf.mxu0  ;;  %v8062_v28 = vld [vmem:[#allocation3 + $0x4] sm:$0x7] }
 0x6a3   : > { %8270 = vmatpush.bf16.msra.mxu2 %v13136_v42  ;;  %v13153_v42 = vld [vmem:[%s18780_s5 + $0x178] sm:$0xff] }
 0x6a4   : > { %11661 = vmatmul.msk.bf16.gmra.mxu3 %vm1074_vm2, %v7006_v44 }
 0x6a5   : > { %v17501_v15 = vpop.f32.mrf.mxu2 }
 0x6a7   : > { %v8226_v36 = vpop.f32.mrf.mxu1  ;;  %v6573_v54 = vpop.f32.mrf.mxu3  ;;  %8271 = vmatpush.bf16.msra.mxu2 %v13135_v4  ;;  %v19491_v4 = vld [vmem:[#allocation68_spill] sm:$0xff] }
 0x6a8   : > { %v17504_v53 = vadd.f32 %v6573_v54, %v6501_v20  ;;  %v6286_v36 = vadd.f32 %v19491_v4, %v17368_v2  ;;  %v6287_v2 = vadd.f32 %v19493_v23, %v17386_v51  ;;  %v8444_v23 = vld [vmem:[#allocation3 + $0x24] sm:$0xe] }
 0x6aa   : > { %v8612_v19 = vpop.f32.mrf.mxu0 }
 0x6ab   : > { %8272 = vmatpush.bf16.msra.mxu2 %v13134_v33  ;;  %v19492_v19 = vld [vmem:[#allocation119_spill] sm:$0xff] }
 0x6ad   : > { %v6949_v62 = vpop.f32.mrf.mxu2 }
 0x6af   : > { %v17515_v41 = vpop.f32.mrf.mxu1  ;;  %v6575_v63 = vpop.f32.mrf.mxu3  ;;  %8273 = vmatpush.bf16.msra.mxu2 %v13133_v50  ;;  %v6388_v50 = vadd.f32 %v19492_v19, %v6286_v36  ;;  %v13172_v36 = vld [vmem:[%s18780_s5 + $0x1f8] sm:$0xff]  ;;  %v13102_v19 = vld [vmem:[%s18780_s5 + $0x8] sm:$0xff] }
 0x6b0   : > { %v13150_v63 = vld [vmem:[%s18780_s5 + $0x160] sm:$0xff]  ;;  %7939 = vmatpush.bf16.msra.mxu3 %v13102_v19 }
 0x6b2   : > { %11934 = vmatmul.msk.bf16.vlgmr.msrb.gmra.mxu2 %vm7889_vm13, %v8062_v28  ;;  %v17522_v44 = vpop.f32.mrf.mxu0 }
 0x6b3   : > { %8489 = vmatpush.bf16.msrb.mxu2 %v13153_v42  ;;  %v6504_v42 = vadd.f32 %v17319_v45, %v6388_v50  ;;  %v13171_v45 = vld [vmem:[%s18780_s5 + $0x1f0] sm:$0xff] }
 0x6b4   : > { %11744 = vmatmul.msk.bf16.vlgmr.msrb.gmra.mxu3 %vm1074_vm2, %v7448_v55  ;;  %v13491_v55 = vld [vmem:[#allocation2 + $0x7c] sm:$0xff] }
 0x6b5   : > { %v17531_v20 = vpop.f32.mrf.mxu2 }
 0x6b7   : > { %v8441_v54 = vpop.f32.mrf.mxu1  ;;  %v6578_v33 = vpop.f32.mrf.mxu3  ;;  %8490 = vmatpush.bf16.msrb.mxu2 %v13152_v29  ;;  %v7449_v29 = vrot.slane %v13491_v55, 1  ;;  %v13169_v55 = vld [vmem:[%s18780_s5 + $0x1e0] sm:$0xff] }
 0x6b8   : > { %v8229_v54 = vld [vmem:[#allocation3 + $0x14] sm:$0x7]  ;;  %v19494_v33 = vld [vmem:[#allocation111_spill] sm:$0xff] }
 0x6b9   : > { %v7450_v51 = vsel %vm1238_vm7, %v7447_v58, %v7449_v29  ;;  %v13170_v58 = vld [vmem:[%s18780_s5 + $0x1e8] sm:$0xff] }
 0x6ba   : > { %v8830_v62 = vpop.f32.mrf.mxu0 }
 0x6bb   : > { %8491 = vmatpush.bf16.msrb.mxu2 %v13151_v17  ;;  %v6389_v17 = vadd.f32 %v19494_v33, %v6287_v2 }
 0x6bd   : > { %v17542_v11 = vpop.f32.mrf.mxu2 }
 0x6bf   : > { %v17544_v0 = vpop.f32.mrf.mxu1  ;;  %v6580_v28 = vpop.f32.mrf.mxu3  ;;  %8492 = vmatpush.bf16.msrb.mxu2 %v13150_v63  ;;  %v6505_v63 = vadd.f32 %v17331_v5, %v6389_v17  ;;  %v19496_v5 = vld [vmem:[#allocation33_spill] sm:$0xff] }
 0x6c0   : > { %v17547_v4 = vadd.f32 %v6580_v28, %v6504_v42  ;;  %v8455_v28 = vunpack.c.l.b16 %v8444_v23 }
 0x6c2   : > { %12017 = vmatmul.msk.bf16.vlgmr.msra.gmra.mxu2 %vm7889_vm13, %v8229_v54  ;;  %v6723_v54 = vadd.f32 %v19496_v5, %v17417_v34 }
 0x6c3   : > { %8714 = vmatpush.bf16.msra.mxu2 %v13172_v36  ;;  %v17571_v36 = vpack.c.b16 %v8455_v28, %v8455_v28 }
 0x6c4   : > { %11745 = vmatmul.msk.bf16.gmra.mxu3 %vm1074_vm2, %v7450_v51 }
 0x6c5   : > { %v7399_v50 = vpop.f32.mrf.mxu2  ;;  %19495 = vst [vmem:[#allocation71_spill] sm:$0xff] %v17571_v36 }
 0x6c6   : > { %v13190_v50 = vld [vmem:[%s18780_s5 + $0x278] sm:$0xff] }
 0x6c7   : > { %v8663_v62 = vpop.f32.mrf.mxu1  ;;  %v6583_v2 = vpop.f32.mrf.mxu3  ;;  %8715 = vmatpush.bf16.msra.mxu2 %v13171_v45  ;;  %v13492_v45 = vld [vmem:[#allocation2 + $0x84] sm:$0xff] }
 0x6c8   : > { %v17563_v42 = vadd.f32 %v6583_v2, %v6505_v63  ;;  %v7451_v19 = vrot.slane %v13492_v45, 1  ;;  %v18937_v62 = vrot.slane %v17571_v36, 1  ;;  %v19497_v63 = vld [vmem:[#allocation43_spill] sm:$0xff] }
 0x6c9   : > { %v6859_v23 = vadd.f32 %v19497_v63, %v6723_v54  ;;  %v13189_v2 = vld [vmem:[%s18780_s5 + $0x270] sm:$0xff]  ;;  %v13168_v63 = vld [vmem:[#allocation3 + $0x34] sm:$0x10] }
 0x6ca   : > { %v7452_v34 = vsel %vm1238_vm7, %v7449_v29, %v7451_v19  ;;  %v13188_v29 = vld [vmem:[%s18780_s5 + $0x268] sm:$0xff] }
 0x6cb   : > { %8716 = vmatpush.bf16.msra.mxu2 %v13170_v58  ;;  %v19498_v58 = vld [vmem:[#allocation32_spill] sm:$0xff]  ;;  %v6951_v54 = vadd.f32 %v17355_v39, %v6859_v23  ;;  %v19499_v45 = vld [vmem:[#allocation39_spill] sm:$0xff]  ;;  %v13187_v39 = vld [vmem:[%s18780_s5 + $0x260] sm:$0xff] }
 0x6cc   : > { %v6724_v28 = vadd.f32 %v19498_v58, %v17433_v46  ;;  %v13101_v46 = vld [vmem:[%s18780_s5] sm:$0xff] }
 0x6cd   : > { %v7401_v33 = vpop.f32.mrf.mxu2  ;;  %7940 = vmatpush.bf16.msra.mxu3 %v13101_v46 }
 0x6cf   : > { %v17575_v17 = vpop.f32.mrf.mxu1  ;;  %v6585_v51 = vpop.f32.mrf.mxu3  ;;  %8717 = vmatpush.bf16.msra.mxu2 %v13169_v55 }
 0x6d2   : > { %12121 = vmatmul.msk.bf16.vlgmr.msrb.gmra.mxu2 %vm7889_vm13, %v18937_v62  ;;  %v19503_v62 = vld [vmem:[#allocation51_spill] sm:$0xff] }
 0x6d3   : > { %8936 = vmatpush.bf16.msrb.mxu2 %v13190_v50  ;;  %v6860_v50 = vadd.f32 %v19499_v45, %v6724_v28 }
 0x6d4   : > { %11746 = vmatmul.msk.bf16.gmra.mxu3 %vm1074_vm2, %v7452_v34  ;;  %v12215_v34 = vld [vmem:[#allocation3 + $0x34] sm:$0xc] }
 0x6d5   : > { %v17592_v55 = vpop.f32.mrf.mxu2  ;;  %v12216_v23 = vor.u32 %v13168_v63, %v12215_v34  ;;  %v6952_v58 = vadd.f32 %v17363_v13, %v6860_v50  ;;  %v13186_v34 = vld [vmem:[#allocation3 + $0x38] sm:$0x10]  ;;  %v12323_v13 = vld [vmem:[#allocation3 + $0x38] sm:$0xc] }
 0x6d6   : > { %v12324_v50 = vor.u32 %v13186_v34, %v12323_v13 }
 0x6d7   : > { %v8885_v5 = vpop.f32.mrf.mxu1  ;;  %v7046_v33 = vpop.f32.mrf.mxu3  ;;  %8937 = vmatpush.bf16.msrb.mxu2 %v13189_v2  ;;  %v17612_v45 = vrot.slane %v12216_v23, 2  ;;  %v7455_v23 = vrot.slane %v17118_v3, 1 }
 0x6d8   : > { %v17595_v51 = vadd.f32 %v7046_v33, %v6951_v54  ;;  %v13493_v54 = vld [vmem:[#allocation2 + $0x8c] sm:$0xff]  ;;  %v17623_v16 = vrot.slane %v12324_v50, 2  ;;  %v19505_v50 = vld [vmem:[#allocation41_spill] sm:$0xff] }
 0x6d9   : > { %v7453_v28 = vrot.slane %v13493_v54, 1  ;;  %19500 = vst [vmem:[#allocation21_spill] sm:$0xff] %v17612_v45  ;;  %v19501_v54 = vld [vmem:[#allocation54_spill] sm:$0xff] }
 0x6da   : > { %19502 = vst [vmem:[#allocation78_spill] sm:$0xff] %v17623_v16 }
 0x6db   : > { %8938 = vmatpush.bf16.msrb.mxu2 %v13188_v29  ;;  %v7454_v29 = vsel %vm1238_vm7, %v7451_v19, %v7453_v28  ;;  %v7456_v19 = vsel %vm1238_vm7, %v7453_v28, %v7455_v23 }
 0x6dd   : > { %v17607_v2 = vpop.f32.mrf.mxu2 }
 0x6df   : > { %v7048_v5 = vpop.f32.mrf.mxu3  ;;  %8939 = vmatpush.bf16.msrb.mxu2 %v13187_v39 }
 0x6e0   : > { %v17610_v33 = vadd.f32 %v7048_v5, %v6952_v58  ;;  %v6727_v58 = vadd.f32 %v19501_v54, %v17471_v56  ;;  %v19504_v56 = vld [vmem:[#allocation42_spill] sm:$0xff]  ;;  %v17645_v54 = vld [vmem:[%s18780_s5 + $0x70] sm:$0xff] }
 0x6e2   : > { %12233 = vmatmul.msk.bf16.vlgmr.msra.gmra.mxu2 %vm7889_vm13, %v17612_v45  ;;  %v6863_v12 = vadd.f32 %v19503_v62, %v6727_v58 }
 0x6e4   : > { %11747 = vmatmul.msk.bf16.gmra.mxu3 %vm1074_vm2, %v7454_v29  ;;  %v17633_v29 = vld [vmem:[%s18780_s5 + $0x78] sm:$0xff]  ;;  %v6955_v34 = vadd.f32 %v17414_v57, %v6863_v12 }
 0x6e5   : > { %v17618_v63 = vpop.f32.mrf.mxu2  ;;  %8052 = vmatpush.bf16.msrb.mxu3 %v17633_v29  ;;  %v19506_v12 = vld [vmem:[#allocation81_spill] sm:$0xff] }
 0x6e6   : > { %v6729_v57 = vadd.f32 %v19506_v12, %v17504_v53  ;;  %v17677_v12 = vld [vmem:[%s18780_s5 + $0xb8] sm:$0xff] }
 0x6e7   : > { %v7051_v46 = vpop.f32.mrf.mxu3 }
 0x6e8   : > { %v6728_v46 = vadd.f32 %v19504_v56, %v17488_v47  ;;  %v17651_v47 = vld [vmem:[%s18780_s5 + $0x68] sm:$0xff]  ;;  %v19507_v56 = vld [vmem:[#allocation48_spill] sm:$0xff] }
 0x6e9   : > { %8053 = vmatpush.bf16.msrb.mxu3 %v17645_v54 }
 0x6ea   : > { %v6864_v28 = vadd.f32 %v19505_v50, %v6728_v46  ;;  %v6865_v46 = vadd.f32 %v19507_v56, %v6729_v57  ;;  %v7842_v57 = vld [vmem:[#allocation3] sm:$0x7] }
 0x6ed   : > { %v7411_v5 = vpop.f32.mrf.mxu2  ;;  %8054 = vmatpush.bf16.msrb.mxu3 %v17651_v47 }
 0x6ee   : > { %v6956_v5 = vadd.f32 %v17430_v32, %v6864_v28  ;;  %v6957_v32 = vadd.f32 %v17443_v21, %v6865_v46  ;;  %v19510_v21 = vld [vmem:[#allocation37_spill] sm:$0xff]  ;;  %v17694_v46 = vld [vmem:[%s18780_s5 + $0xa8] sm:$0xff] }
 0x6ef   : > { %v7053_v39 = vpop.f32.mrf.mxu3  ;;  %19511 = vst [vmem:[#allocation9_spill] sm:$0xff] %v17694_v46 }
 0x6f2   : > { %12341 = vmatmul.msk.bf16.vlgmr.msrb.gmra.mxu2 %vm7889_vm13, %v17623_v16 }
 0x6f4   : > { %11748 = vmatmul.msk.bf16.gmra.mxu3 %vm1074_vm2, %v7456_v19 }
 0x6f5   : > { %v7414_v3 = vpop.f32.mrf.mxu2 }
 0x6f6   : > { %v17665_v3 = vld [vmem:[%s18780_s5 + $0x60] sm:$0xff] }
 0x6f7   : > { %v7056_v62 = vpop.f32.mrf.mxu3  ;;  %19508 = vst [vmem:[#allocation102_spill] sm:$0xff] %v17665_v3  ;;  %8055 = vmatpush.bf16.msrb.mxu3 %v17665_v3 }
 0x6f8   : > { %v17639_v13 = vadd.f32 %v7056_v62, %v6955_v34 }
 0x6fd   : > { %v17655_v58 = vpop.f32.mrf.mxu2 }
 0x6ff   : > { %v7058_v39 = vpop.f32.mrf.mxu3 }
 0x700   : > { %v17658_v19 = vadd.f32 %v7058_v39, %v6956_v5  ;;  %v6732_v5 = vadd.f32 %v19510_v21, %v17547_v4  ;;  %v17701_v4 = vld [vmem:[%s18780_s5 + $0xa0] sm:$0xff] }
 0x704   : > { %11749 = vmatmul.msk.bf16.gmra.mxu3 %vm1074_vm2, %v7455_v23  ;;  %v17684_v23 = vld [vmem:[%s18780_s5 + $0xb0] sm:$0xff]  ;;  %vm10349_vm2 = vcmask 24576  }
 0x705   : > { %v17669_v53 = vpop.f32.mrf.mxu2  ;;  %19509 = vst [vmem:[#allocation105_spill] sm:$0xff] %v17684_v23 }
 0x707   : > { %v7061_v34 = vpop.f32.mrf.mxu3 }
 0x708   : > { %v17672_v62 = vadd.f32 %v7061_v34, %v6957_v32  ;;  %v19512_v32 = vld [vmem:[#allocation55_spill] sm:$0xff] }
 0x709   : > { %v6868_v34 = vadd.f32 %v19512_v32, %v6732_v5  ;;  %v17712_v5 = vld [vmem:[%s18780_s5 + $0x118] sm:$0xff] }
 0x70b   : > { %v6960_v16 = vadd.f32 %v17482_v37, %v6868_v34  ;;  %v17720_v37 = vld [vmem:[%s18780_s5 + $0x110] sm:$0xff] }
 0x70d   : > { %v7421_v50 = vpop.f32.mrf.mxu2 }
 0x70e   : > { %v13114_v50 = vld [vmem:[#allocation3] sm:$0x30] }
 0x70f   : > { %v7063_v28 = vpop.f32.mrf.mxu3 }
 0x710   : > { %v11891_v28 = vld [vmem:[#allocation3] sm:$0x8] }
 0x711   : > { %v11892_v45 = vor.u32 %v13114_v50, %v11891_v28  ;;  %v13198_v50 = vld [vmem:[%s18780_s5 + $0x2b8] sm:$0xff]  ;;  %v11945_v28 = vld [vmem:[#allocation3 + $0x10] sm:$0xc] }
 0x712   : > { %9042 = vmatpush.bf16.msra.mxu0 %v13198_v50  ;;  %v17769_v50 = vld [vmem:[%s18780_s5 + $0x2f8] sm:$0xff] }
 0x713   : > { %v8020_v32 = vrot.slane %v11892_v45, 3  ;;  %v17731_v45 = vld [vmem:[%s18780_s5 + $0x108] sm:$0xff]  ;;  %19519 = vst [vmem:[#allocation76_spill] sm:$0xff] %v17769_v50  ;;  %9158 = vmatpush.bf16.msra.mxu2 %v17769_v50  ;;  %v17803_v50 = vld [vmem:[%s18779_s4] ss:$0 sm:$0xff] }
 0x714   : > { %11851 = vmatmul.msk.bf16.vlgmr.msra.gmra.mxu3 %vm7889_vm13, %v7842_v57  ;;  %v19513_v57 = vld [vmem:[#allocation12_spill] sm:$0xff]  ;;  %19515 = vst [vmem:[#allocation16_spill] sm:$0xff] %v17731_v45 }
 0x715   : > { %8161 = vmatpush.bf16.msra.mxu3 %v17677_v12  ;;  %v17688_v39 = vpop.f32.mrf.mxu2  ;;  %v6733_v21 = vadd.f32 %v19513_v57, %v17563_v42 }
 0x717   : > { %v7066_v56 = vpop.f32.mrf.mxu3 }
 0x719   : > { %8162 = vmatpush.bf16.msra.mxu3 %v17684_v23 }
 0x71d   : > { %8163 = vmatpush.bf16.msra.mxu3 %v17694_v46  ;;  %v7904_v56 = vpop.f32.mrf.mxu2  ;;  %v19514_v46 = vld [vmem:[#allocation46_spill] sm:$0xff] }
 0x71e   : > { %v6869_v3 = vadd.f32 %v19514_v46, %v6733_v21  ;;  %v13123_v46 = vld [vmem:[#allocation3 + $0x10] sm:$0x10] }
 0x71f   : > { %v7068_v36 = vpop.f32.mrf.mxu3  ;;  %v11946_v21 = vor.u32 %v13123_v46, %v11945_v28  ;;  %v17764_v46 = vld [vmem:[%s18780_s5 + $0x190] sm:$0xff]  ;;  %v7178_v28 = vadd.f32 %v17100_v60, %v17610_v33 }
 0x720   : > { %v17706_v23 = vadd.f32 %v7068_v36, %v6960_v16  ;;  %v6961_v42 = vadd.f32 %v17501_v15, %v6869_v3  ;;  %v17740_v15 = vld [vmem:[%s18780_s5 + $0x100] sm:$0xff]  ;;  %v7177_v3 = vadd.f32 %v17086_v40, %v17595_v51  ;;  %v17755_v40 = vld [vmem:[%s18780_s5 + $0x2b0] sm:$0xff]  ;;  %v13203_v51 = vld [vmem:[%s18780_s5 + $0x2d8] sm:$0xff] }
 0x721   : > { %8164 = vmatpush.bf16.msra.mxu3 %v17701_v4  ;;  %19518 = vst [vmem:[#allocation100_spill] sm:$0xff] %v17755_v40  ;;  %9043 = vmatpush.bf16.msra.mxu0 %v17755_v40  ;;  %v17791_v60 = vld [vmem:[%s18780_s5 + $0x2f0] sm:$0xff] }
 0x722   : > { %9100 = vmatpush.bf16.msrb.mxu1 %v13203_v51  ;;  %19522 = vst [vmem:[#allocation14_spill] sm:$0xff] %v17791_v60  ;;  %v19523_v40 = vld [vmem:[#allocation112_spill] sm:$0xff]  ;;  %9159 = vmatpush.bf16.msra.mxu2 %v17791_v60 }
 0x724   : > { %11909 = vmatmul.msk.bf16.vlgmr.msrb.gmra.mxu3 %vm7889_vm13, %v8020_v32  ;;  %v17748_v32 = vld [vmem:[%s18780_s5 + $0x198] sm:$0xff] }
 0x725   : > { %8325 = vmatpush.bf16.msrb.mxu3 %v17712_v5  ;;  %v17722_v16 = vpop.f32.mrf.mxu2  ;;  %19516 = vst [vmem:[#allocation20_spill] sm:$0xff] %v17748_v32 }
 0x727   : > { %v7071_v36 = vpop.f32.mrf.mxu3 }
 0x728   : > { %v17725_v34 = vadd.f32 %v7071_v36, %v6961_v42  ;;  %v8129_v42 = vrot.slane %v11946_v21, 2  ;;  %v19517_v36 = vld [vmem:[#allocation49_spill] sm:$0xff] }
 0x729   : > { %8326 = vmatpush.bf16.msrb.mxu3 %v17720_v37  ;;  %v8280_v21 = vld [vmem:[#allocation3 + $0x14] sm:$0xe] }
 0x72a   : > { %v8291_v33 = vunpack.c.l.b16 %v8280_v21  ;;  %v17813_v21 = vld [vmem:[%s18780_s5 + $0x2a0] sm:$0xff] }
 0x72b   : > { %19524 = vst [vmem:[#allocation19_spill] sm:$0xff] %v17813_v21 }
 0x72d   : > { %8327 = vmatpush.bf16.msrb.mxu3 %v17731_v45  ;;  %v8001_v57 = vpop.f32.mrf.mxu2  ;;  %v7299_v45 = vadd.f32 %v19517_v36, %v7177_v3 }
 0x72f   : > { %v7073_v56 = vpop.f32.mrf.mxu3  ;;  %v7423_v57 = vadd.f32 %v17531_v20, %v7299_v45  ;;  %v17797_v45 = vld [vmem:[%s18780_s5 + $0x188] sm:$0xff] }
 0x730   : > { %v17780_v56 = vld [vmem:[%s18780_s5 + $0x2a8] sm:$0xff] }
 0x731   : > { %8328 = vmatpush.bf16.msrb.mxu3 %v17740_v15  ;;  %19520 = vst [vmem:[#allocation94_spill] sm:$0xff] %v17780_v56  ;;  %9044 = vmatpush.bf16.msra.mxu0 %v17780_v56 }
 0x734   : > { %11963 = vmatmul.msk.bf16.vlgmr.msra.gmra.mxu3 %vm7889_vm13, %v8129_v42  ;;  %v17785_v42 = vld [vmem:[%s18780_s5 + $0x2d0] sm:$0xff] }
 0x735   : > { %8547 = vmatpush.bf16.msra.mxu3 %v17748_v32  ;;  %v17773_v3 = vpop.f32.mrf.mxu2  ;;  %19521 = vst [vmem:[#allocation79_spill] sm:$0xff] %v17785_v42  ;;  %v7300_v32 = vadd.f32 %v19523_v40, %v7178_v28  ;;  %9101 = vmatpush.bf16.msrb.mxu1 %v17785_v42  ;;  %v17824_v40 = vld [vmem:[%s18780_s5 + $0x180] sm:$0xff] }
 0x736   : > { %9045 = vmatpush.bf16.msra.mxu0 %v17813_v21  ;;  %v17844_v42 = vld [vmem:[%s18780_s5 + $0x2e0] sm:$0xff] }
 0x737   : > { %v7496_v36 = vpop.f32.mrf.mxu3  ;;  %19528 = vst [vmem:[#allocation99_spill] sm:$0xff] %v17844_v42 }
 0x738   : > { %v7525_v20 = vadd.f32 %v7496_v36, %v7423_v57  ;;  %v8292_v36 = vpack.c.b16 %v8291_v33, %v8291_v33  ;;  %v17838_v33 = vld [vmem:[%s18780_s5 + $0x2c0] sm:$0xff] }
 0x739   : > { %8548 = vmatpush.bf16.msra.mxu3 %v17764_v46  ;;  %19527 = vst [vmem:[#allocation82_spill] sm:$0xff] %v17838_v33 }
 0x73a   : > { %v7641_v51 = vadd.f32 %v17321_v8, %v7525_v20  ;;  %v17818_v8 = vld [vmem:[%s18780_s5 + $0x2c8] sm:$0xff]  ;;  %v8293_v21 = vrot.slane %v8292_v36, 1 }
 0x73b   : > { %19525 = vst [vmem:[#allocation84_spill] sm:$0xff] %v17818_v8  ;;  %9102 = vmatpush.bf16.msrb.mxu1 %v17818_v8 }
 0x73c   : > { %v7777_v57 = vadd.f32 %v17296_v10, %v7641_v51  ;;  %v17829_v10 = vld [vmem:[%s18780_s5 + $0x2e8] sm:$0xff]  ;;  %v7424_v51 = vadd.f32 %v17542_v11, %v7300_v32  ;;  %v17850_v11 = vld [vmem:[%s18780_s5 + $0x218] sm:$0xff] }
 0x73d   : > { %8549 = vmatpush.bf16.msra.mxu3 %v17797_v45  ;;  %19526 = vst [vmem:[#allocation85_spill] sm:$0xff] %v17829_v10  ;;  %v8110_v20 = vpop.f32.mrf.mxu2  ;;  %9160 = vmatpush.bf16.msra.mxu2 %v17829_v10 }
 0x73e   : > { %v7792_v28 = vadd.f32 %v17803_v50, %v7777_v57 }
 0x73f   : > { %v7498_v60 = vpop.f32.mrf.mxu3  ;;  %9103 = vmatpush.bf16.msrb.mxu1 %v17838_v33 }
 0x740   : > { %v7803_v57 = vmax.f32 %v7792_v28, 0.0  ;;  %v7526_v20 = vadd.f32 %v7498_v60, %v7424_v51  ;;  %v17862_v60 = vld [vmem:[%s18780_s5 + $0x210] sm:$0xff] }
 0x741   : > { %8550 = vmatpush.bf16.msra.mxu3 %v17824_v40  ;;  %9161 = vmatpush.bf16.msra.mxu2 %v17844_v42  ;;  %v12132_v42 = vld [vmem:[#allocation3 + $0x24] sm:$0xc] }
 0x742   : > { %v7814_v32 = vpack.c.bf16 %v7803_v57, %v7803_v57  ;;  %v7642_v8 = vadd.f32 %v17333_v6, %v7526_v20 }
 0x744   : > { %7825 = vst.msk [vmem:[#allocation3 + $0x48] sm:$0xf] %vm4773_vm9, %v7814_v32  ;;  %v7778_v28 = vadd.f32 %v17315_v14, %v7642_v8  ;;  %12042 = vmatmul.msk.bf16.vlgmr.msrb.gmra.mxu3 %vm7889_vm13, %v8293_v21  ;;  %v17871_v14 = vld [vmem:[%s18780_s5 + $0x208] sm:$0xff] }
 0x745   : > { %8772 = vmatpush.bf16.msrb.mxu3 %v17850_v11  ;;  %v17865_v36 = vpop.f32.mrf.mxu2  ;;  %19529 = vst [vmem:[#allocation86_spill] sm:$0xff] %v17871_v14  ;;  %v13154_v8 = vld [vmem:[#allocation3 + $0x24] sm:$0x10] }
 0x746   : > { %v7793_v6 = vadd.f32 %v17803_v50, %v7778_v28  ;;  %v12133_v33 = vor.u32 %v13154_v8, %v12132_v42  ;;  %v17878_v28 = vld [vmem:[%s18780_s5 + $0x200] sm:$0xff]  ;;  %v17889_v42 = vld [vmem:[%s18780_s5 + $0x298] sm:$0xff] }
 0x747   : > { %v7501_v51 = vpop.f32.mrf.mxu3  ;;  %19530 = vst [vmem:[#allocation24_spill] sm:$0xff] %v17878_v28 }
 0x748   : > { %v7804_v57 = vmax.f32 %v7793_v6, 0.0  ;;  %v7181_v6 = vadd.f32 %v17163_v22, %v17639_v13  ;;  %19531 = vst [vmem:[#allocation18_spill] sm:$0xff] %v17889_v42 }
 0x749   : > { %8773 = vmatpush.bf16.msrb.mxu3 %v17862_v60 }
 0x74a   : > { %v7815_v21 = vpack.c.bf16 %v7804_v57, %v7804_v57  ;;  %v7303_v22 = vadd.f32 %v17130_v27, %v7181_v6 }
 0x74b   : > { %v8997_v20 = vld [vmem:[#allocation3 + $0x48] sm:$0xe] }
 0x74c   : > { %7826 = vst.msk [vmem:[#allocation3 + $0x4c] sm:$0xf] %vm4773_vm9, %v7815_v21  ;;  %v9008_v32 = vunpack.c.l.b16 %v8997_v20  ;;  %v17894_v21 = vrot.slane %v12133_v33, 2  ;;  %v12402_v13 = vld [vmem:[#allocation3 + $0x48] sm:$0xc]  ;;  %v17905_v33 = vld [vmem:[%s18780_s5 + $0x290] sm:$0xff]  ;;  %v7427_v6 = vadd.f32 %v17592_v55, %v7303_v22 }
 0x74d   : > { %8774 = vmatpush.bf16.msrb.mxu3 %v17871_v14  ;;  %v8277_v51 = vpop.f32.mrf.mxu2  ;;  %v12431_v20 = vld [vmem:[#allocation3 + $0x48] sm:$0x8]  ;;  %19532 = vst [vmem:[#allocation66_spill] sm:$0xff] %v17905_v33  ;;  %v13173_v22 = vld [vmem:[#allocation3 + $0x34] sm:$0x30] }
 0x74e   : > { %v17882_v10 = vpack.c.b16 %v9008_v32, %v9008_v32 }
 0x74f   : > { %v7503_v57 = vpop.f32.mrf.mxu3 }
 0x750   : > { %v18958_v56 = vrot.slane %v17882_v10, 1 }
 0x751   : > { %8775 = vmatpush.bf16.msrb.mxu3 %v17878_v28  ;;  %v7182_v28 = vadd.f32 %v17191_v59, %v17658_v19  ;;  %v17922_v59 = vld [vmem:[%s18780_s5 + $0x288] sm:$0xff] }
 0x752   : > { %12391 = vmatmul.msk.bf16.vlgmr.msra.gmra.mxu0 %vm7889_vm13, %v18958_v56  ;;  %19533 = vst [vmem:[#allocation34_spill] sm:$0xff] %v17922_v59 }
 0x753   : > { %v13199_v8 = vld [vmem:[#allocation3 + $0x48] sm:$0x10]  ;;  %v7304_v19 = vadd.f32 %v17154_v38, %v7182_v28 }
 0x754   : > { %v13204_v32 = vld [vmem:[#allocation3 + $0x48] sm:$0x30]  ;;  %12150 = vmatmul.msk.bf16.vlgmr.msra.gmra.mxu3 %vm7889_vm13, %v17894_v21  ;;  %v12403_v51 = vor.u32 %v13199_v8, %v12402_v13 }
 0x755   : > { %v12432_v57 = vor.u32 %v13204_v32, %v12431_v20  ;;  %8987 = vmatpush.bf16.msra.mxu3 %v17889_v42  ;;  %v17907_v27 = vpop.f32.mrf.mxu2  ;;  %v12244_v32 = vld [vmem:[#allocation3 + $0x34] sm:$0x8] }
 0x756   : > { %v17910_v56 = vrot.slane %v12403_v51, 2  ;;  %v17931_v51 = vld [vmem:[%s18780_s5 + $0x280] sm:$0xff]  ;;  %v12245_v38 = vor.u32 %v13173_v22, %v12244_v32 }
 0x757   : > { %v17912_v14 = vrot.slane %v12432_v57, 3  ;;  %v7506_v13 = vpop.f32.mrf.mxu3  ;;  %v19534_v57 = vld [vmem:[#allocation115_spill] sm:$0xff] }
 0x758   : > { %v7529_v8 = vadd.f32 %v7506_v13, %v7427_v6  ;;  %12420 = vmatmul.msk.bf16.vlgmr.msrb.gmra.mxu1 %vm7889_vm13, %v17910_v56  ;;  %v7183_v6 = vadd.f32 %v19534_v57, %v17672_v62  ;;  %v17944_v62 = vrot.slane %v12245_v38, 3 }
 0x759   : > { %12449 = vmatmul.msk.bf16.vlgmr.msra.gmra.mxu2 %vm7889_vm13, %v17912_v14  ;;  %8988 = vmatpush.bf16.msra.mxu3 %v17905_v33 }
 0x75a   : > { %v7645_v55 = vadd.f32 %v17365_v26, %v7529_v8  ;;  %v7428_v26 = vadd.f32 %v17607_v2, %v7304_v19  ;;  %v17955_v19 = vld [vmem:[%s18780_s5 + $0x310] sm:$0xff] }
 0x75c   : > { %v7781_v20 = vadd.f32 %v17349_v9, %v7645_v55  ;;  %v17941_v55 = vld [vmem:[%s18780_s5 + $0x318] sm:$0xff] }
 0x75d   : > { %8989 = vmatpush.bf16.msra.mxu3 %v17922_v59  ;;  %v8496_v33 = vpop.f32.mrf.mxu2 }
 0x75e   : > { %v7796_v13 = vadd.f32 %v17803_v50, %v7781_v20  ;;  %v19535_v20 = vld [vmem:[#allocation93_spill] sm:$0xff] }
 0x75f   : > { %v7508_v28 = vpop.f32.mrf.mxu3  ;;  %v7305_v33 = vadd.f32 %v19535_v20, %v7183_v6 }
 0x760   : > { %v7807_v8 = vmax.f32 %v7796_v13, 0.0  ;;  %v7530_v9 = vadd.f32 %v7508_v28, %v7428_v26 }
 0x761   : > { %8990 = vmatpush.bf16.msra.mxu3 %v17931_v51  ;;  %v7429_v32 = vadd.f32 %v17618_v63, %v7305_v33  ;;  %v17974_v63 = vld [vmem:[%s18780_s5 + $0x300] sm:$0xff] }
 0x762   : > { %v7818_v59 = vpack.c.bf16 %v7807_v8, %v7807_v8  ;;  %v7646_v42 = vadd.f32 %v17383_v61, %v7530_v9 }
 0x764   : > { %7829 = vst.msk [vmem:[#allocation3 + $0x58] sm:$0xf] %vm4773_vm9, %v7818_v59  ;;  %v7782_v2 = vadd.f32 %v17358_v49, %v7646_v42  ;;  %12262 = vmatmul.msk.bf16.vlgmr.msrb.gmra.mxu3 %vm7889_vm13, %v17944_v62  ;;  %v17965_v49 = vld [vmem:[%s18780_s5 + $0x308] sm:$0xff] }
 0x765   : > { %9209 = vmatpush.bf16.msrb.mxu3 %v17941_v55  ;;  %v17958_v22 = vpop.f32.mrf.mxu2 }
 0x766   : > { %v7797_v61 = vadd.f32 %v17803_v50, %v7782_v2 }
 0x767   : > { %v7511_v57 = vpop.f32.mrf.mxu3 }
 0x768   : > { %v7808_v59 = vmax.f32 %v7797_v61, 0.0  ;;  %v7531_v6 = vadd.f32 %v7511_v57, %v7429_v32  ;;  %v19536_v61 = vld [vmem:[#allocation53_spill] sm:$0xff]  ;;  %v7187_v57 = vadd.f32 %v17281_v25, %v17725_v34 }
 0x769   : > { %9210 = vmatpush.bf16.msrb.mxu3 %v17955_v19 }
 0x76a   : > { %v7819_v42 = vpack.c.bf16 %v7808_v59, %v7808_v59  ;;  %v7647_v13 = vadd.f32 %v17398_v52, %v7531_v6  ;;  %v17978_v52 = vld [vmem:[#allocation3 + $0x48] sm:$0x7] }
 0x76c   : > { %7830 = vst.msk [vmem:[#allocation3 + $0x5c] sm:$0xf] %vm4773_vm9, %v7819_v42  ;;  %v7783_v26 = vadd.f32 %v17373_v31, %v7647_v13  ;;  %v7186_v31 = vadd.f32 %v17267_v18, %v17706_v23 }
 0x76d   : > { %9211 = vmatpush.bf16.msrb.mxu3 %v17965_v49  ;;  %v8721_v28 = vpop.f32.mrf.mxu2 }
 0x76e   : > { %v7798_v38 = vadd.f32 %v17803_v50, %v7783_v26  ;;  %v7308_v32 = vadd.f32 %v19536_v61, %v7186_v31 }
 0x76f   : > { %v7513_v8 = vpop.f32.mrf.mxu3 }
 0x770   : > { %v7809_v9 = vmax.f32 %v7798_v38, 0.0  ;;  %v7432_v6 = vadd.f32 %v17655_v58, %v7308_v32  ;;  %v19537_v38 = vld [vmem:[#allocation13_spill] sm:$0xff]  ;;  %v17993_v8 = vld [vmem:[#allocation3 + $0x4c] sm:$0x7]  ;;  %v7838_v32 = vld [vmem:[#allocation3 + $0x70] sm:$0x7] }
 0x771   : > { %9212 = vmatpush.bf16.msrb.mxu3 %v17974_v63  ;;  %v7309_v28 = vadd.f32 %v19537_v38, %v7187_v57 }
 0x772   : > { %v7820_v20 = vpack.c.bf16 %v7809_v9, %v7809_v9 }
 0x773   : > { %v7433_v25 = vadd.f32 %v17669_v53, %v7309_v28 }
 0x774   : > { %7831 = vst.msk [vmem:[#allocation3 + $0x60] sm:$0xf] %vm4773_vm9, %v7820_v20  ;;  %12366 = vmatmul.msk.bf16.vlgmr.msra.gmra.mxu3 %vm7889_vm13, %v17978_v52 }
 0x775   : > { %v17985_v33 = vpop.f32.mrf.mxu2 }
 0x777   : > { %v7516_v2 = vpop.f32.mrf.mxu3 }
 0x77d   : > { %v8943_v59 = vpop.f32.mrf.mxu2 }
 0x77f   : > { %v7518_v42 = vpop.f32.mrf.mxu3 }
 0x780   : > { %v7534_v13 = vadd.f32 %v7518_v42, %v7432_v6 }
 0x782   : > { %v7650_v26 = vadd.f32 %v17445_v1, %v7534_v13 }
 0x784   : > { %v7786_v18 = vadd.f32 %v17423_v7, %v7650_v26  ;;  %12474 = vmatmul.msk.bf16.vlgmr.msrb.gmra.mxu3 %vm7889_vm13, %v17993_v8 }
 0x786   : > { %v7801_v23 = vadd.f32 %v17803_v50, %v7786_v18 }
 0x787   : > { %v7521_v34 = vpop.f32.mrf.mxu3 }
 0x788   : > { %v7812_v9 = vmax.f32 %v7801_v23, 0.0  ;;  %v7535_v58 = vadd.f32 %v7521_v34, %v7433_v25 }
 0x78a   : > { %v7823_v20 = vpack.c.bf16 %v7812_v9, %v7812_v9  ;;  %v7651_v31 = vadd.f32 %v17451_v48, %v7535_v58 }
 0x78c   : > { %7834 = vst.msk [vmem:[#allocation3 + $0x6c] sm:$0xf] %vm4773_vm9, %v7823_v20  ;;  %v7787_v1 = vadd.f32 %v17439_v24, %v7651_v31  ;;  %v12533_v20 = vld [vmem:[%s18782_s7 + $0x70] sm:$0xf] }
 0x78e   : > { %v7802_v2 = vadd.f32 %v17803_v50, %v7787_v1  ;;  %v13226_v1 = vld [vmem:[%s18782_s7 + $0x64] sm:$0xf0] }
 0x78f   : > { %v7523_v7 = vpop.f32.mrf.mxu3 }
 0x790   : > { %v7813_v61 = vmax.f32 %v7802_v2, 0.0  ;;  %v13225_v7 = vld [vmem:[%s18782_s7 + $0x64] sm:$0xf] }
 0x792   : > { %v7824_v57 = vpack.c.bf16 %v7813_v61, %v7813_v61  ;;  %v12527_v61 = vld [vmem:[%s18782_s7 + $0x68] sm:$0xf0] }
 0x794   : > { %v7839_v53 = vsel %vm7837_vm0, %v7824_v57, %v7838_v32  ;;  %v12530_v57 = vor.u32 %v13225_v7, %v12527_v61  ;;  %v13222_v7 = vld [vmem:[%s18782_s7 + $0x44] sm:$0xf0]  ;;  %v13221_v61 = vld [vmem:[%s18782_s7 + $0x44] sm:$0xf] }
 0x795   : > { %7840 = vst [vmem:[#allocation3 + $0x70] sm:$0x7] %v7839_v53 }
 0x797   : > { %v7942_v59 = vpop.f32.mrf.mxu3 }
 0x798   : > { %v7943_v26 = vadd.f32 %v7942_v59, %v17688_v39  ;;  %v13228_v39 = vld [vmem:[%s18782_s7 + $0x74] sm:$0xf0] }
 0x799   : > { %v12534_v31 = vor.u32 %v13228_v39, %v12533_v20  ;;  %v12605_v20 = vld [vmem:[%s18782_s7 + $0xe0] sm:$0xf] }
 0x79a   : > { %v8003_v24 = vadd.f32 %v17722_v16, %v7943_v26  ;;  %v13227_v16 = vld [vmem:[%s18782_s7 + $0x74] sm:$0xf]  ;;  %v13244_v26 = vld [vmem:[%s18782_s7 + $0xf4] sm:$0xf0] }
 0x79b   : > { %9322 = vmatpush.bf16.msrb.mxu0 %v12534_v31  ;;  %v12607_v31 = vld [vmem:[%s18782_s7 + $0xe8] sm:$0xf0] }
 0x79f   : > { %v7944_v6 = vpop.f32.mrf.mxu3 }
 0x7a7   : > { %v8057_v42 = vpop.f32.mrf.mxu3 }
 0x7a8   : > { %v8061_v50 = vadd.f32 %v8057_v42, %v8003_v24 }
 0x7aa   : > { %v8112_v28 = vadd.f32 %v17773_v3, %v8061_v50  ;;  %v12615_v50 = vld [vmem:[%s18782_s7 + $0xf8] sm:$0xf0] }
 0x7af   : > { %v8059_v13 = vpop.f32.mrf.mxu3 }
 0x7b7   : > { %v8166_v48 = vpop.f32.mrf.mxu3 }
 0x7b8   : > { %v8170_v18 = vadd.f32 %v8166_v48, %v8112_v28  ;;  %v12613_v48 = vld [vmem:[%s18782_s7 + $0xf0] sm:$0xf]  ;;  %v13224_v28 = vld [vmem:[%s18782_s7 + $0x54] sm:$0xf0] }
 0x7ba   : > { %v8228_v25 = vadd.f32 %v17484_v43, %v8170_v18  ;;  %v12535_v43 = vld [vmem:[%s18782_s7 + $0x78] sm:$0xf0] }
 0x7bb   : > { %v12538_v2 = vor.u32 %v13227_v16, %v12535_v43 }
 0x7bc   : > { %v8279_v34 = vadd.f32 %v17865_v36, %v8228_v25  ;;  %v12525_v36 = vld [vmem:[%s18782_s7 + $0x60] sm:$0xf] }
 0x7bd   : > { %v12526_v32 = vor.u32 %v13226_v1, %v12525_v36  ;;  %9335 = vmatpush.bf16.msra.mxu1 %v12538_v2  ;;  %v12509_v2 = vld [vmem:[%s18782_s7 + $0x40] sm:$0xf] }
 0x7bf   : > { %v8168_v38 = vpop.f32.mrf.mxu3  ;;  %9323 = vmatpush.bf16.msrb.mxu0 %v12526_v32 }
 0x7c0   : > { %v12614_v38 = vor.u32 %v13244_v26, %v12613_v48  ;;  %v13239_v48 = vld [vmem:[%s18782_s7 + $0xd4] sm:$0xf]  ;;  %v12599_v26 = vld [vmem:[%s18782_s7 + $0xd8] sm:$0xf0] }
 0x7c1   : > { %9336 = vmatpush.bf16.msra.mxu1 %v12530_v57  ;;  %v12510_v57 = vor.u32 %v13222_v7, %v12509_v2 }
 0x7c2   : > { %9457 = vmatpush.bf16.msrb.mxu2 %v12614_v38 }
 0x7c7   : > { %v8330_v23 = vpop.f32.mrf.mxu3 }
 0x7c8   : > { %v8334_v3 = vadd.f32 %v8330_v23, %v8279_v34  ;;  %v13223_v34 = vld [vmem:[%s18782_s7 + $0x54] sm:$0xf] }
 0x7ca   : > { %v8392_v53 = vadd.f32 %v17458_v30, %v8334_v3  ;;  %v13243_v30 = vld [vmem:[%s18782_s7 + $0xf4] sm:$0xf]  ;;  %v13241_v3 = vld [vmem:[%s18782_s7 + $0xe4] sm:$0xf] }
 0x7cb   : > { %v12618_v23 = vor.u32 %v13243_v30, %v12615_v50  ;;  %v12610_v1 = vor.u32 %v13241_v3, %v12607_v31  ;;  %v12501_v30 = vld [vmem:[%s18782_s7 + $0x30] sm:$0xf]  ;;  %v13220_v50 = vld [vmem:[%s18782_s7 + $0x34] sm:$0xf0]  ;;  %v13218_v3 = vld [vmem:[%s18782_s7 + $0x24] sm:$0xf0] }
 0x7cc   : > { %v8443_v13 = vadd.f32 %v17515_v41, %v8392_v53  ;;  %v12517_v41 = vld [vmem:[%s18782_s7 + $0x50] sm:$0xf]  ;;  %v12511_v53 = vld [vmem:[%s18782_s7 + $0x48] sm:$0xf0]  ;;  %v13217_v31 = vld [vmem:[%s18782_s7 + $0x24] sm:$0xf] }
 0x7cd   : > { %v12518_v25 = vor.u32 %v13224_v28, %v12517_v41  ;;  %9470 = vmatpush.bf16.msra.mxu3 %v12618_v23  ;;  %v13219_v41 = vld [vmem:[%s18782_s7 + $0x34] sm:$0xf]  ;;  %v12503_v28 = vld [vmem:[%s18782_s7 + $0x38] sm:$0xf0]  ;;  %v12602_v23 = vor.u32 %v13239_v48, %v12599_v26  ;;  %v13236_v48 = vld [vmem:[%s18782_s7 + $0xb4] sm:$0xf0] }
 0x7ce   : > { %v8498_v18 = vadd.f32 %v17907_v27, %v8443_v13  ;;  %v13242_v27 = vld [vmem:[%s18782_s7 + $0xe4] sm:$0xf0]  ;;  %v12514_v13 = vor.u32 %v13221_v61, %v12511_v53 }
 0x7cf   : > { %v8332_v9 = vpop.f32.mrf.mxu3  ;;  %v18009_v58 = vpop.f32.mrf.mxu0  ;;  %9324 = vmatpush.bf16.msrb.mxu0 %v12518_v25  ;;  %v12606_v36 = vor.u32 %v13242_v27, %v12605_v20  ;;  %v12502_v25 = vor.u32 %v13220_v50, %v12501_v30  ;;  %v13237_v20 = vld [vmem:[%s18782_s7 + $0xc4] sm:$0xf]  ;;  %v12493_v27 = vld [vmem:[%s18782_s7 + $0x20] sm:$0xf]  ;;  %v12583_v30 = vld [vmem:[%s18782_s7 + $0xb8] sm:$0xf0] }
 0x7d0   : > { %v12519_v9 = vld [vmem:[%s18782_s7 + $0x58] sm:$0xf0]  ;;  %v12494_v7 = vor.u32 %v13218_v3, %v12493_v27  ;;  %v12477_v27 = vld [vmem:[%s18782_s7] sm:$0xf]  ;;  %v13214_v3 = vld [vmem:[%s18782_s7 + $0x4] sm:$0xf0] }
 0x7d1   : > { %v12522_v16 = vor.u32 %v13223_v34, %v12519_v9  ;;  %9458 = vmatpush.bf16.msrb.mxu2 %v12606_v36  ;;  %9471 = vmatpush.bf16.msra.mxu3 %v12610_v1  ;;  %v12589_v34 = vld [vmem:[%s18782_s7 + $0xc0] sm:$0xf]  ;;  %v13238_v9 = vld [vmem:[%s18782_s7 + $0xc4] sm:$0xf0] }
 0x7d2   : > { %v12590_v36 = vor.u32 %v13238_v9, %v12589_v34  ;;  %v13234_v34 = vld [vmem:[%s18782_s7 + $0xa4] sm:$0xf0]  ;;  %v13233_v9 = vld [vmem:[%s18782_s7 + $0xa4] sm:$0xf] }
 0x7d3   : > { %9337 = vmatpush.bf16.msra.mxu1 %v12522_v16  ;;  %9325 = vmatpush.bf16.msrb.mxu0 %v12510_v57  ;;  %v12506_v16 = vor.u32 %v13219_v41, %v12503_v28  ;;  %v13215_v41 = vld [vmem:[%s18782_s7 + $0x14] sm:$0xf]  ;;  %v12487_v28 = vld [vmem:[%s18782_s7 + $0x18] sm:$0xf0] }
 0x7d5   : > { %v18036_v59 = vpop.f32.mrf.mxu1  ;;  %9472 = vmatpush.bf16.msra.mxu3 %v12602_v23 }
 0x7d7   : > { %v8552_v6 = vpop.f32.mrf.mxu3  ;;  %v9049_v42 = vpop.f32.mrf.mxu0  ;;  %9338 = vmatpush.bf16.msra.mxu1 %v12514_v13  ;;  %9326 = vmatpush.bf16.msrb.mxu0 %v12502_v25  ;;  %v12490_v25 = vor.u32 %v13215_v41, %v12487_v28  ;;  %v13498_v41 = vld [vmem:[%s18780_s5 + $0x58] sm:$0xff]  ;;  %v13499_v28 = vld [vmem:[%s18780_s5 + $0x28] sm:$0xff] }
 0x7d8   : > { %v8556_v43 = vadd.f32 %v8552_v6, %v8498_v18  ;;  %v12597_v6 = vld [vmem:[%s18782_s7 + $0xd0] sm:$0xf]  ;;  %v13240_v42 = vld [vmem:[%s18782_s7 + $0xd4] sm:$0xf0] }
 0x7d9   : > { %v12598_v38 = vor.u32 %v13240_v42, %v12597_v6 }
 0x7da   : > { %v8614_v18 = vadd.f32 %v17495_v35, %v8556_v43  ;;  %v12591_v35 = vld [vmem:[%s18782_s7 + $0xc8] sm:$0xf0] }
 0x7db   : > { %v12495_v43 = vld [vmem:[%s18782_s7 + $0x28] sm:$0xf0]  ;;  %9459 = vmatpush.bf16.msrb.mxu2 %v12598_v38  ;;  %v12594_v2 = vor.u32 %v13237_v20, %v12591_v35  ;;  %9339 = vmatpush.bf16.msra.mxu1 %v12506_v16 }
 0x7dc   : > { %v18048_v24 = vpop.f32.mrf.mxu2  ;;  %v8665_v1 = vadd.f32 %v17544_v0, %v8614_v18  ;;  %9327 = vmatpush.bf16.msrb.mxu0 %v12494_v7  ;;  %v12581_v0 = vld [vmem:[%s18782_s7 + $0xb0] sm:$0xf]  ;;  %v12573_v18 = vld [vmem:[%s18782_s7 + $0xa0] sm:$0xf]  ;;  %v12575_v20 = vld [vmem:[%s18782_s7 + $0xa8] sm:$0xf0] }
 0x7dd   : > { %v9107_v39 = vpop.f32.mrf.mxu1  ;;  %9473 = vmatpush.bf16.msra.mxu3 %v12594_v2  ;;  %v12582_v26 = vor.u32 %v13236_v48, %v12581_v0  ;;  %v12574_v16 = vor.u32 %v13234_v34, %v12573_v18  ;;  %v12578_v35 = vor.u32 %v13233_v9, %v12575_v20  ;;  %v13229_v0 = vld [vmem:[%s18782_s7 + $0x84] sm:$0xf]  ;;  %v12559_v48 = vld [vmem:[%s18782_s7 + $0x88] sm:$0xf0]  ;;  %v18241_v18 = vld [vmem:[%s18781_s6] ss:$0 sm:$0xff] }
 0x7de   : > { %v8723_v57 = vadd.f32 %v17958_v22, %v8665_v1  ;;  %v13235_v22 = vld [vmem:[%s18782_s7 + $0xb4] sm:$0xf]  ;;  %v13232_v1 = vld [vmem:[%s18782_s7 + $0x94] sm:$0xf0]  ;;  %v13503_v20 = vld [vmem:[%s18780_s5] sm:$0xff] }
 0x7df   : > { %v8554_v32 = vpop.f32.mrf.mxu3  ;;  %9460 = vmatpush.bf16.msrb.mxu2 %v12590_v36  ;;  %v12586_v38 = vor.u32 %v13235_v22, %v12583_v30  ;;  %v12565_v36 = vld [vmem:[%s18782_s7 + $0x90] sm:$0xf] }
 0x7e0   : > { %v12498_v32 = vor.u32 %v13217_v31, %v12495_v43  ;;  %v13213_v31 = vld [vmem:[%s18782_s7 + $0x4] sm:$0xf]  ;;  %v12478_v43 = vor.u32 %v13214_v3, %v12477_v27  ;;  %v13505_v3 = vld [vmem:[%s18780_s5 + $0x98] sm:$0xff] }
 0x7e1   : > { %9474 = vmatpush.bf16.msra.mxu3 %v12586_v38  ;;  %v13496_v38 = vld [vmem:[%s18780_s5 + $0x30] sm:$0xff] }
 0x7e2   : > { %9340 = vmatpush.bf16.msra.mxu1 %v12498_v32  ;;  %v12567_v32 = vld [vmem:[%s18782_s7 + $0x98] sm:$0xf0] }
 0x7e3   : > { %9461 = vmatpush.bf16.msrb.mxu2 %v12582_v26  ;;  %v13495_v26 = vld [vmem:[%s18780_s5 + $0x18] sm:$0xff] }
 0x7e4   : > { %v9165_v39 = vpop.f32.mrf.mxu2 }
 0x7e5   : > { %9475 = vmatpush.bf16.msra.mxu3 %v12578_v35 }
 0x7e6   : > { %9341 = vmatpush.bf16.msra.mxu1 %v12490_v25 }
 0x7e7   : > { %v8777_v61 = vpop.f32.mrf.mxu3  ;;  %9462 = vmatpush.bf16.msrb.mxu2 %v12574_v16  ;;  %v13504_v16 = vld [vmem:[%s18780_s5 + $0x48] sm:$0xff] }
 0x7e8   : > { %v8781_v53 = vadd.f32 %v8777_v61, %v8723_v57  ;;  %v13231_v61 = vld [vmem:[%s18782_s7 + $0x94] sm:$0xf]  ;;  %v12566_v57 = vor.u32 %v13232_v1, %v12565_v36  ;;  %v19539_v1 = vld [vmem:[#allocation105_spill] sm:$0xff] }
 0x7e9   : > { %v13507_v36 = vld [vmem:[%s18780_s5 + $0x90] sm:$0xff] }
 0x7ea   : > { %v8832_v42 = vadd.f32 %v17522_v44, %v8781_v53  ;;  %v12485_v44 = vld [vmem:[%s18782_s7 + $0x10] sm:$0xf]  ;;  %v12570_v53 = vor.u32 %v13231_v61, %v12567_v32  ;;  %v19540_v61 = vld [vmem:[#allocation9_spill] sm:$0xff] }
 0x7eb   : > { %9463 = vmatpush.bf16.msrb.mxu2 %v12566_v57  ;;  %v13511_v32 = vld [vmem:[%s18780_s5 + $0xd0] sm:$0xff] }
 0x7ec   : > { %v8887_v13 = vadd.f32 %v17575_v17, %v8832_v42  ;;  %v13216_v17 = vld [vmem:[%s18782_s7 + $0x14] sm:$0xf0]  ;;  %v13230_v42 = vld [vmem:[%s18782_s7 + $0x84] sm:$0xf0]  ;;  %9476 = vmatpush.bf16.msra.mxu3 %v12570_v53  ;;  %v13512_v57 = vld [vmem:[%s18780_s5 + $0xf0] sm:$0xff] }
 0x7ed   : > { %v12486_v50 = vor.u32 %v13216_v17, %v12485_v44  ;;  %v12562_v17 = vor.u32 %v13229_v0, %v12559_v48  ;;  %v13513_v53 = vld [vmem:[%s18780_s5 + $0x80] sm:$0xff]  ;;  %v13516_v48 = vld [vmem:[#allocation3 + $0x24] sm:$0x7] }
 0x7ee   : > { %v8945_v39 = vadd.f32 %v17985_v33, %v8887_v13  ;;  %v12479_v33 = vld [vmem:[%s18782_s7 + $0x8] sm:$0xf0]  ;;  %v13494_v13 = vld [vmem:[%s18780_s5 + $0x38] sm:$0xff] }
 0x7ef   : > { %v8779_v6 = vpop.f32.mrf.mxu3  ;;  %9328 = vmatpush.bf16.msrb.mxu0 %v12486_v50  ;;  %v12482_v7 = vor.u32 %v13213_v31, %v12479_v33  ;;  %v19538_v33 = vld [vmem:[#allocation102_spill] sm:$0xff] }
 0x7f0   : > { %v12557_v6 = vld [vmem:[%s18782_s7 + $0x80] sm:$0xf]  ;;  %9477 = vmatpush.bf16.msra.mxu3 %v12562_v17  ;;  %v19544_v17 = vld [vmem:[#allocation16_spill] sm:$0xff] }
 0x7f1   : > { %9342 = vmatpush.bf16.msra.mxu1 %v12482_v7  ;;  %v12558_v44 = vor.u32 %v13230_v42, %v12557_v6  ;;  %v13510_v7 = vld [vmem:[%s18780_s5 + $0x88] sm:$0xff] }
 0x7f2   : > { %v13514_v6 = vld [vmem:[%s18780_s5 + $0xc8] sm:$0xff] }
 0x7f3   : > { %9329 = vmatpush.bf16.msrb.mxu0 %v12478_v43  ;;  %9464 = vmatpush.bf16.msrb.mxu2 %v12558_v44  ;;  %v13506_v43 = vld [vmem:[%s18780_s5 + $0x40] sm:$0xff]  ;;  %v13515_v42 = vld [vmem:[%s18780_s5 + $0xe8] sm:$0xff]  ;;  %v13521_v44 = vld [vmem:[%s18780_s5 + $0x158] sm:$0xff] }
 0x7f4   : > { %9533 = vmatpush.bf16.msrb.mxu3 %v17633_v29  ;;  %v13501_v29 = vld [vmem:[%s18780_s5 + $0x50] sm:$0xff] }
 0x7f5   : > { %9506 = vmatpush.bf16.msrb.mxu1 %v13495_v26  ;;  %v13519_v26 = vld [vmem:[%s18780_s5 + $0xe0] sm:$0xff] }
 0x7f7   : > { %v8992_v23 = vpop.f32.mrf.mxu3  ;;  %9493 = vmatpush.bf16.msra.mxu0 %v13494_v13  ;;  %9519 = vmatpush.bf16.msra.mxu2 %v13498_v41  ;;  %v19541_v13 = vld [vmem:[#allocation71_spill] sm:$0xff] }
 0x7f8   : > { %v8996_v2 = vadd.f32 %v8992_v23, %v8945_v39  ;;  %v13500_v23 = vld [vmem:[%s18780_s5 + $0x8] sm:$0xff]  ;;  %9534 = vmatpush.bf16.msrb.mxu3 %v17645_v54  ;;  %v19542_v0 = vrot.slane %v19541_v13, 1  ;;  %v13555_v13 = vld [vmem:[%s18780_s5 + $0x2b8] sm:$0xff] }
 0x7f9   : > { %v13527_v41 = vld [vmem:[%s18780_s5 + $0x148] sm:$0xff] }
 0x7fa   : > { %v9051_v22 = vadd.f32 %v18009_v58, %v8996_v2  ;;  %v13497_v58 = vld [vmem:[%s18780_s5 + $0x10] sm:$0xff]  ;;  %v13509_v2 = vld [vmem:[%s18780_s5 + $0xf8] sm:$0xff] }
 0x7fb   : > { %9494 = vmatpush.bf16.msra.mxu0 %v13496_v38  ;;  %9507 = vmatpush.bf16.msrb.mxu1 %v13497_v58  ;;  %v13523_v38 = vld [vmem:[%s18780_s5 + $0x128] sm:$0xff]  ;;  %v13526_v58 = vld [vmem:[%s18780_s5 + $0x120] sm:$0xff] }
 0x7fc   : > { %v9109_v50 = vadd.f32 %v18036_v59, %v9051_v22  ;;  %9520 = vmatpush.bf16.msra.mxu2 %v13501_v29  ;;  %9535 = vmatpush.bf16.msrb.mxu3 %v17651_v47  ;;  %v13518_v22 = vld [vmem:[%s18780_s5 + $0xc0] sm:$0xff] }
 0x7fd   : > { %v13532_v29 = vld [vmem:[%s18780_s5 + $0x160] sm:$0xff] }
 0x7fe   : > { %v9167_v59 = vadd.f32 %v18048_v24, %v9109_v50  ;;  %v13502_v24 = vld [vmem:[%s18780_s5 + $0x20] sm:$0xff]  ;;  %v13525_v50 = vld [vmem:[%s18780_s5 + $0x170] sm:$0xff] }
 0x7ff   : > { %v8994_v30 = vpop.f32.mrf.mxu3  ;;  %9495 = vmatpush.bf16.msra.mxu0 %v13499_v28  ;;  %9508 = vmatpush.bf16.msrb.mxu1 %v13500_v23  ;;  %v13528_v28 = vld [vmem:[%s18780_s5 + $0x168] sm:$0xff]  ;;  %v19545_v23 = vld [vmem:[#allocation21_spill] sm:$0xff] }
 0x800   : > { %9521 = vmatpush.bf16.msra.mxu2 %v13504_v16  ;;  %9536 = vmatpush.bf16.msrb.mxu3 %v19538_v33  ;;  %v19543_v30 = vld [vmem:[#allocation74_spill] sm:$0xff]  ;;  %v13539_v16 = vld [vmem:[%s18780_s5 + $0x1f0] sm:$0xff] }
 0x801   : > { %v13545_v33 = vld [vmem:[%s18780_s5 + $0x1e0] sm:$0xff] }
 0x803   : > { %9496 = vmatpush.bf16.msra.mxu0 %v13502_v24  ;;  %9509 = vmatpush.bf16.msrb.mxu1 %v13503_v20  ;;  %v13533_v24 = vld [vmem:[%s18780_s5 + $0x1b0] sm:$0xff]  ;;  %v13535_v20 = vld [vmem:[%s18780_s5 + $0x1d8] sm:$0xff] }
 0x804   : > { %9522 = vmatpush.bf16.msra.mxu2 %v13506_v43  ;;  %v13544_v43 = vld [vmem:[%s18780_s5 + $0x1c0] sm:$0xff] }
 0x807   : > { %v9214_v25 = vpop.f32.mrf.mxu3 }
 0x808   : > { %v9218_v34 = vadd.f32 %v9214_v25, %v9167_v59  ;;  %v13529_v59 = vld [vmem:[#allocation3 + $0x28] sm:$0x7]  ;;  %v13530_v25 = vld [vmem:[%s18780_s5 + $0x1b8] sm:$0xff] }
 0x80a   : > { %v9223_v9 = vadd.f32 %v18241_v18, %v9218_v34  ;;  %v13531_v34 = vld [vmem:[%s18780_s5 + $0x140] sm:$0xff] }
 0x80c   : > { %v9224_v39 = vmax.f32 %v9223_v9, 0.0  ;;  %v13534_v9 = vld [vmem:[#allocation3 + $0x38] sm:$0x7] }
 0x80e   : > { %v9225_v54 = vpack.c.bf16 %v9224_v39, %v9224_v39  ;;  %v13537_v39 = vld [vmem:[%s18780_s5 + $0x1a8] sm:$0xff] }
 0x80f   : > { %v9216_v35 = vpop.f32.mrf.mxu3 }
 0x810   : > { %v9373_v27 = vunpack.c.l.b16 %v9225_v54  ;;  %9330 = vmatmul.bf16.vlgmr.msrb.gmra.mxu0 %v9225_v54  ;;  %9343 = vmatmul.bf16.vlgmr.msra.gmra.mxu1 %v9225_v54  ;;  %v13541_v54 = vld [vmem:[%s18780_s5 + $0x1c8] sm:$0xff] }
 0x811   : > { %9547 = vmatpush.bf16.msrb.mxu0 %v13505_v3  ;;  %9561 = vmatpush.bf16.msra.mxu1 %v17677_v12  ;;  %v13508_v12 = vld [vmem:[%s18780_s5 + $0xd8] sm:$0xff]  ;;  %v13542_v35 = vld [vmem:[%s18780_s5 + $0x1e8] sm:$0xff] }
 0x812   : > { %v9374_v31 = vpack.c.b16 %v9373_v27, %v9373_v27  ;;  %v19547_v27 = vld [vmem:[#allocation56_spill] sm:$0xff] }
 0x813   : > { %v19548_v3 = vrot.slane %v19547_v27, 1  ;;  %v12660_v27 = vld [vmem:[#allocation3 + $0x6c] sm:$0x8] }
 0x814   : > { %v9375_v47 = vrot.slane %v9374_v31, 2  ;;  %v13543_v31 = vld [vmem:[%s18780_s5 + $0x238] sm:$0xff] }
 0x815   : > { %9548 = vmatpush.bf16.msrb.mxu0 %v13507_v36  ;;  %9562 = vmatpush.bf16.msra.mxu1 %v19539_v1  ;;  %v13547_v36 = vld [vmem:[%s18780_s5 + $0x258] sm:$0xff]  ;;  %v19551_v1 = vld [vmem:[#allocation86_spill] sm:$0xff] }
 0x816   : > { %9465 = vmatmul.bf16.vlgmr.msrb.gmra.mxu2 %v9375_v47  ;;  %9478 = vmatmul.bf16.vlgmr.msra.gmra.mxu3 %v9375_v47  ;;  %v19550_v47 = vrot.slane %v17882_v10, 1  ;;  %v13550_v10 = vld [vmem:[%s18780_s5 + $0x250] sm:$0xff] }
 0x817   : > { %9575 = vmatpush.bf16.msrb.mxu2 %v13508_v12  ;;  %9589 = vmatpush.bf16.msra.mxu3 %v13509_v2  ;;  %v13551_v12 = vld [vmem:[%s18780_s5 + $0x270] sm:$0xff]  ;;  %v13245_v2 = vld [vmem:[#allocation3 + $0x58] sm:$0x10] }
 0x819   : > { %9549 = vmatpush.bf16.msrb.mxu0 %v13510_v7  ;;  %9563 = vmatpush.bf16.msra.mxu1 %v19540_v61  ;;  %v19552_v7 = vld [vmem:[#allocation24_spill] sm:$0xff]  ;;  %v13552_v61 = vld [vmem:[%s18780_s5 + $0x220] sm:$0xff] }
 0x81b   : > { %9576 = vmatpush.bf16.msrb.mxu2 %v13511_v32  ;;  %9590 = vmatpush.bf16.msra.mxu3 %v13512_v57  ;;  %v12636_v32 = vld [vmem:[#allocation3 + $0x58] sm:$0xc]  ;;  %v13553_v57 = vld [vmem:[%s18780_s5 + $0x248] sm:$0xff] }
 0x81d   : > { %9550 = vmatpush.bf16.msrb.mxu0 %v13513_v53  ;;  %9564 = vmatpush.bf16.msra.mxu1 %v17701_v4  ;;  %v13517_v4 = vld [vmem:[%s18780_s5 + $0x138] sm:$0xff]  ;;  %v13554_v53 = vld [vmem:[%s18780_s5 + $0x268] sm:$0xff] }
 0x81f   : > { %9577 = vmatpush.bf16.msrb.mxu2 %v13514_v6  ;;  %9591 = vmatpush.bf16.msra.mxu3 %v13515_v42  ;;  %v12637_v6 = vor.u32 %v13245_v2, %v12636_v32  ;;  %v19553_v42 = vld [vmem:[#allocation18_spill] sm:$0xff] }
 0x820   : > { %12619 = vmatmul.msk.bf16.vlgmr.msra.gmra.mxu0 %vm7889_vm13, %v19542_v0  ;;  %12620 = vmatmul.msk.bf16.vlgmr.msrb.gmra.mxu1 %vm7889_vm13, %v13516_v48  ;;  %v13556_v0 = vld [vmem:[%s18780_s5 + $0x240] sm:$0xff] }
 0x821   : > { %9603 = vmatpush.bf16.msra.mxu0 %v17712_v5  ;;  %9617 = vmatpush.bf16.msrb.mxu1 %v13517_v4  ;;  %v13520_v5 = vld [vmem:[%s18780_s5 + $0x130] sm:$0xff]  ;;  %v9704_v48 = vrot.slane %v12637_v6, 2 }
 0x822   : > { %v19555_v4 = vld [vmem:[#allocation100_spill] sm:$0xff] }
 0x823   : > { %9578 = vmatpush.bf16.msrb.mxu2 %v13518_v22  ;;  %9592 = vmatpush.bf16.msra.mxu3 %v13519_v26  ;;  %v13246_v22 = vld [vmem:[#allocation3 + $0x58] sm:$0x30]  ;;  %v13558_v26 = vld [vmem:[%s18780_s5 + $0x2d8] sm:$0xff] }
 0x825   : > { %9604 = vmatpush.bf16.msra.mxu0 %v17720_v37  ;;  %9618 = vmatpush.bf16.msrb.mxu1 %v13520_v5  ;;  %v13522_v37 = vld [vmem:[%s18780_s5 + $0x178] sm:$0xff] }
 0x826   : > { %12621 = vmatmul.msk.bf16.vlgmr.msra.gmra.mxu2 %vm7889_vm13, %v17894_v21  ;;  %12622 = vmatmul.msk.bf16.vlgmr.msrb.gmra.mxu3 %vm7889_vm13, %v19543_v30  ;;  %v13524_v21 = vld [vmem:[%s18780_s5 + $0x150] sm:$0xff]  ;;  %v12641_v30 = vld [vmem:[#allocation3 + $0x58] sm:$0x8] }
 0x827   : > { %9631 = vmatpush.bf16.msra.mxu2 %v13521_v44  ;;  %9645 = vmatpush.bf16.msrb.mxu3 %v13522_v37  ;;  %v19556_v5 = vld [vmem:[#allocation76_spill] sm:$0xff]  ;;  %v9765_v44 = vld [vmem:[#allocation3 + $0x5c] sm:$0xe] }
 0x828   : > { %v19557_v37 = vld [vmem:[#allocation34_spill] sm:$0xff] }
 0x829   : > { %9605 = vmatpush.bf16.msra.mxu0 %v19544_v17  ;;  %9619 = vmatpush.bf16.msrb.mxu1 %v13523_v38  ;;  %v19558_v17 = vld [vmem:[#allocation94_spill] sm:$0xff]  ;;  %v12642_v38 = vor.u32 %v13246_v22, %v12641_v30 }
 0x82b   : > { %9632 = vmatpush.bf16.msra.mxu2 %v13524_v21  ;;  %9646 = vmatpush.bf16.msrb.mxu3 %v13525_v50  ;;  %v19559_v21 = vld [vmem:[#allocation79_spill] sm:$0xff]  ;;  %v9767_v50 = vunpack.c.l.b16 %v9765_v44 }
 0x82d   : > { %9606 = vmatpush.bf16.msra.mxu0 %v17740_v15  ;;  %9620 = vmatpush.bf16.msrb.mxu1 %v13526_v58  ;;  %v19546_v15 = vld [vmem:[#allocation20_spill] sm:$0xff]  ;;  %v13247_v58 = vld [vmem:[#allocation3 + $0x5c] sm:$0x10] }
 0x82f   : > { %9633 = vmatpush.bf16.msra.mxu2 %v13527_v41  ;;  %9647 = vmatpush.bf16.msrb.mxu3 %v13528_v28  ;;  %v19561_v41 = vld [vmem:[#allocation19_spill] sm:$0xff]  ;;  %v9729_v28 = vrot.slane %v12642_v38, 3 }
 0x830   : > { %12623 = vmatmul.msk.bf16.vlgmr.msrb.gmra.mxu0 %vm7889_vm13, %v13529_v59  ;;  %12624 = vmatmul.msk.bf16.vlgmr.msra.gmra.mxu1 %vm7889_vm13, %v19545_v23  ;;  %v9747_v59 = vld [vmem:[#allocation3 + $0x5c] sm:$0x7] }
 0x831   : > { %9659 = vmatpush.bf16.msrb.mxu0 %v19546_v15  ;;  %9673 = vmatpush.bf16.msra.mxu1 %v13530_v25  ;;  %v12648_v23 = vld [vmem:[#allocation3 + $0x5c] sm:$0xc]  ;;  %v19562_v15 = vld [vmem:[#allocation84_spill] sm:$0xff]  ;;  %v19563_v25 = vld [vmem:[#allocation85_spill] sm:$0xff] }
 0x833   : > { %9634 = vmatpush.bf16.msra.mxu2 %v13531_v34  ;;  %9648 = vmatpush.bf16.msrb.mxu3 %v13532_v29  ;;  %v9768_v34 = vpack.c.b16 %v9767_v50, %v9767_v50  ;;  %v12649_v29 = vor.u32 %v13247_v58, %v12648_v23 }
 0x835   : > { %9660 = vmatpush.bf16.msrb.mxu0 %v17764_v46  ;;  %9674 = vmatpush.bf16.msra.mxu1 %v13533_v24  ;;  %v13536_v46 = vld [vmem:[%s18780_s5 + $0x1f8] sm:$0xff]  ;;  %v9830_v24 = vld [vmem:[#allocation3 + $0x6c] sm:$0xe] }
 0x836   : > { %12625 = vmatmul.msk.bf16.vlgmr.msrb.gmra.mxu2 %vm7889_vm13, %v17944_v62  ;;  %12626 = vmatmul.msk.bf16.vlgmr.msra.gmra.mxu3 %vm7889_vm13, %v13534_v9  ;;  %v13538_v62 = vld [vmem:[%s18780_s5 + $0x1d0] sm:$0xff]  ;;  %v19564_v9 = vld [vmem:[#allocation82_spill] sm:$0xff] }
 0x837   : > { %9687 = vmatpush.bf16.msrb.mxu2 %v13535_v20  ;;  %9712 = vmatpush.bf16.msra.mxu3 %v13536_v46  ;;  %v9769_v20 = vrot.slane %v9768_v34, 1  ;;  %v9794_v46 = vrot.slane %v12649_v29, 2  ;;  %v13264_v34 = vld [vmem:[%s18782_s7 + $0x174] sm:$0xf] }
 0x839   : > { %9661 = vmatpush.bf16.msrb.mxu0 %v17797_v45  ;;  %9675 = vmatpush.bf16.msra.mxu1 %v13537_v39  ;;  %v13540_v45 = vld [vmem:[%s18780_s5 + $0x1a0] sm:$0xff]  ;;  %v9832_v39 = vunpack.c.l.b16 %v9830_v24 }
 0x83b   : > { %9688 = vmatpush.bf16.msrb.mxu2 %v13538_v62  ;;  %9713 = vmatpush.bf16.msra.mxu3 %v13539_v16  ;;  %v9833_v62 = vpack.c.b16 %v9832_v39, %v9832_v39  ;;  %v13248_v16 = vld [vmem:[#allocation3 + $0x6c] sm:$0x10] }
 0x83d   : > { %9662 = vmatpush.bf16.msrb.mxu0 %v17824_v40  ;;  %9676 = vmatpush.bf16.msra.mxu1 %v13540_v45  ;;  %v19549_v40 = vld [vmem:[#allocation78_spill] sm:$0xff]  ;;  %v13249_v45 = vld [vmem:[#allocation3 + $0x6c] sm:$0x30] }
 0x83f   : > { %9689 = vmatpush.bf16.msrb.mxu2 %v13541_v54  ;;  %9714 = vmatpush.bf16.msra.mxu3 %v13542_v35  ;;  %v9812_v54 = vld [vmem:[#allocation3 + $0x6c] sm:$0x7] }
 0x840   : > { %12627 = vmatmul.msk.bf16.vlgmr.msra.gmra.mxu0 %vm7889_vm13, %v19548_v3  ;;  %12628 = vmatmul.msk.bf16.vlgmr.msrb.gmra.mxu1 %vm7889_vm13, %v19549_v40  ;;  %v12655_v35 = vld [vmem:[#allocation3 + $0x6c] sm:$0xc]  ;;  %v12661_v3 = vor.u32 %v13249_v45, %v12660_v27  ;;  %v13262_v45 = vld [vmem:[%s18782_s7 + $0x164] sm:$0xf]  ;;  %v12732_v27 = vld [vmem:[%s18782_s7 + $0x168] sm:$0xf0] }
 0x841   : > { %9737 = vmatpush.bf16.msra.mxu0 %v17850_v11  ;;  %9755 = vmatpush.bf16.msrb.mxu1 %v13543_v31  ;;  %v13546_v11 = vld [vmem:[%s18780_s5 + $0x230] sm:$0xff] }
 0x842   : > { %v9884_v31 = vrot.slane %v12661_v3, 3  ;;  %v12735_v3 = vor.u32 %v13262_v45, %v12732_v27  ;;  %v12700_v27 = vld [vmem:[%s18782_s7 + $0x128] sm:$0xf0] }
 0x843   : > { %9690 = vmatpush.bf16.msrb.mxu2 %v13544_v43  ;;  %9715 = vmatpush.bf16.msra.mxu3 %v13545_v33 }
 0x845   : > { %9738 = vmatpush.bf16.msra.mxu0 %v17862_v60  ;;  %9756 = vmatpush.bf16.msrb.mxu1 %v13546_v11  ;;  %v13548_v60 = vld [vmem:[%s18780_s5 + $0x278] sm:$0xff] }
 0x846   : > { %12629 = vmatmul.msk.bf16.vlgmr.msra.gmra.mxu2 %vm7889_vm13, %v17978_v52  ;;  %12630 = vmatmul.msk.bf16.vlgmr.msrb.gmra.mxu3 %vm7889_vm13, %v19550_v47  ;;  %v13549_v52 = vld [vmem:[%s18780_s5 + $0x228] sm:$0xff] }
 0x847   : > { %9777 = vmatpush.bf16.msra.mxu2 %v13547_v36  ;;  %9802 = vmatpush.bf16.msrb.mxu3 %v13548_v60  ;;  %v7841_v60 = vld [vmem:[%s18783_s8] sm:$0x3] }
 0x849   : > { %9739 = vmatpush.bf16.msra.mxu0 %v19551_v1  ;;  %9757 = vmatpush.bf16.msrb.mxu1 %v13549_v52 }
 0x84b   : > { %9778 = vmatpush.bf16.msra.mxu2 %v13550_v10  ;;  %9803 = vmatpush.bf16.msrb.mxu3 %v13551_v12 }
 0x84d   : > { %9740 = vmatpush.bf16.msra.mxu0 %v19552_v7  ;;  %9758 = vmatpush.bf16.msrb.mxu1 %v13552_v61 }
 0x84f   : > { %9779 = vmatpush.bf16.msra.mxu2 %v13553_v57  ;;  %9804 = vmatpush.bf16.msrb.mxu3 %v13554_v53 }
 0x850   : > { %12631 = vmatmul.msk.bf16.vlgmr.msrb.gmra.mxu0 %vm7889_vm13, %v17910_v56  ;;  %12632 = vmatmul.msk.bf16.vlgmr.msra.gmra.mxu1 %vm7889_vm13, %v17912_v14  ;;  %v13557_v56 = vld [vmem:[%s18780_s5 + $0x260] sm:$0xff] }
 0x851   : > { %9820 = vmatpush.bf16.msrb.mxu0 %v19553_v42  ;;  %9842 = vmatpush.bf16.msra.mxu1 %v13555_v13  ;;  %v19554_v14 = vld [vmem:[#allocation66_spill] sm:$0xff] }
 0x853   : > { %9780 = vmatpush.bf16.msra.mxu2 %v13556_v0  ;;  %9805 = vmatpush.bf16.msrb.mxu3 %v13557_v56 }
 0x855   : > { %9821 = vmatpush.bf16.msrb.mxu0 %v19554_v14  ;;  %9843 = vmatpush.bf16.msra.mxu1 %v19555_v4 }
 0x856   : > { %12633 = vmatmul.msk.bf16.vlgmr.msrb.gmra.mxu2 %vm7889_vm13, %v17993_v8  ;;  %12638 = vmatmul.msk.bf16.vlgmr.msra.gmra.mxu3 %vm7889_vm13, %v9704_v48  ;;  %v19560_v8 = vld [vmem:[#allocation14_spill] sm:$0xff] }
 0x857   : > { %9867 = vmatpush.bf16.msrb.mxu2 %v13558_v26  ;;  %9892 = vmatpush.bf16.msra.mxu3 %v19556_v5 }
 0x859   : > { %9822 = vmatpush.bf16.msrb.mxu0 %v19557_v37  ;;  %9844 = vmatpush.bf16.msra.mxu1 %v19558_v17 }
 0x85b   : > { %9868 = vmatpush.bf16.msrb.mxu2 %v19559_v21  ;;  %9893 = vmatpush.bf16.msra.mxu3 %v19560_v8 }
 0x85d   : > { %9823 = vmatpush.bf16.msrb.mxu0 %v17931_v51  ;;  %9845 = vmatpush.bf16.msra.mxu1 %v19561_v41  ;;  %v19565_v51 = vld [vmem:[#allocation99_spill] sm:$0xff] }
 0x85f   : > { %9869 = vmatpush.bf16.msrb.mxu2 %v19562_v15  ;;  %9894 = vmatpush.bf16.msra.mxu3 %v19563_v25  ;;  %v12738_v15 = vld [vmem:[%s18782_s7 + $0x170] sm:$0xf]  ;;  %v13265_v25 = vld [vmem:[%s18782_s7 + $0x174] sm:$0xf0] }
 0x860   : > { %12643 = vmatmul.msk.bf16.vlgmr.msra.gmra.mxu0 %vm7889_vm13, %v9729_v28  ;;  %12644 = vmatmul.msk.bf16.vlgmr.msrb.gmra.mxu1 %vm7889_vm13, %v9747_v59  ;;  %v12739_v24 = vor.u32 %v13265_v25, %v12738_v15 }
 0x861   : > { %9910 = vmatpush.bf16.msra.mxu0 %v17941_v55  ;;  %v9834_v55 = vrot.slane %v9833_v62, 1  ;;  %v12730_v62 = vld [vmem:[%s18782_s7 + $0x160] sm:$0xf] }
 0x862   : > { %10020 = vmatpush.bf16.msrb.mxu1 %v12739_v24  ;;  %v13275_v24 = vld [vmem:[%s18782_s7 + $0x1c4] sm:$0xf0] }
 0x863   : > { %9870 = vmatpush.bf16.msrb.mxu2 %v19564_v9  ;;  %9895 = vmatpush.bf16.msra.mxu3 %v19565_v51  ;;  %v12740_v9 = vld [vmem:[%s18782_s7 + $0x178] sm:$0xf0] }
 0x864   : > { %v12743_v51 = vor.u32 %v13264_v34, %v12740_v9  ;;  %v13274_v9 = vld [vmem:[%s18782_s7 + $0x1c4] sm:$0xf] }
 0x865   : > { %9911 = vmatpush.bf16.msra.mxu0 %v17955_v19  ;;  %v12656_v19 = vor.u32 %v13248_v16, %v12655_v35  ;;  %v13263_v16 = vld [vmem:[%s18782_s7 + $0x164] sm:$0xf0] }
 0x866   : > { %12645 = vmatmul.msk.bf16.vlgmr.msra.gmra.mxu2 %vm7889_vm13, %v9769_v20  ;;  %12650 = vmatmul.msk.bf16.vlgmr.msrb.gmra.mxu3 %vm7889_vm13, %v9794_v46  ;;  %v12731_v35 = vor.u32 %v13263_v16, %v12730_v62  ;;  %v12698_v62 = vld [vmem:[%s18782_s7 + $0x120] sm:$0xf]  ;;  %v13255_v16 = vld [vmem:[%s18782_s7 + $0x124] sm:$0xf0] }
 0x867   : > { %v9859_v40 = vrot.slane %v12656_v19, 2  ;;  %10033 = vmatpush.bf16.msra.mxu2 %v12743_v51 }
 0x868   : > { %10021 = vmatpush.bf16.msrb.mxu1 %v12731_v35  ;;  %v13254_v35 = vld [vmem:[%s18782_s7 + $0x124] sm:$0xf] }
 0x869   : > { %9912 = vmatpush.bf16.msra.mxu0 %v17965_v49  ;;  %v9902_v49 = vld [vmem:[#allocation3 + $0x70] sm:$0x7] }
 0x86b   : > { %10034 = vmatpush.bf16.msra.mxu2 %v12735_v3 }
 0x86d   : > { %9913 = vmatpush.bf16.msra.mxu0 %v17974_v63 }
 0x870   : > { %12651 = vmatmul.msk.bf16.vlgmr.msrb.gmra.mxu0 %vm7889_vm13, %v9812_v54  ;;  %12652 = vmatmul.msk.bf16.vlgmr.msra.gmra.mxu1 %vm7889_vm13, %v9834_v55 }
 0x876   : > { %12657 = vmatmul.msk.bf16.vlgmr.msrb.gmra.mxu2 %vm7889_vm13, %v9859_v40  ;;  %12662 = vmatmul.msk.bf16.vlgmr.msra.gmra.mxu3 %vm7889_vm13, %v9884_v31  ;;  %v12818_v31 = vld [vmem:[%s18782_s7 + $0x1f0] sm:$0xf] }
 0x880   : > { %12663 = vmatmul.msk.bf16.vlgmr.msra.gmra.mxu0 %vm7889_vm13, %v9902_v49  ;;  %v13281_v49 = vld [vmem:[%s18782_s7 + $0x1f4] sm:$0xf0] }
 0x88d   : > { %v9331_v63 = vpop.f32.mrf.mxu0  ;;  %v9344_v43 = vpop.f32.mrf.mxu1 }
 0x88e   : > { %v9350_v33 = vrot.slane %v9344_v43, 7 }
 0x890   : > { %v9352_v11 = vsel %vm9351_vm1, %v9331_v63, %v9350_v33  ;;  %v13280_v63 = vld [vmem:[%s18782_s7 + $0x1f4] sm:$0xf] }
 0x891   : > { %v9354_v12 = vadd.f32 %v9352_v11, %v7841_v60  ;;  %v12819_v11 = vor.u32 %v13281_v49, %v12818_v31  ;;  %v13261_v60 = vld [vmem:[%s18782_s7 + $0x154] sm:$0xf0] }
 0x893   : > { %10154 = vmatpush.bf16.msrb.mxu3 %v12819_v11 }
 0x895   : > { %v9333_v47 = vpop.f32.mrf.mxu0  ;;  %v9346_v36 = vpop.f32.mrf.mxu1 }
 0x896   : > { %v12820_v47 = vld [vmem:[%s18782_s7 + $0x1f8] sm:$0xf0]  ;;  %v12722_v36 = vld [vmem:[%s18782_s7 + $0x150] sm:$0xf] }
 0x899   : > { %v9466_v1 = vpop.f32.mrf.mxu2  ;;  %v9479_v52 = vpop.f32.mrf.mxu3 }
 0x89a   : > { %v9485_v10 = vrot.slane %v9479_v52, 7  ;;  %v12723_v52 = vor.u32 %v13261_v60, %v12722_v36  ;;  %v12786_v36 = vld [vmem:[%s18782_s7 + $0x1b0] sm:$0xf]  ;;  %v13273_v60 = vld [vmem:[%s18782_s7 + $0x1b4] sm:$0xf0] }
 0x89c   : > { %v9486_v2 = vsel %vm9351_vm1, %v9466_v1, %v9485_v10  ;;  %v12823_v1 = vor.u32 %v13280_v63, %v12820_v47  ;;  %v13260_v10 = vld [vmem:[%s18782_s7 + $0x154] sm:$0xf]  ;;  %10022 = vmatpush.bf16.msrb.mxu1 %v12723_v52  ;;  %v12787_v52 = vor.u32 %v13273_v60, %v12786_v36 }
 0x89d   : > { %v18494_v7 = vadd.f32 %v9486_v2, %v9354_v12  ;;  %v9498_v61 = vpop.f32.mrf.mxu0  ;;  %v9511_v32 = vpop.f32.mrf.mxu1  ;;  %v12724_v12 = vld [vmem:[%s18782_s7 + $0x158] sm:$0xf0]  ;;  %v12810_v2 = vld [vmem:[%s18782_s7 + $0x1e0] sm:$0xf] }
 0x89e   : > { %v9512_v22 = vadd.f32 %v9511_v32, %v9498_v61  ;;  %v12727_v61 = vor.u32 %v13260_v10, %v12724_v12  ;;  %v13279_v32 = vld [vmem:[%s18782_s7 + $0x1e4] sm:$0xf0]  ;;  %10167 = vmatpush.bf16.msrb.mxu0 %v12823_v1  ;;  %v13272_v1 = vld [vmem:[%s18782_s7 + $0x1b4] sm:$0xf]  ;;  %v12788_v10 = vld [vmem:[%s18782_s7 + $0x1b8] sm:$0xf0] }
 0x89f   : > { %v12690_v12 = vld [vmem:[%s18782_s7 + $0x110] sm:$0xf] }
 0x8a0   : > { %10035 = vmatpush.bf16.msra.mxu2 %v12727_v61 }
 0x8a1   : > { %v9468_v57 = vpop.f32.mrf.mxu2  ;;  %v9481_v53 = vpop.f32.mrf.mxu3 }
 0x8a2   : > { %v13278_v57 = vld [vmem:[%s18782_s7 + $0x1e4] sm:$0xf]  ;;  %v12812_v53 = vld [vmem:[%s18782_s7 + $0x1e8] sm:$0xf0] }
 0x8a5   : > { %v9500_v6 = vpop.f32.mrf.mxu0  ;;  %v9513_v42 = vpop.f32.mrf.mxu1 }
 0x8a6   : > { %v12811_v42 = vor.u32 %v13279_v32, %v12810_v2  ;;  %v13253_v2 = vld [vmem:[%s18782_s7 + $0x114] sm:$0xf0]  ;;  %v12791_v32 = vor.u32 %v13272_v1, %v12788_v10 }
 0x8a8   : > { %10155 = vmatpush.bf16.msrb.mxu3 %v12811_v42  ;;  %v12778_v42 = vld [vmem:[%s18782_s7 + $0x1a0] sm:$0xf] }
 0x8a9   : > { %v9524_v13 = vpop.f32.mrf.mxu2  ;;  %v9538_v0 = vpop.f32.mrf.mxu3 }
 0x8aa   : > { %v9528_v26 = vadd.f32 %v9524_v13, %v9512_v22  ;;  %v12815_v13 = vor.u32 %v13278_v57, %v12812_v53  ;;  %v12691_v57 = vor.u32 %v13253_v2, %v12690_v12  ;;  %v13252_v53 = vld [vmem:[%s18782_s7 + $0x114] sm:$0xf]  ;;  %v13286_v12 = vld [vmem:[%s18784_s9 + $0x20] sm:$0xff]  ;;  %v13285_v2 = vld [vmem:[%s18784_s9 + $0x18] sm:$0xff] }
 0x8ac   : > { %v9542_v44 = vadd.f32 %v9538_v0, %v9528_v26  ;;  %v12714_v0 = vld [vmem:[%s18782_s7 + $0x140] sm:$0xf]  ;;  %v12716_v26 = vld [vmem:[%s18782_s7 + $0x148] sm:$0xf0]  ;;  %10168 = vmatpush.bf16.msrb.mxu0 %v12815_v13 }
 0x8ad   : > { %v9552_v56 = vpop.f32.mrf.mxu0  ;;  %v9566_v48 = vpop.f32.mrf.mxu1 }
 0x8ae   : > { %v9556_v38 = vadd.f32 %v9552_v56, %v9542_v44  ;;  %v13259_v56 = vld [vmem:[%s18782_s7 + $0x144] sm:$0xf0] }
 0x8af   : > { %v12715_v22 = vor.u32 %v13259_v56, %v12714_v0 }
 0x8b0   : > { %v9570_v50 = vadd.f32 %v9566_v48, %v9556_v38  ;;  %v13258_v48 = vld [vmem:[%s18782_s7 + $0x144] sm:$0xf]  ;;  %v12706_v38 = vld [vmem:[%s18782_s7 + $0x130] sm:$0xf] }
 0x8b1   : > { %v9526_v14 = vpop.f32.mrf.mxu2  ;;  %v9540_v4 = vpop.f32.mrf.mxu3  ;;  %v12719_v44 = vor.u32 %v13258_v48, %v12716_v26  ;;  %10023 = vmatpush.bf16.msrb.mxu1 %v12715_v22  ;;  %v13271_v48 = vld [vmem:[%s18782_s7 + $0x1a4] sm:$0xf0] }
 0x8b2   : > { %v12779_v22 = vor.u32 %v13271_v48, %v12778_v42  ;;  %v13282_v42 = vld [vmem:[%s18784_s9] sm:$0xff] }
 0x8b3   : > { %10036 = vmatpush.bf16.msra.mxu2 %v12719_v44  ;;  %v13250_v44 = vld [vmem:[%s18782_s7 + $0x104] sm:$0xf] }
 0x8b5   : > { %v9554_v5 = vpop.f32.mrf.mxu0  ;;  %v9568_v30 = vpop.f32.mrf.mxu1 }
 0x8b6   : > { %v12802_v5 = vld [vmem:[%s18782_s7 + $0x1d0] sm:$0xf]  ;;  %v13277_v30 = vld [vmem:[%s18782_s7 + $0x1d4] sm:$0xf0] }
 0x8b9   : > { %v9580_v37 = vpop.f32.mrf.mxu2  ;;  %v9594_v17 = vpop.f32.mrf.mxu3 }
 0x8ba   : > { %v9584_v28 = vadd.f32 %v9580_v37, %v9570_v50  ;;  %v13276_v37 = vld [vmem:[%s18782_s7 + $0x1d4] sm:$0xf] }
 0x8bb   : > { %v13256_v50 = vld [vmem:[%s18782_s7 + $0x134] sm:$0xf] }
 0x8bc   : > { %v9598_v29 = vadd.f32 %v9594_v17, %v9584_v28  ;;  %v12804_v17 = vld [vmem:[%s18782_s7 + $0x1d8] sm:$0xf0] }
 0x8bd   : > { %v9608_v21 = vpop.f32.mrf.mxu0  ;;  %v9622_v8 = vpop.f32.mrf.mxu1  ;;  %v12807_v28 = vor.u32 %v13276_v37, %v12804_v17  ;;  %v12684_v17 = vld [vmem:[%s18782_s7 + $0x108] sm:$0xf0] }
 0x8be   : > { %v9612_v39 = vadd.f32 %v9608_v21, %v9598_v29  ;;  %v12803_v21 = vor.u32 %v13277_v30, %v12802_v5  ;;  %v12794_v29 = vld [vmem:[%s18782_s7 + $0x1c0] sm:$0xf]  ;;  %v13251_v30 = vld [vmem:[%s18782_s7 + $0x104] sm:$0xf0] }
 0x8bf   : > { %10169 = vmatpush.bf16.msrb.mxu0 %v12807_v28  ;;  %v12682_v5 = vld [vmem:[%s18782_s7 + $0x100] sm:$0xf] }
 0x8c0   : > { %v9626_v19 = vadd.f32 %v9622_v8, %v9612_v39  ;;  %v13257_v8 = vld [vmem:[%s18782_s7 + $0x134] sm:$0xf0]  ;;  %10156 = vmatpush.bf16.msrb.mxu3 %v12803_v21  ;;  %v12796_v39 = vld [vmem:[%s18782_s7 + $0x1c8] sm:$0xf0]  ;;  %v12683_v37 = vor.u32 %v13251_v30, %v12682_v5 }
 0x8c1   : > { %v9582_v58 = vpop.f32.mrf.mxu2  ;;  %v9596_v41 = vpop.f32.mrf.mxu3  ;;  %v13269_v21 = vld [vmem:[%s18782_s7 + $0x194] sm:$0xf0] }
 0x8c2   : > { %v12708_v58 = vld [vmem:[%s18782_s7 + $0x138] sm:$0xf0] }
 0x8c3   : > { %v12711_v25 = vor.u32 %v13256_v50, %v12708_v58  ;;  %v12687_v50 = vor.u32 %v13250_v44, %v12684_v17  ;;  %v13268_v58 = vld [vmem:[%s18782_s7 + $0x194] sm:$0xf] }
 0x8c5   : > { %v9610_v59 = vpop.f32.mrf.mxu0  ;;  %v9624_v23 = vpop.f32.mrf.mxu1  ;;  %10037 = vmatpush.bf16.msra.mxu2 %v12711_v25 }
 0x8c6   : > { %v12707_v59 = vor.u32 %v13257_v8, %v12706_v38  ;;  %v12770_v38 = vld [vmem:[%s18782_s7 + $0x190] sm:$0xf] }
 0x8c8   : > { %10024 = vmatpush.bf16.msrb.mxu1 %v12707_v59 }
 0x8c9   : > { %v9636_v20 = vpop.f32.mrf.mxu2  ;;  %v9650_v46 = vpop.f32.mrf.mxu3 }
 0x8ca   : > { %v9640_v40 = vadd.f32 %v9636_v20, %v9626_v19  ;;  %v12703_v19 = vor.u32 %v13254_v35, %v12700_v27  ;;  %v13287_v35 = vld [vmem:[%s18784_s9 + $0x28] sm:$0xff] }
 0x8cb   : > { %v13295_v27 = vld [vmem:[%s18784_s9 + $0x68] sm:$0xff] }
 0x8cc   : > { %v9654_v6 = vadd.f32 %v9650_v46, %v9640_v40  ;;  %v12795_v46 = vor.u32 %v13275_v24, %v12794_v29  ;;  %10038 = vmatpush.bf16.msra.mxu2 %v12703_v19  ;;  %v13289_v29 = vld [vmem:[%s18784_s9 + $0x38] sm:$0xff] }
 0x8cd   : > { %v9664_v55 = vpop.f32.mrf.mxu0  ;;  %v9678_v54 = vpop.f32.mrf.mxu1  ;;  %v13297_v24 = vld [vmem:[%s18784_s9 + $0x78] sm:$0xff] }
 0x8ce   : > { %v9668_v41 = vadd.f32 %v9664_v55, %v9654_v6  ;;  %v12799_v55 = vor.u32 %v13274_v9, %v12796_v39  ;;  %10157 = vmatpush.bf16.msrb.mxu3 %v12795_v46  ;;  %v12692_v6 = vld [vmem:[%s18782_s7 + $0x118] sm:$0xf0]  ;;  %v13266_v9 = vld [vmem:[%s18782_s7 + $0x184] sm:$0xf]  ;;  %v13288_v46 = vld [vmem:[%s18784_s9 + $0x30] sm:$0xff] }
 0x8cf   : > { %v12695_v56 = vor.u32 %v13252_v53, %v12692_v6  ;;  %v13296_v39 = vld [vmem:[%s18784_s9 + $0x70] sm:$0xff]  ;;  %v13283_v53 = vld [vmem:[%s18784_s9 + $0x8] sm:$0xff] }
 0x8d0   : > { %v9682_v34 = vadd.f32 %v9678_v54, %v9668_v41  ;;  %v12699_v54 = vor.u32 %v13255_v16, %v12698_v62  ;;  %10170 = vmatpush.bf16.msrb.mxu0 %v12799_v55  ;;  %v12772_v41 = vld [vmem:[%s18782_s7 + $0x198] sm:$0xf0]  ;;  %v13291_v6 = vld [vmem:[%s18784_s9 + $0x48] sm:$0xff] }
 0x8d1   : > { %v9638_v43 = vpop.f32.mrf.mxu2  ;;  %v9652_v33 = vpop.f32.mrf.mxu3  ;;  %10039 = vmatpush.bf16.msra.mxu2 %v12695_v56  ;;  %v12775_v25 = vor.u32 %v13268_v58, %v12772_v41 }
 0x8d2   : > { %10025 = vmatpush.bf16.msrb.mxu1 %v12699_v54  ;;  %10158 = vmatpush.bf16.msrb.mxu3 %v12787_v52 }
 0x8d4   : > { %10171 = vmatpush.bf16.msrb.mxu0 %v12791_v32  ;;  %v13284_v32 = vld [vmem:[%s18784_s9 + $0x10] sm:$0xff] }
 0x8d5   : > { %v9666_v14 = vpop.f32.mrf.mxu0  ;;  %v9680_v4 = vpop.f32.mrf.mxu1  ;;  %10040 = vmatpush.bf16.msra.mxu2 %v12687_v50 }
 0x8d6   : > { %v13270_v14 = vld [vmem:[%s18782_s7 + $0x1a4] sm:$0xf]  ;;  %v12780_v4 = vld [vmem:[%s18782_s7 + $0x1a8] sm:$0xf0]  ;;  %10026 = vmatpush.bf16.msrb.mxu1 %v12691_v57  ;;  %10159 = vmatpush.bf16.msrb.mxu3 %v12779_v22  ;;  %v13292_v57 = vld [vmem:[%s18784_s9 + $0x50] sm:$0xff] }
 0x8d7   : > { %v12783_v26 = vor.u32 %v13270_v14, %v12780_v4 }
 0x8d9   : > { %v9692_v23 = vpop.f32.mrf.mxu2  ;;  %v9717_v15 = vpop.f32.mrf.mxu3  ;;  %10172 = vmatpush.bf16.msrb.mxu0 %v12783_v26  ;;  %10336 = vmatpush.bf16.msrb.mxu2 %v13297_v24 }
 0x8da   : > { %v9696_v45 = vadd.f32 %v9692_v23, %v9682_v34  ;;  %v12771_v23 = vor.u32 %v13269_v21, %v12770_v38  ;;  %10027 = vmatpush.bf16.msrb.mxu1 %v12683_v37  ;;  %v13267_v34 = vld [vmem:[%s18782_s7 + $0x184] sm:$0xf0] }
 0x8dc   : > { %v9721_v31 = vadd.f32 %v9717_v15, %v9696_v45  ;;  %v12762_v15 = vld [vmem:[%s18782_s7 + $0x180] sm:$0xf]  ;;  %10160 = vmatpush.bf16.msrb.mxu3 %v12771_v23 }
 0x8dd   : > { %v9742_v51 = vpop.f32.mrf.mxu0  ;;  %v9760_v20 = vpop.f32.mrf.mxu1  ;;  %v12763_v45 = vor.u32 %v13267_v34, %v12762_v15  ;;  %10173 = vmatpush.bf16.msrb.mxu0 %v12775_v25  ;;  %10337 = vmatpush.bf16.msrb.mxu2 %v13296_v39 }
 0x8de   : > { %v9746_v43 = vadd.f32 %v9742_v51, %v9721_v31  ;;  %v12764_v51 = vld [vmem:[%s18782_s7 + $0x188] sm:$0xf0]  ;;  %10323 = vmatpush.bf16.msra.mxu1 %v13289_v29 }
 0x8df   : > { %v12767_v55 = vor.u32 %v13266_v9, %v12764_v51 }
 0x8e0   : > { %v9764_v47 = vadd.f32 %v9760_v20, %v9746_v43  ;;  %10161 = vmatpush.bf16.msrb.mxu3 %v12763_v45 }
 0x8e1   : > { %v9694_v3 = vpop.f32.mrf.mxu2  ;;  %v9719_v40 = vpop.f32.mrf.mxu3  ;;  %10174 = vmatpush.bf16.msrb.mxu0 %v12767_v55  ;;  %10338 = vmatpush.bf16.msrb.mxu2 %v13295_v27 }
 0x8e2   : > { %10324 = vmatpush.bf16.msra.mxu1 %v13288_v46 }
 0x8e5   : > { %v9744_v49 = vpop.f32.mrf.mxu0  ;;  %v9762_v63 = vpop.f32.mrf.mxu1 }
 0x8e6   : > { %10325 = vmatpush.bf16.msra.mxu1 %v13287_v35 }
 0x8e9   : > { %v9782_v33 = vpop.f32.mrf.mxu2  ;;  %v9807_v11 = vpop.f32.mrf.mxu3 }
 0x8ea   : > { %v9786_v61 = vadd.f32 %v9782_v33, %v9764_v47  ;;  %10326 = vmatpush.bf16.msra.mxu1 %v13286_v12 }
 0x8ec   : > { %v9811_v8 = vadd.f32 %v9807_v11, %v9786_v61  ;;  %v13293_v61 = vld [vmem:[%s18784_s9 + $0x58] sm:$0xff] }
 0x8ed   : > { %v9825_v13 = vpop.f32.mrf.mxu0  ;;  %v9847_v0 = vpop.f32.mrf.mxu1 }
 0x8ee   : > { %v9829_v20 = vadd.f32 %v9825_v13, %v9811_v8  ;;  %10327 = vmatpush.bf16.msra.mxu1 %v13285_v2  ;;  %v13290_v13 = vld [vmem:[%s18784_s9 + $0x40] sm:$0xff] }
 0x8f0   : > { %v9851_v54 = vadd.f32 %v9847_v0, %v9829_v20 }
 0x8f1   : > { %v9784_v28 = vpop.f32.mrf.mxu2  ;;  %v9809_v59 = vpop.f32.mrf.mxu3 }
 0x8f2   : > { %10328 = vmatpush.bf16.msra.mxu1 %v13284_v32 }
 0x8f5   : > { %v9827_v62 = vpop.f32.mrf.mxu0  ;;  %v9849_v16 = vpop.f32.mrf.mxu1 }
 0x8f6   : > { %10329 = vmatpush.bf16.msra.mxu1 %v13283_v53 }
 0x8f9   : > { %v9872_v19 = vpop.f32.mrf.mxu2  ;;  %v9897_v3 = vpop.f32.mrf.mxu3 }
 0x8fa   : > { %v9876_v40 = vadd.f32 %v9872_v19, %v9851_v54  ;;  %10330 = vmatpush.bf16.msra.mxu1 %v13282_v42 }
 0x8fc   : > { %v9901_v31 = vadd.f32 %v9897_v3, %v9876_v40 }
 0x8fd   : > { %v9915_v49 = vpop.f32.mrf.mxu0 }
 0x8fe   : > { %v9919_v63 = vadd.f32 %v9915_v49, %v9901_v31 }
 0x900   : > { %v9920_v43 = vadd.f32 %v18241_v18, %v9919_v63  ;;  %v13294_v18 = vld [vmem:[%s18784_s9 + $0x60] sm:$0xff] }
 0x901   : > { %v9874_v33 = vpop.f32.mrf.mxu2  ;;  %v9899_v11 = vpop.f32.mrf.mxu3  ;;  %10339 = vmatpush.bf16.msrb.mxu2 %v13294_v18 }
 0x902   : > { %v9921_v47 = vmax.f32 %v9920_v43, 0.0 }
 0x904   : > { %v9922_v36 = vpack.c.bf16 %v9921_v47, %v9921_v47 }
 0x905   : > { %v9917_v60 = vpop.f32.mrf.mxu0  ;;  %10340 = vmatpush.bf16.msrb.mxu2 %v13293_v61 }
 0x906   : > { %v10070_v1 = vunpack.c.l.b16 %v9922_v36  ;;  %10028 = vmatmul.bf16.vlgmr.msrb.gmra.mxu1 %v9922_v36  ;;  %10041 = vmatmul.bf16.vlgmr.msra.gmra.mxu2 %v9922_v36 }
 0x908   : > { %v10071_v52 = vpack.c.b16 %v10070_v1, %v10070_v1 }
 0x909   : > { %10341 = vmatpush.bf16.msrb.mxu2 %v13292_v57 }
 0x90a   : > { %v10072_v10 = vrot.slane %v10071_v52, 2 }
 0x90c   : > { %10162 = vmatmul.bf16.vlgmr.msrb.gmra.mxu3 %v10072_v10  ;;  %10175 = vmatmul.bf16.vlgmr.msrb.gmra.mxu0 %v10072_v10 }
 0x90d   : > { %10342 = vmatpush.bf16.msrb.mxu2 %v13291_v6 }
 0x911   : > { %10343 = vmatpush.bf16.msrb.mxu2 %v13290_v13 }
 0x983   : > { %v10029_v0 = vpop.f32.mrf.mxu1 }
 0x989   : > { %v10042_v56 = vpop.f32.mrf.mxu2  ;;  %v10176_v48 = vpop.f32.mrf.mxu0 }
 0x98a   : > { %v10048_v14 = vrot.slane %v10042_v56, 7  ;;  %v10182_v26 = vrot.slane %v10176_v48, 7 }
 0x98b   : > { %v10031_v4 = vpop.f32.mrf.mxu1 }
 0x98c   : > { %v10049_v22 = vsel %vm9351_vm1, %v10029_v0, %v10048_v14 }
 0x98d   : > { %v10051_v5 = vadd.f32 %v10049_v22, %v18494_v7  ;;  %v10226_v7 = vld [vmem:[%s18785_s10] sm:$0x1] }
 0x98f   : > { %v10163_v30 = vpop.f32.mrf.mxu3 }
 0x990   : > { %v10183_v44 = vsel %vm9351_vm1, %v10163_v30, %v10182_v26 }
 0x991   : > { %v10185_v37 = vadd.f32 %v10183_v44, %v10051_v5  ;;  %v10044_v17 = vpop.f32.mrf.mxu2  ;;  %v10178_v38 = vpop.f32.mrf.mxu0 }
 0x993   : > { %v10186_v21 = vmax.f32 %v10185_v37, 0.0 }
 0x995   : > { %v10188_v8 = vperm.slane %v10186_v21, 0  ;;  %v10189_v50 = vperm.slane %v10186_v21, 1 }
 0x997   : > { %v10192_v58 = vpack.c.bf16 %v10188_v8, %v10188_v8  ;;  %v10193_v41 = vpack.c.bf16 %v10189_v50, %v10189_v50  ;;  %v10165_v28 = vpop.f32.mrf.mxu3 }
 0x999   : > { %10331 = vmatmul.bf16.vlgmr.msra.gmra.mxu1 %v10192_v58  ;;  %10344 = vmatmul.bf16.vlgmr.msrb.gmra.mxu2 %v10193_v41 }
 0xa16   : > { %v10332_v59 = vpop.f32.mrf.mxu1 }
 0xa17   : > { %v10333_v23 = vadd.f32 %v10332_v59, %v10226_v7 }
 0xa1c   : > { %v10345_v15 = vpop.f32.mrf.mxu2 }
 0xa1d   : > { %v10346_v25 = vadd.f32 %v10345_v15, %v10333_v23 }
 0xa1e   : > { %v10334_v34 = vpop.f32.mrf.mxu1 }
 0xa1f   : > { %10350 = vst.msk [vmem:[%s378_s13] sm:$0x1] %vm10349_vm2, %v10346_v25 }
 0xa20   : > { %13596 = shalt.err (!%p13593_p3)
}
 0xa21   : > { %13395 = dma.vmem_to_hbm [thread:$0]  (%p13732_p5), %s10363_s24, 16, %s10365_s25, %s10352_s29  }
 0xa24   : > { %v10347_v29 = vpop.f32.mrf.mxu2 }
 0xa25 PF: > { %p13401_p4 = scmp.ge.s32.totalorder %s13632_s20, 2  ;;  %s10376_s14 = sand.u32 1, %s13620_s17  }
 0xa26   : > { %s10377_s22 = scalar_lea.sflag [#allocation5], %s10376_s14 }
 0xa27   : > { %p13398_p7 = pnand %p13401_p4, %p13736_p6 }
 0xa29   : > { %p13399_p8 = pneg %p13398_p7 }
 0xa2b   : > { %13614 = dma.done.wait (%p13399_p8), %s10377_s22, 16  }
 0xa2c   : > { %13616 = vsyncadd (%p13399_p8), %s10377_s22, 4294967280  ;;  %s19566_s13 = sld [smem:[#allocation7_spill]]  ;;  %p21_p9 = scmp.ge.s32.totalorder %s13719_s23, 4  }
 0xa2d   : > { %s19567_s19 = sld [smem:[#allocation8_spill]]  ;;  %s19568_s17 = smov %s13624_s18 }
 0xa2e   : > { %s19570_s20 = smov %s13719_s23  ;;  %23 = sbr.rel (!%p21_p9) target bundleno = 3 (0x3), region = 150 }
 0xa32   : > { %s19569_s18 = smov %s19566_s13 }
 0xa33   :  { %10382 = vsyncpa [#allocation5], 1 }
 0xa34   :  { %10384 = vsyncpa [#allocation5 + $0x1], 1 }

</bundles_post_ra>
